<compile_context>
chip_gen: v6e
topology: v6e:2x2x1
jax: 0.10.0
libtpu: 0.0.40
codegen_flags: <defaults>
</compile_context>

<pallas_src>
import functools

import jax
import jax.numpy as jnp
from jax.experimental import pallas as pl
from jax.experimental.pallas import tpu as pltpu

LEAK = 0.2
EPS = 1e-5


# ------------------------------ kernel helpers ------------------------------

def _leaky(x):
    return jnp.where(x >= 0, x, LEAK * x)


def _bn_leaky(x):
    """Batch-stat BatchNorm (gamma=1, beta=0, biased var) + LeakyReLU, one pass."""
    inv_r = 1.0 / x.shape[0]
    s = jnp.sum(x, axis=0, keepdims=True)
    ss = jnp.sum(x * x, axis=0, keepdims=True)
    mean = s * inv_r
    var = jnp.maximum(ss * inv_r - mean * mean, 0.0)   # clamp: no NaN from cancellation
    xn = (x - mean) * jax.lax.rsqrt(var + EPS)
    return _leaky(xn)


# -------------------------------- fused kernel ------------------------------

def _dnet_kernel(xp_ref, w1_ref, b1_ref, w2_ref, w1a_ref, w1b_ref, w3_ref, b3_ref,
                 out_ref, y1p_ref, h_ref):
    """Fused DNet forward.

    xp_ref : (4, N*M*M, Cin*16) bf16   conv1 patches, one slab per output-parity class
    w1_ref : (Cin*16, 64)       bf16   conv1 weight
    b1_ref : (1, 64)            f32    conv1 bias
    w2_ref : (16, 64, 128)      bf16   conv2 weight per tap, out-channels even-then-odd
    w1a/b  : (M*M, 1024)        bf16   fc1 weight halves (even / odd channel of a pair)
    w3_ref : (1024, 128)        bf16   fc2 weight, output padded to 128 lanes
    b3_ref : (1, 128)           f32    fc2 bias (padded)
    out_ref: (N*64, 128)        f32    sigmoid output (lane-dense, padded)
    y1p_ref: (2, 2, N, M+1, M+1, 64) f32 scratch — parity-split padded conv1 output
    h_ref  : (N*64, 1024)       f32 scratch — fc1 pre-activation
    """
    n_im = y1p_ref.shape[2]
    m = y1p_ref.shape[3] - 1                 # conv2 output spatial size
    hw = m * m

    # ---- conv1 + bias + LeakyReLU: one small matmul per output-parity class ----
    y1p_ref[...] = jnp.zeros(y1p_ref.shape, y1p_ref.dtype)
    b1 = b1_ref[...]
    for pa in range(2):
        for pb in range(2):
            cls = 2 * pa + pb
            y = jnp.dot(xp_ref[cls], w1_ref[...],
                        preferred_element_type=jnp.float32)
            y = _leaky(y + b1)                           # (N*M*M, 64) f32
            y = y.reshape(n_im, m, m, 64)
            # class (pa,pb) lands in parity plane (1-pa,1-pb) at offset (pa,pb);
            # the untouched border row/col stays zero = conv2's spatial padding.
            y1p_ref[1 - pa, 1 - pb, :, pa:pa + m, pb:pb + m, :] = y

    # ---- conv2 as 16 shifted-window matmuls (VMEM-resident, contiguous reads) ----
    acc = jnp.zeros((n_im * hw, 128), jnp.float32)
    for kh in range(4):
        for kw in range(4):
            tap = y1p_ref[kh % 2, kw % 2, :,
                          kh // 2:kh // 2 + m, kw // 2:kw // 2 + m, :]
            tap = tap.reshape(n_im * hw, 64).astype(jnp.bfloat16)
            acc = acc + jnp.dot(tap, w2_ref[4 * kh + kw],
                                preferred_element_type=jnp.float32)

    # ---- BatchNorm2d (batch stats; conv2 bias cancelled) + LeakyReLU ----
    y2 = _bn_leaky(acc).astype(jnp.bfloat16)             # (N*HW, 128), even|odd channels

    # ---- torch view(-1, 128) + Linear(128,1024): per image, fc row q is
    #      [channel 2q (HW vals), channel 2q+1 (HW vals)]  =>
    #      h_n = Y_even_n^T @ W1a + Y_odd_n^T @ W1b  (no relayout needed). ----
    dn = (((0,), (0,)), ((), ()))                        # contract dim 0 of both
    for im in range(n_im):
        blk = y2[im * hw:(im + 1) * hw, :]
        he = jax.lax.dot_general(blk[:, 0:64], w1a_ref[...], dn,
                                 preferred_element_type=jnp.float32)
        ho = jax.lax.dot_general(blk[:, 64:128], w1b_ref[...], dn,
                                 preferred_element_type=jnp.float32)
        h_ref[im * 64:(im + 1) * 64, :] = he + ho

    # ---- BatchNorm1d (fc1 bias cancelled) + LeakyReLU + Linear(1024,out) + Sigmoid
    hact = _bn_leaky(h_ref[...]).astype(jnp.bfloat16)
    z = jnp.dot(hact, w3_ref[...], preferred_element_type=jnp.float32)
    out_ref[...] = jax.nn.sigmoid(z + b3_ref[...])


# --------------------------------- wrapper ----------------------------------

def _full_spec(shape):
    # Whole-array block (exempt from the (8,128) divisibility rule).
    return pl.BlockSpec(shape, lambda i, _s=shape: (0,) * len(_s))


def init_dnet_params(key, input_dim=1, output_dim=1, input_size=32):
    """Deterministic init mirroring initialize_weights(): W ~ N(0, 0.02), b = 0."""
    fc_in = 128 * (input_size // 32) * (input_size // 32)
    k1, k2, k3, k4 = jax.random.split(key, 4)
    return {
        "conv1_w": 0.02 * jax.random.normal(k1, (64, input_dim, 4, 4), jnp.float32),
        "conv1_b": jnp.zeros((64,), jnp.float32),
        "conv2_w": 0.02 * jax.random.normal(k2, (128, 64, 4, 4), jnp.float32),
        "conv2_b": jnp.zeros((128,), jnp.float32),
        "fc1_w": 0.02 * jax.random.normal(k3, (1024, fc_in), jnp.float32),
        "fc1_b": jnp.zeros((1024,), jnp.float32),
        "fc2_w": 0.02 * jax.random.normal(k4, (output_dim, 1024), jnp.float32),
        "fc2_b": jnp.zeros((output_dim,), jnp.float32),
    }


def dnet_forward(params, x, input_size=32):
    """x: NCHW float32, shape (N, input_dim, input_size, input_size)."""
    n, cin, _, _ = x.shape
    m = input_size // 4                      # conv2 output spatial size
    hw = m * m
    fc_in = 128 * (input_size // 32) ** 2
    assert fc_in == 2 * hw

    # conv1 patch prep: static strided slices of the (tiny) padded raw input,
    # grouped by conv1-output parity class.  No gathers, no activation HBM traffic.
    xp = jnp.pad(x, ((0, 0), (0, 0), (1, 1), (1, 1)))
    classes = []
    for pa in range(2):
        for pb in range(2):
            taps = []
            for c in range(cin):
                for kh in range(4):
                    for kw in range(4):
                        r0, c0 = 2 * pa + kh, 2 * pb + kw
                        taps.append(xp[:, c,
                                       r0:r0 + 4 * (m - 1) + 1:4,
                                       c0:c0 + 4 * (m - 1) + 1:4])
            classes.append(jnp.stack(taps, axis=-1).reshape(n * hw, cin * 16))
    x_patches = jnp.stack(classes, axis=0).astype(jnp.bfloat16)      # (4, N*HW, Cin*16)

    # conv1 weight / bias
    w1t = params["conv1_w"].reshape(64, cin * 16).T.astype(jnp.bfloat16)
    b1 = params["conv1_b"].reshape(1, 64).astype(jnp.float32)

    # conv2 weight per tap, output channels permuted even-then-odd so the torch
    # view(-1, 128) becomes two contiguous lane halves (bias cancelled by BN).
    w2 = params["conv2_w"]                                           # (128, 64, 4, 4)
    w2 = jnp.concatenate([w2[0::2], w2[1::2]], axis=0)
    w2p = jnp.transpose(w2, (2, 3, 1, 0)).reshape(16, 64, 128).astype(jnp.bfloat16)

    # fc1 weight split into the channel-pair halves (fc1 bias cancelled by BN).
    w1fc = params["fc1_w"].T                                         # (fc_in, 1024)
    w1a = w1fc[:hw, :].astype(jnp.bfloat16)
    w1b = w1fc[hw:, :].astype(jnp.bfloat16)

    # fc2 padded to a lane-dense 128-wide output slab.
    out_dim = params["fc2_w"].shape[0]
    out_pad = max(128, ((out_dim + 127) // 128) * 128)
    w3 = jnp.zeros((1024, out_pad), jnp.float32)
    w3 = w3.at[:, :out_dim].set(params["fc2_w"].T).astype(jnp.bfloat16)
    b3 = jnp.zeros((1, out_pad), jnp.float32).at[:, :out_dim].set(
        params["fc2_b"].reshape(1, -1))

    rows = n * 64                                                    # fc batch rows
    inputs = (x_patches, w1t, b1, w2p, w1a, w1b, w3, b3)
    out = pl.pallas_call(
        _dnet_kernel,
        grid=(1,),
        in_specs=[_full_spec(tuple(a.shape)) for a in inputs],
        out_specs=_full_spec((rows, out_pad)),
        out_shape=jax.ShapeDtypeStruct((rows, out_pad), jnp.float32),
        scratch_shapes=[
            pltpu.VMEM((2, 2, n, m + 1, m + 1, 64), jnp.float32),
            pltpu.VMEM((rows, 1024), jnp.float32),
        ],
        compiler_params=pltpu.CompilerParams(
            dimension_semantics=("arbitrary",)),
    )(*inputs)
    return out[:, :out_dim]


# ------------------------- plain-JAX reference (test) -----------------------

def _dnet_reference(params, x, input_size=32):
    def conv(v, w, b, stride):
        y = jax.lax.conv_general_dilated(
            v, w, (stride, stride), [(1, 1), (1, 1)],
            dimension_numbers=("NCHW", "OIHW", "NCHW"))
        return y + b.reshape(1, -1, 1, 1)

    lrelu = lambda v: jnp.where(v >= 0, v, LEAK * v)
    y = lrelu(conv(x, params["conv1_w"], params["conv1_b"], 2))
    y = conv(y, params["conv2_w"], params["conv2_b"], 2)
    mean = y.mean(axis=(0, 2, 3), keepdims=True)
    var = y.var(axis=(0, 2, 3), keepdims=True)
    y = lrelu((y - mean) / jnp.sqrt(var + EPS))
    y = y.reshape(-1, 128 * (input_size // 32) ** 2)
    h = y @ params["fc1_w"].T + params["fc1_b"]
    h = lrelu((h - h.mean(0)) / jnp.sqrt(h.var(0) + EPS))
    z = h @ params["fc2_w"].T + params["fc2_b"]
    return jax.nn.sigmoid(z)


# ----------------------------------- main ------------------------------------

if __name__ == "__main__":
    INPUT_DIM, OUTPUT_DIM, INPUT_SIZE, BATCH = 1, 1, 32, 2

    key = jax.random.PRNGKey(0)
    k_params, k_input = jax.random.split(key)
    params = init_dnet_params(k_params, INPUT_DIM, OUTPUT_DIM, INPUT_SIZE)
    x = jax.random.normal(k_input, (BATCH, INPUT_DIM, INPUT_SIZE, INPUT_SIZE),
                          jnp.float32)

    fwd = jax.jit(functools.partial(dnet_forward, input_size=INPUT_SIZE))
    out = jax.block_until_ready(fwd(params, x))

    assert out.shape == (BATCH * 64, OUTPUT_DIM), out.shape
    assert bool(jnp.all(jnp.isfinite(out)))
    assert bool(jnp.all((out >= 0.0) & (out <= 1.0)))        # sigmoid range

    ref = _dnet_reference(params, x, INPUT_SIZE)
    max_err = float(jnp.max(jnp.abs(out - ref)))
    assert max_err < 5e-2, f"max |kernel - reference| = {max_err}"

    print("KERNEL_OK")
</pallas_src>

<mosaic_0001>
module attributes {stable_mosaic.version = 11 : i64} {
  func.func @_dnet_kernel(%arg0: i32, %arg1: memref<4x128x16xbf16, #tpu.memory_space<vmem>>, %arg2: memref<16x64xbf16, #tpu.memory_space<vmem>>, %arg3: memref<1x64xf32, #tpu.memory_space<vmem>>, %arg4: memref<16x64x128xbf16, #tpu.memory_space<vmem>>, %arg5: memref<64x1024xbf16, #tpu.memory_space<vmem>>, %arg6: memref<64x1024xbf16, #tpu.memory_space<vmem>>, %arg7: memref<1024x128xbf16, #tpu.memory_space<vmem>>, %arg8: memref<1x128xf32, #tpu.memory_space<vmem>>, %arg9: memref<128x128xf32, #tpu.memory_space<vmem>>, %arg10: memref<2x2x2x9x9x64xf32, #tpu.memory_space<vmem>>, %arg11: memref<128x1024xf32, #tpu.memory_space<vmem>>) attributes {dimension_semantics = [#tpu.dimension_semantics<arbitrary>], iteration_bounds = array<i64: 1>, scalar_prefetch = 0 : i64, scratch_operands = 2 : i64, tpu.core_type = #tpu.core_type<tc>, window_params = [{pipeline_mode = #tpu.pipeline_mode<synchronous>, transform_indices = @transform_0, window_bounds = array<i64: 4, 128, 16>}, {pipeline_mode = #tpu.pipeline_mode<synchronous>, transform_indices = @transform_1, window_bounds = array<i64: 16, 64>}, {pipeline_mode = #tpu.pipeline_mode<synchronous>, transform_indices = @transform_2, window_bounds = array<i64: 1, 64>}, {pipeline_mode = #tpu.pipeline_mode<synchronous>, transform_indices = @transform_3, window_bounds = array<i64: 16, 64, 128>}, {pipeline_mode = #tpu.pipeline_mode<synchronous>, transform_indices = @transform_4, window_bounds = array<i64: 64, 1024>}, {pipeline_mode = #tpu.pipeline_mode<synchronous>, transform_indices = @transform_5, window_bounds = array<i64: 64, 1024>}, {pipeline_mode = #tpu.pipeline_mode<synchronous>, transform_indices = @transform_6, window_bounds = array<i64: 1024, 128>}, {pipeline_mode = #tpu.pipeline_mode<synchronous>, transform_indices = @transform_7, window_bounds = array<i64: 1, 128>}, {pipeline_mode = #tpu.pipeline_mode<synchronous>, transform_indices = @transform_8, window_bounds = array<i64: 128, 128>}]} {
    %cst = arith.constant 0.000000e+00 : f32
    %0 = vector.broadcast %cst : f32 to vector<2x2x2x9x9x64xf32>
    %c0 = arith.constant 0 : index
    %c0_0 = arith.constant 0 : index
    %c0_1 = arith.constant 0 : index
    %c0_2 = arith.constant 0 : index
    %c0_3 = arith.constant 0 : index
    %c0_4 = arith.constant 0 : index
    %1 = vector.load %arg10[%c0, %c0_0, %c0_1, %c0_2, %c0_3, %c0_4] : memref<2x2x2x9x9x64xf32, #tpu.memory_space<vmem>>, vector<2x2x2x9x9x64xf32>
    tpu.vector_store %arg10[%c0, %c0_0, %c0_1, %c0_2, %c0_3, %c0_4], %0 {strides = array<i32>} : memref<2x2x2x9x9x64xf32, #tpu.memory_space<vmem>>, vector<2x2x2x9x9x64xf32>,
    %c0_5 = arith.constant 0 : index
    %c0_6 = arith.constant 0 : index
    %2 = vector.load %arg3[%c0_5, %c0_6] : memref<1x64xf32, #tpu.memory_space<vmem>>, vector<1x64xf32>
    %c0_7 = arith.constant 0 : index
    %c0_8 = arith.constant 0 : index
    %c0_9 = arith.constant 0 : index
    %3 = vector.load %arg1[%c0_7, %c0_8, %c0_9] : memref<4x128x16xbf16, #tpu.memory_space<vmem>>, vector<1x128x16xbf16>
    %4 = vector.shape_cast %3 : vector<1x128x16xbf16> to vector<128x16xbf16>
    %c0_10 = arith.constant 0 : index
    %c0_11 = arith.constant 0 : index
    %5 = vector.load %arg2[%c0_10, %c0_11] : memref<16x64xbf16, #tpu.memory_space<vmem>>, vector<16x64xbf16>
    %cst_12 = arith.constant dense<0.000000e+00> : vector<128x64xf32>
    %6 = tpu.matmul %4, %5, %cst_12 {dimension_numbers = #tpu.dot_dimension_numbers<[1], [0], [0], [1], [0, 0, 1, 1], [], []>} : vector<128x16xbf16>, vector<16x64xbf16>, vector<128x64xf32> -> vector<128x64xf32>
    %7 = vector.broadcast %2 : vector<1x64xf32> to vector<128x64xf32>
    %8 = arith.addf %6, %7 : vector<128x64xf32>
    %cst_13 = arith.constant 0.000000e+00 : f32
    %9 = vector.broadcast %cst_13 : f32 to vector<128x64xf32>
    %10 = arith.cmpf oge, %8, %9 : vector<128x64xf32>
    %cst_14 = arith.constant 2.000000e-01 : f32
    %11 = vector.broadcast %cst_14 : f32 to vector<128x64xf32>
    %12 = arith.mulf %11, %8 : vector<128x64xf32>
    %13 = arith.select %10, %8, %12 : vector<128x64xi1>, vector<128x64xf32>
    %14 = vector.shape_cast %13 : vector<128x64xf32> to vector<2x8x8x64xf32>
    %c1 = arith.constant 1 : index
    %c1_15 = arith.constant 1 : index
    %c0_16 = arith.constant 0 : index
    %c0_17 = arith.constant 0 : index
    %c0_18 = arith.constant 0 : index
    %c0_19 = arith.constant 0 : index
    %15 = vector.load %arg10[%c1, %c1_15, %c0_16, %c0_17, %c0_18, %c0_19] : memref<2x2x2x9x9x64xf32, #tpu.memory_space<vmem>>, vector<1x1x2x8x8x64xf32>
    %16 = vector.shape_cast %15 : vector<1x1x2x8x8x64xf32> to vector<2x8x8x64xf32>
    %17 = vector.shape_cast %14 : vector<2x8x8x64xf32> to vector<1x1x2x8x8x64xf32>
    tpu.vector_store %arg10[%c1, %c1_15, %c0_16, %c0_17, %c0_18, %c0_19], %17 {strides = array<i32>} : memref<2x2x2x9x9x64xf32, #tpu.memory_space<vmem>>, vector<1x1x2x8x8x64xf32>,
    %c1_20 = arith.constant 1 : index
    %c0_21 = arith.constant 0 : index
    %c0_22 = arith.constant 0 : index
    %18 = vector.load %arg1[%c1_20, %c0_21, %c0_22] : memref<4x128x16xbf16, #tpu.memory_space<vmem>>, vector<1x128x16xbf16>
    %19 = vector.shape_cast %18 : vector<1x128x16xbf16> to vector<128x16xbf16>
    %c0_23 = arith.constant 0 : index
    %c0_24 = arith.constant 0 : index
    %20 = vector.load %arg2[%c0_23, %c0_24] : memref<16x64xbf16, #tpu.memory_space<vmem>>, vector<16x64xbf16>
    %cst_25 = arith.constant dense<0.000000e+00> : vector<128x64xf32>
    %21 = tpu.matmul %19, %20, %cst_25 {dimension_numbers = #tpu.dot_dimension_numbers<[1], [0], [0], [1], [0, 0, 1, 1], [], []>} : vector<128x16xbf16>, vector<16x64xbf16>, vector<128x64xf32> -> vector<128x64xf32>
    %22 = vector.broadcast %2 : vector<1x64xf32> to vector<128x64xf32>
    %23 = arith.addf %21, %22 : vector<128x64xf32>
    %cst_26 = arith.constant 0.000000e+00 : f32
    %24 = vector.broadcast %cst_26 : f32 to vector<128x64xf32>
    %25 = arith.cmpf oge, %23, %24 : vector<128x64xf32>
    %cst_27 = arith.constant 2.000000e-01 : f32
    %26 = vector.broadcast %cst_27 : f32 to vector<128x64xf32>
    %27 = arith.mulf %26, %23 : vector<128x64xf32>
    %28 = arith.select %25, %23, %27 : vector<128x64xi1>, vector<128x64xf32>
    %29 = vector.shape_cast %28 : vector<128x64xf32> to vector<2x8x8x64xf32>
    %c1_28 = arith.constant 1 : index
    %c0_29 = arith.constant 0 : index
    %c0_30 = arith.constant 0 : index
    %c0_31 = arith.constant 0 : index
    %c1_32 = arith.constant 1 : index
    %c0_33 = arith.constant 0 : index
    %30 = vector.load %arg10[%c1_28, %c0_29, %c0_30, %c0_31, %c1_32, %c0_33] : memref<2x2x2x9x9x64xf32, #tpu.memory_space<vmem>>, vector<1x1x2x8x8x64xf32>
    %31 = vector.shape_cast %30 : vector<1x1x2x8x8x64xf32> to vector<2x8x8x64xf32>
    %32 = vector.shape_cast %29 : vector<2x8x8x64xf32> to vector<1x1x2x8x8x64xf32>
    tpu.vector_store %arg10[%c1_28, %c0_29, %c0_30, %c0_31, %c1_32, %c0_33], %32 {strides = array<i32>} : memref<2x2x2x9x9x64xf32, #tpu.memory_space<vmem>>, vector<1x1x2x8x8x64xf32>,
    %c2 = arith.constant 2 : index
    %c0_34 = arith.constant 0 : index
    %c0_35 = arith.constant 0 : index
    %33 = vector.load %arg1[%c2, %c0_34, %c0_35] : memref<4x128x16xbf16, #tpu.memory_space<vmem>>, vector<1x128x16xbf16>
    %34 = vector.shape_cast %33 : vector<1x128x16xbf16> to vector<128x16xbf16>
    %c0_36 = arith.constant 0 : index
    %c0_37 = arith.constant 0 : index
    %35 = vector.load %arg2[%c0_36, %c0_37] : memref<16x64xbf16, #tpu.memory_space<vmem>>, vector<16x64xbf16>
    %cst_38 = arith.constant dense<0.000000e+00> : vector<128x64xf32>
    %36 = tpu.matmul %34, %35, %cst_38 {dimension_numbers = #tpu.dot_dimension_numbers<[1], [0], [0], [1], [0, 0, 1, 1], [], []>} : vector<128x16xbf16>, vector<16x64xbf16>, vector<128x64xf32> -> vector<128x64xf32>
    %37 = vector.broadcast %2 : vector<1x64xf32> to vector<128x64xf32>
    %38 = arith.addf %36, %37 : vector<128x64xf32>
    %cst_39 = arith.constant 0.000000e+00 : f32
    %39 = vector.broadcast %cst_39 : f32 to vector<128x64xf32>
    %40 = arith.cmpf oge, %38, %39 : vector<128x64xf32>
    %cst_40 = arith.constant 2.000000e-01 : f32
    %41 = vector.broadcast %cst_40 : f32 to vector<128x64xf32>
    %42 = arith.mulf %41, %38 : vector<128x64xf32>
    %43 = arith.select %40, %38, %42 : vector<128x64xi1>, vector<128x64xf32>
    %44 = vector.shape_cast %43 : vector<128x64xf32> to vector<2x8x8x64xf32>
    %c0_41 = arith.constant 0 : index
    %c1_42 = arith.constant 1 : index
    %c0_43 = arith.constant 0 : index
    %c1_44 = arith.constant 1 : index
    %c0_45 = arith.constant 0 : index
    %c0_46 = arith.constant 0 : index
    %45 = vector.load %arg10[%c0_41, %c1_42, %c0_43, %c1_44, %c0_45, %c0_46] : memref<2x2x2x9x9x64xf32, #tpu.memory_space<vmem>>, vector<1x1x2x8x8x64xf32>
    %46 = vector.shape_cast %45 : vector<1x1x2x8x8x64xf32> to vector<2x8x8x64xf32>
    %47 = vector.shape_cast %44 : vector<2x8x8x64xf32> to vector<1x1x2x8x8x64xf32>
    tpu.vector_store %arg10[%c0_41, %c1_42, %c0_43, %c1_44, %c0_45, %c0_46], %47 {strides = array<i32>} : memref<2x2x2x9x9x64xf32, #tpu.memory_space<vmem>>, vector<1x1x2x8x8x64xf32>,
    %c3 = arith.constant 3 : index
    %c0_47 = arith.constant 0 : index
    %c0_48 = arith.constant 0 : index
    %48 = vector.load %arg1[%c3, %c0_47, %c0_48] : memref<4x128x16xbf16, #tpu.memory_space<vmem>>, vector<1x128x16xbf16>
    %49 = vector.shape_cast %48 : vector<1x128x16xbf16> to vector<128x16xbf16>
    %c0_49 = arith.constant 0 : index
    %c0_50 = arith.constant 0 : index
    %50 = vector.load %arg2[%c0_49, %c0_50] : memref<16x64xbf16, #tpu.memory_space<vmem>>, vector<16x64xbf16>
    %cst_51 = arith.constant dense<0.000000e+00> : vector<128x64xf32>
    %51 = tpu.matmul %49, %50, %cst_51 {dimension_numbers = #tpu.dot_dimension_numbers<[1], [0], [0], [1], [0, 0, 1, 1], [], []>} : vector<128x16xbf16>, vector<16x64xbf16>, vector<128x64xf32> -> vector<128x64xf32>
    %52 = vector.broadcast %2 : vector<1x64xf32> to vector<128x64xf32>
    %53 = arith.addf %51, %52 : vector<128x64xf32>
    %cst_52 = arith.constant 0.000000e+00 : f32
    %54 = vector.broadcast %cst_52 : f32 to vector<128x64xf32>
    %55 = arith.cmpf oge, %53, %54 : vector<128x64xf32>
    %cst_53 = arith.constant 2.000000e-01 : f32
    %56 = vector.broadcast %cst_53 : f32 to vector<128x64xf32>
    %57 = arith.mulf %56, %53 : vector<128x64xf32>
    %58 = arith.select %55, %53, %57 : vector<128x64xi1>, vector<128x64xf32>
    %59 = vector.shape_cast %58 : vector<128x64xf32> to vector<2x8x8x64xf32>
    %c0_54 = arith.constant 0 : index
    %c0_55 = arith.constant 0 : index
    %c0_56 = arith.constant 0 : index
    %c1_57 = arith.constant 1 : index
    %c1_58 = arith.constant 1 : index
    %c0_59 = arith.constant 0 : index
    %60 = vector.load %arg10[%c0_54, %c0_55, %c0_56, %c1_57, %c1_58, %c0_59] : memref<2x2x2x9x9x64xf32, #tpu.memory_space<vmem>>, vector<1x1x2x8x8x64xf32>
    %61 = vector.shape_cast %60 : vector<1x1x2x8x8x64xf32> to vector<2x8x8x64xf32>
    %62 = vector.shape_cast %59 : vector<2x8x8x64xf32> to vector<1x1x2x8x8x64xf32>
    tpu.vector_store %arg10[%c0_54, %c0_55, %c0_56, %c1_57, %c1_58, %c0_59], %62 {strides = array<i32>} : memref<2x2x2x9x9x64xf32, #tpu.memory_space<vmem>>, vector<1x1x2x8x8x64xf32>,
    %cst_60 = arith.constant 0.000000e+00 : f32
    %63 = vector.broadcast %cst_60 : f32 to vector<128x128xf32>
    %c0_61 = arith.constant 0 : index
    %c0_62 = arith.constant 0 : index
    %c0_63 = arith.constant 0 : index
    %c0_64 = arith.constant 0 : index
    %c0_65 = arith.constant 0 : index
    %c0_66 = arith.constant 0 : index
    %64 = vector.load %arg10[%c0_61, %c0_62, %c0_63, %c0_64, %c0_65, %c0_66] : memref<2x2x2x9x9x64xf32, #tpu.memory_space<vmem>>, vector<1x1x2x8x8x64xf32>
    %65 = vector.shape_cast %64 : vector<1x1x2x8x8x64xf32> to vector<2x8x8x64xf32>
    %66 = vector.shape_cast %65 : vector<2x8x8x64xf32> to vector<128x64xf32>
    %67 = arith.truncf %66 : vector<128x64xf32> to vector<128x64xbf16>
    %c0_67 = arith.constant 0 : index
    %c0_68 = arith.constant 0 : index
    %c0_69 = arith.constant 0 : index
    %68 = vector.load %arg4[%c0_67, %c0_68, %c0_69] : memref<16x64x128xbf16, #tpu.memory_space<vmem>>, vector<1x64x128xbf16>
    %69 = vector.shape_cast %68 : vector<1x64x128xbf16> to vector<64x128xbf16>
    %cst_70 = arith.constant dense<0.000000e+00> : vector<128x128xf32>
    %70 = tpu.matmul %67, %69, %cst_70 {dimension_numbers = #tpu.dot_dimension_numbers<[1], [0], [0], [1], [0, 0, 1, 1], [], []>} : vector<128x64xbf16>, vector<64x128xbf16>, vector<128x128xf32> -> vector<128x128xf32>
    %71 = arith.addf %63, %70 : vector<128x128xf32>
    %c0_71 = arith.constant 0 : index
    %c1_72 = arith.constant 1 : index
    %c0_73 = arith.constant 0 : index
    %c0_74 = arith.constant 0 : index
    %c0_75 = arith.constant 0 : index
    %c0_76 = arith.constant 0 : index
    %72 = vector.load %arg10[%c0_71, %c1_72, %c0_73, %c0_74, %c0_75, %c0_76] : memref<2x2x2x9x9x64xf32, #tpu.memory_space<vmem>>, vector<1x1x2x8x8x64xf32>
    %73 = vector.shape_cast %72 : vector<1x1x2x8x8x64xf32> to vector<2x8x8x64xf32>
    %74 = vector.shape_cast %73 : vector<2x8x8x64xf32> to vector<128x64xf32>
    %75 = arith.truncf %74 : vector<128x64xf32> to vector<128x64xbf16>
    %c1_77 = arith.constant 1 : index
    %c0_78 = arith.constant 0 : index
    %c0_79 = arith.constant 0 : index
    %76 = vector.load %arg4[%c1_77, %c0_78, %c0_79] : memref<16x64x128xbf16, #tpu.memory_space<vmem>>, vector<1x64x128xbf16>
    %77 = vector.shape_cast %76 : vector<1x64x128xbf16> to vector<64x128xbf16>
    %cst_80 = arith.constant dense<0.000000e+00> : vector<128x128xf32>
    %78 = tpu.matmul %75, %77, %cst_80 {dimension_numbers = #tpu.dot_dimension_numbers<[1], [0], [0], [1], [0, 0, 1, 1], [], []>} : vector<128x64xbf16>, vector<64x128xbf16>, vector<128x128xf32> -> vector<128x128xf32>
    %79 = arith.addf %71, %78 : vector<128x128xf32>
    %c0_81 = arith.constant 0 : index
    %c0_82 = arith.constant 0 : index
    %c0_83 = arith.constant 0 : index
    %c0_84 = arith.constant 0 : index
    %c1_85 = arith.constant 1 : index
    %c0_86 = arith.constant 0 : index
    %80 = vector.load %arg10[%c0_81, %c0_82, %c0_83, %c0_84, %c1_85, %c0_86] : memref<2x2x2x9x9x64xf32, #tpu.memory_space<vmem>>, vector<1x1x2x8x8x64xf32>
    %81 = vector.shape_cast %80 : vector<1x1x2x8x8x64xf32> to vector<2x8x8x64xf32>
    %82 = vector.shape_cast %81 : vector<2x8x8x64xf32> to vector<128x64xf32>
    %83 = arith.truncf %82 : vector<128x64xf32> to vector<128x64xbf16>
    %c2_87 = arith.constant 2 : index
    %c0_88 = arith.constant 0 : index
    %c0_89 = arith.constant 0 : index
    %84 = vector.load %arg4[%c2_87, %c0_88, %c0_89] : memref<16x64x128xbf16, #tpu.memory_space<vmem>>, vector<1x64x128xbf16>
    %85 = vector.shape_cast %84 : vector<1x64x128xbf16> to vector<64x128xbf16>
    %cst_90 = arith.constant dense<0.000000e+00> : vector<128x128xf32>
    %86 = tpu.matmul %83, %85, %cst_90 {dimension_numbers = #tpu.dot_dimension_numbers<[1], [0], [0], [1], [0, 0, 1, 1], [], []>} : vector<128x64xbf16>, vector<64x128xbf16>, vector<128x128xf32> -> vector<128x128xf32>
    %87 = arith.addf %79, %86 : vector<128x128xf32>
    %c0_91 = arith.constant 0 : index
    %c1_92 = arith.constant 1 : index
    %c0_93 = arith.constant 0 : index
    %c0_94 = arith.constant 0 : index
    %c1_95 = arith.constant 1 : index
    %c0_96 = arith.constant 0 : index
    %88 = vector.load %arg10[%c0_91, %c1_92, %c0_93, %c0_94, %c1_95, %c0_96] : memref<2x2x2x9x9x64xf32, #tpu.memory_space<vmem>>, vector<1x1x2x8x8x64xf32>
    %89 = vector.shape_cast %88 : vector<1x1x2x8x8x64xf32> to vector<2x8x8x64xf32>
    %90 = vector.shape_cast %89 : vector<2x8x8x64xf32> to vector<128x64xf32>
    %91 = arith.truncf %90 : vector<128x64xf32> to vector<128x64xbf16>
    %c3_97 = arith.constant 3 : index
    %c0_98 = arith.constant 0 : index
    %c0_99 = arith.constant 0 : index
    %92 = vector.load %arg4[%c3_97, %c0_98, %c0_99] : memref<16x64x128xbf16, #tpu.memory_space<vmem>>, vector<1x64x128xbf16>
    %93 = vector.shape_cast %92 : vector<1x64x128xbf16> to vector<64x128xbf16>
    %cst_100 = arith.constant dense<0.000000e+00> : vector<128x128xf32>
    %94 = tpu.matmul %91, %93, %cst_100 {dimension_numbers = #tpu.dot_dimension_numbers<[1], [0], [0], [1], [0, 0, 1, 1], [], []>} : vector<128x64xbf16>, vector<64x128xbf16>, vector<128x128xf32> -> vector<128x128xf32>
    %95 = arith.addf %87, %94 : vector<128x128xf32>
    %c1_101 = arith.constant 1 : index
    %c0_102 = arith.constant 0 : index
    %c0_103 = arith.constant 0 : index
    %c0_104 = arith.constant 0 : index
    %c0_105 = arith.constant 0 : index
    %c0_106 = arith.constant 0 : index
    %96 = vector.load %arg10[%c1_101, %c0_102, %c0_103, %c0_104, %c0_105, %c0_106] : memref<2x2x2x9x9x64xf32, #tpu.memory_space<vmem>>, vector<1x1x2x8x8x64xf32>
    %97 = vector.shape_cast %96 : vector<1x1x2x8x8x64xf32> to vector<2x8x8x64xf32>
    %98 = vector.shape_cast %97 : vector<2x8x8x64xf32> to vector<128x64xf32>
    %99 = arith.truncf %98 : vector<128x64xf32> to vector<128x64xbf16>
    %c4 = arith.constant 4 : index
    %c0_107 = arith.constant 0 : index
    %c0_108 = arith.constant 0 : index
    %100 = vector.load %arg4[%c4, %c0_107, %c0_108] : memref<16x64x128xbf16, #tpu.memory_space<vmem>>, vector<1x64x128xbf16>
    %101 = vector.shape_cast %100 : vector<1x64x128xbf16> to vector<64x128xbf16>
    %cst_109 = arith.constant dense<0.000000e+00> : vector<128x128xf32>
    %102 = tpu.matmul %99, %101, %cst_109 {dimension_numbers = #tpu.dot_dimension_numbers<[1], [0], [0], [1], [0, 0, 1, 1], [], []>} : vector<128x64xbf16>, vector<64x128xbf16>, vector<128x128xf32> -> vector<128x128xf32>
    %103 = arith.addf %95, %102 : vector<128x128xf32>
    %c1_110 = arith.constant 1 : index
    %c1_111 = arith.constant 1 : index
    %c0_112 = arith.constant 0 : index
    %c0_113 = arith.constant 0 : index
    %c0_114 = arith.constant 0 : index
    %c0_115 = arith.constant 0 : index
    %104 = vector.load %arg10[%c1_110, %c1_111, %c0_112, %c0_113, %c0_114, %c0_115] : memref<2x2x2x9x9x64xf32, #tpu.memory_space<vmem>>, vector<1x1x2x8x8x64xf32>
    %105 = vector.shape_cast %104 : vector<1x1x2x8x8x64xf32> to vector<2x8x8x64xf32>
    %106 = vector.shape_cast %105 : vector<2x8x8x64xf32> to vector<128x64xf32>
    %107 = arith.truncf %106 : vector<128x64xf32> to vector<128x64xbf16>
    %c5 = arith.constant 5 : index
    %c0_116 = arith.constant 0 : index
    %c0_117 = arith.constant 0 : index
    %108 = vector.load %arg4[%c5, %c0_116, %c0_117] : memref<16x64x128xbf16, #tpu.memory_space<vmem>>, vector<1x64x128xbf16>
    %109 = vector.shape_cast %108 : vector<1x64x128xbf16> to vector<64x128xbf16>
    %cst_118 = arith.constant dense<0.000000e+00> : vector<128x128xf32>
    %110 = tpu.matmul %107, %109, %cst_118 {dimension_numbers = #tpu.dot_dimension_numbers<[1], [0], [0], [1], [0, 0, 1, 1], [], []>} : vector<128x64xbf16>, vector<64x128xbf16>, vector<128x128xf32> -> vector<128x128xf32>
    %111 = arith.addf %103, %110 : vector<128x128xf32>
    %c1_119 = arith.constant 1 : index
    %c0_120 = arith.constant 0 : index
    %c0_121 = arith.constant 0 : index
    %c0_122 = arith.constant 0 : index
    %c1_123 = arith.constant 1 : index
    %c0_124 = arith.constant 0 : index
    %112 = vector.load %arg10[%c1_119, %c0_120, %c0_121, %c0_122, %c1_123, %c0_124] : memref<2x2x2x9x9x64xf32, #tpu.memory_space<vmem>>, vector<1x1x2x8x8x64xf32>
    %113 = vector.shape_cast %112 : vector<1x1x2x8x8x64xf32> to vector<2x8x8x64xf32>
    %114 = vector.shape_cast %113 : vector<2x8x8x64xf32> to vector<128x64xf32>
    %115 = arith.truncf %114 : vector<128x64xf32> to vector<128x64xbf16>
    %c6 = arith.constant 6 : index
    %c0_125 = arith.constant 0 : index
    %c0_126 = arith.constant 0 : index
    %116 = vector.load %arg4[%c6, %c0_125, %c0_126] : memref<16x64x128xbf16, #tpu.memory_space<vmem>>, vector<1x64x128xbf16>
    %117 = vector.shape_cast %116 : vector<1x64x128xbf16> to vector<64x128xbf16>
    %cst_127 = arith.constant dense<0.000000e+00> : vector<128x128xf32>
    %118 = tpu.matmul %115, %117, %cst_127 {dimension_numbers = #tpu.dot_dimension_numbers<[1], [0], [0], [1], [0, 0, 1, 1], [], []>} : vector<128x64xbf16>, vector<64x128xbf16>, vector<128x128xf32> -> vector<128x128xf32>
    %119 = arith.addf %111, %118 : vector<128x128xf32>
    %c1_128 = arith.constant 1 : index
    %c1_129 = arith.constant 1 : index
    %c0_130 = arith.constant 0 : index
    %c0_131 = arith.constant 0 : index
    %c1_132 = arith.constant 1 : index
    %c0_133 = arith.constant 0 : index
    %120 = vector.load %arg10[%c1_128, %c1_129, %c0_130, %c0_131, %c1_132, %c0_133] : memref<2x2x2x9x9x64xf32, #tpu.memory_space<vmem>>, vector<1x1x2x8x8x64xf32>
    %121 = vector.shape_cast %120 : vector<1x1x2x8x8x64xf32> to vector<2x8x8x64xf32>
    %122 = vector.shape_cast %121 : vector<2x8x8x64xf32> to vector<128x64xf32>
    %123 = arith.truncf %122 : vector<128x64xf32> to vector<128x64xbf16>
    %c7 = arith.constant 7 : index
    %c0_134 = arith.constant 0 : index
    %c0_135 = arith.constant 0 : index
    %124 = vector.load %arg4[%c7, %c0_134, %c0_135] : memref<16x64x128xbf16, #tpu.memory_space<vmem>>, vector<1x64x128xbf16>
    %125 = vector.shape_cast %124 : vector<1x64x128xbf16> to vector<64x128xbf16>
    %cst_136 = arith.constant dense<0.000000e+00> : vector<128x128xf32>
    %126 = tpu.matmul %123, %125, %cst_136 {dimension_numbers = #tpu.dot_dimension_numbers<[1], [0], [0], [1], [0, 0, 1, 1], [], []>} : vector<128x64xbf16>, vector<64x128xbf16>, vector<128x128xf32> -> vector<128x128xf32>
    %127 = arith.addf %119, %126 : vector<128x128xf32>
    %c0_137 = arith.constant 0 : index
    %c0_138 = arith.constant 0 : index
    %c0_139 = arith.constant 0 : index
    %c1_140 = arith.constant 1 : index
    %c0_141 = arith.constant 0 : index
    %c0_142 = arith.constant 0 : index
    %128 = vector.load %arg10[%c0_137, %c0_138, %c0_139, %c1_140, %c0_141, %c0_142] : memref<2x2x2x9x9x64xf32, #tpu.memory_space<vmem>>, vector<1x1x2x8x8x64xf32>
    %129 = vector.shape_cast %128 : vector<1x1x2x8x8x64xf32> to vector<2x8x8x64xf32>
    %130 = vector.shape_cast %129 : vector<2x8x8x64xf32> to vector<128x64xf32>
    %131 = arith.truncf %130 : vector<128x64xf32> to vector<128x64xbf16>
    %c8 = arith.constant 8 : index
    %c0_143 = arith.constant 0 : index
    %c0_144 = arith.constant 0 : index
    %132 = vector.load %arg4[%c8, %c0_143, %c0_144] : memref<16x64x128xbf16, #tpu.memory_space<vmem>>, vector<1x64x128xbf16>
    %133 = vector.shape_cast %132 : vector<1x64x128xbf16> to vector<64x128xbf16>
    %cst_145 = arith.constant dense<0.000000e+00> : vector<128x128xf32>
    %134 = tpu.matmul %131, %133, %cst_145 {dimension_numbers = #tpu.dot_dimension_numbers<[1], [0], [0], [1], [0, 0, 1, 1], [], []>} : vector<128x64xbf16>, vector<64x128xbf16>, vector<128x128xf32> -> vector<128x128xf32>
    %135 = arith.addf %127, %134 : vector<128x128xf32>
    %c0_146 = arith.constant 0 : index
    %c1_147 = arith.constant 1 : index
    %c0_148 = arith.constant 0 : index
    %c1_149 = arith.constant 1 : index
    %c0_150 = arith.constant 0 : index
    %c0_151 = arith.constant 0 : index
    %136 = vector.load %arg10[%c0_146, %c1_147, %c0_148, %c1_149, %c0_150, %c0_151] : memref<2x2x2x9x9x64xf32, #tpu.memory_space<vmem>>, vector<1x1x2x8x8x64xf32>
    %137 = vector.shape_cast %136 : vector<1x1x2x8x8x64xf32> to vector<2x8x8x64xf32>
    %138 = vector.shape_cast %137 : vector<2x8x8x64xf32> to vector<128x64xf32>
    %139 = arith.truncf %138 : vector<128x64xf32> to vector<128x64xbf16>
    %c9 = arith.constant 9 : index
    %c0_152 = arith.constant 0 : index
    %c0_153 = arith.constant 0 : index
    %140 = vector.load %arg4[%c9, %c0_152, %c0_153] : memref<16x64x128xbf16, #tpu.memory_space<vmem>>, vector<1x64x128xbf16>
    %141 = vector.shape_cast %140 : vector<1x64x128xbf16> to vector<64x128xbf16>
    %cst_154 = arith.constant dense<0.000000e+00> : vector<128x128xf32>
    %142 = tpu.matmul %139, %141, %cst_154 {dimension_numbers = #tpu.dot_dimension_numbers<[1], [0], [0], [1], [0, 0, 1, 1], [], []>} : vector<128x64xbf16>, vector<64x128xbf16>, vector<128x128xf32> -> vector<128x128xf32>
    %143 = arith.addf %135, %142 : vector<128x128xf32>
    %c0_155 = arith.constant 0 : index
    %c0_156 = arith.constant 0 : index
    %c0_157 = arith.constant 0 : index
    %c1_158 = arith.constant 1 : index
    %c1_159 = arith.constant 1 : index
    %c0_160 = arith.constant 0 : index
    %144 = vector.load %arg10[%c0_155, %c0_156, %c0_157, %c1_158, %c1_159, %c0_160] : memref<2x2x2x9x9x64xf32, #tpu.memory_space<vmem>>, vector<1x1x2x8x8x64xf32>
    %145 = vector.shape_cast %144 : vector<1x1x2x8x8x64xf32> to vector<2x8x8x64xf32>
    %146 = vector.shape_cast %145 : vector<2x8x8x64xf32> to vector<128x64xf32>
    %147 = arith.truncf %146 : vector<128x64xf32> to vector<128x64xbf16>
    %c10 = arith.constant 10 : index
    %c0_161 = arith.constant 0 : index
    %c0_162 = arith.constant 0 : index
    %148 = vector.load %arg4[%c10, %c0_161, %c0_162] : memref<16x64x128xbf16, #tpu.memory_space<vmem>>, vector<1x64x128xbf16>
    %149 = vector.shape_cast %148 : vector<1x64x128xbf16> to vector<64x128xbf16>
    %cst_163 = arith.constant dense<0.000000e+00> : vector<128x128xf32>
    %150 = tpu.matmul %147, %149, %cst_163 {dimension_numbers = #tpu.dot_dimension_numbers<[1], [0], [0], [1], [0, 0, 1, 1], [], []>} : vector<128x64xbf16>, vector<64x128xbf16>, vector<128x128xf32> -> vector<128x128xf32>
    %151 = arith.addf %143, %150 : vector<128x128xf32>
    %c0_164 = arith.constant 0 : index
    %c1_165 = arith.constant 1 : index
    %c0_166 = arith.constant 0 : index
    %c1_167 = arith.constant 1 : index
    %c1_168 = arith.constant 1 : index
    %c0_169 = arith.constant 0 : index
    %152 = vector.load %arg10[%c0_164, %c1_165, %c0_166, %c1_167, %c1_168, %c0_169] : memref<2x2x2x9x9x64xf32, #tpu.memory_space<vmem>>, vector<1x1x2x8x8x64xf32>
    %153 = vector.shape_cast %152 : vector<1x1x2x8x8x64xf32> to vector<2x8x8x64xf32>
    %154 = vector.shape_cast %153 : vector<2x8x8x64xf32> to vector<128x64xf32>
    %155 = arith.truncf %154 : vector<128x64xf32> to vector<128x64xbf16>
    %c11 = arith.constant 11 : index
    %c0_170 = arith.constant 0 : index
    %c0_171 = arith.constant 0 : index
    %156 = vector.load %arg4[%c11, %c0_170, %c0_171] : memref<16x64x128xbf16, #tpu.memory_space<vmem>>, vector<1x64x128xbf16>
    %157 = vector.shape_cast %156 : vector<1x64x128xbf16> to vector<64x128xbf16>
    %cst_172 = arith.constant dense<0.000000e+00> : vector<128x128xf32>
    %158 = tpu.matmul %155, %157, %cst_172 {dimension_numbers = #tpu.dot_dimension_numbers<[1], [0], [0], [1], [0, 0, 1, 1], [], []>} : vector<128x64xbf16>, vector<64x128xbf16>, vector<128x128xf32> -> vector<128x128xf32>
    %159 = arith.addf %151, %158 : vector<128x128xf32>
    %c1_173 = arith.constant 1 : index
    %c0_174 = arith.constant 0 : index
    %c0_175 = arith.constant 0 : index
    %c1_176 = arith.constant 1 : index
    %c0_177 = arith.constant 0 : index
    %c0_178 = arith.constant 0 : index
    %160 = vector.load %arg10[%c1_173, %c0_174, %c0_175, %c1_176, %c0_177, %c0_178] : memref<2x2x2x9x9x64xf32, #tpu.memory_space<vmem>>, vector<1x1x2x8x8x64xf32>
    %161 = vector.shape_cast %160 : vector<1x1x2x8x8x64xf32> to vector<2x8x8x64xf32>
    %162 = vector.shape_cast %161 : vector<2x8x8x64xf32> to vector<128x64xf32>
    %163 = arith.truncf %162 : vector<128x64xf32> to vector<128x64xbf16>
    %c12 = arith.constant 12 : index
    %c0_179 = arith.constant 0 : index
    %c0_180 = arith.constant 0 : index
    %164 = vector.load %arg4[%c12, %c0_179, %c0_180] : memref<16x64x128xbf16, #tpu.memory_space<vmem>>, vector<1x64x128xbf16>
    %165 = vector.shape_cast %164 : vector<1x64x128xbf16> to vector<64x128xbf16>
    %cst_181 = arith.constant dense<0.000000e+00> : vector<128x128xf32>
    %166 = tpu.matmul %163, %165, %cst_181 {dimension_numbers = #tpu.dot_dimension_numbers<[1], [0], [0], [1], [0, 0, 1, 1], [], []>} : vector<128x64xbf16>, vector<64x128xbf16>, vector<128x128xf32> -> vector<128x128xf32>
    %167 = arith.addf %159, %166 : vector<128x128xf32>
    %c1_182 = arith.constant 1 : index
    %c1_183 = arith.constant 1 : index
    %c0_184 = arith.constant 0 : index
    %c1_185 = arith.constant 1 : index
    %c0_186 = arith.constant 0 : index
    %c0_187 = arith.constant 0 : index
    %168 = vector.load %arg10[%c1_182, %c1_183, %c0_184, %c1_185, %c0_186, %c0_187] : memref<2x2x2x9x9x64xf32, #tpu.memory_space<vmem>>, vector<1x1x2x8x8x64xf32>
    %169 = vector.shape_cast %168 : vector<1x1x2x8x8x64xf32> to vector<2x8x8x64xf32>
    %170 = vector.shape_cast %169 : vector<2x8x8x64xf32> to vector<128x64xf32>
    %171 = arith.truncf %170 : vector<128x64xf32> to vector<128x64xbf16>
    %c13 = arith.constant 13 : index
    %c0_188 = arith.constant 0 : index
    %c0_189 = arith.constant 0 : index
    %172 = vector.load %arg4[%c13, %c0_188, %c0_189] : memref<16x64x128xbf16, #tpu.memory_space<vmem>>, vector<1x64x128xbf16>
    %173 = vector.shape_cast %172 : vector<1x64x128xbf16> to vector<64x128xbf16>
    %cst_190 = arith.constant dense<0.000000e+00> : vector<128x128xf32>
    %174 = tpu.matmul %171, %173, %cst_190 {dimension_numbers = #tpu.dot_dimension_numbers<[1], [0], [0], [1], [0, 0, 1, 1], [], []>} : vector<128x64xbf16>, vector<64x128xbf16>, vector<128x128xf32> -> vector<128x128xf32>
    %175 = arith.addf %167, %174 : vector<128x128xf32>
    %c1_191 = arith.constant 1 : index
    %c0_192 = arith.constant 0 : index
    %c0_193 = arith.constant 0 : index
    %c1_194 = arith.constant 1 : index
    %c1_195 = arith.constant 1 : index
    %c0_196 = arith.constant 0 : index
    %176 = vector.load %arg10[%c1_191, %c0_192, %c0_193, %c1_194, %c1_195, %c0_196] : memref<2x2x2x9x9x64xf32, #tpu.memory_space<vmem>>, vector<1x1x2x8x8x64xf32>
    %177 = vector.shape_cast %176 : vector<1x1x2x8x8x64xf32> to vector<2x8x8x64xf32>
    %178 = vector.shape_cast %177 : vector<2x8x8x64xf32> to vector<128x64xf32>
    %179 = arith.truncf %178 : vector<128x64xf32> to vector<128x64xbf16>
    %c14 = arith.constant 14 : index
    %c0_197 = arith.constant 0 : index
    %c0_198 = arith.constant 0 : index
    %180 = vector.load %arg4[%c14, %c0_197, %c0_198] : memref<16x64x128xbf16, #tpu.memory_space<vmem>>, vector<1x64x128xbf16>
    %181 = vector.shape_cast %180 : vector<1x64x128xbf16> to vector<64x128xbf16>
    %cst_199 = arith.constant dense<0.000000e+00> : vector<128x128xf32>
    %182 = tpu.matmul %179, %181, %cst_199 {dimension_numbers = #tpu.dot_dimension_numbers<[1], [0], [0], [1], [0, 0, 1, 1], [], []>} : vector<128x64xbf16>, vector<64x128xbf16>, vector<128x128xf32> -> vector<128x128xf32>
    %183 = arith.addf %175, %182 : vector<128x128xf32>
    %c1_200 = arith.constant 1 : index
    %c1_201 = arith.constant 1 : index
    %c0_202 = arith.constant 0 : index
    %c1_203 = arith.constant 1 : index
    %c1_204 = arith.constant 1 : index
    %c0_205 = arith.constant 0 : index
    %184 = vector.load %arg10[%c1_200, %c1_201, %c0_202, %c1_203, %c1_204, %c0_205] : memref<2x2x2x9x9x64xf32, #tpu.memory_space<vmem>>, vector<1x1x2x8x8x64xf32>
    %185 = vector.shape_cast %184 : vector<1x1x2x8x8x64xf32> to vector<2x8x8x64xf32>
    %186 = vector.shape_cast %185 : vector<2x8x8x64xf32> to vector<128x64xf32>
    %187 = arith.truncf %186 : vector<128x64xf32> to vector<128x64xbf16>
    %c15 = arith.constant 15 : index
    %c0_206 = arith.constant 0 : index
    %c0_207 = arith.constant 0 : index
    %188 = vector.load %arg4[%c15, %c0_206, %c0_207] : memref<16x64x128xbf16, #tpu.memory_space<vmem>>, vector<1x64x128xbf16>
    %189 = vector.shape_cast %188 : vector<1x64x128xbf16> to vector<64x128xbf16>
    %cst_208 = arith.constant dense<0.000000e+00> : vector<128x128xf32>
    %190 = tpu.matmul %187, %189, %cst_208 {dimension_numbers = #tpu.dot_dimension_numbers<[1], [0], [0], [1], [0, 0, 1, 1], [], []>} : vector<128x64xbf16>, vector<64x128xbf16>, vector<128x128xf32> -> vector<128x128xf32>
    %191 = arith.addf %183, %190 : vector<128x128xf32>
    %cst_209 = arith.constant dense<0.000000e+00> : vector<128xf32>
    %192 = vector.multi_reduction <add>, %191, %cst_209 [0] : vector<128x128xf32> to vector<128xf32>
    %193 = vector.shape_cast %192 : vector<128xf32> to vector<1x128xf32>
    %194 = arith.mulf %191, %191 : vector<128x128xf32>
    %cst_210 = arith.constant dense<0.000000e+00> : vector<128xf32>
    %195 = vector.multi_reduction <add>, %194, %cst_210 [0] : vector<128x128xf32> to vector<128xf32>
    %196 = vector.shape_cast %195 : vector<128xf32> to vector<1x128xf32>
    %cst_211 = arith.constant 7.812500e-03 : f32
    %197 = vector.broadcast %cst_211 : f32 to vector<1x128xf32>
    %198 = arith.mulf %193, %197 : vector<1x128xf32>
    %cst_212 = arith.constant 7.812500e-03 : f32
    %199 = vector.broadcast %cst_212 : f32 to vector<1x128xf32>
    %200 = arith.mulf %196, %199 : vector<1x128xf32>
    %201 = arith.mulf %198, %198 : vector<1x128xf32>
    %202 = arith.subf %200, %201 : vector<1x128xf32>
    %cst_213 = arith.constant 0.000000e+00 : f32
    %203 = vector.broadcast %cst_213 : f32 to vector<1x128xf32>
    %204 = arith.maximumf %202, %203 : vector<1x128xf32>
    %205 = vector.broadcast %198 : vector<1x128xf32> to vector<128x128xf32>
    %206 = arith.subf %191, %205 : vector<128x128xf32>
    %cst_214 = arith.constant 9.99999974E-6 : f32
    %207 = vector.broadcast %cst_214 : f32 to vector<1x128xf32>
    %208 = arith.addf %204, %207 : vector<1x128xf32>
    %209 = math.rsqrt %208 : vector<1x128xf32>
    %210 = vector.broadcast %209 : vector<1x128xf32> to vector<128x128xf32>
    %211 = arith.mulf %206, %210 : vector<128x128xf32>
    %cst_215 = arith.constant 0.000000e+00 : f32
    %212 = vector.broadcast %cst_215 : f32 to vector<128x128xf32>
    %213 = arith.cmpf oge, %211, %212 : vector<128x128xf32>
    %cst_216 = arith.constant 2.000000e-01 : f32
    %214 = vector.broadcast %cst_216 : f32 to vector<128x128xf32>
    %215 = arith.mulf %214, %211 : vector<128x128xf32>
    %216 = arith.select %213, %211, %215 : vector<128x128xi1>, vector<128x128xf32>
    %217 = arith.truncf %216 : vector<128x128xf32> to vector<128x128xbf16>
    %218 = vector.extract_strided_slice %217 {offsets = [0, 0], sizes = [64, 128], strides = [1, 1]} : vector<128x128xbf16> to vector<64x128xbf16>
    %219 = vector.extract_strided_slice %218 {offsets = [0, 0], sizes = [64, 64], strides = [1, 1]} : vector<64x128xbf16> to vector<64x64xbf16>
    %c0_217 = arith.constant 0 : index
    %c0_218 = arith.constant 0 : index
    %220 = vector.load %arg5[%c0_217, %c0_218] : memref<64x1024xbf16, #tpu.memory_space<vmem>>, vector<64x1024xbf16>
    %cst_219 = arith.constant dense<0.000000e+00> : vector<64x1024xf32>
    %221 = tpu.matmul %219, %220, %cst_219 {dimension_numbers = #tpu.dot_dimension_numbers<[0], [0], [1], [1], [0, 1, 1, 1], [], []>} : vector<64x64xbf16>, vector<64x1024xbf16>, vector<64x1024xf32> -> vector<64x1024xf32>
    %222 = vector.extract_strided_slice %218 {offsets = [0, 64], sizes = [64, 64], strides = [1, 1]} : vector<64x128xbf16> to vector<64x64xbf16>
    %c0_220 = arith.constant 0 : index
    %c0_221 = arith.constant 0 : index
    %223 = vector.load %arg6[%c0_220, %c0_221] : memref<64x1024xbf16, #tpu.memory_space<vmem>>, vector<64x1024xbf16>
    %cst_222 = arith.constant dense<0.000000e+00> : vector<64x1024xf32>
    %224 = tpu.matmul %222, %223, %cst_222 {dimension_numbers = #tpu.dot_dimension_numbers<[0], [0], [1], [1], [0, 1, 1, 1], [], []>} : vector<64x64xbf16>, vector<64x1024xbf16>, vector<64x1024xf32> -> vector<64x1024xf32>
    %225 = arith.addf %221, %224 : vector<64x1024xf32>
    %c0_223 = arith.constant 0 : index
    %c0_224 = arith.constant 0 : index
    %226 = vector.load %arg11[%c0_223, %c0_224] : memref<128x1024xf32, #tpu.memory_space<vmem>>, vector<64x1024xf32>
    tpu.vector_store %arg11[%c0_223, %c0_224], %225 {strides = array<i32>} : memref<128x1024xf32, #tpu.memory_space<vmem>>, vector<64x1024xf32>,
    %227 = vector.extract_strided_slice %217 {offsets = [64, 0], sizes = [64, 128], strides = [1, 1]} : vector<128x128xbf16> to vector<64x128xbf16>
    %228 = vector.extract_strided_slice %227 {offsets = [0, 0], sizes = [64, 64], strides = [1, 1]} : vector<64x128xbf16> to vector<64x64xbf16>
    %c0_225 = arith.constant 0 : index
    %c0_226 = arith.constant 0 : index
    %229 = vector.load %arg5[%c0_225, %c0_226] : memref<64x1024xbf16, #tpu.memory_space<vmem>>, vector<64x1024xbf16>
    %cst_227 = arith.constant dense<0.000000e+00> : vector<64x1024xf32>
    %230 = tpu.matmul %228, %229, %cst_227 {dimension_numbers = #tpu.dot_dimension_numbers<[0], [0], [1], [1], [0, 1, 1, 1], [], []>} : vector<64x64xbf16>, vector<64x1024xbf16>, vector<64x1024xf32> -> vector<64x1024xf32>
    %231 = vector.extract_strided_slice %227 {offsets = [0, 64], sizes = [64, 64], strides = [1, 1]} : vector<64x128xbf16> to vector<64x64xbf16>
    %c0_228 = arith.constant 0 : index
    %c0_229 = arith.constant 0 : index
    %232 = vector.load %arg6[%c0_228, %c0_229] : memref<64x1024xbf16, #tpu.memory_space<vmem>>, vector<64x1024xbf16>
    %cst_230 = arith.constant dense<0.000000e+00> : vector<64x1024xf32>
    %233 = tpu.matmul %231, %232, %cst_230 {dimension_numbers = #tpu.dot_dimension_numbers<[0], [0], [1], [1], [0, 1, 1, 1], [], []>} : vector<64x64xbf16>, vector<64x1024xbf16>, vector<64x1024xf32> -> vector<64x1024xf32>
    %234 = arith.addf %230, %233 : vector<64x1024xf32>
    %c64 = arith.constant 64 : index
    %c0_231 = arith.constant 0 : index
    %235 = vector.load %arg11[%c64, %c0_231] : memref<128x1024xf32, #tpu.memory_space<vmem>>, vector<64x1024xf32>
    tpu.vector_store %arg11[%c64, %c0_231], %234 {strides = array<i32>} : memref<128x1024xf32, #tpu.memory_space<vmem>>, vector<64x1024xf32>,
    %c0_232 = arith.constant 0 : index
    %c0_233 = arith.constant 0 : index
    %236 = vector.load %arg11[%c0_232, %c0_233] : memref<128x1024xf32, #tpu.memory_space<vmem>>, vector<128x1024xf32>
    %cst_234 = arith.constant dense<0.000000e+00> : vector<1024xf32>
    %237 = vector.multi_reduction <add>, %236, %cst_234 [0] : vector<128x1024xf32> to vector<1024xf32>
    %238 = vector.shape_cast %237 : vector<1024xf32> to vector<1x1024xf32>
    %239 = arith.mulf %236, %236 : vector<128x1024xf32>
    %cst_235 = arith.constant dense<0.000000e+00> : vector<1024xf32>
    %240 = vector.multi_reduction <add>, %239, %cst_235 [0] : vector<128x1024xf32> to vector<1024xf32>
    %241 = vector.shape_cast %240 : vector<1024xf32> to vector<1x1024xf32>
    %cst_236 = arith.constant 7.812500e-03 : f32
    %242 = vector.broadcast %cst_236 : f32 to vector<1x1024xf32>
    %243 = arith.mulf %238, %242 : vector<1x1024xf32>
    %cst_237 = arith.constant 7.812500e-03 : f32
    %244 = vector.broadcast %cst_237 : f32 to vector<1x1024xf32>
    %245 = arith.mulf %241, %244 : vector<1x1024xf32>
    %246 = arith.mulf %243, %243 : vector<1x1024xf32>
    %247 = arith.subf %245, %246 : vector<1x1024xf32>
    %cst_238 = arith.constant 0.000000e+00 : f32
    %248 = vector.broadcast %cst_238 : f32 to vector<1x1024xf32>
    %249 = arith.maximumf %247, %248 : vector<1x1024xf32>
    %250 = vector.broadcast %243 : vector<1x1024xf32> to vector<128x1024xf32>
    %251 = arith.subf %236, %250 : vector<128x1024xf32>
    %cst_239 = arith.constant 9.99999974E-6 : f32
    %252 = vector.broadcast %cst_239 : f32 to vector<1x1024xf32>
    %253 = arith.addf %249, %252 : vector<1x1024xf32>
    %254 = math.rsqrt %253 : vector<1x1024xf32>
    %255 = vector.broadcast %254 : vector<1x1024xf32> to vector<128x1024xf32>
    %256 = arith.mulf %251, %255 : vector<128x1024xf32>
    %cst_240 = arith.constant 0.000000e+00 : f32
    %257 = vector.broadcast %cst_240 : f32 to vector<128x1024xf32>
    %258 = arith.cmpf oge, %256, %257 : vector<128x1024xf32>
    %cst_241 = arith.constant 2.000000e-01 : f32
    %259 = vector.broadcast %cst_241 : f32 to vector<128x1024xf32>
    %260 = arith.mulf %259, %256 : vector<128x1024xf32>
    %261 = arith.select %258, %256, %260 : vector<128x1024xi1>, vector<128x1024xf32>
    %262 = arith.truncf %261 : vector<128x1024xf32> to vector<128x1024xbf16>
    %c0_242 = arith.constant 0 : index
    %c0_243 = arith.constant 0 : index
    %263 = vector.load %arg7[%c0_242, %c0_243] : memref<1024x128xbf16, #tpu.memory_space<vmem>>, vector<1024x128xbf16>
    %cst_244 = arith.constant dense<0.000000e+00> : vector<128x128xf32>
    %264 = tpu.matmul %262, %263, %cst_244 {dimension_numbers = #tpu.dot_dimension_numbers<[1], [0], [0], [1], [0, 0, 1, 1], [], []>} : vector<128x1024xbf16>, vector<1024x128xbf16>, vector<128x128xf32> -> vector<128x128xf32>
    %c0_245 = arith.constant 0 : index
    %c0_246 = arith.constant 0 : index
    %265 = vector.load %arg8[%c0_245, %c0_246] : memref<1x128xf32, #tpu.memory_space<vmem>>, vector<1x128xf32>
    %266 = vector.broadcast %265 : vector<1x128xf32> to vector<128x128xf32>
    %267 = arith.addf %264, %266 : vector<128x128xf32>
    %268 = arith.negf %267 : vector<128x128xf32>
    %269 = math.exp %268 : vector<128x128xf32>
    %cst_247 = arith.constant 1.000000e+00 : f32
    %270 = vector.broadcast %cst_247 : f32 to vector<128x128xf32>
    %271 = arith.addf %270, %269 : vector<128x128xf32>
    %272 = arith.divf %270, %271 : vector<128x128xf32>
    %c0_248 = arith.constant 0 : index
    %c0_249 = arith.constant 0 : index
    %273 = vector.load %arg9[%c0_248, %c0_249] : memref<128x128xf32, #tpu.memory_space<vmem>>, vector<128x128xf32>
    tpu.vector_store %arg9[%c0_248, %c0_249], %272 {strides = array<i32>} : memref<128x128xf32, #tpu.memory_space<vmem>>, vector<128x128xf32>,
    return
  }
  func.func @transform_0(%arg0: i32) -> (i32, i32, i32) {
    %c0_i32 = arith.constant 0 : i32
    %c0_i32_0 = arith.constant 0 : i32
    %c0_i32_1 = arith.constant 0 : i32
    %c0_i32_2 = arith.constant 0 : i32
    return %c0_i32, %c0_i32_0, %c0_i32_1 : i32, i32, i32
  }
  func.func @transform_1(%arg0: i32) -> (i32, i32) {
    %c0_i32 = arith.constant 0 : i32
    %c0_i32_0 = arith.constant 0 : i32
    %c0_i32_1 = arith.constant 0 : i32
    return %c0_i32, %c0_i32_0 : i32, i32
  }
  func.func @transform_2(%arg0: i32) -> (i32, i32) {
    %c0_i32 = arith.constant 0 : i32
    %c0_i32_0 = arith.constant 0 : i32
    %c0_i32_1 = arith.constant 0 : i32
    return %c0_i32, %c0_i32_0 : i32, i32
  }
  func.func @transform_3(%arg0: i32) -> (i32, i32, i32) {
    %c0_i32 = arith.constant 0 : i32
    %c0_i32_0 = arith.constant 0 : i32
    %c0_i32_1 = arith.constant 0 : i32
    %c0_i32_2 = arith.constant 0 : i32
    return %c0_i32, %c0_i32_0, %c0_i32_1 : i32, i32, i32
  }
  func.func @transform_4(%arg0: i32) -> (i32, i32) {
    %c0_i32 = arith.constant 0 : i32
    %c0_i32_0 = arith.constant 0 : i32
    %c0_i32_1 = arith.constant 0 : i32
    return %c0_i32, %c0_i32_0 : i32, i32
  }
  func.func @transform_5(%arg0: i32) -> (i32, i32) {
    %c0_i32 = arith.constant 0 : i32
    %c0_i32_0 = arith.constant 0 : i32
    %c0_i32_1 = arith.constant 0 : i32
    return %c0_i32, %c0_i32_0 : i32, i32
  }
  func.func @transform_6(%arg0: i32) -> (i32, i32) {
    %c0_i32 = arith.constant 0 : i32
    %c0_i32_0 = arith.constant 0 : i32
    %c0_i32_1 = arith.constant 0 : i32
    return %c0_i32, %c0_i32_0 : i32, i32
  }
  func.func @transform_7(%arg0: i32) -> (i32, i32) {
    %c0_i32 = arith.constant 0 : i32
    %c0_i32_0 = arith.constant 0 : i32
    %c0_i32_1 = arith.constant 0 : i32
    return %c0_i32, %c0_i32_0 : i32, i32
  }
  func.func @transform_8(%arg0: i32) -> (i32, i32) {
    %c0_i32 = arith.constant 0 : i32
    %c0_i32_0 = arith.constant 0 : i32
    %c0_i32_1 = arith.constant 0 : i32
    return %c0_i32, %c0_i32_0 : i32, i32
  }
}

</mosaic_0001>

<bundles_post_ra>
// kernel: dnet_forward.1
= control target key start
LH: loop header
LB: loop body
LE: loop exit
PB: predicated region body
PF: predicated region fallthrough
CT: control target
= control target key end

     0   :  { %vm30_vm0 = vcmask 523264   ;;  %v10888_v1 = vmov 0.0   ;;  %vm247_vm1 = vcmask 130048   ;;  %vm32_vm2 = vcmask 516096   ;;  %s15662_s1 = inlined_call_operand.vmem [shape: bf16[16,64], index: 1, kind: input, shape index: {}]   ;;  %s15663_s0 = inlined_call_operand.vmem [shape: bf16[4,128,16], index: 0, kind: input, shape index: {}]   ;;  %s15664_s3 = inlined_call_operand.vmem [shape: bf16[16,64,128], index: 3, kind: input, shape index: {}]   ;;  %s15665_s2 = inlined_call_operand.vmem [shape: f32[1,64], index: 2, kind: input, shape index: {}]   ;;  %s15666_s5 = inlined_call_operand.vmem [shape: bf16[64,1024], index: 5, kind: input, shape index: {}]   ;;  %s15667_s4 = inlined_call_operand.vmem [shape: bf16[64,1024], index: 4, kind: input, shape index: {}]   ;;  %s15668_s6 = inlined_call_operand.vmem [shape: bf16[1024,128], index: 6, kind: input, shape index: {}]   ;;  %s15669_s7 = inlined_call_operand.vmem [shape: f32[1,128], index: 7, kind: input, shape index: {}]   ;;  %s15670_s8 = inlined_call_operand.vmem [shape: f32[128,128], index: 8, kind: output, shape index: {}]  }
   0x1   :  { %v10939_v0 = vld [vmem:[%s15662_s1] sm:$0xff]   ;;  %144 = vst.msk [vmem:[#allocation2 + $0x380] sm:$0xff] %vm30_vm0, %v10888_v1  ;;  %31 = vst.msk [vmem:[#allocation2] sm:$0xff] %vm30_vm0, %v10888_v1  ;;  %v10646_v5 = vld [vmem:[%s15663_s0 + $0x8] sm:$0xff]  }
   0x2   :  { %34 = vst.msk [vmem:[#allocation2 + $0x10] sm:$0xff] %vm30_vm0, %v10888_v1  ;;  %36 = vst.msk [vmem:[#allocation2 + $0x20] sm:$0xff] %vm30_vm0, %v10888_v1  ;;  %v10643_v2 = vld [vmem:[%s15662_s1] sm:$0xff]   ;;  %10183 = vmatprep.subr.bf16.mxu0 %v10939_v0  ;;  %v10647_v6 = vld [vmem:[%s15663_s0 + $0x48] sm:$0xff]  }
   0x3   :  { %38 = vst.msk [vmem:[#allocation2 + $0x30] sm:$0xff] %vm30_vm0, %v10888_v1  ;;  %40 = vst.msk [vmem:[#allocation2 + $0x40] sm:$0xff] %vm30_vm0, %v10888_v1  ;;  %v10644_v3 = vld [vmem:[%s15663_s0] sm:$0xff]   ;;  %10201 = vmatprep.subr.bf16.mxu1 %v10643_v2  ;;  %10184 = vmatpush3.bf16.msra.mxu0 %v10939_v0  ;;  %v10650_v9 = vld [vmem:[%s15663_s0 + $0x10] sm:$0xff]  }
   0x4   :  { %42 = vst.msk [vmem:[#allocation2 + $0x50] sm:$0xff] %vm30_vm0, %v10888_v1  ;;  %44 = vst.msk [vmem:[#allocation2 + $0x60] sm:$0xff] %vm30_vm0, %v10888_v1  ;;  %v10645_v4 = vld [vmem:[%s15663_s0 + $0x40] sm:$0xff]   ;;  %10202 = vmatpush3.bf16.msra.mxu1 %v10643_v2  ;;  %10185 = vmatprep.mubr.msk.bf16.mxu0 %vm247_vm1, %v10644_v3  ;;  %v10651_v10 = vld [vmem:[%s15663_s0 + $0x50] sm:$0xff]  }
   0x5   :  { %46 = vst.msk [vmem:[#allocation2 + $0x70] sm:$0xff] %vm30_vm0, %v10888_v1  ;;  %48 = vst.msk [vmem:[#allocation2 + $0x80] sm:$0xff] %vm30_vm0, %v10888_v1  ;;  %10203 = vmatprep.mubr.msk.bf16.mxu1 %vm247_vm1, %v10645_v4  ;;  %v10648_v7 = vld [vmem:[%s15662_s1] sm:$0xff]   ;;  %v10652_v11 = vld [vmem:[%s15663_s0 + $0x18] sm:$0xff]  }
   0x6   :  { %50 = vst.msk [vmem:[#allocation2 + $0x90] sm:$0xff] %vm30_vm0, %v10888_v1  ;;  %52 = vst.msk [vmem:[#allocation2 + $0xa0] sm:$0xff] %vm30_vm0, %v10888_v1  ;;  %10186 = vmatmul.mubr.msk.bf16.vlgmr.msra.gmra.mxu0 %vm247_vm1, %v10646_v5  ;;  %v10649_v8 = vld [vmem:[%s15662_s1] sm:$0xff]   ;;  %10219 = vmatprep.subr.bf16.mxu0 %v10648_v7  ;;  %v10653_v12 = vld [vmem:[%s15663_s0 + $0x58] sm:$0xff]  }
   0x7   :  { %54 = vst.msk [vmem:[#allocation2 + $0xb0] sm:$0xff] %vm30_vm0, %v10888_v1  ;;  %56 = vst.msk [vmem:[#allocation2 + $0xc0] sm:$0xff] %vm30_vm0, %v10888_v1  ;;  %10204 = vmatmul.mubr.msk.bf16.vlgmr.msra.gmra.mxu1 %vm247_vm1, %v10647_v6  ;;  %10220 = vmatpush3.bf16.msra.mxu0 %v10648_v7  ;;  %v10654_v13 = vld [vmem:[%s15663_s0 + $0x20] sm:$0xff]   ;;  %v10656_v15 = vld [vmem:[%s15663_s0 + $0x28] sm:$0xff]  }
   0x8   :  { %58 = vst.msk [vmem:[#allocation2 + $0xd0] sm:$0xff] %vm30_vm0, %v10888_v1  ;;  %60 = vst.msk [vmem:[#allocation2 + $0xe0] sm:$0xff] %vm30_vm0, %v10888_v1  ;;  %10237 = vmatprep.subr.bf16.mxu1 %v10649_v8  ;;  %10189 = vmatprep.mubr.msk.bf16.mxu0 %vm247_vm1, %v10650_v9  ;;  %v10655_v14 = vld [vmem:[%s15663_s0 + $0x60] sm:$0xff]   ;;  %v10657_v16 = vld [vmem:[%s15663_s0 + $0x68] sm:$0xff]  }
   0x9   :  { %62 = vst.msk [vmem:[#allocation2 + $0xf0] sm:$0xff] %vm30_vm0, %v10888_v1  ;;  %64 = vst.msk [vmem:[#allocation2 + $0x100] sm:$0xff] %vm30_vm0, %v10888_v1  ;;  %10238 = vmatpush3.bf16.msra.mxu1 %v10649_v8  ;;  %10207 = vmatprep.mubr.msk.bf16.mxu1 %vm247_vm1, %v10651_v10  ;;  %v10658_v17 = vld [vmem:[%s15663_s0 + $0x30] sm:$0xff]   ;;  %v10660_v19 = vld [vmem:[%s15663_s0 + $0x38] sm:$0xff]  }
   0xa   :  { %66 = vst.msk [vmem:[#allocation2 + $0x110] sm:$0xff] %vm30_vm0, %v10888_v1  ;;  %68 = vst.msk [vmem:[#allocation2 + $0x120] sm:$0xff] %vm30_vm0, %v10888_v1  ;;  %v10659_v18 = vld [vmem:[%s15663_s0 + $0x70] sm:$0xff]   ;;  %v10661_v20 = vld [vmem:[%s15663_s0 + $0x78] sm:$0xff]  }
   0xb   :  { %70 = vst.msk [vmem:[#allocation2 + $0x130] sm:$0xff] %vm30_vm0, %v10888_v1  ;;  %72 = vst.msk [vmem:[#allocation2 + $0x140] sm:$0xff] %vm30_vm0, %v10888_v1  ;;  %v10662_v21 = vld [vmem:[%s15663_s0 + $0x80] sm:$0xff]   ;;  %v10664_v23 = vld [vmem:[%s15663_s0 + $0x88] sm:$0xff]  }
   0xc   :  { %74 = vst.msk [vmem:[#allocation2 + $0x150] sm:$0xff] %vm30_vm0, %v10888_v1  ;;  %76 = vst.msk [vmem:[#allocation2 + $0x160] sm:$0xff] %vm30_vm0, %v10888_v1  ;;  %v10663_v22 = vld [vmem:[%s15663_s0 + $0xc0] sm:$0xff]   ;;  %v10665_v24 = vld [vmem:[%s15663_s0 + $0xc8] sm:$0xff]  }
   0xd   :  { %78 = vst.msk [vmem:[#allocation2 + $0x170] sm:$0xff] %vm30_vm0, %v10888_v1  ;;  %80 = vst.msk [vmem:[#allocation2 + $0x180] sm:$0xff] %vm30_vm0, %v10888_v1  ;;  %v10666_v25 = vld [vmem:[%s15663_s0 + $0x90] sm:$0xff]   ;;  %v10668_v27 = vld [vmem:[%s15663_s0 + $0x98] sm:$0xff]  }
   0xe   :  { %82 = vst.msk [vmem:[#allocation2 + $0x190] sm:$0xff] %vm30_vm0, %v10888_v1  ;;  %84 = vst.msk [vmem:[#allocation2 + $0x1a0] sm:$0xff] %vm30_vm0, %v10888_v1  ;;  %10190 = vmatmul.mubr.msk.bf16.gmra.mxu0 %vm247_vm1, %v10652_v11  ;;  %v10667_v26 = vld [vmem:[%s15663_s0 + $0xd0] sm:$0xff]   ;;  %v10669_v28 = vld [vmem:[%s15663_s0 + $0xd8] sm:$0xff]  }
   0xf   :  { %86 = vst.msk [vmem:[#allocation2 + $0x1b0] sm:$0xff] %vm30_vm0, %v10888_v1  ;;  %88 = vst.msk [vmem:[#allocation2 + $0x1c0] sm:$0xff] %vm30_vm0, %v10888_v1  ;;  %10208 = vmatmul.mubr.msk.bf16.gmra.mxu1 %vm247_vm1, %v10653_v12  ;;  %10193 = vmatprep.mubr.msk.bf16.mxu0 %vm247_vm1, %v10654_v13  ;;  %v10670_v29 = vld [vmem:[%s15663_s0 + $0xa0] sm:$0xff]   ;;  %v10672_v31 = vld [vmem:[%s15663_s0 + $0xa8] sm:$0xff]  }
  0x10   :  { %90 = vst.msk [vmem:[#allocation2 + $0x1d0] sm:$0xff] %vm30_vm0, %v10888_v1  ;;  %92 = vst.msk [vmem:[#allocation2 + $0x1e0] sm:$0xff] %vm30_vm0, %v10888_v1  ;;  %10211 = vmatprep.mubr.msk.bf16.mxu1 %vm247_vm1, %v10655_v14  ;;  %v10671_v30 = vld [vmem:[%s15663_s0 + $0xe0] sm:$0xff]   ;;  %v10673_v32 = vld [vmem:[%s15663_s0 + $0xe8] sm:$0xff]  }
  0x11   :  { %94 = vst.msk [vmem:[#allocation2 + $0x1f0] sm:$0xff] %vm30_vm0, %v10888_v1  ;;  %96 = vst.msk [vmem:[#allocation2 + $0x200] sm:$0xff] %vm30_vm0, %v10888_v1  ;;  %v10674_v33 = vld [vmem:[%s15663_s0 + $0xb0] sm:$0xff]   ;;  %v10676_v35 = vld [vmem:[%s15663_s0 + $0xb8] sm:$0xff]  }
  0x12   :  { %98 = vst.msk [vmem:[#allocation2 + $0x210] sm:$0xff] %vm30_vm0, %v10888_v1  ;;  %100 = vst.msk [vmem:[#allocation2 + $0x220] sm:$0xff] %vm30_vm0, %v10888_v1  ;;  %v10675_v34 = vld [vmem:[%s15663_s0 + $0xf0] sm:$0xff]   ;;  %v10677_v36 = vld [vmem:[%s15663_s0 + $0xf8] sm:$0xff]  }
  0x13   :  { %102 = vst.msk [vmem:[#allocation2 + $0x230] sm:$0xff] %vm30_vm0, %v10888_v1  ;;  %104 = vst.msk [vmem:[#allocation2 + $0x240] sm:$0xff] %vm30_vm0, %v10888_v1  ;;  %v10678_v37 = vld [vmem:[%s15664_s3 + $0x38] sm:$0xff]   ;;  %v10680_v39 = vld [vmem:[%s15664_s3 + $0x30] sm:$0xff]  }
  0x14   :  { %106 = vst.msk [vmem:[#allocation2 + $0x250] sm:$0xff] %vm30_vm0, %v10888_v1  ;;  %108 = vst.msk [vmem:[#allocation2 + $0x260] sm:$0xff] %vm30_vm0, %v10888_v1  ;;  %v10679_v38 = vld [vmem:[%s15664_s3 + $0x18] sm:$0xff]   ;;  %10255 = vmatprep.subr.bf16.mxu0 %v10678_v37  ;;  %v10681_v40 = vld [vmem:[%s15664_s3 + $0x10] sm:$0xff]  }
  0x15   :  { %110 = vst.msk [vmem:[#allocation2 + $0x270] sm:$0xff] %vm30_vm0, %v10888_v1  ;;  %112 = vst.msk [vmem:[#allocation2 + $0x280] sm:$0xff] %vm30_vm0, %v10888_v1  ;;  %10279 = vmatprep.subr.bf16.mxu1 %v10679_v38  ;;  %v10682_v41 = vld [vmem:[%s15664_s3 + $0x28] sm:$0xff]   ;;  %v10684_v43 = vld [vmem:[%s15664_s3 + $0x20] sm:$0xff]  }
  0x16   :  { %114 = vst.msk [vmem:[#allocation2 + $0x290] sm:$0xff] %vm30_vm0, %v10888_v1  ;;  %116 = vst.msk [vmem:[#allocation2 + $0x2a0] sm:$0xff] %vm30_vm0, %v10888_v1  ;;  %10194 = vmatmul.mubr.msk.bf16.gmra.mxu0 %vm247_vm1, %v10656_v15  ;;  %v10683_v42 = vld [vmem:[%s15664_s3 + $0x8] sm:$0xff]   ;;  %v10685_v44 = vld [vmem:[%s15664_s3] sm:$0xff]  }
  0x17   :  { %118 = vst.msk [vmem:[#allocation2 + $0x2b0] sm:$0xff] %vm30_vm0, %v10888_v1  ;;  %120 = vst.msk [vmem:[#allocation2 + $0x2c0] sm:$0xff] %vm30_vm0, %v10888_v1  ;;  %10212 = vmatmul.mubr.msk.bf16.gmra.mxu1 %vm247_vm1, %v10657_v16  ;;  %10197 = vmatprep.mubr.msk.bf16.mxu0 %vm247_vm1, %v10658_v17  ;;  %v11395_v45 = vld [vmem:[%s15664_s3 + $0x58] sm:$0xff]   ;;  %v11407_v47 = vld [vmem:[%s15665_s2] ss:$0 sm:$0xff] }
  0x18   :  { %122 = vst.msk [vmem:[#allocation2 + $0x2d0] sm:$0xff] %vm30_vm0, %v10888_v1  ;;  %124 = vst.msk [vmem:[#allocation2 + $0x2e0] sm:$0xff] %vm30_vm0, %v10888_v1  ;;  %10215 = vmatprep.mubr.msk.bf16.mxu1 %vm247_vm1, %v10659_v18  ;;  %v11401_v46 = vld [vmem:[%s15664_s3 + $0x78] sm:$0xff]  }
  0x19   :  { %126 = vst.msk [vmem:[#allocation2 + $0x2f0] sm:$0xff] %vm30_vm0, %v10888_v1  ;;  %128 = vst.msk [vmem:[#allocation2 + $0x300] sm:$0xff] %vm30_vm0, %v10888_v1 }
  0x1a   :  { %130 = vst.msk [vmem:[#allocation2 + $0x310] sm:$0xff] %vm30_vm0, %v10888_v1  ;;  %132 = vst.msk [vmem:[#allocation2 + $0x320] sm:$0xff] %vm30_vm0, %v10888_v1 }
  0x1b   :  { %134 = vst.msk [vmem:[#allocation2 + $0x330] sm:$0xff] %vm30_vm0, %v10888_v1  ;;  %136 = vst.msk [vmem:[#allocation2 + $0x340] sm:$0xff] %vm30_vm0, %v10888_v1 }
  0x1c   :  { %138 = vst.msk [vmem:[#allocation2 + $0x350] sm:$0xff] %vm30_vm0, %v10888_v1  ;;  %140 = vst.msk [vmem:[#allocation2 + $0x360] sm:$0xff] %vm30_vm0, %v10888_v1 }
  0x1d   :  { %142 = vst.msk [vmem:[#allocation2 + $0x370] sm:$0xff] %vm30_vm0, %v10888_v1  ;;  %146 = vst.msk [vmem:[#allocation2 + $0x390] sm:$0xff] %vm30_vm0, %v10888_v1 }
  0x1e   :  { %148 = vst.msk [vmem:[#allocation2 + $0x3a0] sm:$0xff] %vm30_vm0, %v10888_v1  ;;  %150 = vst.msk [vmem:[#allocation2 + $0x3b0] sm:$0xff] %vm30_vm0, %v10888_v1  ;;  %10198 = vmatmul.mubr.msk.bf16.gmra.mxu0 %vm247_vm1, %v10660_v19 }
  0x1f   :  { %152 = vst.msk [vmem:[#allocation2 + $0x3c0] sm:$0xff] %vm30_vm0, %v10888_v1  ;;  %154 = vst.msk [vmem:[#allocation2 + $0x3d0] sm:$0xff] %vm30_vm0, %v10888_v1  ;;  %10216 = vmatmul.mubr.msk.bf16.gmra.mxu1 %vm247_vm1, %v10661_v20  ;;  %10221 = vmatprep.mubr.msk.bf16.mxu0 %vm247_vm1, %v10662_v21 }
  0x20   :  { %156 = vst.msk [vmem:[#allocation2 + $0x3e0] sm:$0xff] %vm30_vm0, %v10888_v1  ;;  %158 = vst.msk [vmem:[#allocation2 + $0x3f0] sm:$0xff] %vm30_vm0, %v10888_v1  ;;  %10239 = vmatprep.mubr.msk.bf16.mxu1 %vm247_vm1, %v10663_v22 }
  0x21   :  { %160 = vst.msk [vmem:[#allocation2 + $0x400] sm:$0xff] %vm30_vm0, %v10888_v1  ;;  %162 = vst.msk [vmem:[#allocation2 + $0x410] sm:$0xff] %vm30_vm0, %v10888_v1 }
  0x22   :  { %164 = vst.msk [vmem:[#allocation2 + $0x420] sm:$0xff] %vm30_vm0, %v10888_v1  ;;  %166 = vst.msk [vmem:[#allocation2 + $0x430] sm:$0xff] %vm30_vm0, %v10888_v1 }
  0x23   :  { %168 = vst.msk [vmem:[#allocation2 + $0x440] sm:$0xff] %vm30_vm0, %v10888_v1  ;;  %170 = vst.msk [vmem:[#allocation2 + $0x450] sm:$0xff] %vm30_vm0, %v10888_v1 }
  0x24   :  { %172 = vst.msk [vmem:[#allocation2 + $0x460] sm:$0xff] %vm30_vm0, %v10888_v1  ;;  %174 = vst.msk [vmem:[#allocation2 + $0x470] sm:$0xff] %vm30_vm0, %v10888_v1 }
  0x25   :  { %109 = vst.msk [vmem:[#allocation2 + $0x268] sm:$0x1] %vm32_vm2, %v10888_v1  ;;  %33 = vst.msk [vmem:[#allocation2 + $0x8] sm:$0x1] %vm32_vm2, %v10888_v1 }
  0x26   :  { %10222 = vmatmul.mubr.msk.bf16.vlgmr.msra.gmra.mxu0 %vm247_vm1, %v10664_v23  ;;  %35 = vst.msk [vmem:[#allocation2 + $0x18] sm:$0x1] %vm32_vm2, %v10888_v1  ;;  %37 = vst.msk [vmem:[#allocation2 + $0x28] sm:$0x1] %vm32_vm2, %v10888_v1 }
  0x27   :  { %10240 = vmatmul.mubr.msk.bf16.vlgmr.msra.gmra.mxu1 %vm247_vm1, %v10665_v24  ;;  %10225 = vmatprep.mubr.msk.bf16.mxu0 %vm247_vm1, %v10666_v25  ;;  %39 = vst.msk [vmem:[#allocation2 + $0x38] sm:$0x1] %vm32_vm2, %v10888_v1  ;;  %41 = vst.msk [vmem:[#allocation2 + $0x48] sm:$0x1] %vm32_vm2, %v10888_v1 }
  0x28   :  { %10243 = vmatprep.mubr.msk.bf16.mxu1 %vm247_vm1, %v10667_v26  ;;  %43 = vst.msk [vmem:[#allocation2 + $0x58] sm:$0x1] %vm32_vm2, %v10888_v1  ;;  %45 = vst.msk [vmem:[#allocation2 + $0x68] sm:$0x1] %vm32_vm2, %v10888_v1  ;;  %10256 = vmatpush3.bf16.msra.mxu0 %v10678_v37 }
  0x29   :  { %47 = vst.msk [vmem:[#allocation2 + $0x78] sm:$0x1] %vm32_vm2, %v10888_v1  ;;  %49 = vst.msk [vmem:[#allocation2 + $0x88] sm:$0x1] %vm32_vm2, %v10888_v1  ;;  %10280 = vmatpush3.bf16.msra.mxu1 %v10679_v38  ;;  %10257 = vmatprep.subr.bf16.mxu0 %v10680_v39 }
  0x2a   :  { %51 = vst.msk [vmem:[#allocation2 + $0x98] sm:$0x1] %vm32_vm2, %v10888_v1  ;;  %53 = vst.msk [vmem:[#allocation2 + $0xa8] sm:$0x1] %vm32_vm2, %v10888_v1  ;;  %10281 = vmatprep.subr.bf16.mxu1 %v10681_v40 }
  0x2b   :  { %55 = vst.msk [vmem:[#allocation2 + $0xb8] sm:$0x1] %vm32_vm2, %v10888_v1  ;;  %57 = vst.msk [vmem:[#allocation2 + $0xc8] sm:$0x1] %vm32_vm2, %v10888_v1 }
  0x2c   :  { %59 = vst.msk [vmem:[#allocation2 + $0xd8] sm:$0x1] %vm32_vm2, %v10888_v1  ;;  %61 = vst.msk [vmem:[#allocation2 + $0xe8] sm:$0x1] %vm32_vm2, %v10888_v1  ;;  %10258 = vmatpush3.bf16.msra.mxu0 %v10680_v39 }
  0x2d   :  { %63 = vst.msk [vmem:[#allocation2 + $0xf8] sm:$0x1] %vm32_vm2, %v10888_v1  ;;  %65 = vst.msk [vmem:[#allocation2 + $0x108] sm:$0x1] %vm32_vm2, %v10888_v1  ;;  %10282 = vmatpush3.bf16.msra.mxu1 %v10681_v40  ;;  %10259 = vmatprep.subr.bf16.mxu0 %v10682_v41 }
  0x2e   :  { %10226 = vmatmul.mubr.msk.bf16.gmra.mxu0 %vm247_vm1, %v10668_v27  ;;  %67 = vst.msk [vmem:[#allocation2 + $0x118] sm:$0x1] %vm32_vm2, %v10888_v1  ;;  %69 = vst.msk [vmem:[#allocation2 + $0x128] sm:$0x1] %vm32_vm2, %v10888_v1  ;;  %10283 = vmatprep.subr.bf16.mxu1 %v10683_v42 }
  0x2f   :  { %10244 = vmatmul.mubr.msk.bf16.gmra.mxu1 %vm247_vm1, %v10669_v28  ;;  %10229 = vmatprep.mubr.msk.bf16.mxu0 %vm247_vm1, %v10670_v29  ;;  %71 = vst.msk [vmem:[#allocation2 + $0x138] sm:$0x1] %vm32_vm2, %v10888_v1  ;;  %73 = vst.msk [vmem:[#allocation2 + $0x148] sm:$0x1] %vm32_vm2, %v10888_v1 }
  0x30   :  { %10247 = vmatprep.mubr.msk.bf16.mxu1 %vm247_vm1, %v10671_v30  ;;  %75 = vst.msk [vmem:[#allocation2 + $0x158] sm:$0x1] %vm32_vm2, %v10888_v1  ;;  %77 = vst.msk [vmem:[#allocation2 + $0x168] sm:$0x1] %vm32_vm2, %v10888_v1  ;;  %10260 = vmatpush3.bf16.msra.mxu0 %v10682_v41 }
  0x31   :  { %79 = vst.msk [vmem:[#allocation2 + $0x178] sm:$0x1] %vm32_vm2, %v10888_v1  ;;  %81 = vst.msk [vmem:[#allocation2 + $0x188] sm:$0x1] %vm32_vm2, %v10888_v1  ;;  %10284 = vmatpush3.bf16.msra.mxu1 %v10683_v42  ;;  %10261 = vmatprep.subr.bf16.mxu0 %v10684_v43 }
  0x32   :  { %83 = vst.msk [vmem:[#allocation2 + $0x198] sm:$0x1] %vm32_vm2, %v10888_v1  ;;  %85 = vst.msk [vmem:[#allocation2 + $0x1a8] sm:$0x1] %vm32_vm2, %v10888_v1  ;;  %10285 = vmatprep.subr.bf16.mxu1 %v10685_v44 }
  0x33   :  { %87 = vst.msk [vmem:[#allocation2 + $0x1b8] sm:$0x1] %vm32_vm2, %v10888_v1  ;;  %89 = vst.msk [vmem:[#allocation2 + $0x1c8] sm:$0x1] %vm32_vm2, %v10888_v1 }
  0x34   :  { %91 = vst.msk [vmem:[#allocation2 + $0x1d8] sm:$0x1] %vm32_vm2, %v10888_v1  ;;  %93 = vst.msk [vmem:[#allocation2 + $0x1e8] sm:$0x1] %vm32_vm2, %v10888_v1  ;;  %10262 = vmatpush3.bf16.msra.mxu0 %v10684_v43 }
  0x35   :  { %95 = vst.msk [vmem:[#allocation2 + $0x1f8] sm:$0x1] %vm32_vm2, %v10888_v1  ;;  %97 = vst.msk [vmem:[#allocation2 + $0x208] sm:$0x1] %vm32_vm2, %v10888_v1  ;;  %10286 = vmatpush3.bf16.msra.mxu1 %v10685_v44  ;;  %10303 = vmatprep.subr.bf16.mxu0 %v11395_v45 }
  0x36   :  { %10230 = vmatmul.mubr.msk.bf16.gmra.mxu0 %vm247_vm1, %v10672_v31  ;;  %99 = vst.msk [vmem:[#allocation2 + $0x218] sm:$0x1] %vm32_vm2, %v10888_v1  ;;  %101 = vst.msk [vmem:[#allocation2 + $0x228] sm:$0x1] %vm32_vm2, %v10888_v1  ;;  %10327 = vmatprep.subr.bf16.mxu1 %v11401_v46 }
  0x37   :  { %10248 = vmatmul.mubr.msk.bf16.gmra.mxu1 %vm247_vm1, %v10673_v32  ;;  %10233 = vmatprep.mubr.msk.bf16.mxu0 %vm247_vm1, %v10674_v33  ;;  %103 = vst.msk [vmem:[#allocation2 + $0x238] sm:$0x1] %vm32_vm2, %v10888_v1  ;;  %105 = vst.msk [vmem:[#allocation2 + $0x248] sm:$0x1] %vm32_vm2, %v10888_v1 }
  0x38   :  { %10251 = vmatprep.mubr.msk.bf16.mxu1 %vm247_vm1, %v10675_v34  ;;  %107 = vst.msk [vmem:[#allocation2 + $0x258] sm:$0x1] %vm32_vm2, %v10888_v1  ;;  %111 = vst.msk [vmem:[#allocation2 + $0x278] sm:$0x1] %vm32_vm2, %v10888_v1 }
  0x39   :  { %113 = vst.msk [vmem:[#allocation2 + $0x288] sm:$0x1] %vm32_vm2, %v10888_v1  ;;  %115 = vst.msk [vmem:[#allocation2 + $0x298] sm:$0x1] %vm32_vm2, %v10888_v1 }
  0x3a   :  { %117 = vst.msk [vmem:[#allocation2 + $0x2a8] sm:$0x1] %vm32_vm2, %v10888_v1  ;;  %119 = vst.msk [vmem:[#allocation2 + $0x2b8] sm:$0x1] %vm32_vm2, %v10888_v1 }
  0x3b   :  { %121 = vst.msk [vmem:[#allocation2 + $0x2c8] sm:$0x1] %vm32_vm2, %v10888_v1  ;;  %123 = vst.msk [vmem:[#allocation2 + $0x2d8] sm:$0x1] %vm32_vm2, %v10888_v1 }
  0x3c   :  { %125 = vst.msk [vmem:[#allocation2 + $0x2e8] sm:$0x1] %vm32_vm2, %v10888_v1  ;;  %127 = vst.msk [vmem:[#allocation2 + $0x2f8] sm:$0x1] %vm32_vm2, %v10888_v1 }
  0x3d   :  { %129 = vst.msk [vmem:[#allocation2 + $0x308] sm:$0x1] %vm32_vm2, %v10888_v1  ;;  %131 = vst.msk [vmem:[#allocation2 + $0x318] sm:$0x1] %vm32_vm2, %v10888_v1 }
  0x3e   :  { %10234 = vmatmul.mubr.msk.bf16.gmra.mxu0 %vm247_vm1, %v10676_v35  ;;  %133 = vst.msk [vmem:[#allocation2 + $0x328] sm:$0x1] %vm32_vm2, %v10888_v1  ;;  %135 = vst.msk [vmem:[#allocation2 + $0x338] sm:$0x1] %vm32_vm2, %v10888_v1 }
  0x3f   :  { %10252 = vmatmul.mubr.msk.bf16.gmra.mxu1 %vm247_vm1, %v10677_v36  ;;  %137 = vst.msk [vmem:[#allocation2 + $0x348] sm:$0x1] %vm32_vm2, %v10888_v1  ;;  %139 = vst.msk [vmem:[#allocation2 + $0x358] sm:$0x1] %vm32_vm2, %v10888_v1 }
  0x40   :  { %141 = vst.msk [vmem:[#allocation2 + $0x368] sm:$0x1] %vm32_vm2, %v10888_v1  ;;  %143 = vst.msk [vmem:[#allocation2 + $0x378] sm:$0x1] %vm32_vm2, %v10888_v1 }
  0x41   :  { %145 = vst.msk [vmem:[#allocation2 + $0x388] sm:$0x1] %vm32_vm2, %v10888_v1  ;;  %147 = vst.msk [vmem:[#allocation2 + $0x398] sm:$0x1] %vm32_vm2, %v10888_v1 }
  0x42   :  { %149 = vst.msk [vmem:[#allocation2 + $0x3a8] sm:$0x1] %vm32_vm2, %v10888_v1  ;;  %151 = vst.msk [vmem:[#allocation2 + $0x3b8] sm:$0x1] %vm32_vm2, %v10888_v1 }
  0x43   :  { %153 = vst.msk [vmem:[#allocation2 + $0x3c8] sm:$0x1] %vm32_vm2, %v10888_v1  ;;  %155 = vst.msk [vmem:[#allocation2 + $0x3d8] sm:$0x1] %vm32_vm2, %v10888_v1 }
  0x44   :  { %157 = vst.msk [vmem:[#allocation2 + $0x3e8] sm:$0x1] %vm32_vm2, %v10888_v1  ;;  %159 = vst.msk [vmem:[#allocation2 + $0x3f8] sm:$0x1] %vm32_vm2, %v10888_v1 }
  0x45   :  { %161 = vst.msk [vmem:[#allocation2 + $0x408] sm:$0x1] %vm32_vm2, %v10888_v1  ;;  %163 = vst.msk [vmem:[#allocation2 + $0x418] sm:$0x1] %vm32_vm2, %v10888_v1 }
  0x46   :  { %165 = vst.msk [vmem:[#allocation2 + $0x428] sm:$0x1] %vm32_vm2, %v10888_v1  ;;  %167 = vst.msk [vmem:[#allocation2 + $0x438] sm:$0x1] %vm32_vm2, %v10888_v1 }
  0x47   :  { %169 = vst.msk [vmem:[#allocation2 + $0x448] sm:$0x1] %vm32_vm2, %v10888_v1  ;;  %171 = vst.msk [vmem:[#allocation2 + $0x458] sm:$0x1] %vm32_vm2, %v10888_v1 }
  0x48   :  { %173 = vst.msk [vmem:[#allocation2 + $0x468] sm:$0x1] %vm32_vm2, %v10888_v1  ;;  %175 = vst.msk [vmem:[#allocation2 + $0x478] sm:$0x1] %vm32_vm2, %v10888_v1 }
  0xc6   :  { %v10187_v48 = vpop.f32.mrf.mxu0 }
  0xc7   :  { %v315_v49 = vadd.f32 %v10187_v48, %v11407_v47  ;;  %v10205_v50 = vpop.f32.mrf.mxu1 }
  0xc8   :  { %v566_v51 = vadd.f32 %v10205_v50, %v11407_v47  ;;  %v306_v52 = vpop.f32.mrf.mxu0 }
  0xc9   :  { %vm371_vm3 = vcmp.ge.f32.partialorder %v315_v49, 0.0  ;;  %v387_v53 = vmul.f32 0.2, %v315_v49  ;;  %v307_v54 = vadd.f32 %v11407_v47, %v306_v52  ;;  %v557_v55 = vpop.f32.mrf.mxu1 }
  0xca   :  { %vm622_vm4 = vcmp.ge.f32.partialorder %v566_v51, 0.0  ;;  %v638_v56 = vmul.f32 0.2, %v566_v51  ;;  %v558_v57 = vadd.f32 %v11407_v47, %v557_v55  ;;  %v10188_v58 = vpop.f32.mrf.mxu0 }
  0xcb   :  { %v403_v59 = vsel %vm371_vm3, %v315_v49, %v387_v53  ;;  %vm369_vm5 = vcmp.ge.f32.partialorder %v307_v54, 0.0  ;;  %v385_v60 = vmul.f32 0.2, %v307_v54  ;;  %v318_v61 = vadd.f32 %v10188_v58, %v11407_v47  ;;  %v10206_v62 = vpop.f32.mrf.mxu1 }
  0xcc   :  { %420 = vst.msk [vmem:[#allocation2 + $0x380] sm:$0xff] %vm30_vm0, %v403_v59  ;;  %v654_v63 = vsel %vm622_vm4, %v566_v51, %v638_v56  ;;  %vm620_vm6 = vcmp.ge.f32.partialorder %v558_v57, 0.0  ;;  %v636_v0 = vmul.f32 0.2, %v558_v57  ;;  %v569_v1 = vadd.f32 %v10206_v62, %v11407_v47  ;;  %v309_v2 = vpop.f32.mrf.mxu0 }
  0xcd   :  { %671 = vst.msk [vmem:[#allocation2 + $0x261] sm:$0xff] %vm30_vm0, %v654_v63  ;;  %v401_v3 = vsel %vm369_vm5, %v307_v54, %v385_v60  ;;  %vm372_vm7 = vcmp.ge.f32.partialorder %v318_v61, 0.0  ;;  %v388_v4 = vmul.f32 0.2, %v318_v61  ;;  %v310_v5 = vadd.f32 %v11407_v47, %v309_v2  ;;  %v560_v6 = vpop.f32.mrf.mxu1 }
  0xce   :  { %418 = vst.msk [vmem:[#allocation2 + $0x360] sm:$0xff] %vm30_vm0, %v401_v3  ;;  %v652_v7 = vsel %vm620_vm6, %v558_v57, %v636_v0  ;;  %vm623_vm8 = vcmp.ge.f32.partialorder %v569_v1, 0.0  ;;  %v639_v8 = vmul.f32 0.2, %v569_v1  ;;  %v561_v9 = vadd.f32 %v11407_v47, %v560_v6  ;;  %v10191_v10 = vpop.f32.mrf.mxu0 }
  0xcf   :  { %669 = vst.msk [vmem:[#allocation2 + $0x241] sm:$0xff] %vm30_vm0, %v652_v7  ;;  %v404_v11 = vsel %vm372_vm7, %v318_v61, %v388_v4  ;;  %vm370_vm9 = vcmp.ge.f32.partialorder %v310_v5, 0.0  ;;  %v386_v12 = vmul.f32 0.2, %v310_v5  ;;  %v331_v13 = vadd.f32 %v10191_v10, %v11407_v47  ;;  %v10209_v14 = vpop.f32.mrf.mxu1 }
  0xd0   :  { %421 = vst.msk [vmem:[#allocation2 + $0x390] sm:$0xff] %vm30_vm0, %v404_v11  ;;  %v655_v15 = vsel %vm623_vm8, %v569_v1, %v639_v8  ;;  %vm621_vm10 = vcmp.ge.f32.partialorder %v561_v9, 0.0  ;;  %v637_v16 = vmul.f32 0.2, %v561_v9  ;;  %v582_v17 = vadd.f32 %v10209_v14, %v11407_v47  ;;  %v322_v18 = vpop.f32.mrf.mxu0 }
  0xd1   :  { %672 = vst.msk [vmem:[#allocation2 + $0x271] sm:$0xff] %vm30_vm0, %v655_v15  ;;  %v402_v19 = vsel %vm370_vm9, %v310_v5, %v386_v12  ;;  %vm375_vm11 = vcmp.ge.f32.partialorder %v331_v13, 0.0  ;;  %v391_v20 = vmul.f32 0.2, %v331_v13  ;;  %v323_v21 = vadd.f32 %v11407_v47, %v322_v18  ;;  %v573_v22 = vpop.f32.mrf.mxu1 }
  0xd2   :  { %419 = vst.msk [vmem:[#allocation2 + $0x370] sm:$0xff] %vm30_vm0, %v402_v19  ;;  %v653_v23 = vsel %vm621_vm10, %v561_v9, %v637_v16  ;;  %vm626_vm12 = vcmp.ge.f32.partialorder %v582_v17, 0.0  ;;  %v642_v24 = vmul.f32 0.2, %v582_v17  ;;  %v574_v25 = vadd.f32 %v11407_v47, %v573_v22  ;;  %v10192_v26 = vpop.f32.mrf.mxu0 }
  0xd3   :  { %670 = vst.msk [vmem:[#allocation2 + $0x251] sm:$0xff] %vm30_vm0, %v653_v23  ;;  %v407_v27 = vsel %vm375_vm11, %v331_v13, %v391_v20  ;;  %vm373_vm13 = vcmp.ge.f32.partialorder %v323_v21, 0.0  ;;  %v389_v28 = vmul.f32 0.2, %v323_v21  ;;  %v334_v29 = vadd.f32 %v10192_v26, %v11407_v47  ;;  %v10210_v30 = vpop.f32.mrf.mxu1 }
  0xd4   :  { %424 = vst.msk [vmem:[#allocation2 + $0x3c0] sm:$0xff] %vm30_vm0, %v407_v27  ;;  %v658_v31 = vsel %vm626_vm12, %v582_v17, %v642_v24  ;;  %vm624_vm14 = vcmp.ge.f32.partialorder %v574_v25, 0.0  ;;  %v640_v32 = vmul.f32 0.2, %v574_v25  ;;  %v585_v33 = vadd.f32 %v10210_v30, %v11407_v47  ;;  %v325_v34 = vpop.f32.mrf.mxu0 }
  0xd5   :  { %675 = vst.msk [vmem:[#allocation2 + $0x2a1] sm:$0xff] %vm30_vm0, %v658_v31  ;;  %v405_v35 = vsel %vm373_vm13, %v323_v21, %v389_v28  ;;  %vm376_vm15 = vcmp.ge.f32.partialorder %v334_v29, 0.0  ;;  %v392_v36 = vmul.f32 0.2, %v334_v29  ;;  %v326_v37 = vadd.f32 %v11407_v47, %v325_v34  ;;  %v576_v38 = vpop.f32.mrf.mxu1 }
  0xd6   :  { %422 = vst.msk [vmem:[#allocation2 + $0x3a0] sm:$0xff] %vm30_vm0, %v405_v35  ;;  %v656_v39 = vsel %vm624_vm14, %v574_v25, %v640_v32  ;;  %vm627_vm1 = vcmp.ge.f32.partialorder %v585_v33, 0.0  ;;  %v643_v40 = vmul.f32 0.2, %v585_v33  ;;  %v577_v41 = vadd.f32 %v11407_v47, %v576_v38  ;;  %v10195_v42 = vpop.f32.mrf.mxu0 }
  0xd7   :  { %673 = vst.msk [vmem:[#allocation2 + $0x281] sm:$0xff] %vm30_vm0, %v656_v39  ;;  %v408_v43 = vsel %vm376_vm15, %v334_v29, %v392_v36  ;;  %vm374_vm2 = vcmp.ge.f32.partialorder %v326_v37, 0.0  ;;  %v390_v44 = vmul.f32 0.2, %v326_v37  ;;  %v347_v48 = vadd.f32 %v10195_v42, %v11407_v47  ;;  %v10213_v49 = vpop.f32.mrf.mxu1 }
  0xd8   :  { %425 = vst.msk [vmem:[#allocation2 + $0x3d0] sm:$0xff] %vm30_vm0, %v408_v43  ;;  %v659_v50 = vsel %vm627_vm1, %v585_v33, %v643_v40  ;;  %vm625_vm3 = vcmp.ge.f32.partialorder %v577_v41, 0.0  ;;  %v641_v51 = vmul.f32 0.2, %v577_v41  ;;  %v598_v52 = vadd.f32 %v10213_v49, %v11407_v47  ;;  %v338_v53 = vpop.f32.mrf.mxu0 }
  0xd9   :  { %676 = vst.msk [vmem:[#allocation2 + $0x2b1] sm:$0xff] %vm30_vm0, %v659_v50  ;;  %v406_v54 = vsel %vm374_vm2, %v326_v37, %v390_v44  ;;  %vm379_vm4 = vcmp.ge.f32.partialorder %v347_v48, 0.0  ;;  %v395_v55 = vmul.f32 0.2, %v347_v48  ;;  %v339_v56 = vadd.f32 %v11407_v47, %v338_v53  ;;  %v589_v57 = vpop.f32.mrf.mxu1 }
  0xda   :  { %423 = vst.msk [vmem:[#allocation2 + $0x3b0] sm:$0xff] %vm30_vm0, %v406_v54  ;;  %v657_v58 = vsel %vm625_vm3, %v577_v41, %v641_v51  ;;  %vm630_vm5 = vcmp.ge.f32.partialorder %v598_v52, 0.0  ;;  %v646_v59 = vmul.f32 0.2, %v598_v52  ;;  %v590_v60 = vadd.f32 %v11407_v47, %v589_v57  ;;  %v10196_v61 = vpop.f32.mrf.mxu0 }
  0xdb   :  { %674 = vst.msk [vmem:[#allocation2 + $0x291] sm:$0xff] %vm30_vm0, %v657_v58  ;;  %v411_v62 = vsel %vm379_vm4, %v347_v48, %v395_v55  ;;  %vm377_vm6 = vcmp.ge.f32.partialorder %v339_v56, 0.0  ;;  %v393_v63 = vmul.f32 0.2, %v339_v56  ;;  %v350_v0 = vadd.f32 %v10196_v61, %v11407_v47  ;;  %v10214_v1 = vpop.f32.mrf.mxu1 }
  0xdc   :  { %428 = vst.msk [vmem:[#allocation2 + $0x410] sm:$0xff] %vm30_vm0, %v411_v62  ;;  %v662_v2 = vsel %vm630_vm5, %v598_v52, %v646_v59  ;;  %vm628_vm7 = vcmp.ge.f32.partialorder %v590_v60, 0.0  ;;  %v644_v3 = vmul.f32 0.2, %v590_v60  ;;  %v601_v4 = vadd.f32 %v10214_v1, %v11407_v47  ;;  %v341_v5 = vpop.f32.mrf.mxu0 }
  0xdd   :  { %679 = vst.msk [vmem:[#allocation2 + $0x2f1] sm:$0xff] %vm30_vm0, %v662_v2  ;;  %v409_v6 = vsel %vm377_vm6, %v339_v56, %v393_v63  ;;  %vm380_vm8 = vcmp.ge.f32.partialorder %v350_v0, 0.0  ;;  %v396_v7 = vmul.f32 0.2, %v350_v0  ;;  %v342_v8 = vadd.f32 %v11407_v47, %v341_v5  ;;  %v592_v9 = vpop.f32.mrf.mxu1 }
  0xde   :  { %426 = vst.msk [vmem:[#allocation2 + $0x3f0] sm:$0xff] %vm30_vm0, %v409_v6  ;;  %v660_v10 = vsel %vm628_vm7, %v590_v60, %v644_v3  ;;  %vm631_vm9 = vcmp.ge.f32.partialorder %v601_v4, 0.0  ;;  %v647_v11 = vmul.f32 0.2, %v601_v4  ;;  %v593_v12 = vadd.f32 %v11407_v47, %v592_v9  ;;  %v10199_v13 = vpop.f32.mrf.mxu0 }
  0xdf   :  { %677 = vst.msk [vmem:[#allocation2 + $0x2d1] sm:$0xff] %vm30_vm0, %v660_v10  ;;  %v412_v14 = vsel %vm380_vm8, %v350_v0, %v396_v7  ;;  %vm378_vm10 = vcmp.ge.f32.partialorder %v342_v8, 0.0  ;;  %v394_v15 = vmul.f32 0.2, %v342_v8  ;;  %v363_v16 = vadd.f32 %v10199_v13, %v11407_v47  ;;  %v10217_v17 = vpop.f32.mrf.mxu1 }
  0xe0   :  { %429 = vst.msk [vmem:[#allocation2 + $0x420] sm:$0xff] %vm30_vm0, %v412_v14  ;;  %v663_v18 = vsel %vm631_vm9, %v601_v4, %v647_v11  ;;  %vm629_vm11 = vcmp.ge.f32.partialorder %v593_v12, 0.0  ;;  %v645_v19 = vmul.f32 0.2, %v593_v12  ;;  %v614_v20 = vadd.f32 %v10217_v17, %v11407_v47  ;;  %v354_v21 = vpop.f32.mrf.mxu0 }
  0xe1   :  { %680 = vst.msk [vmem:[#allocation2 + $0x301] sm:$0xff] %vm30_vm0, %v663_v18  ;;  %v410_v22 = vsel %vm378_vm10, %v342_v8, %v394_v15  ;;  %vm383_vm12 = vcmp.ge.f32.partialorder %v363_v16, 0.0  ;;  %v399_v23 = vmul.f32 0.2, %v363_v16  ;;  %v355_v24 = vadd.f32 %v11407_v47, %v354_v21  ;;  %v605_v25 = vpop.f32.mrf.mxu1 }
  0xe2   :  { %427 = vst.msk [vmem:[#allocation2 + $0x400] sm:$0xff] %vm30_vm0, %v410_v22  ;;  %v661_v26 = vsel %vm629_vm11, %v593_v12, %v645_v19  ;;  %vm634_vm13 = vcmp.ge.f32.partialorder %v614_v20, 0.0  ;;  %v650_v27 = vmul.f32 0.2, %v614_v20  ;;  %v606_v28 = vadd.f32 %v11407_v47, %v605_v25  ;;  %v10200_v29 = vpop.f32.mrf.mxu0 }
  0xe3   :  { %678 = vst.msk [vmem:[#allocation2 + $0x2e1] sm:$0xff] %vm30_vm0, %v661_v26  ;;  %v415_v30 = vsel %vm383_vm12, %v363_v16, %v399_v23  ;;  %vm381_vm14 = vcmp.ge.f32.partialorder %v355_v24, 0.0  ;;  %v397_v31 = vmul.f32 0.2, %v355_v24  ;;  %v366_v32 = vadd.f32 %v10200_v29, %v11407_v47  ;;  %v10218_v33 = vpop.f32.mrf.mxu1 }
  0xe4   :  { %432 = vst.msk [vmem:[#allocation2 + $0x450] sm:$0xff] %vm30_vm0, %v415_v30  ;;  %v666_v34 = vsel %vm634_vm13, %v614_v20, %v650_v27  ;;  %vm632_vm15 = vcmp.ge.f32.partialorder %v606_v28, 0.0  ;;  %v648_v35 = vmul.f32 0.2, %v606_v28  ;;  %v617_v36 = vadd.f32 %v10218_v33, %v11407_v47  ;;  %v357_v37 = vpop.f32.mrf.mxu0 }
  0xe5   :  { %683 = vst.msk [vmem:[#allocation2 + $0x331] sm:$0xff] %vm30_vm0, %v666_v34  ;;  %v413_v38 = vsel %vm381_vm14, %v355_v24, %v397_v31  ;;  %vm384_vm1 = vcmp.ge.f32.partialorder %v366_v32, 0.0  ;;  %v400_v39 = vmul.f32 0.2, %v366_v32  ;;  %v358_v40 = vadd.f32 %v11407_v47, %v357_v37  ;;  %v608_v41 = vpop.f32.mrf.mxu1 }
  0xe6   :  { %430 = vst.msk [vmem:[#allocation2 + $0x430] sm:$0xff] %vm30_vm0, %v413_v38  ;;  %v664_v42 = vsel %vm632_vm15, %v606_v28, %v648_v35  ;;  %vm635_vm2 = vcmp.ge.f32.partialorder %v617_v36, 0.0  ;;  %v651_v43 = vmul.f32 0.2, %v617_v36  ;;  %v609_v44 = vadd.f32 %v11407_v47, %v608_v41  ;;  %v10223_v48 = vpop.f32.mrf.mxu0 }
  0xe7   :  { %681 = vst.msk [vmem:[#allocation2 + $0x311] sm:$0xff] %vm30_vm0, %v664_v42  ;;  %v416_v49 = vsel %vm384_vm1, %v366_v32, %v400_v39  ;;  %vm382_vm3 = vcmp.ge.f32.partialorder %v358_v40, 0.0  ;;  %v398_v50 = vmul.f32 0.2, %v358_v40  ;;  %v817_v51 = vadd.f32 %v10223_v48, %v11407_v47  ;;  %v10241_v52 = vpop.f32.mrf.mxu1 }
  0xe8   :  { %433 = vst.msk [vmem:[#allocation2 + $0x460] sm:$0xff] %vm30_vm0, %v416_v49  ;;  %v667_v53 = vsel %vm635_vm2, %v617_v36, %v651_v43  ;;  %vm633_vm4 = vcmp.ge.f32.partialorder %v609_v44, 0.0  ;;  %v649_v54 = vmul.f32 0.2, %v609_v44  ;;  %v1068_v55 = vadd.f32 %v10241_v52, %v11407_v47  ;;  %v808_v56 = vpop.f32.mrf.mxu0 }
  0xe9   :  { %684 = vst.msk [vmem:[#allocation2 + $0x341] sm:$0xff] %vm30_vm0, %v667_v53  ;;  %v414_v57 = vsel %vm382_vm3, %v358_v40, %v398_v50  ;;  %vm873_vm5 = vcmp.ge.f32.partialorder %v817_v51, 0.0  ;;  %v889_v58 = vmul.f32 0.2, %v817_v51  ;;  %v809_v59 = vadd.f32 %v11407_v47, %v808_v56  ;;  %v1059_v60 = vpop.f32.mrf.mxu1 }
  0xea   :  { %431 = vst.msk [vmem:[#allocation2 + $0x440] sm:$0xff] %vm30_vm0, %v414_v57  ;;  %v665_v61 = vsel %vm633_vm4, %v609_v44, %v649_v54  ;;  %vm1124_vm6 = vcmp.ge.f32.partialorder %v1068_v55, 0.0  ;;  %v1140_v62 = vmul.f32 0.2, %v1068_v55  ;;  %v1060_v63 = vadd.f32 %v11407_v47, %v1059_v60  ;;  %v10224_v0 = vpop.f32.mrf.mxu0  ;;  %v1220_v60 = vld [vmem:[#allocation2 + $0x120] sm:$0xff] }
  0xeb   :  { %682 = vst.msk [vmem:[#allocation2 + $0x321] sm:$0xff] %vm30_vm0, %v665_v61  ;;  %v905_v1 = vsel %vm873_vm5, %v817_v51, %v889_v58  ;;  %vm871_vm7 = vcmp.ge.f32.partialorder %v809_v59, 0.0  ;;  %v887_v2 = vmul.f32 0.2, %v809_v59  ;;  %v820_v3 = vadd.f32 %v10224_v0, %v11407_v47  ;;  %v10242_v4 = vpop.f32.mrf.mxu1 }
  0xec   :  { %922 = vst.msk [vmem:[#allocation2 + $0x150] sm:$0xff] %vm30_vm0, %v905_v1  ;;  %v1156_v5 = vsel %vm1124_vm6, %v1068_v55, %v1140_v62  ;;  %vm1122_vm8 = vcmp.ge.f32.partialorder %v1060_v63, 0.0  ;;  %v1138_v6 = vmul.f32 0.2, %v1060_v63  ;;  %v1071_v7 = vadd.f32 %v10242_v4, %v11407_v47  ;;  %v811_v8 = vpop.f32.mrf.mxu0 }
  0xed   :  { %1173 = vst.msk [vmem:[#allocation2 + $0x31] sm:$0xff] %vm30_vm0, %v1156_v5  ;;  %v903_v9 = vsel %vm871_vm7, %v809_v59, %v887_v2  ;;  %vm874_vm9 = vcmp.ge.f32.partialorder %v820_v3, 0.0  ;;  %v890_v10 = vmul.f32 0.2, %v820_v3  ;;  %v812_v11 = vadd.f32 %v11407_v47, %v811_v8  ;;  %v1062_v12 = vpop.f32.mrf.mxu1  ;;  %v1187_v2 = vld [vmem:[#allocation2] sm:$0xff] }
  0xee   :  { %920 = vst.msk [vmem:[#allocation2 + $0x130] sm:$0xff] %vm30_vm0, %v903_v9  ;;  %v1154_v13 = vsel %vm1122_vm8, %v1060_v63, %v1138_v6  ;;  %vm1125_vm10 = vcmp.ge.f32.partialorder %v1071_v7, 0.0  ;;  %v1141_v14 = vmul.f32 0.2, %v1071_v7  ;;  %v1063_v15 = vadd.f32 %v11407_v47, %v1062_v12  ;;  %v10227_v16 = vpop.f32.mrf.mxu0 }
  0xef   :  { %1171 = vst.msk [vmem:[#allocation2 + $0x11] sm:$0xff] %vm30_vm0, %v1154_v13  ;;  %v906_v17 = vsel %vm874_vm9, %v820_v3, %v890_v10  ;;  %vm872_vm11 = vcmp.ge.f32.partialorder %v812_v11, 0.0  ;;  %v888_v18 = vmul.f32 0.2, %v812_v11  ;;  %v833_v19 = vadd.f32 %v10227_v16, %v11407_v47  ;;  %v10245_v20 = vpop.f32.mrf.mxu1 }
  0xf0   :  { %923 = vst.msk [vmem:[#allocation2 + $0x160] sm:$0xff] %vm30_vm0, %v906_v17  ;;  %v1157_v21 = vsel %vm1125_vm10, %v1071_v7, %v1141_v14  ;;  %vm1123_vm12 = vcmp.ge.f32.partialorder %v1063_v15, 0.0  ;;  %v1139_v22 = vmul.f32 0.2, %v1063_v15  ;;  %v1084_v23 = vadd.f32 %v10245_v20, %v11407_v47  ;;  %v824_v24 = vpop.f32.mrf.mxu0 }
  0xf1   :  { %1174 = vst.msk [vmem:[#allocation2 + $0x41] sm:$0xff] %vm30_vm0, %v1157_v21  ;;  %v904_v25 = vsel %vm872_vm11, %v812_v11, %v888_v18  ;;  %vm877_vm13 = vcmp.ge.f32.partialorder %v833_v19, 0.0  ;;  %v893_v26 = vmul.f32 0.2, %v833_v19  ;;  %v825_v27 = vadd.f32 %v11407_v47, %v824_v24  ;;  %v1075_v28 = vpop.f32.mrf.mxu1 }
  0xf2   :  { %921 = vst.msk [vmem:[#allocation2 + $0x140] sm:$0xff] %vm30_vm0, %v904_v25  ;;  %v1155_v29 = vsel %vm1123_vm12, %v1063_v15, %v1139_v22  ;;  %vm1128_vm14 = vcmp.ge.f32.partialorder %v1084_v23, 0.0  ;;  %v1144_v30 = vmul.f32 0.2, %v1084_v23  ;;  %v1076_v31 = vadd.f32 %v11407_v47, %v1075_v28  ;;  %v10228_v32 = vpop.f32.mrf.mxu0 }
  0xf3   :  { %1172 = vst.msk [vmem:[#allocation2 + $0x21] sm:$0xff] %vm30_vm0, %v1155_v29  ;;  %v909_v33 = vsel %vm877_vm13, %v833_v19, %v893_v26  ;;  %vm875_vm15 = vcmp.ge.f32.partialorder %v825_v27, 0.0  ;;  %v891_v34 = vmul.f32 0.2, %v825_v27  ;;  %v836_v35 = vadd.f32 %v10228_v32, %v11407_v47  ;;  %v10246_v36 = vpop.f32.mrf.mxu1 }
  0xf4   :  { %926 = vst.msk [vmem:[#allocation2 + $0x190] sm:$0xff] %vm30_vm0, %v909_v33  ;;  %v1160_v37 = vsel %vm1128_vm14, %v1084_v23, %v1144_v30  ;;  %vm1126_vm1 = vcmp.ge.f32.partialorder %v1076_v31, 0.0  ;;  %v1142_v38 = vmul.f32 0.2, %v1076_v31  ;;  %v1087_v39 = vadd.f32 %v10246_v36, %v11407_v47  ;;  %v827_v40 = vpop.f32.mrf.mxu0  ;;  %v11525_v23 = vld [vmem:[#allocation2 + $0x150] sm:$0xff] }
  0xf5   :  { %1177 = vst.msk [vmem:[#allocation2 + $0x71] sm:$0xff] %vm30_vm0, %v1160_v37  ;;  %v907_v41 = vsel %vm875_vm15, %v825_v27, %v891_v34  ;;  %vm878_vm2 = vcmp.ge.f32.partialorder %v836_v35, 0.0  ;;  %v894_v42 = vmul.f32 0.2, %v836_v35  ;;  %v828_v43 = vadd.f32 %v11407_v47, %v827_v40  ;;  %v1078_v44 = vpop.f32.mrf.mxu1  ;;  %v11504_v61 = vld [vmem:[#allocation2 + $0x130] sm:$0xff]  ;;  %15882 = vst [vmem:[#allocation8_spill] sm:$0xff] %v11525_v23 }
  0xf6   :  { %924 = vst.msk [vmem:[#allocation2 + $0x170] sm:$0xff] %vm30_vm0, %v907_v41  ;;  %v1158_v48 = vsel %vm1126_vm1, %v1076_v31, %v1142_v38  ;;  %vm1129_vm3 = vcmp.ge.f32.partialorder %v1087_v39, 0.0  ;;  %v1145_v49 = vmul.f32 0.2, %v1087_v39  ;;  %v1079_v50 = vadd.f32 %v11407_v47, %v1078_v44  ;;  %v10231_v51 = vpop.f32.mrf.mxu0  ;;  %15878 = vst [vmem:[#allocation4_spill] sm:$0xff] %v11504_v61  ;;  %v11508_v3 = vld [vmem:[#allocation2 + $0x10] sm:$0xff] }
  0xf7   :  { %1175 = vst.msk [vmem:[#allocation2 + $0x51] sm:$0xff] %vm30_vm0, %v1158_v48  ;;  %v910_v52 = vsel %vm878_vm2, %v836_v35, %v894_v42  ;;  %vm876_vm4 = vcmp.ge.f32.partialorder %v828_v43, 0.0  ;;  %v892_v53 = vmul.f32 0.2, %v828_v43  ;;  %v849_v54 = vadd.f32 %v10231_v51, %v11407_v47  ;;  %v10249_v55 = vpop.f32.mrf.mxu1  ;;  %15879 = vst [vmem:[#allocation5_spill] sm:$0xff] %v11508_v3  ;;  %v11527_v24 = vld [vmem:[#allocation2 + $0x30] sm:$0xff] }
  0xf8   :  { %927 = vst.msk [vmem:[#allocation2 + $0x1a0] sm:$0xff] %vm30_vm0, %v910_v52  ;;  %v1161_v56 = vsel %vm1129_vm3, %v1087_v39, %v1145_v49  ;;  %vm1127_vm5 = vcmp.ge.f32.partialorder %v1079_v50, 0.0  ;;  %v1143_v57 = vmul.f32 0.2, %v1079_v50  ;;  %v1100_v58 = vadd.f32 %v10249_v55, %v11407_v47  ;;  %v840_v59 = vpop.f32.mrf.mxu0  ;;  %15883 = vst [vmem:[#allocation9_spill] sm:$0xff] %v11527_v24  ;;  %v10688_v30 = vld [vmem:[%s15664_s3 + $0x50] sm:$0xff]  }
  0xf9   :  { %1178 = vst.msk [vmem:[#allocation2 + $0x81] sm:$0xff] %vm30_vm0, %v1161_v56  ;;  %v908_v62 = vsel %vm876_vm4, %v828_v43, %v892_v53  ;;  %vm881_vm6 = vcmp.ge.f32.partialorder %v849_v54, 0.0  ;;  %v897_v63 = vmul.f32 0.2, %v849_v54  ;;  %v841_v0 = vadd.f32 %v11407_v47, %v840_v59  ;;  %v1091_v1 = vpop.f32.mrf.mxu1  ;;  %v11514_v12 = vld [vmem:[#allocation2 + $0x140] sm:$0xff]  ;;  %v10689_v31 = vld [vmem:[%s15664_s3 + $0x70] sm:$0xff]  }
  0xfa   :  { %925 = vst.msk [vmem:[#allocation2 + $0x180] sm:$0xff] %vm30_vm0, %v908_v62  ;;  %v1159_v4 = vsel %vm1127_vm5, %v1079_v50, %v1143_v57  ;;  %vm1132_vm7 = vcmp.ge.f32.partialorder %v1100_v58, 0.0  ;;  %v1148_v5 = vmul.f32 0.2, %v1100_v58  ;;  %v1092_v6 = vadd.f32 %v11407_v47, %v1091_v1  ;;  %v10232_v7 = vpop.f32.mrf.mxu0  ;;  %15880 = vst [vmem:[#allocation6_spill] sm:$0xff] %v11514_v12  ;;  %v11516_v13 = vld [vmem:[#allocation2 + $0x20] sm:$0xff] }
  0xfb   :  { %1176 = vst.msk [vmem:[#allocation2 + $0x61] sm:$0xff] %vm30_vm0, %v1159_v4  ;;  %v913_v8 = vsel %vm881_vm6, %v849_v54, %v897_v63  ;;  %vm879_vm8 = vcmp.ge.f32.partialorder %v841_v0, 0.0  ;;  %v895_v9 = vmul.f32 0.2, %v841_v0  ;;  %v1236_v10 = vpack.c.bf16 %v11504_v61, %v1220_v60  ;;  %v10250_v11 = vpop.f32.mrf.mxu1  ;;  %15881 = vst [vmem:[#allocation7_spill] sm:$0xff] %v11516_v13  ;;  %v11553_v50 = vld [vmem:[#allocation2 + $0x160] sm:$0xff] }
  0xfc   :  { %930 = vst.msk [vmem:[#allocation2 + $0x1e0] sm:$0xff] %vm30_vm0, %v913_v8  ;;  %v1164_v14 = vsel %vm1132_vm7, %v1100_v58, %v1148_v5  ;;  %vm1130_vm9 = vcmp.ge.f32.partialorder %v1092_v6, 0.0  ;;  %v1146_v15 = vmul.f32 0.2, %v1092_v6  ;;  %v1203_v16 = vpack.c.bf16 %v11508_v3, %v1187_v2  ;;  %v843_v17 = vpop.f32.mrf.mxu0  ;;  %15884 = vst [vmem:[#allocation10_spill] sm:$0xff] %v11553_v50  ;;  %v11557_v51 = vld [vmem:[#allocation2 + $0x40] sm:$0xff] }
  0xfd   :  { %1181 = vst.msk [vmem:[#allocation2 + $0xc1] sm:$0xff] %vm30_vm0, %v1164_v14  ;;  %v911_v18 = vsel %vm879_vm8, %v841_v0, %v895_v9  ;;  %10263 = vmatprep.mubr.msk.bf16.mxu0 %vm30_vm0, %v1236_v10  ;;  %v852_v19 = vadd.f32 %v10232_v7, %v11407_v47  ;;  %v1103_v20 = vadd.f32 %v10250_v11, %v11407_v47  ;;  %v1094_v22 = vpop.f32.mrf.mxu1  ;;  %15886 = vst [vmem:[#allocation12_spill] sm:$0xff] %v11557_v51  ;;  %v10690_v55 = vld [vmem:[%s15664_s3 + $0x48] sm:$0xff]   ;;  %v11581_v9 = vld [vmem:[#allocation2 + $0x190] sm:$0xff] }
  0xfe   :  { %v844_v21 = vadd.f32 %v11407_v47, %v843_v17  ;;  %928 = vst.msk [vmem:[#allocation2 + $0x1c0] sm:$0xff] %vm30_vm0, %v911_v18  ;;  %v1162_v25 = vsel %vm1130_vm9, %v1092_v6, %v1146_v15  ;;  %10287 = vmatprep.mubr.msk.bf16.mxu1 %vm30_vm0, %v1203_v16  ;;  %v1095_v26 = vadd.f32 %v11407_v47, %v1094_v22  ;;  %v10235_v29 = vpop.f32.mrf.mxu0  ;;  %v11559_v52 = vld [vmem:[#allocation2 + $0x50] sm:$0xff]  ;;  %15889 = vst [vmem:[#allocation15_spill] sm:$0xff] %v11581_v9  ;;  %v11924_v61 = vld [vmem:[#allocation2 + $0x321] sm:$0xff] }
  0xff   :  { %v1237_v27 = vpack.c.bf16 %v11525_v23, %v11514_v12  ;;  %v1204_v28 = vpack.c.bf16 %v11527_v24, %v11516_v13  ;;  %1179 = vst.msk [vmem:[#allocation2 + $0xa1] sm:$0xff] %vm30_vm0, %v1162_v25  ;;  %vm882_vm10 = vcmp.ge.f32.partialorder %v852_v19, 0.0  ;;  %v898_v32 = vmul.f32 0.2, %v852_v19  ;;  %v10253_v34 = vpop.f32.mrf.mxu1  ;;  %15887 = vst [vmem:[#allocation13_spill] sm:$0xff] %v11559_v52  ;;  %v1228_v10 = vld [vmem:[#allocation2 + $0x1b0] sm:$0xff] }
 0x100   :  { %vm1133_vm11 = vcmp.ge.f32.partialorder %v1103_v20, 0.0  ;;  %v1149_v33 = vmul.f32 0.2, %v1103_v20  ;;  %vm880_vm12 = vcmp.ge.f32.partialorder %v844_v21, 0.0  ;;  %v896_v35 = vmul.f32 0.2, %v844_v21  ;;  %v856_v37 = vpop.f32.mrf.mxu0 }
 0x101   :  { %vm1131_vm13 = vcmp.ge.f32.partialorder %v1095_v26, 0.0  ;;  %v1147_v36 = vmul.f32 0.2, %v1095_v26  ;;  %10264 = vmatmul.mubr.msk.bf16.vlgmr.msra.gmra.mxu0 %vm30_vm0, %v1237_v27  ;;  %10288 = vmatmul.mubr.msk.bf16.vlgmr.msra.gmra.mxu1 %vm30_vm0, %v1204_v28  ;;  %v914_v38 = vsel %vm882_vm10, %v852_v19, %v898_v32  ;;  %v865_v40 = vadd.f32 %v10235_v29, %v11407_v47  ;;  %v1107_v42 = vpop.f32.mrf.mxu1  ;;  %v11561_v54 = vld [vmem:[#allocation2 + $0x180] sm:$0xff]  ;;  %v1195_v11 = vld [vmem:[#allocation2 + $0x90] sm:$0xff]  ;;  %15939 = vst [vmem:[#allocation65_spill] sm:$0xff] %v11924_v61 }
 0x102   :  { %v1165_v39 = vsel %vm1133_vm11, %v1103_v20, %v1149_v33  ;;  %10304 = vmatpush3.bf16.msra.mxu0 %v11395_v45  ;;  %v1116_v41 = vadd.f32 %v10253_v34, %v11407_v47  ;;  %931 = vst.msk [vmem:[#allocation2 + $0x1f0] sm:$0xff] %vm30_vm0, %v914_v38  ;;  %v912_v43 = vsel %vm880_vm12, %v844_v21, %v896_v35  ;;  %v11555_v45 = vld [vmem:[#allocation2 + $0x170] sm:$0xff]  ;;  %v10236_v53 = vpop.f32.mrf.mxu0  ;;  %15888 = vst [vmem:[#allocation14_spill] sm:$0xff] %v11561_v54  ;;  %v11591_v17 = vld [vmem:[#allocation2 + $0x60] sm:$0xff] }
 0x103   :  { %1182 = vst.msk [vmem:[#allocation2 + $0xd1] sm:$0xff] %vm30_vm0, %v1165_v39  ;;  %v1163_v44 = vsel %vm1131_vm13, %v1095_v26, %v1147_v36  ;;  %10328 = vmatpush3.bf16.msra.mxu1 %v11401_v46  ;;  %v857_v48 = vadd.f32 %v11407_v47, %v856_v37  ;;  %v1108_v49 = vadd.f32 %v11407_v47, %v1107_v42  ;;  %15885 = vst [vmem:[#allocation11_spill] sm:$0xff] %v11555_v45  ;;  %v11569_v46 = vld [vmem:[%s15664_s3 + $0x68] sm:$0xff]   ;;  %v10254_v58 = vpop.f32.mrf.mxu1  ;;  %v11593_v18 = vld [vmem:[#allocation2 + $0x70] sm:$0xff] }
 0x104   :  { %929 = vst.msk [vmem:[#allocation2 + $0x1d0] sm:$0xff] %vm30_vm0, %v912_v43  ;;  %1180 = vst.msk [vmem:[#allocation2 + $0xb1] sm:$0xff] %vm30_vm0, %v1163_v44  ;;  %vm885_vm14 = vcmp.ge.f32.partialorder %v865_v40, 0.0  ;;  %v901_v56 = vmul.f32 0.2, %v865_v40  ;;  %vm1136_vm15 = vcmp.ge.f32.partialorder %v1116_v41, 0.0  ;;  %10305 = vmatprep.subr.bf16.mxu0 %v10688_v30  ;;  %10329 = vmatprep.subr.bf16.mxu1 %v10689_v31  ;;  %v859_v62 = vpop.f32.mrf.mxu0  ;;  %v1238_v1 = vpack.c.bf16 %v11555_v45, %v11553_v50 }
 0x105   :  { %v1152_v57 = vmul.f32 0.2, %v1116_v41  ;;  %vm883_vm1 = vcmp.ge.f32.partialorder %v857_v48, 0.0  ;;  %v899_v59 = vmul.f32 0.2, %v857_v48  ;;  %vm1134_vm2 = vcmp.ge.f32.partialorder %v1108_v49, 0.0  ;;  %v1110_v4 = vpop.f32.mrf.mxu1 }
 0x106   :  { %v1150_v60 = vmul.f32 0.2, %v1108_v49  ;;  %v917_v63 = vsel %vm885_vm14, %v865_v40, %v901_v56  ;;  %v1205_v2 = vpack.c.bf16 %v11559_v52, %v11557_v51  ;;  %10306 = vmatpush3.bf16.msra.mxu0 %v10688_v30  ;;  %v868_v7 = vadd.f32 %v10236_v53, %v11407_v47  ;;  %10267 = vmatprep.mubr.msk.bf16.mxu0 %vm30_vm0, %v1238_v1  ;;  %v11595_v19 = vld [vmem:[#allocation2 + $0x1c0] sm:$0xff]  ;;  %v11619_v36 = vld [vmem:[%s15664_s3 + $0x98] sm:$0xff]   ;;  %v10699_v52 = vld [vmem:[%s15664_s3 + $0xa8] sm:$0xff]  }
 0x107   :  { %v1168_v0 = vsel %vm1136_vm15, %v1116_v41, %v1152_v57  ;;  %934 = vst.msk [vmem:[#allocation2 + $0x220] sm:$0xff] %vm30_vm0, %v917_v63  ;;  %v915_v5 = vsel %vm883_vm1, %v857_v48, %v899_v59  ;;  %v1119_v8 = vadd.f32 %v10254_v58, %v11407_v47  ;;  %10330 = vmatpush3.bf16.msra.mxu1 %v10689_v31  ;;  %15890 = vst [vmem:[#allocation16_spill] sm:$0xff] %v11591_v17  ;;  %v11597_v20 = vld [vmem:[#allocation2 + $0xa0] sm:$0xff]  ;;  %v11630_v38 = vld [vmem:[%s15664_s3 + $0xb8] sm:$0xff]  }
 0x108   :  { %1185 = vst.msk [vmem:[#allocation2 + $0x101] sm:$0xff] %vm30_vm0, %v1168_v0  ;;  %v1166_v6 = vsel %vm1134_vm2, %v1108_v49, %v1150_v60  ;;  %932 = vst.msk [vmem:[#allocation2 + $0x200] sm:$0xff] %vm30_vm0, %v915_v5  ;;  %10291 = vmatprep.mubr.msk.bf16.mxu1 %vm30_vm0, %v1205_v2  ;;  %v860_v14 = vadd.f32 %v11407_v47, %v859_v62  ;;  %v1111_v15 = vadd.f32 %v11407_v47, %v1110_v4  ;;  %v10692_v21 = vld [vmem:[%s15664_s3 + $0x40] sm:$0xff]   ;;  %v11667_v60 = vld [vmem:[#allocation2 + $0x11] sm:$0xff] }
 0x109   :  { %1183 = vst.msk [vmem:[#allocation2 + $0xe1] sm:$0xff] %vm30_vm0, %v1166_v6  ;;  %v1239_v16 = vpack.c.bf16 %v11581_v9, %v11561_v54  ;;  %15891 = vst [vmem:[#allocation17_spill] sm:$0xff] %v11593_v18  ;;  %vm886_vm3 = vcmp.ge.f32.partialorder %v868_v7, 0.0  ;;  %v902_v22 = vmul.f32 0.2, %v868_v7  ;;  %vm1137_vm4 = vcmp.ge.f32.partialorder %v1119_v8, 0.0  ;;  %10307 = vmatprep.subr.bf16.mxu0 %v10690_v55  ;;  %10331 = vmatprep.subr.bf16.mxu1 %v11569_v46 }
 0x10a   :  { %15892 = vst [vmem:[#allocation18_spill] sm:$0xff] %v11595_v19  ;;  %15893 = vst [vmem:[#allocation19_spill] sm:$0xff] %v11597_v20  ;;  %v1153_v25 = vmul.f32 0.2, %v1119_v8  ;;  %vm884_vm5 = vcmp.ge.f32.partialorder %v860_v14, 0.0  ;;  %vm1135_vm6 = vcmp.ge.f32.partialorder %v1111_v15, 0.0  ;;  %v1206_v29 = vpack.c.bf16 %v11593_v18, %v11591_v17  ;;  %10308 = vmatpush3.bf16.msra.mxu0 %v10690_v55 }
 0x10b   :  { %v900_v47 = vmul.f32 0.2, %v860_v14  ;;  %v1151_v26 = vmul.f32 0.2, %v1111_v15  ;;  %10268 = vmatmul.mubr.msk.bf16.gmra.mxu0 %vm30_vm0, %v1239_v16  ;;  %v918_v27 = vsel %vm886_vm3, %v868_v7, %v902_v22  ;;  %v1240_v30 = vpack.c.bf16 %v11595_v19, %v1228_v10  ;;  %v11607_v31 = vld [vmem:[#allocation2 + $0x1d0] sm:$0xff]  ;;  %v10693_v32 = vld [vmem:[%s15664_s3 + $0x60] sm:$0xff]   ;;  %10332 = vmatpush3.bf16.msra.mxu1 %v11569_v46 }
 0x10c   :  { %v1169_v28 = vsel %vm1137_vm4, %v1119_v8, %v1153_v25  ;;  %15894 = vst [vmem:[#allocation20_spill] sm:$0xff] %v11607_v31  ;;  %935 = vst.msk [vmem:[#allocation2 + $0x230] sm:$0xff] %vm30_vm0, %v918_v27  ;;  %v1207_v35 = vpack.c.bf16 %v11597_v20, %v1195_v11  ;;  %10292 = vmatmul.mubr.msk.bf16.gmra.mxu1 %vm30_vm0, %v1206_v29  ;;  %v11625_v37 = vld [vmem:[#allocation2 + $0x1e0] sm:$0xff]  ;;  %v11635_v40 = vld [vmem:[#allocation2 + $0xb0] sm:$0xff]  ;;  %10309 = vmatprep.subr.bf16.mxu0 %v10692_v21 }
 0x10d   :  { %1186 = vst.msk [vmem:[#allocation2 + $0x111] sm:$0xff] %vm30_vm0, %v1169_v28  ;;  %v916_v33 = vsel %vm884_vm5, %v860_v14, %v900_v47  ;;  %v1167_v34 = vsel %vm1135_vm6, %v1111_v15, %v1151_v26  ;;  %10271 = vmatprep.mubr.msk.bf16.mxu0 %vm30_vm0, %v1240_v30  ;;  %15895 = vst [vmem:[#allocation21_spill] sm:$0xff] %v11625_v37  ;;  %v1241_v39 = vpack.c.bf16 %v11625_v37, %v11607_v31  ;;  %v11637_v41 = vld [vmem:[#allocation2 + $0x1f0] sm:$0xff]  ;;  %v11643_v44 = vld [vmem:[#allocation2 + $0xc0] sm:$0xff] }
 0x10e   :  { %933 = vst.msk [vmem:[#allocation2 + $0x210] sm:$0xff] %vm30_vm0, %v916_v33  ;;  %1184 = vst.msk [vmem:[#allocation2 + $0xf1] sm:$0xff] %vm30_vm0, %v1167_v34  ;;  %10295 = vmatprep.mubr.msk.bf16.mxu1 %vm30_vm0, %v1207_v35  ;;  %10310 = vmatpush3.bf16.msra.mxu0 %v10692_v21  ;;  %v1208_v49 = vpack.c.bf16 %v11643_v44, %v11635_v40  ;;  %v11650_v53 = vld [vmem:[#allocation2 + $0xd0] sm:$0xff]  ;;  %v11660_v56 = vld [vmem:[#allocation2 + $0x220] sm:$0xff] }
 0x10f   :  { %15896 = vst [vmem:[#allocation22_spill] sm:$0xff] %v11635_v40  ;;  %15897 = vst [vmem:[#allocation23_spill] sm:$0xff] %v11637_v41  ;;  %v11639_v42 = vld [vmem:[#allocation2 + $0x200] sm:$0xff]  ;;  %10333 = vmatprep.subr.bf16.mxu1 %v10693_v32  ;;  %10351 = vmatprep.subr.bf16.mxu0 %v11619_v36  ;;  %v11674_v2 = vld [vmem:[#allocation2 + $0x131] sm:$0xff] }
 0x110   :  { %15898 = vst [vmem:[#allocation24_spill] sm:$0xff] %v11639_v42  ;;  %v11641_v43 = vld [vmem:[#allocation2 + $0xe0] sm:$0xff]  ;;  %15900 = vst [vmem:[#allocation26_spill] sm:$0xff] %v11643_v44  ;;  %v1242_v48 = vpack.c.bf16 %v11639_v42, %v11637_v41  ;;  %10334 = vmatpush3.bf16.msra.mxu1 %v10693_v32  ;;  %v11689_v11 = vld [vmem:[#allocation2 + $0x31] sm:$0xff] }
 0x111   :  { %15899 = vst [vmem:[#allocation25_spill] sm:$0xff] %v11641_v43  ;;  %15901 = vst [vmem:[#allocation27_spill] sm:$0xff] %v11650_v53  ;;  %10375 = vmatprep.subr.bf16.mxu1 %v11630_v38  ;;  %v1209_v55 = vpack.c.bf16 %v11641_v43, %v11650_v53  ;;  %v1543_v59 = vld [vmem:[#allocation2 + $0x1] sm:$0xff]  ;;  %v11702_v25 = vld [vmem:[#allocation2 + $0x151] sm:$0xff] }
 0x112   :  { %15903 = vst [vmem:[#allocation29_spill] sm:$0xff] %v11660_v56  ;;  %15905 = vst [vmem:[#allocation31_spill] sm:$0xff] %v11667_v60  ;;  %v11669_v62 = vld [vmem:[#allocation2 + $0x100] sm:$0xff]  ;;  %v1559_v0 = vpack.c.bf16 %v11667_v60, %v1543_v59  ;;  %v11704_v47 = vld [vmem:[#allocation2 + $0x51] sm:$0xff] }
 0x113   :  { %10272 = vmatmul.mubr.msk.bf16.gmra.mxu0 %vm30_vm0, %v1241_v39  ;;  %15906 = vst [vmem:[#allocation32_spill] sm:$0xff] %v11669_v62  ;;  %v1737_v1 = vld [vmem:[#allocation2 + $0x121] sm:$0xff]  ;;  %15907 = vst [vmem:[#allocation33_spill] sm:$0xff] %v11674_v2  ;;  %v11706_v26 = vld [vmem:[#allocation2 + $0x171] sm:$0xff] }
 0x114   :  { %10275 = vmatprep.mubr.msk.bf16.mxu0 %vm30_vm0, %v1242_v48  ;;  %10296 = vmatmul.mubr.msk.bf16.gmra.mxu1 %vm30_vm0, %v1208_v49  ;;  %v11678_v4 = vld [vmem:[#allocation2 + $0x161] sm:$0xff]  ;;  %v1753_v8 = vpack.c.bf16 %v11674_v2, %v1737_v1  ;;  %15910 = vst [vmem:[#allocation36_spill] sm:$0xff] %v11689_v11  ;;  %15913 = vst [vmem:[#allocation39_spill] sm:$0xff] %v11702_v25  ;;  %v11722_v33 = vld [vmem:[%s15664_s3 + $0x90] sm:$0xff]  }
 0x115   :  { %v11657_v46 = vld [vmem:[#allocation2 + $0x210] sm:$0xff]  ;;  %10299 = vmatprep.mubr.msk.bf16.mxu1 %vm30_vm0, %v1209_v55  ;;  %15908 = vst [vmem:[#allocation34_spill] sm:$0xff] %v11678_v4  ;;  %v11687_v10 = vld [vmem:[#allocation2 + $0x21] sm:$0xff]  ;;  %15914 = vst [vmem:[#allocation40_spill] sm:$0xff] %v11704_v47 }
 0x116   :  { %15902 = vst [vmem:[#allocation28_spill] sm:$0xff] %v11657_v46  ;;  %v1243_v57 = vpack.c.bf16 %v11660_v56, %v11657_v46  ;;  %v11665_v58 = vld [vmem:[#allocation2 + $0xf0] sm:$0xff]  ;;  %15909 = vst [vmem:[#allocation35_spill] sm:$0xff] %v11687_v10  ;;  %v11691_v14 = vld [vmem:[#allocation2 + $0x141] sm:$0xff]  ;;  %v1560_v22 = vpack.c.bf16 %v11689_v11, %v11687_v10 }
 0x117   :  { %15904 = vst [vmem:[#allocation30_spill] sm:$0xff] %v11665_v58  ;;  %v1210_v63 = vpack.c.bf16 %v11669_v62, %v11665_v58  ;;  %15911 = vst [vmem:[#allocation37_spill] sm:$0xff] %v11691_v14  ;;  %v11693_v15 = vld [vmem:[#allocation2 + $0x41] sm:$0xff]  ;;  %v11724_v34 = vld [vmem:[#allocation2 + $0xb1] sm:$0xff]  ;;  %v1754_v42 = vpack.c.bf16 %v11702_v25, %v11691_v14  ;;  %v1755_v25 = vpack.c.bf16 %v11706_v26, %v11678_v4 }
 0x118   :  { %15912 = vst [vmem:[#allocation38_spill] sm:$0xff] %v11693_v15  ;;  %15915 = vst [vmem:[#allocation41_spill] sm:$0xff] %v11706_v26  ;;  %v11708_v27 = vld [vmem:[#allocation2 + $0x61] sm:$0xff]  ;;  %v11726_v35 = vld [vmem:[#allocation2 + $0x1d1] sm:$0xff]  ;;  %v1561_v11 = vpack.c.bf16 %v11704_v47, %v11693_v15 }
 0x119   :  { %15916 = vst [vmem:[#allocation42_spill] sm:$0xff] %v11708_v27  ;;  %v11710_v28 = vld [vmem:[#allocation2 + $0x181] sm:$0xff]  ;;  %v11728_v39 = vld [vmem:[#allocation2 + $0xd1] sm:$0xff] }
 0x11a   :  { %15917 = vst [vmem:[#allocation43_spill] sm:$0xff] %v11710_v28  ;;  %v11730_v48 = vld [vmem:[#allocation2 + $0x250] sm:$0xff]  ;;  %v11750_v30 = vld [vmem:[#allocation2 + $0x3a0] sm:$0xff]  ;;  %v11809_v46 = vld [vmem:[%s15664_s3 + $0x88] sm:$0xff]  }
 0x11b   :  { %10276 = vmatmul.mubr.msk.bf16.gmra.mxu0 %vm30_vm0, %v1243_v57  ;;  %v11732_v49 = vld [vmem:[#allocation2 + $0x370] sm:$0xff]  ;;  %v11762_v16 = vld [vmem:[#allocation2 + $0xa1] sm:$0xff] }
 0x11c   :  { %10311 = vmatprep.mubr.msk.bf16.mxu0 %vm30_vm0, %v1559_v0  ;;  %10300 = vmatmul.mubr.msk.bf16.gmra.mxu1 %vm30_vm0, %v1210_v63  ;;  %v11740_v63 = vld [vmem:[#allocation2 + $0x1f1] sm:$0xff]  ;;  %15919 = vst [vmem:[#allocation45_spill] sm:$0xff] %v11762_v16  ;;  %v11764_v21 = vld [vmem:[#allocation2 + $0x1c1] sm:$0xff] }
 0x11d   :  { %10335 = vmatprep.mubr.msk.bf16.mxu1 %vm30_vm0, %v1753_v8  ;;  %v11742_v0 = vld [vmem:[#allocation2 + $0xf1] sm:$0xff]  ;;  %v11746_v8 = vld [vmem:[#allocation2 + $0x280] sm:$0xff] }
 0x11e   :  { %v11744_v1 = vld [vmem:[#allocation2 + $0x211] sm:$0xff]  ;;  %v11766_v7 = vld [vmem:[#allocation2 + $0xc1] sm:$0xff] }
 0x11f   :  { %v11748_v32 = vld [vmem:[#allocation2 + $0x290] sm:$0xff]  ;;  %v11768_v6 = vld [vmem:[#allocation2 + $0x260] sm:$0xff] }
 0x120   :  { %v11752_v29 = vld [vmem:[#allocation2 + $0x3b0] sm:$0xff]  ;;  %v11770_v5 = vld [vmem:[#allocation2 + $0x380] sm:$0xff] }
 0x121   :  { %15918 = vst [vmem:[#allocation44_spill] sm:$0xff] %v11752_v29  ;;  %v11783_v2 = vld [vmem:[%s15664_s3 + $0xb0] sm:$0xff]   ;;  %v11785_v60 = vld [vmem:[#allocation2 + $0x1e1] sm:$0xff] }
 0x122   :  { %v11787_v10 = vld [vmem:[#allocation2 + $0xe1] sm:$0xff]  ;;  %v11791_v55 = vld [vmem:[#allocation2 + $0x270] sm:$0xff] }
 0x123   :  { %v11789_v56 = vld [vmem:[#allocation2 + $0x201] sm:$0xff]  ;;  %v11793_v59 = vld [vmem:[#allocation2 + $0x390] sm:$0xff]  ;;  %10312 = vmatmul.mubr.msk.bf16.vlgmr.msra.gmra.mxu0 %vm30_vm0, %v1560_v22 }
 0x124   :  { %15920 = vst [vmem:[#allocation46_spill] sm:$0xff] %v11793_v59  ;;  %v11795_v62 = vld [vmem:[#allocation2 + $0x3c0] sm:$0xff]  ;;  %10315 = vmatprep.mubr.msk.bf16.mxu0 %vm30_vm0, %v1561_v11  ;;  %10352 = vmatpush3.bf16.msra.mxu0 %v11619_v36  ;;  %v11827_v14 = vld [vmem:[#allocation2 + $0x310] sm:$0xff] }
 0x125   :  { %v11811_v37 = vld [vmem:[#allocation2 + $0x2a0] sm:$0xff]  ;;  %15923 = vst [vmem:[#allocation49_spill] sm:$0xff] %v11827_v14  ;;  %v11831_v58 = vld [vmem:[#allocation2 + $0x430] sm:$0xff]  ;;  %10353 = vmatprep.subr.bf16.mxu0 %v11722_v33  ;;  %10336 = vmatmul.mubr.msk.bf16.vlgmr.msra.gmra.mxu1 %vm30_vm0, %v1754_v42 }
 0x126   :  { %v11813_v41 = vld [vmem:[#allocation2 + $0x2e0] sm:$0xff]  ;;  %15925 = vst [vmem:[#allocation51_spill] sm:$0xff] %v11831_v58  ;;  %v11833_v47 = vld [vmem:[#allocation2 + $0x251] sm:$0xff]  ;;  %10339 = vmatprep.mubr.msk.bf16.mxu1 %vm30_vm0, %v1755_v25  ;;  %10376 = vmatpush3.bf16.msra.mxu1 %v11630_v38 }
 0x127   :  { %15921 = vst [vmem:[#allocation47_spill] sm:$0xff] %v11813_v41  ;;  %v11815_v57 = vld [vmem:[#allocation2 + $0x400] sm:$0xff]  ;;  %v11835_v44 = vld [vmem:[#allocation2 + $0x371] sm:$0xff]  ;;  %10377 = vmatprep.subr.bf16.mxu1 %v11783_v2 }
 0x128   :  { %15922 = vst [vmem:[#allocation48_spill] sm:$0xff] %v11815_v57  ;;  %v11829_v43 = vld [vmem:[#allocation2 + $0x320] sm:$0xff]  ;;  %v11846_v26 = vld [vmem:[#allocation2 + $0x91] sm:$0xff]  ;;  %10354 = vmatpush3.bf16.msra.mxu0 %v11722_v33 }
 0x129   :  { %15924 = vst [vmem:[#allocation50_spill] sm:$0xff] %v11829_v43  ;;  %v11837_v22 = vld [vmem:[#allocation2 + $0x281] sm:$0xff]  ;;  %v11848_v4 = vld [vmem:[#allocation2 + $0x2f0] sm:$0xff]  ;;  %10355 = vmatprep.subr.bf16.mxu0 %v11809_v46 }
 0x12a   :  { %v11839_v15 = vld [vmem:[#allocation2 + $0x3a1] sm:$0xff]  ;;  %15927 = vst [vmem:[#allocation53_spill] sm:$0xff] %v11848_v4  ;;  %v11850_v53 = vld [vmem:[#allocation2 + $0x410] sm:$0xff]  ;;  %10378 = vmatpush3.bf16.msra.mxu1 %v11783_v2 }
 0x12b   :  { %15926 = vst [vmem:[#allocation52_spill] sm:$0xff] %v11839_v15  ;;  %15928 = vst [vmem:[#allocation54_spill] sm:$0xff] %v11850_v53  ;;  %v11852_v19 = vld [vmem:[#allocation2 + $0x440] sm:$0xff]  ;;  %v11854_v31 = vld [vmem:[#allocation2 + $0x291] sm:$0xff]  ;;  %10379 = vmatprep.subr.bf16.mxu1 %v10699_v52 }
 0x12c   :  { %15929 = vst [vmem:[#allocation55_spill] sm:$0xff] %v11852_v19  ;;  %v11856_v20 = vld [vmem:[#allocation2 + $0x3b1] sm:$0xff]  ;;  %v11867_v18 = vld [vmem:[#allocation2 + $0x300] sm:$0xff]  ;;  %v1563_v19 = vpack.c.bf16 %v11762_v16, %v11846_v26  ;;  %10356 = vmatpush3.bf16.msra.mxu0 %v11809_v46  ;;  %v1948_v16 = vpack.c.bf16 %v11791_v55, %v11768_v6 }
 0x12d   :  { %15930 = vst [vmem:[#allocation56_spill] sm:$0xff] %v11856_v20  ;;  %15931 = vst [vmem:[#allocation57_spill] sm:$0xff] %v11867_v18  ;;  %v11869_v45 = vld [vmem:[#allocation2 + $0x420] sm:$0xff]  ;;  %v11871_v54 = vld [vmem:[#allocation2 + $0x330] sm:$0xff] }
 0x12e   :  { %15932 = vst [vmem:[#allocation58_spill] sm:$0xff] %v11869_v45  ;;  %15933 = vst [vmem:[#allocation59_spill] sm:$0xff] %v11871_v54  ;;  %v11873_v23 = vld [vmem:[#allocation2 + $0x261] sm:$0xff]  ;;  %v11875_v11 = vld [vmem:[#allocation2 + $0x271] sm:$0xff]  ;;  %10380 = vmatpush3.bf16.msra.mxu1 %v10699_v52  ;;  %v1759_v52 = vpack.c.bf16 %v11789_v56, %v11740_v63 }
 0x12f   :  { %v11877_v50 = vld [vmem:[#allocation2 + $0x381] sm:$0xff]  ;;  %v11879_v36 = vld [vmem:[#allocation2 + $0x391] sm:$0xff] }
 0x130   :  { %15934 = vst [vmem:[#allocation60_spill] sm:$0xff] %v11879_v36  ;;  %v11887_v9 = vld [vmem:[#allocation2 + $0x71] sm:$0xff]  ;;  %v10700_v17 = vld [vmem:[%s15664_s3 + $0x80] sm:$0xff]  }
 0x131   :  { %15935 = vst [vmem:[#allocation61_spill] sm:$0xff] %v11887_v9  ;;  %v11895_v24 = vld [vmem:[#allocation2 + $0x450] sm:$0xff]  ;;  %v11897_v40 = vld [vmem:[#allocation2 + $0x2a1] sm:$0xff]  ;;  %v1562_v12 = vpack.c.bf16 %v11887_v9, %v11708_v27  ;;  %10357 = vmatprep.subr.bf16.mxu0 %v10700_v17  ;;  %v10703_v46 = vld [vmem:[%s15664_s3 + $0xf8] sm:$0xff]  }
 0x132   :  { %15936 = vst [vmem:[#allocation62_spill] sm:$0xff] %v11895_v24  ;;  %v11899_v51 = vld [vmem:[#allocation2 + $0x3c1] sm:$0xff]  ;;  %v1745_v3 = vld [vmem:[#allocation2 + $0x1b1] sm:$0xff]  ;;  %10358 = vmatpush3.bf16.msra.mxu0 %v10700_v17 }
 0x133   :  { %v11901_v42 = vld [vmem:[#allocation2 + $0x401] sm:$0xff]  ;;  %v11915_v53 = vld [vmem:[#allocation2 + $0x311] sm:$0xff]  ;;  %10316 = vmatmul.mubr.msk.bf16.gmra.mxu0 %vm30_vm0, %v1562_v12  ;;  %v1757_v54 = vpack.c.bf16 %v11764_v21, %v1745_v3  ;;  %v1564_v3 = vpack.c.bf16 %v11766_v7, %v11724_v34 }
 0x134   :  { %v11913_v13 = vld [vmem:[#allocation2 + $0x2e1] sm:$0xff]  ;;  %v11917_v4 = vld [vmem:[#allocation2 + $0x431] sm:$0xff]  ;;  %10319 = vmatprep.mubr.msk.bf16.mxu0 %vm30_vm0, %v1563_v19 }
 0x135   :  { %15937 = vst [vmem:[#allocation63_spill] sm:$0xff] %v11917_v4  ;;  %v11921_v38 = vld [vmem:[#allocation2 + $0x191] sm:$0xff]  ;;  %v11926_v9 = vld [vmem:[#allocation2 + $0x441] sm:$0xff] }
 0x136   :  { %15938 = vst [vmem:[#allocation64_spill] sm:$0xff] %v11921_v38  ;;  %15940 = vst [vmem:[#allocation66_spill] sm:$0xff] %v11926_v9  ;;  %v1756_v24 = vpack.c.bf16 %v11921_v38, %v11710_v28  ;;  %v11940_v58 = vld [vmem:[#allocation2 + $0x2f1] sm:$0xff]  ;;  %v11942_v45 = vld [vmem:[#allocation2 + $0x301] sm:$0xff]  ;;  %v1565_v28 = vpack.c.bf16 %v11787_v10, %v11728_v39 }
 0x137   :  { %v11944_v33 = vld [vmem:[#allocation2 + $0x411] sm:$0xff]  ;;  %v11952_v25 = vld [vmem:[#allocation2 + $0x421] sm:$0xff] }
 0x138   :  { %15941 = vst [vmem:[#allocation67_spill] sm:$0xff] %v11952_v25  ;;  %v11954_v38 = vld [vmem:[#allocation2 + $0x331] sm:$0xff]  ;;  %v10701_v12 = vld [vmem:[%s15664_s3 + $0xa0] sm:$0xff]   ;;  %10340 = vmatmul.mubr.msk.bf16.gmra.mxu1 %vm30_vm0, %v1756_v24  ;;  %v1758_v24 = vpack.c.bf16 %v11785_v60, %v11726_v35 }
 0x139   :  { %15942 = vst [vmem:[#allocation68_spill] sm:$0xff] %v11954_v38  ;;  %v11956_v26 = vld [vmem:[#allocation2 + $0x451] sm:$0xff]  ;;  %10343 = vmatprep.mubr.msk.bf16.mxu1 %vm30_vm0, %v1757_v54  ;;  %10381 = vmatprep.subr.bf16.mxu1 %v10701_v12  ;;  %v11996_v54 = vld [vmem:[#allocation2 + $0x101] sm:$0xff] }
 0x13a   :  { %15943 = vst [vmem:[#allocation69_spill] sm:$0xff] %v11956_v26  ;;  %v10702_v19 = vld [vmem:[%s15664_s3 + $0xd8] sm:$0xff]   ;;  %10382 = vmatpush3.bf16.msra.mxu1 %v10701_v12  ;;  %v1566_v17 = vpack.c.bf16 %v11996_v54, %v11742_v0  ;;  %v12002_v2 = vld [vmem:[#allocation2 + $0x221] sm:$0xff]  ;;  %v12038_v27 = vld [vmem:[#allocation2 + $0x3d0] sm:$0xff] }
 0x13b   :  { %10399 = vmatprep.subr.bf16.mxu0 %v10702_v19  ;;  %10320 = vmatmul.mubr.msk.bf16.gmra.mxu0 %vm30_vm0, %v1564_v3  ;;  %v1931_v3 = vld [vmem:[#allocation2 + $0x240] sm:$0xff] }
 0x13c   :  { %10323 = vmatprep.mubr.msk.bf16.mxu0 %vm30_vm0, %v1565_v28  ;;  %10423 = vmatprep.subr.bf16.mxu1 %v10703_v46  ;;  %v1947_v12 = vpack.c.bf16 %v11730_v48, %v1931_v3  ;;  %v1760_v28 = vpack.c.bf16 %v12002_v2, %v11744_v1  ;;  %v1949_v3 = vpack.c.bf16 %v11748_v32, %v11746_v8 }
 0x140   :  { %10344 = vmatmul.mubr.msk.bf16.gmra.mxu1 %vm30_vm0, %v1758_v24  ;;  %v2125_v24 = vld [vmem:[#allocation2 + $0x360] sm:$0xff] }
 0x141   :  { %10347 = vmatprep.mubr.msk.bf16.mxu1 %vm30_vm0, %v1759_v52  ;;  %v2141_v52 = vpack.c.bf16 %v11732_v49, %v2125_v24  ;;  %v2143_v24 = vpack.c.bf16 %v11752_v29, %v11750_v30  ;;  %v1939_v29 = vld [vmem:[#allocation2 + $0x2d0] sm:$0xff] }
 0x143   :  { %10324 = vmatmul.mubr.msk.bf16.gmra.mxu0 %vm30_vm0, %v1566_v17  ;;  %v10704_v17 = vld [vmem:[%s15664_s3 + $0xd0] sm:$0xff]  }
 0x144   :  { %10359 = vmatprep.mubr.msk.bf16.mxu0 %vm30_vm0, %v1947_v12  ;;  %v2142_v12 = vpack.c.bf16 %v11793_v59, %v11770_v5 }
 0x148   :  { %10348 = vmatmul.mubr.msk.bf16.gmra.mxu1 %vm30_vm0, %v1760_v28  ;;  %v10705_v28 = vld [vmem:[%s15664_s3 + $0xf0] sm:$0xff]  }
 0x149   :  { %10383 = vmatprep.mubr.msk.bf16.mxu1 %vm30_vm0, %v2141_v52  ;;  %v10706_v52 = vld [vmem:[%s15664_s3 + $0xc8] sm:$0xff]  }
 0x14b   :  { %10360 = vmatmul.mubr.msk.bf16.vlgmr.msra.gmra.mxu0 %vm30_vm0, %v1948_v16  ;;  %v12030_v16 = vld [vmem:[#allocation2 + $0x2b0] sm:$0xff] }
 0x14c   :  { %10363 = vmatprep.mubr.msk.bf16.mxu0 %vm30_vm0, %v1949_v3  ;;  %10400 = vmatpush3.bf16.msra.mxu0 %v10702_v19  ;;  %15944 = vst [vmem:[#allocation70_spill] sm:$0xff] %v12030_v16  ;;  %v10707_v19 = vld [vmem:[%s15664_s3 + $0xe8] sm:$0xff]   ;;  %v1950_v3 = vpack.c.bf16 %v12030_v16, %v11811_v37  ;;  %v10709_v16 = vld [vmem:[%s15664_s3 + $0xe0] sm:$0xff]  }
 0x14d   :  { %10401 = vmatprep.subr.bf16.mxu0 %v10704_v17 }
 0x150   :  { %10384 = vmatmul.mubr.msk.bf16.vlgmr.msra.gmra.mxu1 %vm30_vm0, %v2142_v12  ;;  %10402 = vmatpush3.bf16.msra.mxu0 %v10704_v17  ;;  %v10708_v12 = vld [vmem:[%s15664_s3 + $0xc0] sm:$0xff]   ;;  %v2133_v17 = vld [vmem:[#allocation2 + $0x3f0] sm:$0xff] }
 0x151   :  { %10387 = vmatprep.mubr.msk.bf16.mxu1 %vm30_vm0, %v2143_v24  ;;  %10424 = vmatpush3.bf16.msra.mxu1 %v10703_v46  ;;  %v1951_v24 = vpack.c.bf16 %v11813_v41, %v1939_v29  ;;  %v2144_v46 = vpack.c.bf16 %v12038_v27, %v11795_v62  ;;  %v2145_v59 = vpack.c.bf16 %v11815_v57, %v2133_v17  ;;  %v10710_v29 = vld [vmem:[%s15664_s3 + $0x118] sm:$0xff]   ;;  %v15947_v17 = vld [vmem:[#allocation58_spill] sm:$0xff]  ;;  %v12071_v41 = vld [vmem:[#allocation2 + $0x340] sm:$0xff] }
 0x152   :  { %10425 = vmatprep.subr.bf16.mxu1 %v10705_v28  ;;  %10403 = vmatprep.subr.bf16.mxu0 %v10706_v52 }
 0x153   :  { %10364 = vmatmul.mubr.msk.bf16.gmra.mxu0 %vm30_vm0, %v1950_v3 }
 0x154   :  { %10367 = vmatprep.mubr.msk.bf16.mxu0 %vm30_vm0, %v1951_v24  ;;  %10404 = vmatpush3.bf16.msra.mxu0 %v10706_v52  ;;  %v15945_v52 = vld [vmem:[#allocation53_spill] sm:$0xff]  ;;  %v1953_v24 = vpack.c.bf16 %v11829_v43, %v11827_v14 }
 0x155   :  { %10426 = vmatpush3.bf16.msra.mxu1 %v10705_v28  ;;  %10405 = vmatprep.subr.bf16.mxu0 %v10708_v12  ;;  %v10711_v28 = vld [vmem:[%s15664_s3 + $0x138] sm:$0xff]   ;;  %v1952_v3 = vpack.c.bf16 %v11867_v18, %v15945_v52 }
 0x156   :  { %10427 = vmatprep.subr.bf16.mxu1 %v10707_v19  ;;  %v15950_v18 = vld [vmem:[#allocation59_spill] sm:$0xff] }
 0x157   :  { %v1954_v43 = vpack.c.bf16 %v12071_v41, %v15950_v18 }
 0x158   :  { %10388 = vmatmul.mubr.msk.bf16.gmra.mxu1 %vm30_vm0, %v2144_v46  ;;  %10406 = vmatpush3.bf16.msra.mxu0 %v10708_v12  ;;  %v15946_v46 = vld [vmem:[#allocation54_spill] sm:$0xff]  ;;  %v15949_v12 = vld [vmem:[#allocation55_spill] sm:$0xff] }
 0x159   :  { %10391 = vmatprep.mubr.msk.bf16.mxu1 %vm30_vm0, %v2145_v59  ;;  %10428 = vmatpush3.bf16.msra.mxu1 %v10707_v19  ;;  %v2146_v59 = vpack.c.bf16 %v15947_v17, %v15946_v46  ;;  %v15948_v19 = vld [vmem:[#allocation51_spill] sm:$0xff] }
 0x15a   :  { %10429 = vmatprep.subr.bf16.mxu1 %v10709_v16  ;;  %10447 = vmatprep.subr.bf16.mxu0 %v10710_v29  ;;  %v2147_v57 = vpack.c.bf16 %v15949_v12, %v15948_v19 }
 0x15b   :  { %10368 = vmatmul.mubr.msk.bf16.gmra.mxu0 %vm30_vm0, %v1952_v3  ;;  %v12076_v3 = vld [vmem:[#allocation2 + $0x460] sm:$0xff] }
 0x15c   :  { %10371 = vmatprep.mubr.msk.bf16.mxu0 %vm30_vm0, %v1953_v24  ;;  %v15951_v24 = vld [vmem:[#allocation62_spill] sm:$0xff] }
 0x15d   :  { %10430 = vmatpush3.bf16.msra.mxu1 %v10709_v16  ;;  %v2319_v16 = vld [vmem:[#allocation2 + $0x241] sm:$0xff]  ;;  %v2148_v14 = vpack.c.bf16 %v12076_v3, %v15951_v24 }
 0x15e   :  { %10471 = vmatprep.subr.bf16.mxu1 %v10711_v28  ;;  %v2335_v17 = vpack.c.bf16 %v11833_v47, %v2319_v16  ;;  %v10712_v16 = vld [vmem:[%s15664_s3 + $0x110] sm:$0xff]  }
 0x160   :  { %10392 = vmatmul.mubr.msk.bf16.gmra.mxu1 %vm30_vm0, %v2146_v59  ;;  %v2513_v59 = vld [vmem:[#allocation2 + $0x361] sm:$0xff] }
 0x161   :  { %10395 = vmatprep.mubr.msk.bf16.mxu1 %vm30_vm0, %v2147_v57  ;;  %v2529_v12 = vpack.c.bf16 %v11835_v44, %v2513_v59  ;;  %v2336_v57 = vpack.c.bf16 %v11875_v11, %v11873_v23  ;;  %v10714_v59 = vld [vmem:[%s15664_s3 + $0x108] sm:$0xff]  }
 0x163   :  { %10372 = vmatmul.mubr.msk.bf16.gmra.mxu0 %vm30_vm0, %v1954_v43  ;;  %v2337_v43 = vpack.c.bf16 %v11854_v31, %v11837_v22 }
 0x164   :  { %10407 = vmatprep.mubr.msk.bf16.mxu0 %vm30_vm0, %v2335_v17  ;;  %v2530_v17 = vpack.c.bf16 %v11879_v36, %v11877_v50  ;;  %v10715_v36 = vld [vmem:[%s15664_s3 + $0x128] sm:$0xff]  }
 0x168   :  { %10396 = vmatmul.mubr.msk.bf16.gmra.mxu1 %vm30_vm0, %v2148_v14  ;;  %v10713_v14 = vld [vmem:[%s15664_s3 + $0x130] sm:$0xff]  }
 0x169   :  { %10431 = vmatprep.mubr.msk.bf16.mxu1 %vm30_vm0, %v2529_v12  ;;  %v2531_v12 = vpack.c.bf16 %v11856_v20, %v11839_v15  ;;  %v2327_v20 = vld [vmem:[#allocation2 + $0x2d1] sm:$0xff] }
 0x16b   :  { %10408 = vmatmul.mubr.msk.bf16.vlgmr.msra.gmra.mxu0 %vm30_vm0, %v2336_v57  ;;  %v12106_v57 = vld [vmem:[#allocation2 + $0x2b1] sm:$0xff] }
 0x16c   :  { %10411 = vmatprep.mubr.msk.bf16.mxu0 %vm30_vm0, %v2337_v43  ;;  %10448 = vmatpush3.bf16.msra.mxu0 %v10710_v29  ;;  %15952 = vst [vmem:[#allocation53_spill] sm:$0xff] %v12106_v57  ;;  %v12109_v29 = vld [vmem:[#allocation2 + $0x3d1] sm:$0xff]  ;;  %v2338_v43 = vpack.c.bf16 %v12106_v57, %v11897_v40  ;;  %v10717_v57 = vld [vmem:[%s15664_s3 + $0x120] sm:$0xff]  }
 0x16d   :  { %10449 = vmatprep.subr.bf16.mxu0 %v10712_v16 }
 0x170   :  { %10432 = vmatmul.mubr.msk.bf16.vlgmr.msra.gmra.mxu1 %vm30_vm0, %v2530_v17  ;;  %10450 = vmatpush3.bf16.msra.mxu0 %v10712_v16  ;;  %v10716_v17 = vld [vmem:[%s15664_s3 + $0x100] sm:$0xff]   ;;  %v2521_v16 = vld [vmem:[#allocation2 + $0x3f1] sm:$0xff] }
 0x171   :  { %10435 = vmatprep.mubr.msk.bf16.mxu1 %vm30_vm0, %v2531_v12  ;;  %10472 = vmatpush3.bf16.msra.mxu1 %v10711_v28  ;;  %v2339_v12 = vpack.c.bf16 %v11913_v13, %v2327_v20  ;;  %v2532_v28 = vpack.c.bf16 %v12109_v29, %v11899_v51  ;;  %v2533_v15 = vpack.c.bf16 %v11901_v42, %v2521_v16  ;;  %v10718_v20 = vld [vmem:[%s15664_s3 + $0x158] sm:$0xff]  }
 0x172   :  { %10473 = vmatprep.subr.bf16.mxu1 %v10713_v14  ;;  %10451 = vmatprep.subr.bf16.mxu0 %v10714_v59  ;;  %v15955_v16 = vld [vmem:[#allocation7_spill] sm:$0xff] }
 0x173   :  { %10412 = vmatmul.mubr.msk.bf16.gmra.mxu0 %vm30_vm0, %v2338_v43  ;;  %v2341_v43 = vpack.c.bf16 %v11924_v61, %v11915_v53 }
 0x174   :  { %10415 = vmatprep.mubr.msk.bf16.mxu0 %vm30_vm0, %v2339_v12  ;;  %10452 = vmatpush3.bf16.msra.mxu0 %v10714_v59  ;;  %v2340_v59 = vpack.c.bf16 %v11942_v45, %v11940_v58 }
 0x175   :  { %10474 = vmatpush3.bf16.msra.mxu1 %v10713_v14  ;;  %10453 = vmatprep.subr.bf16.mxu0 %v10716_v17  ;;  %v10719_v14 = vld [vmem:[%s15664_s3 + $0x178] sm:$0xff]  }
 0x176   :  { %10475 = vmatprep.subr.bf16.mxu1 %v10715_v36 }
 0x178   :  { %10436 = vmatmul.mubr.msk.bf16.gmra.mxu1 %vm30_vm0, %v2532_v28  ;;  %10454 = vmatpush3.bf16.msra.mxu0 %v10716_v17  ;;  %v12147_v17 = vld [vmem:[#allocation2 + $0x341] sm:$0xff] }
 0x179   :  { %10439 = vmatprep.mubr.msk.bf16.mxu1 %vm30_vm0, %v2533_v15  ;;  %10476 = vmatpush3.bf16.msra.mxu1 %v10715_v36  ;;  %v2534_v15 = vpack.c.bf16 %v11952_v25, %v11944_v33  ;;  %v2535_v36 = vpack.c.bf16 %v11926_v9, %v11917_v4  ;;  %15953 = vst [vmem:[#allocation54_spill] sm:$0xff] %v12147_v17  ;;  %v12152_v28 = vld [vmem:[#allocation2 + $0x461] sm:$0xff] }
 0x17a   :  { %10477 = vmatprep.subr.bf16.mxu1 %v10717_v57  ;;  %10495 = vmatprep.subr.bf16.mxu0 %v10718_v20  ;;  %v2342_v12 = vpack.c.bf16 %v12147_v17, %v11954_v38  ;;  %15954 = vst [vmem:[#allocation51_spill] sm:$0xff] %v12152_v28  ;;  %v15959_v9 = vld [vmem:[#allocation4_spill] sm:$0xff]  ;;  %v10720_v17 = vld [vmem:[%s15664_s3 + $0x150] sm:$0xff]   ;;  %v15962_v25 = vld [vmem:[#allocation9_spill] sm:$0xff] }
 0x17b   :  { %10416 = vmatmul.mubr.msk.bf16.gmra.mxu0 %vm30_vm0, %v2340_v59  ;;  %v15956_v59 = vld [vmem:[#allocation5_spill] sm:$0xff] }
 0x17c   :  { %10419 = vmatprep.mubr.msk.bf16.mxu0 %vm30_vm0, %v2341_v43  ;;  %v15957_v43 = vpack.c.bf16 %v15955_v16, %v15956_v59  ;;  %v15965_v16 = vld [vmem:[#allocation13_spill] sm:$0xff] }
 0x17d   :  { %10478 = vmatpush3.bf16.msra.mxu1 %v10717_v57  ;;  %v2536_v57 = vpack.c.bf16 %v12152_v28, %v11956_v26  ;;  %v15964_v28 = vld [vmem:[#allocation16_spill] sm:$0xff]  ;;  %v10723_v26 = vld [vmem:[%s15664_s3 + $0x168] sm:$0xff]  }
 0x17e   :  { %10519 = vmatprep.subr.bf16.mxu1 %v10719_v14  ;;  %v15966_v59 = vpack.c.bf16 %v15964_v28, %v15965_v16  ;;  %v15971_v28 = vld [vmem:[#allocation11_spill] sm:$0xff] }
 0x180   :  { %10440 = vmatmul.mubr.msk.bf16.gmra.mxu1 %vm30_vm0, %v2534_v15  ;;  %v15958_v15 = vld [vmem:[#allocation6_spill] sm:$0xff] }
 0x181   :  { %10443 = vmatprep.mubr.msk.bf16.mxu1 %vm30_vm0, %v2535_v36  ;;  %v15960_v36 = vpack.c.bf16 %v15958_v15, %v15959_v9  ;;  %v10721_v9 = vld [vmem:[%s15664_s3 + $0x170] sm:$0xff]   ;;  %v15968_v15 = vld [vmem:[#allocation8_spill] sm:$0xff] }
 0x183   :  { %10420 = vmatmul.mubr.msk.bf16.gmra.mxu0 %vm30_vm0, %v2342_v12  ;;  %v15961_v12 = vld [vmem:[#allocation12_spill] sm:$0xff] }
 0x184   :  { %10455 = vmatprep.mubr.msk.bf16.mxu0 %vm30_vm0, %v15957_v43  ;;  %v15963_v4 = vpack.c.bf16 %v15961_v12, %v15962_v25  ;;  %v15967_v43 = vld [vmem:[#allocation10_spill] sm:$0xff] }
 0x185   :  { %v15969_v25 = vpack.c.bf16 %v15967_v43, %v15968_v15  ;;  %v10724_v43 = vld [vmem:[%s15664_s3 + $0x140] sm:$0xff]   ;;  %v15974_v15 = vld [vmem:[#allocation15_spill] sm:$0xff] }
 0x188   :  { %10444 = vmatmul.mubr.msk.bf16.gmra.mxu1 %vm30_vm0, %v2536_v57  ;;  %v10722_v57 = vld [vmem:[%s15664_s3 + $0x148] sm:$0xff]  }
 0x189   :  { %10479 = vmatprep.mubr.msk.bf16.mxu1 %vm30_vm0, %v15960_v36  ;;  %v15970_v36 = vld [vmem:[#allocation14_spill] sm:$0xff] }
 0x18a   :  { %v15972_v12 = vpack.c.bf16 %v15970_v36, %v15971_v28  ;;  %v10726_v28 = vld [vmem:[%s15664_s3 + $0x198] sm:$0xff]  }
 0x18b   :  { %10456 = vmatmul.mubr.msk.bf16.vlgmr.msra.gmra.mxu0 %vm30_vm0, %v15963_v4  ;;  %v2714_v4 = vld [vmem:[#allocation2 + $0x80] sm:$0xff] }
 0x18c   :  { %10459 = vmatprep.mubr.msk.bf16.mxu0 %vm30_vm0, %v15966_v59  ;;  %10496 = vmatpush3.bf16.msra.mxu0 %v10718_v20  ;;  %v15973_v20 = vld [vmem:[#allocation17_spill] sm:$0xff]  ;;  %v2908_v59 = vld [vmem:[#allocation2 + $0x1a0] sm:$0xff] }
 0x18d   :  { %10497 = vmatprep.subr.bf16.mxu0 %v10720_v17  ;;  %v2726_v16 = vpack.c.bf16 %v2714_v4, %v15973_v20  ;;  %v10725_v4 = vld [vmem:[%s15664_s3 + $0x160] sm:$0xff]  }
 0x190   :  { %10480 = vmatmul.mubr.msk.bf16.vlgmr.msra.gmra.mxu1 %vm30_vm0, %v15969_v25  ;;  %10498 = vmatpush3.bf16.msra.mxu0 %v10720_v17  ;;  %v2920_v25 = vpack.c.bf16 %v2908_v59, %v15974_v15  ;;  %v15976_v17 = vld [vmem:[#allocation19_spill] sm:$0xff]  ;;  %v15982_v59 = vld [vmem:[#allocation26_spill] sm:$0xff] }
 0x191   :  { %10483 = vmatprep.mubr.msk.bf16.mxu1 %vm30_vm0, %v15972_v12  ;;  %10520 = vmatpush3.bf16.msra.mxu1 %v10719_v14  ;;  %v15975_v14 = vld [vmem:[#allocation22_spill] sm:$0xff] }
 0x192   :  { %10521 = vmatprep.subr.bf16.mxu1 %v10721_v9  ;;  %10499 = vmatprep.subr.bf16.mxu0 %v10722_v57  ;;  %v15977_v36 = vpack.c.bf16 %v15975_v14, %v15976_v17  ;;  %v15979_v12 = vld [vmem:[#allocation18_spill] sm:$0xff]  ;;  %v15985_v14 = vld [vmem:[#allocation25_spill] sm:$0xff] }
 0x193   :  { %10460 = vmatmul.mubr.msk.bf16.gmra.mxu0 %vm30_vm0, %v2726_v16  ;;  %v15981_v16 = vld [vmem:[#allocation27_spill] sm:$0xff] }
 0x194   :  { %10463 = vmatprep.mubr.msk.bf16.mxu0 %vm30_vm0, %v15977_v36  ;;  %10500 = vmatpush3.bf16.msra.mxu0 %v10722_v57  ;;  %v10727_v57 = vld [vmem:[%s15664_s3 + $0x1b8] sm:$0xff]   ;;  %v15983_v15 = vpack.c.bf16 %v15981_v16, %v15982_v59  ;;  %v15993_v16 = vld [vmem:[#allocation32_spill] sm:$0xff] }
 0x195   :  { %10522 = vmatpush3.bf16.msra.mxu1 %v10721_v9  ;;  %10501 = vmatprep.subr.bf16.mxu0 %v10724_v43  ;;  %v15978_v9 = vld [vmem:[#allocation20_spill] sm:$0xff] }
 0x196   :  { %10523 = vmatprep.subr.bf16.mxu1 %v10723_v26  ;;  %v15980_v20 = vpack.c.bf16 %v15978_v9, %v15979_v12  ;;  %v2722_v9 = vld [vmem:[#allocation2 + $0x110] sm:$0xff]  ;;  %v15990_v12 = vld [vmem:[#allocation28_spill] sm:$0xff] }
 0x197   :  { %v2730_v59 = vpack.c.bf16 %v2722_v9, %v15993_v16  ;;  %v16001_v9 = vld [vmem:[#allocation38_spill] sm:$0xff] }
 0x198   :  { %10484 = vmatmul.mubr.msk.bf16.gmra.mxu1 %vm30_vm0, %v2920_v25  ;;  %10502 = vmatpush3.bf16.msra.mxu0 %v10724_v43  ;;  %v15984_v25 = vld [vmem:[#allocation30_spill] sm:$0xff]  ;;  %v15988_v43 = vld [vmem:[#allocation21_spill] sm:$0xff] }
 0x199   :  { %10487 = vmatprep.mubr.msk.bf16.mxu1 %vm30_vm0, %v15980_v20  ;;  %10524 = vmatpush3.bf16.msra.mxu1 %v10723_v26  ;;  %v15986_v17 = vpack.c.bf16 %v15984_v25, %v15985_v14  ;;  %v15987_v26 = vld [vmem:[#allocation23_spill] sm:$0xff]  ;;  %v15991_v20 = vld [vmem:[#allocation24_spill] sm:$0xff]  ;;  %v16004_v16 = vld [vmem:[#allocation42_spill] sm:$0xff] }
 0x19a   :  { %10525 = vmatprep.subr.bf16.mxu1 %v10725_v4  ;;  %10543 = vmatprep.subr.bf16.mxu0 %v10726_v28  ;;  %v15989_v36 = vpack.c.bf16 %v15987_v26, %v15988_v43  ;;  %v15992_v61 = vpack.c.bf16 %v15990_v12, %v15991_v20  ;;  %v15995_v14 = vld [vmem:[#allocation35_spill] sm:$0xff]  ;;  %v15998_v26 = vld [vmem:[#allocation37_spill] sm:$0xff]  ;;  %v16002_v12 = vld [vmem:[#allocation36_spill] sm:$0xff] }
 0x19b   :  { %10464 = vmatmul.mubr.msk.bf16.gmra.mxu0 %vm30_vm0, %v15983_v15  ;;  %v15994_v15 = vld [vmem:[#allocation29_spill] sm:$0xff]  ;;  %v16003_v20 = vpack.c.bf16 %v16001_v9, %v16002_v12 }
 0x19c   :  { %10467 = vmatprep.mubr.msk.bf16.mxu0 %vm30_vm0, %v15986_v17  ;;  %v15996_v17 = vld [vmem:[#allocation31_spill] sm:$0xff]  ;;  %v15999_v43 = vld [vmem:[#allocation33_spill] sm:$0xff] }
 0x19d   :  { %10526 = vmatpush3.bf16.msra.mxu1 %v10725_v4  ;;  %v2916_v4 = vld [vmem:[#allocation2 + $0x230] sm:$0xff]  ;;  %v15997_v38 = vpack.c.bf16 %v15995_v14, %v15996_v17  ;;  %v16008_v14 = vld [vmem:[#allocation39_spill] sm:$0xff] }
 0x19e   :  { %10567 = vmatprep.subr.bf16.mxu1 %v10727_v57  ;;  %v2924_v25 = vpack.c.bf16 %v2916_v4, %v15994_v15  ;;  %v10730_v15 = vld [vmem:[%s15664_s3 + $0x188] sm:$0xff]  }
 0x1a0   :  { %10488 = vmatmul.mubr.msk.bf16.gmra.mxu1 %vm30_vm0, %v15989_v36  ;;  %v16000_v36 = vpack.c.bf16 %v15998_v26, %v15999_v43  ;;  %v3102_v26 = vld [vmem:[#allocation2 + $0x81] sm:$0xff]  ;;  %v16010_v43 = vld [vmem:[#allocation43_spill] sm:$0xff] }
 0x1a1   :  { %10491 = vmatprep.mubr.msk.bf16.mxu1 %vm30_vm0, %v15992_v61  ;;  %v10728_v61 = vld [vmem:[%s15664_s3 + $0x190] sm:$0xff]  }
 0x1a3   :  { %10468 = vmatmul.mubr.msk.bf16.gmra.mxu0 %vm30_vm0, %v2730_v59  ;;  %v16005_v59 = vld [vmem:[#allocation40_spill] sm:$0xff] }
 0x1a4   :  { %10503 = vmatprep.mubr.msk.bf16.mxu0 %vm30_vm0, %v15997_v38  ;;  %v16006_v4 = vpack.c.bf16 %v16004_v16, %v16005_v59  ;;  %v10729_v38 = vld [vmem:[%s15664_s3 + $0x1b0] sm:$0xff]   ;;  %v10731_v16 = vld [vmem:[%s15664_s3 + $0x1a8] sm:$0xff]   ;;  %v10732_v59 = vld [vmem:[%s15664_s3 + $0x180] sm:$0xff]  }
 0x1a8   :  { %10492 = vmatmul.mubr.msk.bf16.gmra.mxu1 %vm30_vm0, %v2924_v25  ;;  %v16007_v25 = vld [vmem:[#allocation34_spill] sm:$0xff] }
 0x1a9   :  { %10527 = vmatprep.mubr.msk.bf16.mxu1 %vm30_vm0, %v16000_v36  ;;  %v16009_v17 = vpack.c.bf16 %v16007_v25, %v16008_v14  ;;  %v16011_v36 = vld [vmem:[#allocation41_spill] sm:$0xff]  ;;  %v10733_v14 = vld [vmem:[%s15664_s3 + $0x1a0] sm:$0xff]  }
 0x1aa   :  { %v16012_v9 = vpack.c.bf16 %v16010_v43, %v16011_v36  ;;  %v16021_v43 = vpack.c.bf16 %v11744_v1, %v11789_v56  ;;  %v10736_v56 = vld [vmem:[%s15664_s3 + $0x1d0] sm:$0xff]  }
 0x1ab   :  { %10504 = vmatmul.mubr.msk.bf16.vlgmr.msra.gmra.mxu0 %vm30_vm0, %v16003_v20  ;;  %v3296_v20 = vld [vmem:[#allocation2 + $0x1a1] sm:$0xff] }
 0x1ac   :  { %10507 = vmatprep.mubr.msk.bf16.mxu0 %vm30_vm0, %v16006_v4  ;;  %10544 = vmatpush3.bf16.msra.mxu0 %v10726_v28  ;;  %v16013_v28 = vld [vmem:[#allocation61_spill] sm:$0xff]  ;;  %v16014_v4 = vld [vmem:[#allocation64_spill] sm:$0xff] }
 0x1ad   :  { %10545 = vmatprep.subr.bf16.mxu0 %v10728_v61  ;;  %v3114_v12 = vpack.c.bf16 %v3102_v26, %v16013_v28  ;;  %v3308_v25 = vpack.c.bf16 %v3296_v20, %v16014_v4  ;;  %v16019_v26 = vpack.c.bf16 %v11742_v0, %v11787_v10  ;;  %v16022_v0 = vpack.c.bf16 %v11768_v6, %v11730_v48  ;;  %v3491_v28 = vld [vmem:[#allocation2 + $0x2c0] sm:$0xff] }
 0x1ae   :  { %v16024_v6 = vpack.c.bf16 %v11746_v8, %v11791_v55  ;;  %v16025_v48 = vpack.c.bf16 %v11811_v37, %v11748_v32  ;;  %v10738_v55 = vld [vmem:[%s15664_s3 + $0x1c8] sm:$0xff]   ;;  %v16026_v8 = vld [vmem:[#allocation46_spill] sm:$0xff] }
 0x1b0   :  { %10528 = vmatmul.mubr.msk.bf16.vlgmr.msra.gmra.mxu1 %vm30_vm0, %v16009_v17  ;;  %10546 = vmatpush3.bf16.msra.mxu0 %v10728_v61  ;;  %v10734_v17 = vld [vmem:[%s15664_s3 + $0x1d8] sm:$0xff]  }
 0x1b1   :  { %10531 = vmatprep.mubr.msk.bf16.mxu1 %vm30_vm0, %v16012_v9  ;;  %10568 = vmatpush3.bf16.msra.mxu1 %v10727_v57  ;;  %v16015_v57 = vld [vmem:[#allocation45_spill] sm:$0xff]  ;;  %v16027_v9 = vpack.c.bf16 %v11750_v30, %v16026_v8  ;;  %v16030_v30 = vld [vmem:[#allocation70_spill] sm:$0xff] }
 0x1b2   :  { %10569 = vmatprep.subr.bf16.mxu1 %v10729_v38  ;;  %10547 = vmatprep.subr.bf16.mxu0 %v10730_v15  ;;  %v16016_v61 = vpack.c.bf16 %v11724_v34, %v16015_v57  ;;  %v10735_v34 = vld [vmem:[%s15664_s3 + $0x1f8] sm:$0xff]   ;;  %v3503_v57 = vpack.c.bf16 %v3491_v28, %v16030_v30 }
 0x1b3   :  { %10508 = vmatmul.mubr.msk.bf16.gmra.mxu0 %vm30_vm0, %v3114_v12  ;;  %v16028_v12 = vld [vmem:[#allocation44_spill] sm:$0xff] }
 0x1b4   :  { %10511 = vmatprep.mubr.msk.bf16.mxu0 %vm30_vm0, %v16016_v61  ;;  %10548 = vmatpush3.bf16.msra.mxu0 %v10730_v15  ;;  %v16018_v15 = vpack.c.bf16 %v11728_v39, %v11766_v7  ;;  %v3304_v39 = vld [vmem:[#allocation2 + $0x231] sm:$0xff]  ;;  %v16029_v20 = vpack.c.bf16 %v11795_v62, %v16028_v12  ;;  %v3686_v61 = vld [vmem:[#allocation2 + $0x3e0] sm:$0xff] }
 0x1b5   :  { %10570 = vmatpush3.bf16.msra.mxu1 %v10729_v38  ;;  %10549 = vmatprep.subr.bf16.mxu0 %v10732_v59  ;;  %v16017_v38 = vpack.c.bf16 %v11726_v35, %v11764_v21  ;;  %v16020_v21 = vpack.c.bf16 %v11740_v63, %v11785_v60  ;;  %v3110_v35 = vld [vmem:[#allocation2 + $0x111] sm:$0xff]  ;;  %v3312_v10 = vpack.c.bf16 %v3304_v39, %v12002_v2  ;;  %v10740_v62 = vld [vmem:[%s15664_s3 + $0x1c0] sm:$0xff]  }
 0x1b6   :  { %10571 = vmatprep.subr.bf16.mxu1 %v10731_v16  ;;  %v3118_v7 = vpack.c.bf16 %v3110_v35, %v11996_v54  ;;  %v16023_v60 = vpack.c.bf16 %v11770_v5, %v11732_v49  ;;  %v10737_v2 = vld [vmem:[%s15664_s3 + $0x1f0] sm:$0xff]   ;;  %v16042_v12 = vld [vmem:[#allocation55_spill] sm:$0xff] }
 0x1b8   :  { %10532 = vmatmul.mubr.msk.bf16.gmra.mxu1 %vm30_vm0, %v3308_v25  ;;  %10550 = vmatpush3.bf16.msra.mxu0 %v10732_v59 }
 0x1b9   :  { %10535 = vmatprep.mubr.msk.bf16.mxu1 %vm30_vm0, %v16017_v38  ;;  %10572 = vmatpush3.bf16.msra.mxu1 %v10731_v16  ;;  %v3698_v38 = vpack.c.bf16 %v3686_v61, %v12038_v27  ;;  %v16033_v27 = vld [vmem:[#allocation48_spill] sm:$0xff]  ;;  %v3694_v61 = vld [vmem:[#allocation2 + $0x470] sm:$0xff] }
 0x1ba   :  { %10573 = vmatprep.subr.bf16.mxu1 %v10733_v14  ;;  %10591 = vmatprep.subr.bf16.mxu0 %v10734_v17 }
 0x1bb   :  { %10512 = vmatmul.mubr.msk.bf16.gmra.mxu0 %vm30_vm0, %v16018_v15 }
 0x1bc   :  { %10515 = vmatprep.mubr.msk.bf16.mxu0 %vm30_vm0, %v16019_v26  ;;  %v10741_v26 = vld [vmem:[%s15664_s3 + $0x1e0] sm:$0xff]  }
 0x1bd   :  { %10574 = vmatpush3.bf16.msra.mxu1 %v10733_v14  ;;  %v10739_v14 = vld [vmem:[%s15664_s3 + $0x1e8] sm:$0xff]   ;;  %s10889_s3 = smov 64  }
 0x1be   :  { %10615 = vmatprep.subr.bf16.mxu1 %v10735_v34 }
 0x1c0   :  { %10536 = vmatmul.mubr.msk.bf16.gmra.mxu1 %vm30_vm0, %v16020_v21 }
 0x1c1   :  { %10539 = vmatprep.mubr.msk.bf16.mxu1 %vm30_vm0, %v16021_v43  ;;  %v10265_v63 = vpop.f32.mrf.mxu0  ;;  %v10289_v1 = vpop.f32.mrf.mxu1 }
 0x1c2   :  { %v12329_v54 = vadd.f32 %v10289_v1, %v10265_v63  ;;  %v16035_v1 = vld [vmem:[#allocation49_spill] sm:$0xff] }
 0x1c3   :  { %10516 = vmatmul.mubr.msk.bf16.gmra.mxu0 %vm30_vm0, %v3118_v7  ;;  %v1335_v5 = vpop.f32.mrf.mxu0  ;;  %v1480_v49 = vpop.f32.mrf.mxu1  ;;  %v16034_v7 = vpack.c.bf16 %v15946_v46, %v16033_v27 }
 0x1c4   :  { %10551 = vmatprep.mubr.msk.bf16.mxu0 %vm30_vm0, %v16022_v0  ;;  %v12342_v36 = vadd.f32 %v1480_v49, %v1335_v5  ;;  %v16038_v5 = vld [vmem:[#allocation50_spill] sm:$0xff] }
 0x1c5   :  { %v10266_v37 = vpop.f32.mrf.mxu0  ;;  %v10290_v32 = vpop.f32.mrf.mxu1  ;;  %v16039_v49 = vpack.c.bf16 %v15950_v18, %v16038_v5 }
 0x1c6   :  { %v12355_v16 = vadd.f32 %v10290_v32, %v10266_v37  ;;  %v3499_v32 = vld [vmem:[#allocation2 + $0x350] sm:$0xff] }
 0x1c7   :  { %v1338_v59 = vpop.f32.mrf.mxu0  ;;  %v1483_v4 = vpop.f32.mrf.mxu1 }
 0x1c8   :  { %10540 = vmatmul.mubr.msk.bf16.gmra.mxu1 %vm30_vm0, %v3312_v10  ;;  %v12357_v25 = vadd.f32 %v1483_v4, %v1338_v59 }
 0x1c9   :  { %10575 = vmatprep.mubr.msk.bf16.mxu1 %vm30_vm0, %v16023_v60 }
 0x1cb   :  { %10552 = vmatmul.mubr.msk.bf16.vlgmr.msra.gmra.mxu0 %vm30_vm0, %v16024_v6  ;;  %v16036_v6 = vld [vmem:[#allocation57_spill] sm:$0xff] }
 0x1cc   :  { %10555 = vmatprep.mubr.msk.bf16.mxu0 %vm30_vm0, %v16025_v48  ;;  %10592 = vmatpush3.bf16.msra.mxu0 %v10734_v17  ;;  %v10269_v17 = vpop.f32.mrf.mxu0  ;;  %v10293_v35 = vpop.f32.mrf.mxu1  ;;  %v16037_v48 = vpack.c.bf16 %v16035_v1, %v16036_v6  ;;  %v16048_v6 = vld [vmem:[#allocation52_spill] sm:$0xff] }
 0x1cd   :  { %10593 = vmatprep.subr.bf16.mxu0 %v10736_v56  ;;  %v12376_v43 = vadd.f32 %v10293_v35, %v10269_v17 }
 0x1ce   :  { %v1351_v21 = vpop.f32.mrf.mxu0  ;;  %v1496_v39 = vpop.f32.mrf.mxu1 }
 0x1cf   :  { %v12382_v10 = vadd.f32 %v1496_v39, %v1351_v21  ;;  %v16045_v21 = vpack.c.bf16 %v11877_v50, %v11835_v44  ;;  %v16046_v39 = vpack.c.bf16 %v11837_v22, %v11875_v11  ;;  %v16047_v50 = vpack.c.bf16 %v11897_v40, %v11854_v31  ;;  %v3880_v11 = vld [vmem:[#allocation2 + $0x2c1] sm:$0xff] }
 0x1d0   :  { %10576 = vmatmul.mubr.msk.bf16.vlgmr.msra.gmra.mxu1 %vm30_vm0, %v16027_v9  ;;  %10594 = vmatpush3.bf16.msra.mxu0 %v10736_v56  ;;  %v10294_v60 = vpop.f32.mrf.mxu1  ;;  %v16040_v9 = vld [vmem:[#allocation58_spill] sm:$0xff] }
 0x1d1   :  { %10579 = vmatprep.mubr.msk.bf16.mxu1 %vm30_vm0, %v16029_v20  ;;  %10616 = vmatpush3.bf16.msra.mxu1 %v10735_v34  ;;  %v16031_v34 = vld [vmem:[#allocation47_spill] sm:$0xff]  ;;  %v16041_v37 = vpack.c.bf16 %v15948_v19, %v16040_v9  ;;  %v16043_v20 = vpack.c.bf16 %v15951_v24, %v16042_v12  ;;  %v16044_v24 = vpack.c.bf16 %v11873_v23, %v11833_v47  ;;  %v4074_v12 = vld [vmem:[#allocation2 + $0x3e1] sm:$0xff] }
 0x1d2   :  { %10617 = vmatprep.subr.bf16.mxu1 %v10737_v2  ;;  %10595 = vmatprep.subr.bf16.mxu0 %v10738_v55  ;;  %v16032_v15 = vpack.c.bf16 %v15945_v52, %v16031_v34  ;;  %v10270_v52 = vpop.f32.mrf.mxu0  ;;  %v1499_v46 = vpop.f32.mrf.mxu1 }
 0x1d3   :  { %10556 = vmatmul.mubr.msk.bf16.gmra.mxu0 %vm30_vm0, %v3503_v57  ;;  %v12384_v56 = vadd.f32 %v10294_v60, %v10270_v52  ;;  %v3507_v57 = vpack.c.bf16 %v3499_v32, %v12071_v41 }
 0x1d4   :  { %10559 = vmatprep.mubr.msk.bf16.mxu0 %vm30_vm0, %v16032_v15  ;;  %10596 = vmatpush3.bf16.msra.mxu0 %v10738_v55  ;;  %v1354_v0 = vpop.f32.mrf.mxu0  ;;  %v10297_v8 = vpop.f32.mrf.mxu1 }
 0x1d5   :  { %10618 = vmatpush3.bf16.msra.mxu1 %v10737_v2  ;;  %10597 = vmatprep.subr.bf16.mxu0 %v10740_v62  ;;  %v12394_v2 = vadd.f32 %v1499_v46, %v1354_v0 }
 0x1d6   :  { %10619 = vmatprep.subr.bf16.mxu1 %v10739_v14  ;;  %v10273_v63 = vpop.f32.mrf.mxu0  ;;  %v1512_v59 = vpop.f32.mrf.mxu1 }
 0x1d7   :  { %v12400_v28 = vadd.f32 %v10297_v8, %v10273_v63 }
 0x1d8   :  { %10580 = vmatmul.mubr.msk.bf16.gmra.mxu1 %vm30_vm0, %v3698_v38  ;;  %10598 = vmatpush3.bf16.msra.mxu0 %v10740_v62  ;;  %v1367_v55 = vpop.f32.mrf.mxu0  ;;  %v3702_v38 = vpack.c.bf16 %v3694_v61, %v12076_v3 }
 0x1d9   :  { %10583 = vmatprep.mubr.msk.bf16.mxu1 %vm30_vm0, %v16034_v7  ;;  %10620 = vmatpush3.bf16.msra.mxu1 %v10739_v14  ;;  %v12406_v4 = vadd.f32 %v1512_v59, %v1367_v55  ;;  %v10298_v14 = vpop.f32.mrf.mxu1 }
 0x1da   :  { %10621 = vmatprep.subr.bf16.mxu1 %v10741_v26  ;;  %v10274_v18 = vpop.f32.mrf.mxu0 }
 0x1db   :  { %10560 = vmatmul.mubr.msk.bf16.gmra.mxu0 %vm30_vm0, %v16037_v48  ;;  %v12409_v19 = vadd.f32 %v10298_v14, %v10274_v18  ;;  %v1515_v17 = vpop.f32.mrf.mxu1  ;;  %v16049_v48 = vld [vmem:[#allocation60_spill] sm:$0xff] }
 0x1dc   :  { %10563 = vmatprep.mubr.msk.bf16.mxu0 %vm30_vm0, %v16039_v49  ;;  %v1370_v30 = vpop.f32.mrf.mxu0  ;;  %v16050_v46 = vpack.c.bf16 %v16048_v6, %v16049_v48 }
 0x1dd   :  { %10622 = vmatpush3.bf16.msra.mxu1 %v10741_v26  ;;  %v12417_v34 = vadd.f32 %v1515_v17, %v1370_v30  ;;  %v10301_v26 = vpop.f32.mrf.mxu1  ;;  %v4086_v30 = vpack.c.bf16 %v4074_v12, %v12109_v29  ;;  %v16055_v17 = vpack.c.bf16 %v11944_v33, %v11901_v42  ;;  %v16057_v33 = vld [vmem:[#allocation68_spill] sm:$0xff] }
 0x1de   :  { %v10277_v62 = vpop.f32.mrf.mxu0 }
 0x1df   :  { %v12420_v41 = vadd.f32 %v10301_v26, %v10277_v62  ;;  %v1528_v3 = vpop.f32.mrf.mxu1 }
 0x1e0   :  { %10584 = vmatmul.mubr.msk.bf16.gmra.mxu1 %vm30_vm0, %v16041_v37  ;;  %v1383_v15 = vpop.f32.mrf.mxu0  ;;  %v16053_v37 = vld [vmem:[#allocation53_spill] sm:$0xff] }
 0x1e1   :  { %10587 = vmatprep.mubr.msk.bf16.mxu1 %vm30_vm0, %v16043_v20  ;;  %v12426_v27 = vadd.f32 %v1528_v3, %v1383_v15  ;;  %v10302_v47 = vpop.f32.mrf.mxu1  ;;  %v3892_v32 = vpack.c.bf16 %v3880_v11, %v16053_v37  ;;  %v16067_v37 = vld [vmem:[#allocation51_spill] sm:$0xff] }
 0x1e2   :  { %v10278_v35 = vpop.f32.mrf.mxu0 }
 0x1e3   :  { %10564 = vmatmul.mubr.msk.bf16.gmra.mxu0 %vm30_vm0, %v3507_v57  ;;  %v12428_v7 = vadd.f32 %v10302_v47, %v10278_v35  ;;  %v1531_v0 = vpop.f32.mrf.mxu1  ;;  %v16058_v35 = vld [vmem:[#allocation65_spill] sm:$0xff]  ;;  %v16060_v47 = vld [vmem:[#allocation63_spill] sm:$0xff] }
 0x1e4   :  { %10599 = vmatprep.mubr.msk.bf16.mxu0 %vm30_vm0, %v16044_v24  ;;  %v1386_v23 = vpop.f32.mrf.mxu0  ;;  %v16059_v3 = vpack.c.bf16 %v16057_v33, %v16058_v35 }
 0x1e5   :  { %v12439_v44 = vadd.f32 %v1531_v0, %v1386_v23  ;;  %v10337_v1 = vpop.f32.mrf.mxu1 }
 0x1e6   :  { %v10313_v52 = vpop.f32.mrf.mxu0 }
 0x1e7   :  { %v1723_v60 = vadd.f32 %v10313_v52, %v12329_v54  ;;  %v16051_v54 = vld [vmem:[#allocation56_spill] sm:$0xff]  ;;  %v1852_v40 = vpop.f32.mrf.mxu1  ;;  %v16061_v52 = vld [vmem:[#allocation67_spill] sm:$0xff] }
 0x1e8   :  { %10588 = vmatmul.mubr.msk.bf16.gmra.mxu1 %vm30_vm0, %v3702_v38  ;;  %v1658_v63 = vpop.f32.mrf.mxu0  ;;  %v16052_v49 = vpack.c.bf16 %v11899_v51, %v16051_v54  ;;  %v4082_v54 = vld [vmem:[#allocation2 + $0x471] sm:$0xff] }
 0x1e9   :  { %10623 = vmatprep.mubr.msk.bf16.mxu1 %vm30_vm0, %v16045_v21  ;;  %v1721_v22 = vadd.f32 %v1658_v63, %v12342_v36  ;;  %v12446_v5 = vadd.f32 %v10337_v1, %v1723_v60  ;;  %v10338_v36 = vpop.f32.mrf.mxu1  ;;  %v16063_v60 = vld [vmem:[#allocation69_spill] sm:$0xff] }
 0x1ea   :  { %v10314_v31 = vpop.f32.mrf.mxu0 }
 0x1eb   :  { %10600 = vmatmul.mubr.msk.bf16.vlgmr.msra.gmra.mxu0 %vm30_vm0, %v16046_v39  ;;  %v1724_v55 = vadd.f32 %v10314_v31, %v12355_v16  ;;  %v12453_v8 = vadd.f32 %v1852_v40, %v1721_v22  ;;  %v12461_v51 = vpop.f32.mrf.mxu1  ;;  %v16054_v16 = vpack.c.bf16 %v11940_v58, %v11913_v13  ;;  %v16062_v39 = vpack.c.bf16 %v16060_v47, %v16061_v52  ;;  %v16066_v22 = vld [vmem:[#allocation54_spill] sm:$0xff] }
 0x1ec   :  { %10603 = vmatprep.mubr.msk.bf16.mxu0 %vm30_vm0, %v16047_v50  ;;  %v12455_v9 = vpop.f32.mrf.mxu0  ;;  %v16064_v50 = vld [vmem:[#allocation66_spill] sm:$0xff] }
 0x1ed   :  { %v12458_v20 = vadd.f32 %v10338_v36, %v1724_v55  ;;  %v16065_v63 = vpack.c.bf16 %v16063_v60, %v16064_v50 }
 0x1f0   :  { %10624 = vmatmul.mubr.msk.bf16.vlgmr.msra.gmra.mxu1 %vm30_vm0, %v16050_v46 }
 0x1f1   :  { %10627 = vmatprep.mubr.msk.bf16.mxu1 %vm30_vm0, %v16052_v49 }
 0x1f3   :  { %v10317_v18 = vpop.f32.mrf.mxu0  ;;  %10604 = vmatmul.mubr.msk.bf16.gmra.mxu0 %vm30_vm0, %v3892_v32  ;;  %v4090_v32 = vpack.c.bf16 %v4082_v54, %v16067_v37 }
 0x1f4   :  { %v1727_v59 = vadd.f32 %v10317_v18, %v12376_v43  ;;  %10607 = vmatprep.mubr.msk.bf16.mxu0 %vm30_vm0, %v16054_v16 }
 0x1f5   :  { %v1674_v57 = vpop.f32.mrf.mxu0 }
 0x1f6   :  { %v1725_v14 = vadd.f32 %v1674_v57, %v12382_v10  ;;  %v16056_v10 = vpack.c.bf16 %v11915_v53, %v11942_v45  ;;  %v3888_v53 = vld [vmem:[#allocation2 + $0x351] sm:$0xff] }
 0x1f7   :  { %v10318_v43 = vpop.f32.mrf.mxu0  ;;  %v3896_v11 = vpack.c.bf16 %v3888_v53, %v16066_v22 }
 0x1f8   :  { %v10341_v61 = vpop.f32.mrf.mxu1  ;;  %10628 = vmatmul.mubr.msk.bf16.gmra.mxu1 %vm30_vm0, %v4086_v30  ;;  %v1728_v38 = vadd.f32 %v10318_v43, %v12384_v56 }
 0x1f9   :  { %v12471_v62 = vadd.f32 %v10341_v61, %v1727_v59  ;;  %10631 = vmatprep.mubr.msk.bf16.mxu1 %vm30_vm0, %v16055_v17  ;;  %v12478_v58 = vpop.f32.mrf.mxu0 }
 0x1fa   :  { %v1868_v29 = vpop.f32.mrf.mxu1 }
 0x1fb   :  { %v1919_v13 = vadd.f32 %v1868_v29, %v1725_v14  ;;  %v10321_v26 = vpop.f32.mrf.mxu0  ;;  %10608 = vmatmul.mubr.msk.bf16.gmra.mxu0 %vm30_vm0, %v16056_v10 }
 0x1fc   :  { %v10342_v24 = vpop.f32.mrf.mxu1  ;;  %v1731_v42 = vadd.f32 %v10321_v26, %v12400_v28  ;;  %10611 = vmatprep.mubr.msk.bf16.mxu0 %vm30_vm0, %v16059_v3 }
 0x1fd   :  { %v1922_v15 = vadd.f32 %v10342_v24, %v1728_v38  ;;  %v1690_v56 = vpop.f32.mrf.mxu0 }
 0x1fe   :  { %v12484_v21 = vpop.f32.mrf.mxu1  ;;  %v1729_v45 = vadd.f32 %v1690_v56, %v12406_v4 }
 0x1ff   :  { %v10322_v28 = vpop.f32.mrf.mxu0 }
 0x200   :  { %v10345_v23 = vpop.f32.mrf.mxu1  ;;  %10632 = vmatmul.mubr.msk.bf16.gmra.mxu1 %vm30_vm0, %v16062_v39  ;;  %v1732_v6 = vadd.f32 %v10322_v28, %v12409_v19 }
 0x201   :  { %v1925_v0 = vadd.f32 %v10345_v23, %v1731_v42  ;;  %10635 = vmatprep.mubr.msk.bf16.mxu1 %vm30_vm0, %v16065_v63  ;;  %v12501_v46 = vpop.f32.mrf.mxu0 }
 0x202   :  { %v1884_v1 = vpop.f32.mrf.mxu1 }
 0x203   :  { %v1923_v48 = vadd.f32 %v1884_v1, %v1729_v45  ;;  %v10325_v4 = vpop.f32.mrf.mxu0  ;;  %10612 = vmatmul.mubr.msk.bf16.gmra.mxu0 %vm30_vm0, %v3896_v11 }
 0x204   :  { %v10346_v49 = vpop.f32.mrf.mxu1  ;;  %v1735_v55 = vadd.f32 %v10325_v4, %v12420_v41 }
 0x205   :  { %v1926_v31 = vadd.f32 %v10346_v49, %v1732_v6  ;;  %v1706_v12 = vpop.f32.mrf.mxu0 }
 0x206   :  { %v12505_v40 = vpop.f32.mrf.mxu1  ;;  %v1733_v19 = vadd.f32 %v1706_v12, %v12426_v27 }
 0x207   :  { %v10326_v59 = vpop.f32.mrf.mxu0 }
 0x208   :  { %v10349_v36 = vpop.f32.mrf.mxu1  ;;  %10636 = vmatmul.mubr.msk.bf16.gmra.mxu1 %vm30_vm0, %v4090_v32  ;;  %v1736_v16 = vadd.f32 %v10326_v59, %v12428_v7 }
 0x209   :  { %v1929_v18 = vadd.f32 %v10349_v36, %v1735_v55  ;;  %v12512_v61 = vpop.f32.mrf.mxu0 }
 0x20a   :  { %v1900_v30 = vpop.f32.mrf.mxu1 }
 0x20b   :  { %v1927_v57 = vadd.f32 %v1900_v30, %v1733_v19  ;;  %v10361_v43 = vpop.f32.mrf.mxu0 }
 0x20c   :  { %v10350_v14 = vpop.f32.mrf.mxu1  ;;  %v2111_v29 = vadd.f32 %v10361_v43, %v12446_v5 }
 0x20d   :  { %v1930_v17 = vadd.f32 %v10350_v14, %v1736_v16  ;;  %v2046_v38 = vpop.f32.mrf.mxu0 }
 0x20e   :  { %v12514_v41 = vpop.f32.mrf.mxu1  ;;  %v2109_v26 = vadd.f32 %v2046_v38, %v12453_v8 }
 0x20f   :  { %v10362_v10 = vpop.f32.mrf.mxu0 }
 0x210   :  { %v10385_v24 = vpop.f32.mrf.mxu1  ;;  %v2112_v33 = vadd.f32 %v10362_v10, %v12458_v20 }
 0x211   :  { %v2305_v27 = vadd.f32 %v10385_v24, %v2111_v29  ;;  %v12519_v35 = vpop.f32.mrf.mxu0 }
 0x212   :  { %v2240_v42 = vpop.f32.mrf.mxu1 }
 0x213   :  { %v2303_v7 = vadd.f32 %v2240_v42, %v2109_v26  ;;  %v10365_v23 = vpop.f32.mrf.mxu0 }
 0x214   :  { %v10386_v3 = vpop.f32.mrf.mxu1  ;;  %v2115_v52 = vadd.f32 %v10365_v23, %v12471_v62 }
 0x215   :  { %v2306_v56 = vadd.f32 %v10386_v3, %v2112_v33  ;;  %v2062_v5 = vpop.f32.mrf.mxu0 }
 0x216   :  { %v12521_v47 = vpop.f32.mrf.mxu1  ;;  %v2113_v45 = vadd.f32 %v2062_v5, %v1919_v13 }
 0x217   :  { %v10366_v8 = vpop.f32.mrf.mxu0 }
 0x218   :  { %v10389_v39 = vpop.f32.mrf.mxu1  ;;  %v2116_v50 = vadd.f32 %v10366_v8, %v1922_v15 }
 0x219   :  { %v2309_v53 = vadd.f32 %v10389_v39, %v2115_v52  ;;  %v12524_v28 = vpop.f32.mrf.mxu0 }
 0x21a   :  { %v2256_v60 = vpop.f32.mrf.mxu1 }
 0x21b   :  { %v2307_v63 = vadd.f32 %v2256_v60, %v2113_v45  ;;  %v10369_v6 = vpop.f32.mrf.mxu0 }
 0x21c   :  { %v10390_v20 = vpop.f32.mrf.mxu1  ;;  %v2119_v11 = vadd.f32 %v10369_v6, %v1925_v0 }
 0x21d   :  { %v2310_v1 = vadd.f32 %v10390_v20, %v2116_v50  ;;  %v2078_v54 = vpop.f32.mrf.mxu0 }
 0x21e   :  { %v12526_v22 = vpop.f32.mrf.mxu1  ;;  %v2117_v4 = vadd.f32 %v2078_v54, %v1923_v48 }
 0x21f   :  { %v10370_v55 = vpop.f32.mrf.mxu0 }
 0x220   :  { %v10393_v49 = vpop.f32.mrf.mxu1  ;;  %v2120_v13 = vadd.f32 %v10370_v55, %v1926_v31 }
 0x221   :  { %v2313_v62 = vadd.f32 %v10393_v49, %v2119_v11  ;;  %v12528_v12 = vpop.f32.mrf.mxu0 }
 0x222   :  { %v2272_v37 = vpop.f32.mrf.mxu1 }
 0x223   :  { %v2311_v32 = vadd.f32 %v2272_v37, %v2117_v4  ;;  %v10373_v19 = vpop.f32.mrf.mxu0 }
 0x224   :  { %v10394_v15 = vpop.f32.mrf.mxu1  ;;  %v2123_v30 = vadd.f32 %v10373_v19, %v1929_v18 }
 0x225   :  { %v2314_v36 = vadd.f32 %v10394_v15, %v2120_v13  ;;  %v2094_v16 = vpop.f32.mrf.mxu0 }
 0x226   :  { %v12530_v59 = vpop.f32.mrf.mxu1  ;;  %v2121_v43 = vadd.f32 %v2094_v16, %v1927_v57 }
 0x227   :  { %v10374_v29 = vpop.f32.mrf.mxu0 }
 0x228   :  { %v10397_v14 = vpop.f32.mrf.mxu1  ;;  %v2124_v48 = vadd.f32 %v10374_v29, %v1930_v17 }
 0x229   :  { %v2317_v0 = vadd.f32 %v10397_v14, %v2123_v30  ;;  %v12532_v26 = vpop.f32.mrf.mxu0 }
 0x22a   :  { %v2288_v38 = vpop.f32.mrf.mxu1 }
 0x22b   :  { %v2315_v24 = vadd.f32 %v2288_v38, %v2121_v43  ;;  %v10409_v42 = vpop.f32.mrf.mxu0 }
 0x22c   :  { %v10398_v31 = vpop.f32.mrf.mxu1  ;;  %v2499_v3 = vadd.f32 %v10409_v42, %v2305_v27 }
 0x22d   :  { %v2318_v10 = vadd.f32 %v10398_v31, %v2124_v48  ;;  %v2434_v23 = vpop.f32.mrf.mxu0 }
 0x22e   :  { %v12534_v33 = vpop.f32.mrf.mxu1  ;;  %v2497_v5 = vadd.f32 %v2434_v23, %v2303_v7 }
 0x22f   :  { %v10410_v39 = vpop.f32.mrf.mxu0 }
 0x230   :  { %v10433_v52 = vpop.f32.mrf.mxu1  ;;  %v2500_v57 = vadd.f32 %v10410_v39, %v2306_v56 }
 0x231   :  { %v2693_v18 = vadd.f32 %v10433_v52, %v2499_v3  ;;  %v12536_v60 = vpop.f32.mrf.mxu0 }
 0x232   :  { %v2628_v45 = vpop.f32.mrf.mxu1 }
 0x233   :  { %v2691_v8 = vadd.f32 %v2628_v45, %v2497_v5  ;;  %v10413_v20 = vpop.f32.mrf.mxu0 }
 0x234   :  { %v10434_v17 = vpop.f32.mrf.mxu1  ;;  %v2503_v11 = vadd.f32 %v10413_v20, %v2309_v53 }
 0x235   :  { %v2694_v50 = vadd.f32 %v10434_v17, %v2500_v57  ;;  %v2450_v54 = vpop.f32.mrf.mxu0 }
 0x236   :  { %v12538_v6 = vpop.f32.mrf.mxu1  ;;  %v2501_v4 = vadd.f32 %v2450_v54, %v2307_v63 }
 0x237   :  { %v10414_v55 = vpop.f32.mrf.mxu0 }
 0x238   :  { %v10437_v49 = vpop.f32.mrf.mxu1  ;;  %v2504_v7 = vadd.f32 %v10414_v55, %v2310_v1 }
 0x239   :  { %v2697_v27 = vadd.f32 %v10437_v49, %v2503_v11  ;;  %v12540_v15 = vpop.f32.mrf.mxu0 }
 0x23a   :  { %v2644_v37 = vpop.f32.mrf.mxu1 }
 0x23b   :  { %v2695_v13 = vadd.f32 %v2644_v37, %v2501_v4  ;;  %v10417_v30 = vpop.f32.mrf.mxu0 }
 0x23c   :  { %v10438_v56 = vpop.f32.mrf.mxu1  ;;  %v2507_v14 = vadd.f32 %v10417_v30, %v2313_v62 }
 0x23d   :  { %v2698_v19 = vadd.f32 %v10438_v56, %v2504_v7  ;;  %v2466_v43 = vpop.f32.mrf.mxu0 }
 0x23e   :  { %v12542_v16 = vpop.f32.mrf.mxu1  ;;  %v2505_v38 = vadd.f32 %v2466_v43, %v2311_v32 }
 0x23f   :  { %v10418_v48 = vpop.f32.mrf.mxu0 }
 0x240   :  { %v10441_v29 = vpop.f32.mrf.mxu1  ;;  %v2508_v63 = vadd.f32 %v10418_v48, %v2314_v36 }
 0x241   :  { %v2701_v53 = vadd.f32 %v10441_v29, %v2507_v14  ;;  %v12544_v3 = vpop.f32.mrf.mxu0 }
 0x242   :  { %v2660_v31 = vpop.f32.mrf.mxu1 }
 0x243   :  { %v2699_v42 = vadd.f32 %v2660_v31, %v2505_v38  ;;  %v10421_v52 = vpop.f32.mrf.mxu0 }
 0x244   :  { %v10442_v1 = vpop.f32.mrf.mxu1  ;;  %v2511_v39 = vadd.f32 %v10421_v52, %v2317_v0 }
 0x245   :  { %v2702_v23 = vadd.f32 %v10442_v1, %v2508_v63  ;;  %v2482_v45 = vpop.f32.mrf.mxu0 }
 0x246   :  { %v12546_v5 = vpop.f32.mrf.mxu1  ;;  %v2509_v17 = vadd.f32 %v2482_v45, %v2315_v24 }
 0x247   :  { %v10422_v20 = vpop.f32.mrf.mxu0 }
 0x248   :  { %v10445_v57 = vpop.f32.mrf.mxu1  ;;  %v2512_v32 = vadd.f32 %v10422_v20, %v2318_v10 }
 0x249   :  { %v2705_v62 = vadd.f32 %v10445_v57, %v2511_v39  ;;  %v12548_v49 = vpop.f32.mrf.mxu0 }
 0x24a   :  { %v2676_v11 = vpop.f32.mrf.mxu1 }
 0x24b   :  { %v2703_v54 = vadd.f32 %v2676_v11, %v2509_v17  ;;  %v10457_v55 = vpop.f32.mrf.mxu0 }
 0x24c   :  { %v10446_v36 = vpop.f32.mrf.mxu1  ;;  %v2887_v7 = vadd.f32 %v10457_v55, %v2693_v18 }
 0x24d   :  { %v2706_v4 = vadd.f32 %v10446_v36, %v2512_v32  ;;  %v2822_v56 = vpop.f32.mrf.mxu0 }
 0x24e   :  { %v12550_v37 = vpop.f32.mrf.mxu1  ;;  %v2885_v14 = vadd.f32 %v2822_v56, %v2691_v8 }
 0x24f   :  { %v10458_v43 = vpop.f32.mrf.mxu0 }
 0x250   :  { %v10481_v30 = vpop.f32.mrf.mxu1  ;;  %v2888_v24 = vadd.f32 %v10458_v43, %v2694_v50 }
 0x251   :  { %v3081_v0 = vadd.f32 %v10481_v30, %v2887_v7  ;;  %v12554_v48 = vpop.f32.mrf.mxu0 }
 0x252   :  { %v3016_v29 = vpop.f32.mrf.mxu1 }
 0x253   :  { %v12552_v38 = vadd.f32 %v3016_v29, %v2885_v14  ;;  %v10461_v63 = vpop.f32.mrf.mxu0 }
 0x254   :  { %v10482_v10 = vpop.f32.mrf.mxu1  ;;  %v2891_v52 = vadd.f32 %v10461_v63, %v2697_v27 }
 0x255   :  { %v12556_v31 = vadd.f32 %v10482_v10, %v2888_v24  ;;  %v2838_v39 = vpop.f32.mrf.mxu0 }
 0x256   :  { %v12558_v1 = vpop.f32.mrf.mxu1  ;;  %v2889_v45 = vadd.f32 %v2838_v39, %v2695_v13 }
 0x257   :  { %v10462_v8 = vpop.f32.mrf.mxu0 }
 0x258   :  { %v10485_v18 = vpop.f32.mrf.mxu1  ;;  %v2892_v20 = vadd.f32 %v10462_v8, %v2698_v19 }
 0x259   :  { %v3085_v57 = vadd.f32 %v10485_v18, %v2891_v52  ;;  %v12562_v50 = vpop.f32.mrf.mxu0 }
 0x25a   :  { %v3032_v17 = vpop.f32.mrf.mxu1 }
 0x25b   :  { %v12560_v11 = vadd.f32 %v3032_v17, %v2889_v45  ;;  %v10465_v55 = vpop.f32.mrf.mxu0 }
 0x25c   :  { %v10486_v32 = vpop.f32.mrf.mxu1  ;;  %v2895_v56 = vadd.f32 %v10465_v55, %v2701_v53 }
 0x25d   :  { %v12564_v36 = vadd.f32 %v10486_v32, %v2892_v20  ;;  %v2854_v30 = vpop.f32.mrf.mxu0 }
 0x25e   :  { %v12566_v7 = vpop.f32.mrf.mxu1  ;;  %v2893_v14 = vadd.f32 %v2854_v30, %v2699_v42 }
 0x25f   :  { %v10466_v13 = vpop.f32.mrf.mxu0 }
 0x260   :  { %v10489_v27 = vpop.f32.mrf.mxu1  ;;  %v2896_v24 = vadd.f32 %v10466_v13, %v2702_v23 }
 0x261   :  { %v3089_v43 = vadd.f32 %v10489_v27, %v2895_v56  ;;  %v12570_v19 = vpop.f32.mrf.mxu0 }
 0x262   :  { %v3048_v29 = vpop.f32.mrf.mxu1 }
 0x263   :  { %v12568_v10 = vadd.f32 %v3048_v29, %v2893_v14  ;;  %v10469_v39 = vpop.f32.mrf.mxu0 }
 0x264   :  { %v10490_v63 = vpop.f32.mrf.mxu1  ;;  %v2899_v45 = vadd.f32 %v10469_v39, %v2705_v62 }
 0x265   :  { %16068 = vst [vmem:[#allocation59_spill] sm:$0xff] %v12568_v10  ;;  %v12572_v52 = vadd.f32 %v10490_v63, %v2896_v24  ;;  %v2870_v8 = vpop.f32.mrf.mxu0 }
 0x266   :  { %v12574_v18 = vpop.f32.mrf.mxu1  ;;  %v2897_v17 = vadd.f32 %v2870_v8, %v2703_v54 }
 0x267   :  { %16069 = vst [vmem:[#allocation62_spill] sm:$0xff] %v12572_v52  ;;  %16070 = vst [vmem:[#allocation7_spill] sm:$0xff] %v12574_v18  ;;  %v10470_v42 = vpop.f32.mrf.mxu0 }
 0x268   :  { %v10493_v53 = vpop.f32.mrf.mxu1  ;;  %v2900_v55 = vadd.f32 %v10470_v42, %v2706_v4 }
 0x269   :  { %v3093_v20 = vadd.f32 %v10493_v53, %v2899_v45  ;;  %v12578_v23 = vpop.f32.mrf.mxu0 }
 0x26a   :  { %v3064_v32 = vpop.f32.mrf.mxu1  ;;  %16072 = vst [vmem:[#allocation6_spill] sm:$0xff] %v12578_v23 }
 0x26b   :  { %v12576_v56 = vadd.f32 %v3064_v32, %v2897_v17  ;;  %v10505_v14 = vpop.f32.mrf.mxu0 }
 0x26c   :  { %v10494_v30 = vpop.f32.mrf.mxu1  ;;  %v3275_v29 = vadd.f32 %v10505_v14, %v3081_v0 }
 0x26d   :  { %16071 = vst [vmem:[#allocation5_spill] sm:$0xff] %v12576_v56  ;;  %v12580_v27 = vadd.f32 %v10494_v30, %v2900_v55  ;;  %v12584_v24 = vpop.f32.mrf.mxu0 }
 0x26e   :  { %v12582_v13 = vpop.f32.mrf.mxu1 }
 0x26f   :  { %16073 = vst [vmem:[#allocation4_spill] sm:$0xff] %v12580_v27  ;;  %16074 = vst [vmem:[#allocation12_spill] sm:$0xff] %v12582_v13  ;;  %v12588_v54 = vpop.f32.mrf.mxu0 }
 0x270   :  { %v10529_v62 = vpop.f32.mrf.mxu1 }
 0x271   :  { %v12586_v63 = vadd.f32 %v10529_v62, %v3275_v29  ;;  %v12592_v4 = vpop.f32.mrf.mxu0 }
 0x272   :  { %v12590_v39 = vpop.f32.mrf.mxu1 }
 0x273   :  { %v10509_v8 = vpop.f32.mrf.mxu0 }
 0x274   :  { %v12594_v45 = vpop.f32.mrf.mxu1  ;;  %v3279_v17 = vadd.f32 %v10509_v8, %v3085_v57 }
 0x275   :  { %v12598_v42 = vpop.f32.mrf.mxu0 }
 0x276   :  { %v12596_v53 = vpop.f32.mrf.mxu1 }
 0x277   :  { %v12602_v55 = vpop.f32.mrf.mxu0 }
 0x278   :  { %v10533_v0 = vpop.f32.mrf.mxu1 }
 0x279   :  { %v12600_v32 = vadd.f32 %v10533_v0, %v3279_v17  ;;  %v12606_v14 = vpop.f32.mrf.mxu0 }
 0x27a   :  { %v12604_v30 = vpop.f32.mrf.mxu1 }
 0x27b   :  { %16075 = vst [vmem:[#allocation9_spill] sm:$0xff] %v12600_v32  ;;  %v10513_v62 = vpop.f32.mrf.mxu0 }
 0x27c   :  { %v12608_v29 = vpop.f32.mrf.mxu1  ;;  %v3283_v56 = vadd.f32 %v10513_v62, %v3089_v43 }
 0x27d   :  { %16076 = vst [vmem:[#allocation16_spill] sm:$0xff] %v12608_v29  ;;  %v12612_v13 = vpop.f32.mrf.mxu0 }
 0x27e   :  { %v12610_v27 = vpop.f32.mrf.mxu1  ;;  %16077 = vst [vmem:[#allocation13_spill] sm:$0xff] %v12612_v13 }
 0x27f   :  { %v12616_v52 = vpop.f32.mrf.mxu0 }
 0x280   :  { %v10537_v57 = vpop.f32.mrf.mxu1  ;;  %16079 = vst [vmem:[#allocation8_spill] sm:$0xff] %v12616_v52 }
 0x281   :  { %v12614_v8 = vadd.f32 %v10537_v57, %v3283_v56  ;;  %v12620_v0 = vpop.f32.mrf.mxu0 }
 0x282   :  { %v12618_v17 = vpop.f32.mrf.mxu1  ;;  %16081 = vst [vmem:[#allocation11_spill] sm:$0xff] %v12620_v0 }
 0x283   :  { %16078 = vst [vmem:[#allocation10_spill] sm:$0xff] %v12614_v8  ;;  %16080 = vst [vmem:[#allocation14_spill] sm:$0xff] %v12618_v17  ;;  %v10517_v10 = vpop.f32.mrf.mxu0 }
 0x284   :  { %v12622_v32 = vpop.f32.mrf.mxu1  ;;  %v3287_v29 = vadd.f32 %v10517_v10, %v3093_v20  ;;  %v1722_v10 = vadd.f32 %v12455_v9, %v12357_v25  ;;  %v1726_v25 = vadd.f32 %v12478_v58, %v12394_v2 }
 0x285   :  { %16082 = vst [vmem:[#allocation17_spill] sm:$0xff] %v12622_v32  ;;  %v12626_v18 = vpop.f32.mrf.mxu0 }
 0x286   :  { %v12624_v23 = vpop.f32.mrf.mxu1  ;;  %16084 = vst [vmem:[#allocation22_spill] sm:$0xff] %v12626_v18 }
 0x287   :  { %16083 = vst [vmem:[#allocation15_spill] sm:$0xff] %v12624_v23  ;;  %v12630_v13 = vpop.f32.mrf.mxu0 }
 0x288   :  { %v10541_v43 = vpop.f32.mrf.mxu1  ;;  %16086 = vst [vmem:[#allocation20_spill] sm:$0xff] %v12630_v13 }
 0x289   :  { %v12628_v62 = vadd.f32 %v10541_v43, %v3287_v29  ;;  %v12634_v57 = vpop.f32.mrf.mxu0 }
 0x28a   :  { %v12632_v56 = vpop.f32.mrf.mxu1  ;;  %16088 = vst [vmem:[#allocation27_spill] sm:$0xff] %v12634_v57  ;;  %v1916_v57 = vadd.f32 %v12461_v51, %v1722_v10  ;;  %v1920_v10 = vadd.f32 %v12484_v21, %v1726_v25  ;;  %v1734_v21 = vadd.f32 %v12512_v61, %v12439_v44 }
 0x28b   :  { %16085 = vst [vmem:[#allocation19_spill] sm:$0xff] %v12628_v62  ;;  %16087 = vst [vmem:[#allocation18_spill] sm:$0xff] %v12632_v56  ;;  %v12638_v17 = vpop.f32.mrf.mxu0 }
 0x28c   :  { %v12636_v8 = vpop.f32.mrf.mxu1  ;;  %v2114_v58 = vadd.f32 %v12524_v28, %v1920_v10  ;;  %v1928_v44 = vadd.f32 %v12514_v41, %v1734_v21 }
 0x28d   :  { %16089 = vst [vmem:[#allocation26_spill] sm:$0xff] %v12636_v8  ;;  %v3599_v0 = vpop.f32.mrf.mxu0 }
 0x28e   :  { %v12640_v32 = vpop.f32.mrf.mxu1 }
 0x28f   :  { %16090 = vst [vmem:[#allocation30_spill] sm:$0xff] %v12640_v32  ;;  %v12646_v29 = vpop.f32.mrf.mxu0  ;;  %v2110_v32 = vadd.f32 %v12519_v35, %v1916_v57  ;;  %v1730_v35 = vadd.f32 %v12501_v46, %v12417_v34 }
 0x290   :  { %v12644_v20 = vpop.f32.mrf.mxu1 }
 0x291   :  { %v12650_v62 = vpop.f32.mrf.mxu0  ;;  %v2304_v52 = vadd.f32 %v12521_v47, %v2110_v32  ;;  %v1924_v47 = vadd.f32 %v12505_v40, %v1730_v35 }
 0x292   :  { %v12648_v43 = vpop.f32.mrf.mxu1 }
 0x293   :  { %v12655_v8 = vpop.f32.mrf.mxu0 }
 0x294   :  { %v12653_v56 = vpop.f32.mrf.mxu1  ;;  %16091 = vst [vmem:[#allocation25_spill] sm:$0xff] %v12655_v8  ;;  %v2498_v8 = vadd.f32 %v12536_v60, %v2304_v52  ;;  %v2308_v60 = vadd.f32 %v12526_v22, %v2114_v58  ;;  %v2118_v52 = vadd.f32 %v12528_v12, %v1924_v47  ;;  %v3273_v22 = vadd.f32 %v12584_v24, %v12552_v38 }
 0x295   :  { %v12662_v9 = vpop.f32.mrf.mxu0 }
 0x296   :  { %v12658_v13 = vpop.f32.mrf.mxu1  ;;  %v2692_v34 = vadd.f32 %v12538_v6, %v2498_v8  ;;  %v2502_v40 = vadd.f32 %v12540_v15, %v2308_v60  ;;  %v2312_v6 = vadd.f32 %v12530_v59, %v2118_v52  ;;  %v2122_v8 = vadd.f32 %v12532_v26, %v1928_v44 }
 0x297   :  { %v12666_v23 = vpop.f32.mrf.mxu0  ;;  %v3467_v24 = vadd.f32 %v12590_v39, %v3273_v22  ;;  %v3276_v26 = vadd.f32 %v12588_v54, %v12556_v31  ;;  %v3277_v39 = vadd.f32 %v12598_v42, %v12560_v11  ;;  %v16095_v22 = vld [vmem:[#allocation6_spill] sm:$0xff] }
 0x298   :  { %v12664_v18 = vpop.f32.mrf.mxu1  ;;  %16093 = vst [vmem:[#allocation21_spill] sm:$0xff] %v12666_v23  ;;  %v2886_v25 = vadd.f32 %v12554_v48, %v2692_v34  ;;  %v2696_v15 = vadd.f32 %v12542_v16, %v2502_v40  ;;  %v2506_v47 = vadd.f32 %v12544_v3, %v2312_v6  ;;  %v2316_v34 = vadd.f32 %v12534_v33, %v2122_v8 }
 0x299   :  { %16092 = vst [vmem:[#allocation23_spill] sm:$0xff] %v12664_v18  ;;  %v12674_v57 = vpop.f32.mrf.mxu0  ;;  %v3662_v60 = vadd.f32 %v3599_v0, %v3467_v24  ;;  %v3470_v54 = vadd.f32 %v12594_v45, %v3276_v26  ;;  %v3471_v44 = vadd.f32 %v12604_v30, %v3277_v39  ;;  %v16098_v30 = vld [vmem:[#allocation13_spill] sm:$0xff]  ;;  %v16099_v26 = vld [vmem:[#allocation62_spill] sm:$0xff] }
 0x29a   :  { %v12669_v51 = vpop.f32.mrf.mxu1  ;;  %v3080_v48 = vadd.f32 %v12558_v1, %v2886_v25  ;;  %v2890_v38 = vadd.f32 %v12562_v50, %v2696_v15  ;;  %v2700_v3 = vadd.f32 %v12546_v5, %v2506_v47  ;;  %v3664_v5 = vadd.f32 %v12638_v17, %v12586_v63  ;;  %v16094_v17 = vld [vmem:[#allocation7_spill] sm:$0xff] }
 0x29b   :  { %v12680_v18 = vpop.f32.mrf.mxu0  ;;  %v3857_v42 = vadd.f32 %v12648_v43, %v3662_v60  ;;  %v16097_v47 = vld [vmem:[#allocation59_spill] sm:$0xff]  ;;  %v16103_v39 = vld [vmem:[#allocation25_spill] sm:$0xff] }
 0x29c   :  { %v12677_v2 = vpop.f32.mrf.mxu1  ;;  %v3274_v21 = vadd.f32 %v12592_v4, %v3080_v48  ;;  %v2510_v4 = vadd.f32 %v12548_v49, %v2316_v34  ;;  %v3084_v31 = vadd.f32 %v12566_v7, %v2890_v38  ;;  %v2894_v33 = vadd.f32 %v12570_v19, %v2700_v3  ;;  %v16096_v48 = vld [vmem:[#allocation16_spill] sm:$0xff]  ;;  %v16101_v60 = vld [vmem:[#allocation11_spill] sm:$0xff] }
 0x29d   :  { %v12685_v32 = vpop.f32.mrf.mxu0  ;;  %v3280_v49 = vadd.f32 %v12602_v55, %v12564_v36  ;;  %v3665_v7 = vadd.f32 %v12646_v29, %v3470_v54  ;;  %v3859_v36 = vadd.f32 %v12644_v20, %v3664_v5  ;;  %v3666_v29 = vadd.f32 %v12662_v9, %v3471_v44  ;;  %v16100_v34 = vld [vmem:[#allocation8_spill] sm:$0xff] }
 0x29e   :  { %v12682_v23 = vpop.f32.mrf.mxu1  ;;  %v3468_v50 = vadd.f32 %v12596_v53, %v3274_v21  ;;  %v3278_v11 = vadd.f32 %v12606_v14, %v3084_v31  ;;  %v2704_v45 = vadd.f32 %v12550_v37, %v2510_v4  ;;  %v3088_v6 = vadd.f32 %v16094_v17, %v2894_v33 }
 0x29f   :  { %v12694_v28 = vpop.f32.mrf.mxu0  ;;  %v3474_v14 = vadd.f32 %v16096_v48, %v3280_v49  ;;  %v3281_v21 = vadd.f32 %v16098_v30, %v16097_v47  ;;  %v3860_v38 = vadd.f32 %v12653_v56, %v3665_v7  ;;  %v3284_v3 = vadd.f32 %v16100_v34, %v16099_v26  ;;  %v16104_v49 = vld [vmem:[#allocation21_spill] sm:$0xff]  ;;  %v16106_v7 = vld [vmem:[#allocation14_spill] sm:$0xff] }
 0x2a0   :  { %v12690_v46 = vpop.f32.mrf.mxu1  ;;  %v3663_v53 = vadd.f32 %v12650_v62, %v3468_v50  ;;  %v2898_v8 = vadd.f32 %v16095_v22, %v2704_v45  ;;  %v3472_v37 = vadd.f32 %v12610_v27, %v3278_v11  ;;  %v3282_v4 = vadd.f32 %v16101_v60, %v3088_v6  ;;  %v16102_v50 = vld [vmem:[#allocation9_spill] sm:$0xff]  ;;  %v16105_v11 = vld [vmem:[#allocation12_spill] sm:$0xff]  ;;  %v16109_v22 = vld [vmem:[#allocation23_spill] sm:$0xff] }
 0x2a1   :  { %v12700_v35 = vpop.f32.mrf.mxu0  ;;  %v3861_v5 = vadd.f32 %v12669_v51, %v3666_v29  ;;  %v3669_v56 = vadd.f32 %v16104_v49, %v3474_v14  ;;  %v16107_v6 = vld [vmem:[#allocation17_spill] sm:$0xff]  ;;  %v16111_v60 = vld [vmem:[#allocation22_spill] sm:$0xff] }
 0x2a2   :  { %v12697_v10 = vpop.f32.mrf.mxu1  ;;  %v3858_v43 = vadd.f32 %v12658_v13, %v3663_v53  ;;  %v3668_v13 = vadd.f32 %v16103_v39, %v16102_v50  ;;  %v16112_v50 = vld [vmem:[#allocation4_spill] sm:$0xff] }
 0x2a3   :  { %v12708_v12 = vpop.f32.mrf.mxu0 }
 0x2a4   :  { %v12703_v61 = vpop.f32.mrf.mxu1  ;;  %v3863_v51 = vadd.f32 %v16109_v22, %v3668_v13  ;;  %v16115_v22 = vld [vmem:[#allocation18_spill] sm:$0xff] }
 0x2a5   :  { %v12716_v41 = vpop.f32.mrf.mxu0 }
 0x2a6   :  { %v12712_v58 = vpop.f32.mrf.mxu1 }
 0x2a7   :  { %v12725_v1 = vpop.f32.mrf.mxu0 }
 0x2a8   :  { %v12719_v59 = vpop.f32.mrf.mxu1 }
 0x2a9   :  { %v12731_v52 = vpop.f32.mrf.mxu0 }
 0x2aa   :  { %v12728_v16 = vpop.f32.mrf.mxu1 }
 0x2ab   :  { %v10601_v0 = vpop.f32.mrf.mxu0 }
 0x2ac   :  { %v12737_v25 = vpop.f32.mrf.mxu1  ;;  %v4053_v24 = vadd.f32 %v10601_v0, %v3859_v36  ;;  %v3667_v0 = vadd.f32 %v12674_v57, %v3472_v37  ;;  %v3478_v36 = vadd.f32 %v16107_v6, %v3284_v3  ;;  %v16110_v3 = vld [vmem:[#allocation5_spill] sm:$0xff] }
 0x2ad   :  { %v3988_v19 = vpop.f32.mrf.mxu0 }
 0x2ae   :  { %v12747_v40 = vpop.f32.mrf.mxu1  ;;  %v4051_v55 = vadd.f32 %v3988_v19, %v3857_v42  ;;  %v3092_v42 = vadd.f32 %v16105_v11, %v2898_v8  ;;  %v3475_v19 = vadd.f32 %v16106_v7, %v3281_v21  ;;  %v3862_v37 = vadd.f32 %v12682_v23, %v3667_v0  ;;  %v16114_v23 = vld [vmem:[#allocation10_spill] sm:$0xff] }
 0x2af   :  { %v10602_v62 = vpop.f32.mrf.mxu0  ;;  %v3673_v0 = vadd.f32 %v12694_v28, %v3478_v36 }
 0x2b0   :  { %v10625_v63 = vpop.f32.mrf.mxu1  ;;  %v4054_v27 = vadd.f32 %v10602_v62, %v3860_v38  ;;  %v3670_v47 = vadd.f32 %v12685_v32, %v3475_v19  ;;  %v3672_v32 = vadd.f32 %v12680_v18, %v16114_v23 }
 0x2b1   :  { %v3991_v20 = vpop.f32.mrf.mxu0  ;;  %v12776_v45 = vadd.f32 %v10625_v63, %v4053_v24 }
 0x2b2   :  { %v4182_v15 = vpop.f32.mrf.mxu1  ;;  %v4052_v9 = vadd.f32 %v3991_v20, %v3858_v43  ;;  %v3867_v28 = vadd.f32 %v12690_v46, %v3672_v32 }
 0x2b3   :  { %v12769_v33 = vadd.f32 %v4182_v15, %v4051_v55  ;;  %v10605_v54 = vpop.f32.mrf.mxu0  ;;  %v16108_v55 = vld [vmem:[#allocation15_spill] sm:$0xff]  ;;  %v3864_v15 = vadd.f32 %v12677_v2, %v3669_v56  ;;  %v4284_v38 = vmul.f32 %v12776_v45, %v12776_v45  ;;  %v16113_v2 = vld [vmem:[#allocation20_spill] sm:$0xff]  ;;  %v3865_v56 = vadd.f32 %v12697_v10, %v3670_v47 }
 0x2b4   :  { %v10626_v31 = vpop.f32.mrf.mxu1  ;;  %v3476_v62 = vadd.f32 %v16108_v55, %v3282_v4  ;;  %v4057_v30 = vadd.f32 %v10605_v54, %v3863_v51  ;;  %v3285_v4 = vadd.f32 %v16111_v60, %v16110_v3  ;;  %v3288_v39 = vadd.f32 %v16113_v2, %v16112_v50  ;;  %v16118_v3 = vld [vmem:[#allocation30_spill] sm:$0xff] }
 0x2b5   :  { %v4004_v17 = vpop.f32.mrf.mxu0  ;;  %v4282_v57 = vmul.f32 %v12769_v33, %v12769_v33  ;;  %v12785_v43 = vadd.f32 %v10626_v31, %v4054_v27 }
 0x2b6   :  { %v4185_v53 = vpop.f32.mrf.mxu1  ;;  %v4055_v14 = vadd.f32 %v4004_v17, %v3861_v5  ;;  %v3479_v51 = vadd.f32 %v16115_v22, %v3285_v4 }
 0x2b7   :  { %v12778_v44 = vadd.f32 %v4185_v53, %v4052_v9  ;;  %v10606_v29 = vpop.f32.mrf.mxu0  ;;  %v4285_v9 = vmul.f32 %v12785_v43, %v12785_v43  ;;  %v3671_v53 = vadd.f32 %v12700_v35, %v3476_v62 }
 0x2b8   :  { %v10629_v48 = vpop.f32.mrf.mxu1  ;;  %v4058_v5 = vadd.f32 %v10606_v29, %v3864_v15  ;;  %v3868_v29 = vadd.f32 %v12703_v61, %v3673_v0  ;;  %v16119_v61 = vld [vmem:[#allocation19_spill] sm:$0xff] }
 0x2b9   :  { %v4261_v63 = vadd.f32 %v12778_v44, %v12769_v33  ;;  %v4283_v8 = vmul.f32 %v12778_v44, %v12778_v44  ;;  %v4007_v34 = vpop.f32.mrf.mxu0  ;;  %v12811_v11 = vadd.f32 %v10629_v48, %v4057_v30  ;;  %v3866_v15 = vadd.f32 %v12712_v58, %v3671_v53 }
 0x2ba   :  { %v4198_v21 = vpop.f32.mrf.mxu1  ;;  %v4056_v31 = vadd.f32 %v4007_v34, %v3862_v37  ;;  %v3674_v37 = vadd.f32 %v12716_v41, %v3479_v51  ;;  %v3676_v58 = vadd.f32 %v12708_v12, %v16119_v61 }
 0x2bb   :  { %v4262_v24 = vadd.f32 %v4261_v63, %v12776_v45  ;;  %v4298_v20 = vadd.f32 %v4283_v8, %v4282_v57  ;;  %v12797_v26 = vadd.f32 %v4198_v21, %v4055_v14  ;;  %v10609_v49 = vpop.f32.mrf.mxu0  ;;  %v16116_v14 = vld [vmem:[#allocation27_spill] sm:$0xff]  ;;  %v4288_v46 = vmul.f32 %v12811_v11, %v12811_v11 }
 0x2bc   :  { %v10630_v13 = vpop.f32.mrf.mxu1  ;;  %v3286_v10 = vadd.f32 %v16116_v14, %v3092_v42  ;;  %v4061_v42 = vadd.f32 %v10609_v49, %v3867_v28  ;;  %v3871_v53 = vadd.f32 %v12719_v59, %v3676_v58 }
 0x2bd   :  { %v4299_v27 = vadd.f32 %v4298_v20, %v4284_v38  ;;  %v4263_v54 = vadd.f32 %v4262_v24, %v12785_v43  ;;  %v4286_v19 = vmul.f32 %v12797_v26, %v12797_v26  ;;  %v4020_v55 = vpop.f32.mrf.mxu0  ;;  %v12821_v48 = vadd.f32 %v10630_v13, %v4058_v5  ;;  %v16117_v20 = vld [vmem:[#allocation26_spill] sm:$0xff] }
 0x2be   :  { %v4201_v7 = vpop.f32.mrf.mxu1  ;;  %v4059_v35 = vadd.f32 %v4020_v55, %v3865_v56  ;;  %v3482_v34 = vadd.f32 %v16117_v20, %v3288_v39  ;;  %v3480_v60 = vadd.f32 %v16118_v3, %v3286_v10 }
 0x2bf   :  { %v4264_v18 = vadd.f32 %v4263_v54, %v12797_v26  ;;  %v4300_v17 = vadd.f32 %v4299_v27, %v4285_v9  ;;  %v12816_v6 = vadd.f32 %v4201_v7, %v4056_v31  ;;  %v10610_v8 = vpop.f32.mrf.mxu0  ;;  %v4289_v50 = vmul.f32 %v12821_v48, %v12821_v48 }
 0x2c0   :  { %v10633_v36 = vpop.f32.mrf.mxu1  ;;  %v4062_v32 = vadd.f32 %v10610_v8, %v3868_v29  ;;  %v3869_v31 = vadd.f32 %v12728_v16, %v3674_v37  ;;  %v3677_v9 = vadd.f32 %v12725_v1, %v3482_v34  ;;  %v3675_v39 = vadd.f32 %v12731_v52, %v3480_v60 }
 0x2c1   :  { %v4301_v62 = vadd.f32 %v4300_v17, %v4286_v19  ;;  %v4265_v57 = vadd.f32 %v4264_v18, %v12816_v6  ;;  %v4287_v63 = vmul.f32 %v12816_v6, %v12816_v6  ;;  %v4023_v24 = vpop.f32.mrf.mxu0  ;;  %v12844_v27 = vadd.f32 %v10633_v36, %v4061_v42 }
 0x2c2   :  { %v4214_v47 = vpop.f32.mrf.mxu1  ;;  %v4060_v41 = vadd.f32 %v4023_v24, %v3866_v15  ;;  %v3872_v55 = vadd.f32 %v12737_v25, %v3677_v9  ;;  %v3870_v22 = vadd.f32 %v12747_v40, %v3675_v39 }
 0x2c3   :  { %v4266_v30 = vadd.f32 %v4265_v57, %v12811_v11  ;;  %v4302_v21 = vadd.f32 %v4301_v62, %v4287_v63  ;;  %v12832_v38 = vadd.f32 %v4214_v47, %v4059_v35  ;;  %v10613_v13 = vpop.f32.mrf.mxu0  ;;  %v4292_v59 = vmul.f32 %v12844_v27, %v12844_v27 }
 0x2c4   :  { %v10634_v4 = vpop.f32.mrf.mxu1  ;;  %v4065_v51 = vadd.f32 %v10613_v13, %v3871_v53 }
 0x2c5   :  { %v4303_v2 = vadd.f32 %v4302_v21, %v4288_v46  ;;  %v4267_v23 = vadd.f32 %v4266_v30, %v12821_v48  ;;  %v4290_v5 = vmul.f32 %v12832_v38, %v12832_v38  ;;  %v4036_v0 = vpop.f32.mrf.mxu0  ;;  %v12852_v1 = vadd.f32 %v10634_v4, %v4062_v32 }
 0x2c6   :  { %v4217_v54 = vpop.f32.mrf.mxu1  ;;  %v4063_v16 = vadd.f32 %v4036_v0, %v3869_v31 }
 0x2c7   :  { %v4268_v12 = vadd.f32 %v4267_v23, %v12832_v38  ;;  %v4304_v49 = vadd.f32 %v4303_v2, %v4289_v50  ;;  %v12849_v56 = vadd.f32 %v4217_v54, %v4060_v41  ;;  %v10614_v17 = vpop.f32.mrf.mxu0  ;;  %v4293_v63 = vmul.f32 %v12852_v1, %v12852_v1 }
 0x2c8   :  { %v10637_v7 = vpop.f32.mrf.mxu1  ;;  %v4066_v40 = vadd.f32 %v10614_v17, %v3872_v55 }
 0x2c9   :  { %v4305_v18 = vadd.f32 %v4304_v49, %v4290_v5  ;;  %v4269_v52 = vadd.f32 %v4268_v12, %v12849_v56  ;;  %v4291_v19 = vmul.f32 %v12849_v56, %v12849_v56  ;;  %v4039_v35 = vpop.f32.mrf.mxu0  ;;  %v12867_v29 = vadd.f32 %v10637_v7, %v4065_v51 }
 0x2ca   :  { %v4230_v14 = vpop.f32.mrf.mxu1  ;;  %v4064_v57 = vadd.f32 %v4039_v35, %v3870_v22 }
 0x2cb   :  { %v4270_v10 = vadd.f32 %v4269_v52, %v12844_v27  ;;  %v4306_v28 = vadd.f32 %v4305_v18, %v4291_v19  ;;  %v12862_v36 = vadd.f32 %v4230_v14, %v4063_v16  ;;  %v4296_v34 = vmul.f32 %v12867_v29, %v12867_v29 }
 0x2cc   :  { %v10638_v62 = vpop.f32.mrf.mxu1 }
 0x2cd   :  { %v4307_v8 = vadd.f32 %v4306_v28, %v4292_v59  ;;  %v4271_v25 = vadd.f32 %v4270_v10, %v12852_v1  ;;  %v4294_v42 = vmul.f32 %v12862_v36, %v12862_v36  ;;  %v12872_v21 = vadd.f32 %v10638_v62, %v4066_v40 }
 0x2ce   :  { %v4233_v15 = vpop.f32.mrf.mxu1 }
 0x2cf   :  { %v4272_v37 = vadd.f32 %v4271_v25, %v12862_v36  ;;  %v4308_v47 = vadd.f32 %v4307_v8, %v4293_v63  ;;  %v4258_v46 = vadd.f32 %v4233_v15, %v4064_v57  ;;  %v4297_v61 = vmul.f32 %v12872_v21, %v12872_v21 }
 0x2d1   :  { %v4309_v30 = vadd.f32 %v4308_v47, %v4294_v42  ;;  %v4273_v24 = vadd.f32 %v4272_v37, %v4258_v46  ;;  %v4295_v20 = vmul.f32 %v4258_v46, %v4258_v46 }
 0x2d3   :  { %v4274_v3 = vadd.f32 %v4273_v24, %v12867_v29  ;;  %v4310_v60 = vadd.f32 %v4309_v30, %v4295_v20 }
 0x2d5   :  { %v4275_v58 = vadd.f32 %v4274_v3, %v12872_v21  ;;  %v4311_v4 = vadd.f32 %v4310_v60, %v4296_v34 }
 0x2d7   :  { %v4276_v41 = vrot.slane %v4275_v58, 4  ;;  %v4312_v50 = vadd.f32 %v4311_v4, %v4297_v61 }
 0x2d9   :  { %v4277_v2 = vadd.f32 %v4276_v41, %v4275_v58  ;;  %v4313_v23 = vrot.slane %v4312_v50, 4 }
 0x2db   :  { %v4278_v32 = vrot.slane %v4277_v2, 2  ;;  %v4314_v13 = vadd.f32 %v4313_v23, %v4312_v50 }
 0x2dd   :  { %v4279_v31 = vadd.f32 %v4278_v32, %v4277_v2  ;;  %v4315_v9 = vrot.slane %v4314_v13, 2 }
 0x2df   :  { %v4280_v39 = vrot.slane %v4279_v31, 1  ;;  %v4316_v54 = vadd.f32 %v4315_v9, %v4314_v13 }
 0x2e1   :  { %v4281_v12 = vadd.f32 %v4280_v39, %v4279_v31  ;;  %v4317_v5 = vrot.slane %v4316_v54, 1 }
 0x2e3   :  { %v4318_v49 = vadd.f32 %v4317_v5, %v4316_v54  ;;  %v12880_v0 = vmul.f32 0.0078125, %v4281_v12 }
 0x2e5   :  { %v4320_v53 = vmul.f32 0.0078125, %v4318_v49  ;;  %v4321_v7 = vmul.f32 %v12880_v0, %v12880_v0  ;;  %v4337_v16 = vsub.f32 %v4258_v46, %v12880_v0  ;;  %v4328_v18 = vsub.f32 %v12797_v26, %v12880_v0 }
 0x2e6   :  { %v4329_v52 = vsub.f32 %v12816_v6, %v12880_v0  ;;  %v4324_v19 = vsub.f32 %v12769_v33, %v12880_v0  ;;  %v4325_v17 = vsub.f32 %v12778_v44, %v12880_v0  ;;  %v4330_v55 = vsub.f32 %v12811_v11, %v12880_v0 }
 0x2e7   :  { %v4322_v22 = vsub.f32 %v4320_v53, %v4321_v7  ;;  %v4331_v51 = vsub.f32 %v12821_v48, %v12880_v0  ;;  %v4326_v14 = vsub.f32 %v12776_v45, %v12880_v0  ;;  %v4327_v26 = vsub.f32 %v12785_v43, %v12880_v0 }
 0x2e8   :  { %v4334_v6 = vsub.f32 %v12844_v27, %v12880_v0  ;;  %v4335_v33 = vsub.f32 %v12852_v1, %v12880_v0  ;;  %v4338_v44 = vsub.f32 %v12867_v29, %v12880_v0  ;;  %v4339_v11 = vsub.f32 %v12872_v21, %v12880_v0 }
 0x2e9   :  { %v4323_v59 = vmax.f32 %v4322_v22, 0.0  ;;  %v4332_v48 = vsub.f32 %v12832_v38, %v12880_v0  ;;  %v4333_v45 = vsub.f32 %v12849_v56, %v12880_v0  ;;  %v4336_v43 = vsub.f32 %v12862_v36, %v12880_v0  ;;  %v4470_v36 = vld [vmem:[%s15666_s5 + $0xc0] sm:$0xff] }
 0x2ea   :  { %v4474_v0 = vld [vmem:[%s15666_s5 + $0xe0] sm:$0xff] }
 0x2eb   :  { %v4340_v27 = vadd.f32 1e-05, %v4323_v59  ;;  %v4471_v59 = vld [vmem:[%s15666_s5 + $0xc8] sm:$0xff] }
 0x2ed   :  { %10806 = vrsqrt.f32 %v4340_v27  ;;  %v4475_v27 = vld [vmem:[%s15666_s5 + $0xe8] sm:$0xff] }
 0x2fa   :  { %v12915_v10 = vpop.eup %10806 }
 0x2fb   :  { %v12918_v1 = vmul.f32 %v12915_v10, %v4337_v16  ;;  %v4346_v28 = vmul.f32 %v12915_v10, %v4328_v18  ;;  %v4347_v35 = vmul.f32 %v12915_v10, %v4329_v52  ;;  %v4342_v62 = vmul.f32 %v12915_v10, %v4324_v19 }
 0x2fc   :  { %v4343_v38 = vmul.f32 %v12915_v10, %v4325_v17  ;;  %v4348_v57 = vmul.f32 %v12915_v10, %v4330_v55  ;;  %v4349_v63 = vmul.f32 %v12915_v10, %v4331_v51  ;;  %v4344_v8 = vmul.f32 %v12915_v10, %v4326_v14 }
 0x2fd   :  { %v12928_v25 = vmul.f32 0.2, %v12918_v1  ;;  %vm4362_vm7 = vcmp.ge.f32.partialorder %v4346_v28, 0.0  ;;  %vm4363_vm8 = vcmp.ge.f32.partialorder %v4347_v35, 0.0  ;;  %v4378_v40 = vmul.f32 0.2, %v4346_v28 }
 0x2fe   :  { %v4379_v29 = vmul.f32 0.2, %v4347_v35  ;;  %vm4358_vm9 = vcmp.ge.f32.partialorder %v4342_v62, 0.0  ;;  %vm4359_vm10 = vcmp.ge.f32.partialorder %v4343_v38, 0.0  ;;  %v4374_v15 = vmul.f32 0.2, %v4342_v62 }
 0x2ff   :  { %v4394_v37 = vsel %vm4362_vm7, %v4346_v28, %v4378_v40  ;;  %v4375_v42 = vmul.f32 0.2, %v4343_v38  ;;  %vm4364_vm11 = vcmp.ge.f32.partialorder %v4348_v57, 0.0  ;;  %vm4365_vm12 = vcmp.ge.f32.partialorder %v4349_v63, 0.0  ;;  %v4455_v40 = vld [vmem:[%s15666_s5 + $0x48] sm:$0xff] }
 0x300   :  { %v4395_v47 = vsel %vm4363_vm8, %v4347_v35, %v4379_v29  ;;  %v4390_v46 = vsel %vm4358_vm9, %v4342_v62, %v4374_v15  ;;  %v4380_v30 = vmul.f32 0.2, %v4348_v57  ;;  %v4381_v21 = vmul.f32 0.2, %v4349_v63  ;;  %v4459_v29 = vld [vmem:[%s15666_s5 + $0x68] sm:$0xff] }
 0x301   :  { %v4408_v24 = vpack.c.bf16 %v4395_v47, %v4394_v37  ;;  %v4391_v20 = vsel %vm4359_vm10, %v4343_v38, %v4375_v42  ;;  %v4345_v34 = vmul.f32 %v12915_v10, %v4327_v26  ;;  %vm4360_vm13 = vcmp.ge.f32.partialorder %v4344_v8, 0.0  ;;  %v4463_v38 = vld [vmem:[%s15666_s5 + $0x88] sm:$0xff] }
 0x302   :  { %v4406_v3 = vpack.c.bf16 %v4391_v20, %v4390_v46  ;;  %v4396_v60 = vsel %vm4364_vm11, %v4348_v57, %v4380_v30  ;;  %v4397_v61 = vsel %vm4365_vm12, %v4349_v63, %v4381_v21  ;;  %v4376_v58 = vmul.f32 0.2, %v4344_v8  ;;  %v4467_v57 = vld [vmem:[%s15666_s5 + $0xa8] sm:$0xff]  ;;  %v4454_v63 = vld [vmem:[%s15666_s5 + $0x40] sm:$0xff] }
 0x303   :  { %4486 = vrot.lane.b32.xlu1 %v4408_v24, %s10889_s3  ;;  %v12932_v4 = vpack.c.bf16 %v4397_v61, %v4396_v60  ;;  %vm4361_vm14 = vcmp.ge.f32.partialorder %v4345_v34, 0.0  ;;  %v4377_v41 = vmul.f32 0.2, %v4345_v34  ;;  %v4352_v50 = vmul.f32 %v12915_v10, %v4334_v6  ;;  %v4446_v46 = vld [vmem:[%s15666_s5] sm:$0xff]  ;;  %v4447_v21 = vld [vmem:[%s15666_s5 + $0x8] sm:$0xff] }
 0x304   :  { %4482 = vrot.lane.b32.xlu0 %v4406_v3, %s10889_s3  ;;  %v4392_v2 = vsel %vm4360_vm13, %v4344_v8, %v4376_v58  ;;  %v4353_v23 = vmul.f32 %v12915_v10, %v4335_v33  ;;  %v4356_v32 = vmul.f32 %v12915_v10, %v4338_v44  ;;  %v4357_v13 = vmul.f32 %v12915_v10, %v4339_v11  ;;  %v4450_v30 = vld [vmem:[%s15666_s5 + $0x20] sm:$0xff] }
 0x305   :  { %v4393_v31 = vsel %vm4361_vm14, %v4345_v34, %v4377_v41  ;;  %vm4368_vm15 = vcmp.ge.f32.partialorder %v4352_v50, 0.0  ;;  %v4384_v9 = vmul.f32 0.2, %v4352_v50  ;;  %v4350_v39 = vmul.f32 %v12915_v10, %v4332_v48  ;;  %v4476_v41 = vld [vmem:[%s15666_s5 + $0xf0] sm:$0xff] }
 0x306   :  { %v4407_v54 = vpack.c.bf16 %v4393_v31, %v4392_v2  ;;  %vm4369_vm1 = vcmp.ge.f32.partialorder %v4353_v23, 0.0  ;;  %v4385_v12 = vmul.f32 0.2, %v4353_v23  ;;  %vm4372_vm2 = vcmp.ge.f32.partialorder %v4356_v32, 0.0 }
 0x307   :  { %4488 = vrot.lane.b32.xlu1 %v12932_v4, %s10889_s3  ;;  %v4400_v5 = vsel %vm4368_vm15, %v4352_v50, %v4384_v9  ;;  %vm4373_vm3 = vcmp.ge.f32.partialorder %v4357_v13, 0.0  ;;  %v4388_v49 = vmul.f32 0.2, %v4356_v32  ;;  %v4389_v53 = vmul.f32 0.2, %v4357_v13  ;;  %v4473_v50 = vld [vmem:[%s15666_s5 + $0xd8] sm:$0xff] }
 0x308   :  { %4484 = vrot.lane.b32.xlu0 %v4407_v54, %s10889_s3  ;;  %v4401_v7 = vsel %vm4369_vm1, %v4353_v23, %v4385_v12  ;;  %v4351_v16 = vmul.f32 %v12915_v10, %v4333_v45  ;;  %vm4366_vm4 = vcmp.ge.f32.partialorder %v4350_v39, 0.0  ;;  %v4382_v18 = vmul.f32 0.2, %v4350_v39 }
 0x309   :  { %v12947_v52 = vpack.c.bf16 %v4401_v7, %v4400_v5  ;;  %v4404_v19 = vsel %vm4372_vm2, %v4356_v32, %v4388_v49  ;;  %v4405_v17 = vsel %vm4373_vm3, %v4357_v13, %v4389_v53  ;;  %v4354_v55 = vmul.f32 %v12915_v10, %v4336_v43  ;;  %v4462_v10 = vld [vmem:[%s15666_s5 + $0x80] sm:$0xff]  ;;  %v4477_v32 = vld [vmem:[%s15666_s5 + $0xf8] sm:$0xff]  ;;  %v4464_v5 = vld [vmem:[%s15666_s5 + $0x90] sm:$0xff] }
 0x30a   :  { %v12953_v22 = vpack.c.bf16 %v4405_v17, %v4404_v19  ;;  %vm4367_vm5 = vcmp.ge.f32.partialorder %v4351_v16, 0.0  ;;  %v4383_v51 = vmul.f32 0.2, %v4351_v16  ;;  %v4398_v14 = vsel %vm4366_vm4, %v4350_v39, %v4382_v18  ;;  %v4468_v49 = vld [vmem:[%s15666_s5 + $0xb0] sm:$0xff]  ;;  %v4465_v53 = vld [vmem:[%s15666_s5 + $0x98] sm:$0xff] }
 0x30b   :  { %vm4370_vm6 = vcmp.ge.f32.partialorder %v4354_v55, 0.0  ;;  %vm4371_vm7 = vcmp.ge.f32.partialorder %v12918_v1, 0.0  ;;  %v4386_v56 = vmul.f32 0.2, %v4354_v55  ;;  %v15748_v48 = vmov 0   ;;  %v4469_v7 = vld [vmem:[%s15666_s5 + $0xb8] sm:$0xff] }
 0x30c   :  { %v4399_v26 = vsel %vm4367_vm5, %v4351_v16, %v4383_v51  ;;  %v4403_v6 = vsel %vm4371_vm7, %v12918_v1, %v12928_v25  ;;  %4714 = vmatprep.mubr.bf16.mxu0 %v15748_v48  ;;  %4787 = vmatprep.mubr.bf16.mxu1 %v15748_v48  ;;  %v12973_v45 = vcombine.low %v4470_v36, %v4474_v0  ;;  %v4466_v1 = vld [vmem:[%s15666_s5 + $0xa0] sm:$0xff]  ;;  %v4456_v19 = vld [vmem:[%s15666_s5 + $0x50] sm:$0xff] }
 0x30d   :  { %v12958_v33 = vpack.c.bf16 %v4399_v26, %v4398_v14  ;;  %v4402_v44 = vsel %vm4370_vm6, %v4354_v55, %v4386_v56  ;;  %v12975_v43 = vcombine.high %v4470_v36, %v4474_v0  ;;  %v12986_v28 = vcombine.low %v4471_v59, %v4475_v27  ;;  %v4458_v25 = vld [vmem:[%s15666_s5 + $0x60] sm:$0xff]  ;;  %v4460_v17 = vld [vmem:[%s15666_s5 + $0x70] sm:$0xff]  ;;  %v4457_v55 = vld [vmem:[%s15666_s5 + $0x58] sm:$0xff] }
 0x30e   :  { %v12960_v11 = vpack.c.bf16 %v4403_v6, %v4402_v44  ;;  %v12988_v35 = vcombine.high %v4471_v59, %v4475_v27  ;;  %v12990_v62 = vcombine.high %v4462_v10, %v4466_v1  ;;  %v13002_v8 = vcombine.high %v4463_v38, %v4467_v57  ;;  %v4448_v6 = vld [vmem:[%s15666_s5 + $0x10] sm:$0xff]  ;;  %v4449_v44 = vld [vmem:[%s15666_s5 + $0x18] sm:$0xff] }
 0x30f   :  { %4690 = vmatprep.subr.bf16.mxu0 %v12975_v43  ;;  %v13015_v15 = vcombine.low %v4462_v10, %v4466_v1  ;;  %v13019_v37 = vcombine.low %v4463_v38, %v4467_v57  ;;  %v13023_v42 = vcombine.high %v4454_v63, %v4458_v25  ;;  %v13025_v47 = vcombine.high %v4455_v40, %v4459_v29  ;;  %v4438_v1 = vld [vmem:[%s15667_s4 + $0xc0] sm:$0xff]  ;;  %v4439_v57 = vld [vmem:[%s15667_s4 + $0xc8] sm:$0xff] }
 0x310   :  { %4691 = vmatpush1.bf16.msra.mxu0 %v12973_v45  ;;  %4763 = vmatprep.subr.bf16.mxu1 %v12988_v35  ;;  %v13040_v20 = vcombine.low %v4454_v63, %v4458_v25  ;;  %v13045_v34 = vcombine.low %v4455_v40, %v4459_v29  ;;  %v13054_v61 = vcombine.low %v4446_v46, %v4450_v30  ;;  %v4442_v38 = vld [vmem:[%s15667_s4 + $0xe0] sm:$0xff]  ;;  %v4443_v63 = vld [vmem:[%s15667_s4 + $0xe8] sm:$0xff] }
 0x311   :  { %4764 = vmatpush1.bf16.msra.mxu1 %v12986_v28  ;;  %4692 = vmatprep.subr.bf16.mxu0 %v12990_v62  ;;  %v13082_v13 = vcombine.low %v4473_v50, %v4477_v32  ;;  %v13084_v31 = vcombine.high %v4473_v50, %v4477_v32  ;;  %v13109_v18 = vcombine.high %v4464_v5, %v4468_v49  ;;  %v4434_v32 = vld [vmem:[%s15667_s4 + $0xa0] sm:$0xff] }
 0x312   :  { %4765 = vmatprep.subr.bf16.mxu1 %v13002_v8  ;;  %v13133_v51 = vcombine.low %v4464_v5, %v4468_v49  ;;  %v13135_v14 = vcombine.low %v4465_v53, %v4469_v7  ;;  %v13139_v56 = vcombine.high %v4456_v19, %v4460_v17  ;;  %v13159_v0 = vcombine.low %v4456_v19, %v4460_v17  ;;  %v4423_v19 = vld [vmem:[%s15667_s4 + $0x48] sm:$0xff] }
 0x313   :  { %v13195_v29 = vcombine.high %v4438_v1, %v4442_v38  ;;  %v4427_v17 = vld [vmem:[%s15667_s4 + $0x68] sm:$0xff] }
 0x314   :  { %4693 = vmatpush1.bf16.msra.mxu0 %v13015_v15 }
 0x315   :  { %4766 = vmatpush1.bf16.msra.mxu1 %v13019_v37  ;;  %4694 = vmatprep.subr.bf16.mxu0 %v13023_v42 }
 0x316   :  { %4767 = vmatprep.subr.bf16.mxu1 %v13025_v47 }
 0x318   :  { %4695 = vmatpush1.bf16.msra.mxu0 %v13040_v20 }
 0x319   :  { %4768 = vmatpush1.bf16.msra.mxu1 %v13045_v34 }
 0x32a   :  { %4974 = vxpose.xlu1.c.b16.start [1/4] (short) (narrow) %v4406_v3, 64  ;;  %v13049_v3 = vcombine.high %v4446_v46, %v4450_v30  ;;  %v13197_v46 = vcombine.high %v4439_v57, %v4443_v63 }
 0x32c   :  { %4696 = vmatprep.subr.bf16.mxu0 %v13049_v3 }
 0x32d   :  { %4697 = vmatpush1.bf16.msra.mxu0 %v13054_v61 }
 0x32e   :  { %4975 = vxpose.xlu1.c.b16.cont [2/4] (short) (narrow) %v4407_v54, 64 }
 0x332   :  { %4976 = vxpose.xlu1.c.b16.cont [3/4] (short) (narrow) %v4408_v24, 64  ;;  %v4451_v24 = vld [vmem:[%s15666_s5 + $0x28] sm:$0xff] }
 0x333   :  { %v13051_v60 = vcombine.high %v4447_v21, %v4451_v24  ;;  %v13059_v58 = vcombine.low %v4447_v21, %v4451_v24 }
 0x335   :  { %4769 = vmatprep.subr.bf16.mxu1 %v13051_v60 }
 0x336   :  { %4977 = vxpose.xlu1.c.b16.end [4/4] (short) (narrow) %v12932_v4, 64  ;;  %4770 = vmatpush1.bf16.msra.mxu1 %v13059_v58  ;;  %v4472_v4 = vld [vmem:[%s15666_s5 + $0xd0] sm:$0xff] }
 0x337   :  { %v13075_v2 = vcombine.low %v4472_v4, %v4476_v41  ;;  %v13077_v23 = vcombine.high %v4472_v4, %v4476_v41  ;;  %4909 = vmatprep.subr.bf16.mxu1 %v13084_v31  ;;  %v4430_v41 = vld [vmem:[%s15667_s4 + $0x80] sm:$0xff] }
 0x338   :  { %v13241_v5 = vcombine.high %v4430_v41, %v4434_v32 }
 0x339   :  { %4836 = vmatprep.subr.bf16.mxu0 %v13077_v23 }
 0x33a   :  { %5588 = vrot.lane.b32.xlu1 %v12947_v52, %s10889_s3 }
 0x33e   :  { %5592 = vrot.lane.b32.xlu1 %v12953_v22, %s10889_s3 }
 0x361   :  { %6078 = vxpose.xlu1.c.b16.start [1/4] (short) (narrow) %v12958_v33, 64 }
 0x365   :  { %6079 = vxpose.xlu1.c.b16.cont [2/4] (short) (narrow) %v12947_v52, 64  ;;  %v13111_v52 = vcombine.high %v4465_v53, %v4469_v7  ;;  %v4422_v53 = vld [vmem:[%s15667_s4 + $0x40] sm:$0xff] }
 0x366   :  { %v4426_v7 = vld [vmem:[%s15667_s4 + $0x60] sm:$0xff] }
 0x369   :  { %6080 = vxpose.xlu1.c.b16.cont [3/4] (short) (narrow) %v12960_v11, 64 }
 0x36d   :  { %6081 = vxpose.xlu1.c.b16.end [4/4] (short) (narrow) %v12953_v22, 64  ;;  %v4461_v22 = vld [vmem:[%s15666_s5 + $0x78] sm:$0xff] }
 0x36e   :  { %v13141_v26 = vcombine.high %v4457_v55, %v4461_v22  ;;  %v13161_v59 = vcombine.low %v4457_v55, %v4461_v22 }
 0x375   :  { %v4487_v54 = vpop.permute.xlu1 %4486 }
 0x376   :  { %v4483_v9 = vpop.permute.xlu0 %4482 }
 0x377   :  { %4494 = vxpose.xlu0.c.b16.start [1/4] (short) (narrow) %v4483_v9, 64  ;;  %v4431_v9 = vld [vmem:[%s15667_s4 + $0x88] sm:$0xff] }
 0x379   :  { %v4489_v12 = vpop.permute.xlu1 %4488 }
 0x37a   :  { %v4485_v39 = vpop.permute.xlu0 %4484 }
 0x37b   :  { %4495 = vxpose.xlu0.c.b16.cont [2/4] (short) (narrow) %v4485_v39, 64  ;;  %v4435_v39 = vld [vmem:[%s15667_s4 + $0xa8] sm:$0xff] }
 0x37c   :  { %v13243_v49 = vcombine.high %v4431_v9, %v4435_v39  ;;  %v13269_v22 = vcombine.low %v4431_v9, %v4435_v39 }
 0x37f   :  { %4496 = vxpose.xlu0.c.b16.cont [3/4] (short) (narrow) %v4487_v54, 64  ;;  %v13237_v54 = vcombine.low %v4438_v1, %v4442_v38  ;;  %v4418_v1 = vld [vmem:[%s15667_s4 + $0x20] sm:$0xff]  ;;  %v4415_v38 = vld [vmem:[%s15667_s4 + $0x8] sm:$0xff] }
 0x383   :  { %4497 = vxpose.xlu0.c.b16.end [4/4] (short) (narrow) %v4489_v12, 64  ;;  %v13239_v12 = vcombine.low %v4439_v57, %v4443_v63  ;;  %v4419_v57 = vld [vmem:[%s15667_s4 + $0x28] sm:$0xff]  ;;  %v13291_v63 = vcombine.low %v4422_v53, %v4426_v7 }
 0x384   :  { %v13303_v39 = vcombine.high %v4415_v38, %v4419_v57 }
 0x385   :  { %16120 = vst [vmem:[#allocation28_spill] sm:$0xff] %v13291_v63 }
 0x386   :  { %16123 = vst [vmem:[#allocation29_spill] sm:$0xff] %v13303_v39 }
 0x38c   :  { %5586 = vrot.lane.b32.xlu0 %v12958_v33, %s10889_s3  ;;  %v4452_v33 = vld [vmem:[%s15666_s5 + $0x30] sm:$0xff]  ;;  %v13205_v21 = vpop.trf.xlu1 }
 0x38d   :  { %v13165_v27 = vcombine.high %v4448_v6, %v4452_v33  ;;  %v13189_v25 = vcombine.low %v4448_v6, %v4452_v33  ;;  %v13273_v6 = vcombine.high %v4422_v53, %v4426_v7  ;;  %v13275_v33 = vcombine.high %v4423_v19, %v4427_v17  ;;  %v4440_v53 = vld [vmem:[%s15667_s4 + $0xd0] sm:$0xff] }
 0x38e   :  { %v4444_v7 = vld [vmem:[%s15667_s4 + $0xf0] sm:$0xff] }
 0x390   :  { %5590 = vrot.lane.b32.xlu0 %v12960_v11, %s10889_s3  ;;  %v4453_v11 = vld [vmem:[%s15666_s5 + $0x38] sm:$0xff]  ;;  %v13215_v4 = vpop.trf.xlu1 }
 0x391   :  { %v13167_v10 = vcombine.high %v4449_v44, %v4453_v11  ;;  %v13191_v40 = vcombine.low %v4449_v44, %v4453_v11  ;;  %v4414_v11 = vld [vmem:[%s15667_s4] sm:$0xff] }
 0x394   :  { %v13226_v50 = vpop.trf.xlu1 }
 0x398   :  { %v13263_v55 = vpop.trf.xlu1 }
 0x3ac   :  { %v5589_v9 = vpop.permute.xlu1 %5588 }
 0x3d9   :  { %v13107_v16 = vpop.trf.xlu0 }
 0x3da   :  { %9458 = vmatmul.mubr.msk.bf16.vlgmr.msra.gmra.mxu0 %vm30_vm0, %v13107_v16  ;;  %9462 = vmatmul.mubr.msk.bf16.vlgmr.msra.gmra.mxu1 %vm30_vm0, %v13107_v16 }
 0x3db   :  { %4724 = vmatprep.mubr.bf16.mxu0 %v15748_v48  ;;  %4797 = vmatprep.mubr.bf16.mxu1 %v15748_v48 }
 0x3dc   :  { %4837 = vmatpush1.bf16.msra.mxu0 %v13075_v2  ;;  %4910 = vmatpush1.bf16.msra.mxu1 %v13082_v13 }
 0x3dd   :  { %4838 = vmatprep.subr.bf16.mxu0 %v13109_v18  ;;  %4911 = vmatprep.subr.bf16.mxu1 %v13111_v52  ;;  %v13155_v36 = vpop.trf.xlu0 }
 0x3e0   :  { %4839 = vmatpush1.bf16.msra.mxu0 %v13133_v51  ;;  %4912 = vmatpush1.bf16.msra.mxu1 %v13135_v14 }
 0x3e1   :  { %4840 = vmatprep.subr.bf16.mxu0 %v13139_v56  ;;  %4913 = vmatprep.subr.bf16.mxu1 %v13141_v26  ;;  %v13199_v30 = vpop.trf.xlu0 }
 0x3e2   :  { %9459 = vmatmul.mubr.msk.bf16.gmra.mxu0 %vm30_vm0, %v13155_v36  ;;  %9463 = vmatmul.mubr.msk.bf16.gmra.mxu1 %vm30_vm0, %v13155_v36 }
 0x3e3   :  { %4734 = vmatprep.mubr.bf16.mxu0 %v15748_v48  ;;  %4807 = vmatprep.mubr.bf16.mxu1 %v15748_v48 }
 0x3e4   :  { %4841 = vmatpush1.bf16.msra.mxu0 %v13159_v0  ;;  %4914 = vmatpush1.bf16.msra.mxu1 %v13161_v59 }
 0x3e5   :  { %4842 = vmatprep.subr.bf16.mxu0 %v13165_v27  ;;  %4915 = vmatprep.subr.bf16.mxu1 %v13167_v10  ;;  %v13213_v24 = vpop.trf.xlu0 }
 0x3e8   :  { %4843 = vmatpush1.bf16.msra.mxu0 %v13189_v25  ;;  %4916 = vmatpush1.bf16.msra.mxu1 %v13191_v40 }
 0x3e9   :  { %5170 = vmatprep.subr.bf16.mxu0 %v13195_v29  ;;  %5243 = vmatprep.subr.bf16.mxu1 %v13197_v46 }
 0x3ea   :  { %9460 = vmatmul.mubr.msk.bf16.gmra.mxu0 %vm30_vm0, %v13199_v30  ;;  %9464 = vmatmul.mubr.msk.bf16.gmra.mxu1 %vm30_vm0, %v13199_v30 }
 0x3eb   :  { %4744 = vmatprep.mubr.bf16.mxu0 %v15748_v48  ;;  %4817 = vmatprep.mubr.bf16.mxu1 %v15748_v48 }
 0x3f2   :  { %9461 = vmatmul.mubr.msk.bf16.gmra.mxu0 %vm30_vm0, %v13213_v24  ;;  %9465 = vmatmul.mubr.msk.bf16.gmra.mxu1 %vm30_vm0, %v13213_v24 }
 0x3f3   :  { %4860 = vmatprep.mubr.bf16.mxu0 %v15748_v48  ;;  %4933 = vmatprep.mubr.bf16.mxu1 %v15748_v48 }
 0x3fa   :  { %9466 = vmatmul.mubr.msk.bf16.vlgmr.msra.gmra.mxu0 %vm30_vm0, %v13107_v16  ;;  %9470 = vmatmul.mubr.msk.bf16.vlgmr.msra.gmra.mxu1 %vm30_vm0, %v13107_v16  ;;  %v13267_v16 = vcombine.low %v4430_v41, %v4434_v32  ;;  %v13294_v41 = vcombine.low %v4423_v19, %v4427_v17  ;;  %v13297_v32 = vcombine.high %v4414_v11, %v4418_v1 }
 0x3fb   :  { %4870 = vmatprep.mubr.bf16.mxu0 %v15748_v48  ;;  %4943 = vmatprep.mubr.bf16.mxu1 %v15748_v48  ;;  %v13314_v19 = vcombine.low %v4414_v11, %v4418_v1  ;;  %v13320_v17 = vcombine.high %v4440_v53, %v4444_v7  ;;  %v5593_v1 = vpop.permute.xlu1 %5592 }
 0x3fc   :  { %5171 = vmatpush1.bf16.msra.mxu0 %v13237_v54  ;;  %5244 = vmatpush1.bf16.msra.mxu1 %v13239_v12  ;;  %16121 = vst [vmem:[#allocation24_spill] sm:$0xff] %v13294_v41  ;;  %16122 = vst [vmem:[#allocation32_spill] sm:$0xff] %v13297_v32 }
 0x3fd   :  { %5172 = vmatprep.subr.bf16.mxu0 %v13241_v5  ;;  %5245 = vmatprep.subr.bf16.mxu1 %v13243_v49  ;;  %16124 = vst [vmem:[#allocation35_spill] sm:$0xff] %v13314_v19  ;;  %16126 = vst [vmem:[#allocation37_spill] sm:$0xff] %v13320_v17 }
 0x3fe   :  { %v5587_v44 = vpop.permute.xlu0 %5586 }
 0x3ff   :  { %5598 = vxpose.xlu0.c.b16.start [1/4] (short) (narrow) %v5587_v44, 64  ;;  %v4441_v44 = vld [vmem:[%s15667_s4 + $0xd8] sm:$0xff] }
 0x400   :  { %5173 = vmatpush1.bf16.msra.mxu0 %v13267_v16  ;;  %5246 = vmatpush1.bf16.msra.mxu1 %v13269_v22 }
 0x401   :  { %5174 = vmatprep.subr.bf16.mxu0 %v13273_v6  ;;  %5247 = vmatprep.subr.bf16.mxu1 %v13275_v33 }
 0x402   :  { %9467 = vmatmul.mubr.msk.bf16.gmra.mxu0 %vm30_vm0, %v13155_v36  ;;  %9471 = vmatmul.mubr.msk.bf16.gmra.mxu1 %vm30_vm0, %v13155_v36  ;;  %v13318_v36 = vcombine.low %v4415_v38, %v4419_v57  ;;  %v16128_v38 = vmov 0   ;;  %v4433_v57 = vld [vmem:[%s15667_s4 + $0x98] sm:$0xff] }
 0x403   :  { %5599 = vxpose.xlu0.c.b16.cont [2/4] (short) (narrow) %v5589_v9, 64  ;;  %4880 = vmatprep.mubr.bf16.mxu0 %v15748_v48  ;;  %v4445_v9 = vld [vmem:[%s15667_s4 + $0xf8] sm:$0xff] }
 0x404   :  { %4953 = vmatprep.mubr.bf16.mxu1 %v15748_v48  ;;  %5175 = vmatpush1.bf16.msra.mxu0 %v13291_v63  ;;  %16125 = vst [vmem:[#allocation31_spill] sm:$0xff] %v13318_v36  ;;  %v5591_v48 = vpop.permute.xlu0 %5590  ;;  %v13330_v11 = vcombine.high %v4441_v44, %v4445_v9  ;;  %v4416_v63 = vld [vmem:[%s15667_s4 + $0x10] sm:$0xff] }
 0x405   :  { %5248 = vmatpush1.bf16.msra.mxu1 %v13294_v41  ;;  %5176 = vmatprep.subr.bf16.mxu0 %v13297_v32 }
 0x406   :  { %5249 = vmatprep.subr.bf16.mxu1 %v13303_v39  ;;  %16127 = vst [vmem:[#allocation33_spill] sm:$0xff] %v13330_v11 }
 0x407   :  { %5600 = vxpose.xlu0.c.b16.cont [3/4] (short) (narrow) %v5591_v48, 64  ;;  %v4432_v48 = vld [vmem:[%s15667_s4 + $0x90] sm:$0xff] }
 0x408   :  { %5177 = vmatpush1.bf16.msra.mxu0 %v13314_v19  ;;  %v4424_v19 = vld [vmem:[%s15667_s4 + $0x50] sm:$0xff] }
 0x409   :  { %5250 = vmatpush1.bf16.msra.mxu1 %v13318_v36  ;;  %5316 = vmatprep.subr.bf16.mxu0 %v13320_v17 }
 0x40a   :  { %9468 = vmatmul.mubr.msk.bf16.gmra.mxu0 %vm30_vm0, %v13199_v30  ;;  %9472 = vmatmul.mubr.msk.bf16.gmra.mxu1 %vm30_vm0, %v13199_v30  ;;  %v4436_v30 = vld [vmem:[%s15667_s4 + $0xb0] sm:$0xff] }
 0x40b   :  { %5601 = vxpose.xlu0.c.b16.end [4/4] (short) (narrow) %v5593_v1, 64  ;;  %4890 = vmatprep.mubr.bf16.mxu0 %v16128_v38  ;;  %v13359_v1 = vcombine.low %v4440_v53, %v4444_v7  ;;  %v13363_v17 = vcombine.high %v4432_v48, %v4436_v30  ;;  %v4428_v53 = vld [vmem:[%s15667_s4 + $0x70] sm:$0xff]  ;;  %v4425_v7 = vld [vmem:[%s15667_s4 + $0x58] sm:$0xff] }
 0x40c   :  { %4963 = vmatprep.mubr.bf16.mxu1 %v16128_v38  ;;  %5389 = vmatprep.subr.bf16.mxu1 %v13330_v11  ;;  %v13361_v11 = vcombine.low %v4441_v44, %v4445_v9  ;;  %v4429_v44 = vld [vmem:[%s15667_s4 + $0x78] sm:$0xff]  ;;  %v13387_v9 = vcombine.low %v4432_v48, %v4436_v30  ;;  %v13393_v32 = vcombine.high %v4424_v19, %v4428_v53 }
 0x40d   :  { %16130 = vst [vmem:[#allocation36_spill] sm:$0xff] %v13363_v17  ;;  %v13395_v41 = vcombine.high %v4425_v7, %v4429_v44  ;;  %v4417_v48 = vld [vmem:[%s15667_s4 + $0x18] sm:$0xff] }
 0x40e   :  { %16129 = vst [vmem:[#allocation38_spill] sm:$0xff] %v13361_v11  ;;  %v4421_v30 = vld [vmem:[%s15667_s4 + $0x38] sm:$0xff] }
 0x412   :  { %9469 = vmatmul.mubr.msk.bf16.gmra.mxu0 %vm30_vm0, %v13213_v24  ;;  %9473 = vmatmul.mubr.msk.bf16.gmra.mxu1 %vm30_vm0, %v13213_v24  ;;  %v4437_v24 = vld [vmem:[%s15667_s4 + $0xb8] sm:$0xff] }
 0x413   :  { %5194 = vmatprep.mubr.bf16.mxu0 %v16128_v38  ;;  %5267 = vmatprep.mubr.bf16.mxu1 %v16128_v38  ;;  %v13365_v36 = vcombine.high %v4433_v57, %v4437_v24  ;;  %v13389_v39 = vcombine.low %v4433_v57, %v4437_v24  ;;  %v13411_v57 = vcombine.low %v4424_v19, %v4428_v53 }
 0x414   :  { %v13413_v24 = vcombine.low %v4425_v7, %v4429_v44  ;;  %v13431_v53 = vcombine.low %v4417_v48, %v4421_v30 }
 0x415   :  { %16131 = vst [vmem:[#allocation42_spill] sm:$0xff] %v13365_v36 }
 0x41a   :  { %9506 = vmatmul.mubr.msk.bf16.vlgmr.msra.gmra.mxu0 %vm30_vm0, %v13205_v21  ;;  %9510 = vmatmul.mubr.msk.bf16.vlgmr.msra.gmra.mxu1 %vm30_vm0, %v13205_v21 }
 0x41b   :  { %5204 = vmatprep.mubr.bf16.mxu0 %v16128_v38  ;;  %5277 = vmatprep.mubr.bf16.mxu1 %v16128_v38 }
 0x41c   :  { %5317 = vmatpush1.bf16.msra.mxu0 %v13359_v1  ;;  %5390 = vmatpush1.bf16.msra.mxu1 %v13361_v11  ;;  %v4420_v11 = vld [vmem:[%s15667_s4 + $0x30] sm:$0xff] }
 0x41d   :  { %5318 = vmatprep.subr.bf16.mxu0 %v13363_v17  ;;  %5391 = vmatprep.subr.bf16.mxu1 %v13365_v36  ;;  %v13417_v36 = vcombine.high %v4416_v63, %v4420_v11  ;;  %v13419_v17 = vcombine.high %v4417_v48, %v4421_v30  ;;  %v13429_v19 = vcombine.low %v4416_v63, %v4420_v11 }
 0x420   :  { %5319 = vmatpush1.bf16.msra.mxu0 %v13387_v9  ;;  %5392 = vmatpush1.bf16.msra.mxu1 %v13389_v39 }
 0x421   :  { %5320 = vmatprep.subr.bf16.mxu0 %v13393_v32  ;;  %5393 = vmatprep.subr.bf16.mxu1 %v13395_v41 }
 0x422   :  { %9507 = vmatmul.mubr.msk.bf16.gmra.mxu0 %vm30_vm0, %v13215_v4  ;;  %9511 = vmatmul.mubr.msk.bf16.gmra.mxu1 %vm30_vm0, %v13215_v4 }
 0x423   :  { %5214 = vmatprep.mubr.bf16.mxu0 %v16128_v38  ;;  %5287 = vmatprep.mubr.bf16.mxu1 %v16128_v38 }
 0x424   :  { %5321 = vmatpush1.bf16.msra.mxu0 %v13411_v57  ;;  %5394 = vmatpush1.bf16.msra.mxu1 %v13413_v24 }
 0x425   :  { %5322 = vmatprep.subr.bf16.mxu0 %v13417_v36  ;;  %5395 = vmatprep.subr.bf16.mxu1 %v13419_v17 }
 0x428   :  { %5323 = vmatpush1.bf16.msra.mxu0 %v13429_v19  ;;  %5396 = vmatpush1.bf16.msra.mxu1 %v13431_v53 }
 0x429   :  { %5794 = vmatprep.subr.bf16.mxu0 %v12975_v43  ;;  %5867 = vmatprep.subr.bf16.mxu1 %v12988_v35 }
 0x42a   :  { %9508 = vmatmul.mubr.msk.bf16.gmra.mxu0 %vm30_vm0, %v13226_v50  ;;  %9512 = vmatmul.mubr.msk.bf16.gmra.mxu1 %vm30_vm0, %v13226_v50 }
 0x42b   :  { %5224 = vmatprep.mubr.bf16.mxu0 %v16128_v38  ;;  %5297 = vmatprep.mubr.bf16.mxu1 %v16128_v38 }
 0x432   :  { %9509 = vmatmul.mubr.msk.bf16.gmra.mxu0 %vm30_vm0, %v13263_v55  ;;  %9513 = vmatmul.mubr.msk.bf16.gmra.mxu1 %vm30_vm0, %v13263_v55 }
 0x433   :  { %5340 = vmatprep.mubr.bf16.mxu0 %v16128_v38  ;;  %5413 = vmatprep.mubr.bf16.mxu1 %v16128_v38 }
 0x43a   :  { %9514 = vmatmul.mubr.msk.bf16.vlgmr.msra.gmra.mxu0 %vm30_vm0, %v13205_v21  ;;  %9518 = vmatmul.mubr.msk.bf16.vlgmr.msra.gmra.mxu1 %vm30_vm0, %v13205_v21 }
 0x43b   :  { %5350 = vmatprep.mubr.bf16.mxu0 %v16128_v38  ;;  %5423 = vmatprep.mubr.bf16.mxu1 %v16128_v38 }
 0x43c   :  { %5795 = vmatpush1.bf16.msra.mxu0 %v12973_v45  ;;  %5868 = vmatpush1.bf16.msra.mxu1 %v12986_v28 }
 0x43d   :  { %5796 = vmatprep.subr.bf16.mxu0 %v12990_v62  ;;  %5869 = vmatprep.subr.bf16.mxu1 %v13002_v8  ;;  %v16132_v62 = vld [vmem:[#allocation28_spill] sm:$0xff] }
 0x43e   :  { %v16133_v8 = vld [vmem:[#allocation24_spill] sm:$0xff] }
 0x440   :  { %5797 = vmatpush1.bf16.msra.mxu0 %v13015_v15  ;;  %5870 = vmatpush1.bf16.msra.mxu1 %v13019_v37  ;;  %v16134_v15 = vld [vmem:[#allocation32_spill] sm:$0xff]  ;;  %v16135_v37 = vld [vmem:[#allocation29_spill] sm:$0xff] }
 0x441   :  { %5798 = vmatprep.subr.bf16.mxu0 %v13023_v42  ;;  %5871 = vmatprep.subr.bf16.mxu1 %v13025_v47  ;;  %v16136_v42 = vld [vmem:[#allocation35_spill] sm:$0xff] }
 0x442   :  { %9515 = vmatmul.mubr.msk.bf16.gmra.mxu0 %vm30_vm0, %v13215_v4  ;;  %9519 = vmatmul.mubr.msk.bf16.gmra.mxu1 %vm30_vm0, %v13215_v4  ;;  %v16137_v47 = vld [vmem:[#allocation31_spill] sm:$0xff] }
 0x443   :  { %5360 = vmatprep.mubr.bf16.mxu0 %v16128_v38  ;;  %5433 = vmatprep.mubr.bf16.mxu1 %v16128_v38 }
 0x444   :  { %5799 = vmatpush1.bf16.msra.mxu0 %v13040_v20  ;;  %5872 = vmatpush1.bf16.msra.mxu1 %v13045_v34  ;;  %v16138_v20 = vld [vmem:[#allocation37_spill] sm:$0xff] }
 0x445   :  { %5800 = vmatprep.subr.bf16.mxu0 %v13049_v3  ;;  %5873 = vmatprep.subr.bf16.mxu1 %v13051_v60  ;;  %v16139_v34 = vld [vmem:[#allocation33_spill] sm:$0xff] }
 0x448   :  { %5801 = vmatpush1.bf16.msra.mxu0 %v13054_v61  ;;  %5874 = vmatpush1.bf16.msra.mxu1 %v13059_v58 }
 0x449   :  { %5940 = vmatprep.subr.bf16.mxu0 %v13077_v23  ;;  %6013 = vmatprep.subr.bf16.mxu1 %v13084_v31 }
 0x44a   :  { %9516 = vmatmul.mubr.msk.bf16.gmra.mxu0 %vm30_vm0, %v13226_v50  ;;  %9520 = vmatmul.mubr.msk.bf16.gmra.mxu1 %vm30_vm0, %v13226_v50 }
 0x44b   :  { %5370 = vmatprep.mubr.bf16.mxu0 %v16128_v38  ;;  %5443 = vmatprep.mubr.bf16.mxu1 %v16128_v38 }
 0x452   :  { %9517 = vmatmul.mubr.msk.bf16.gmra.mxu0 %vm30_vm0, %v13263_v55  ;;  %9521 = vmatmul.mubr.msk.bf16.gmra.mxu1 %vm30_vm0, %v13263_v55 }
 0x453   :  { %5818 = vmatprep.mubr.bf16.mxu0 %v16128_v38  ;;  %5891 = vmatprep.mubr.bf16.mxu1 %v16128_v38 }
 0x461   :  { %v5606_v45 = vpop.trf.xlu0 }
 0x462   :  { %9554 = vmatmul.mubr.msk.bf16.vlgmr.msra.gmra.mxu0 %vm30_vm0, %v5606_v45  ;;  %9558 = vmatmul.mubr.msk.bf16.vlgmr.msra.gmra.mxu1 %vm30_vm0, %v5606_v45 }
 0x463   :  { %5941 = vmatpush1.bf16.msra.mxu0 %v13075_v2  ;;  %6014 = vmatpush1.bf16.msra.mxu1 %v13082_v13  ;;  %v13567_v13 = vpop.trf.xlu1 }
 0x464   :  { %5828 = vmatprep.mubr.bf16.mxu0 %v16128_v38  ;;  %5901 = vmatprep.mubr.bf16.mxu1 %v16128_v38 }
 0x465   :  { %5942 = vmatprep.subr.bf16.mxu0 %v13109_v18  ;;  %6015 = vmatprep.subr.bf16.mxu1 %v13111_v52  ;;  %v5607_v43 = vpop.trf.xlu0 }
 0x467   :  { %5943 = vmatpush1.bf16.msra.mxu0 %v13133_v51  ;;  %6016 = vmatpush1.bf16.msra.mxu1 %v13135_v14 }
 0x468   :  { %5944 = vmatprep.subr.bf16.mxu0 %v13139_v56  ;;  %6017 = vmatprep.subr.bf16.mxu1 %v13141_v26  ;;  %v16140_v26 = vld [vmem:[#allocation38_spill] sm:$0xff] }
 0x469   :  { %v5608_v28 = vpop.trf.xlu0 }
 0x46a   :  { %9555 = vmatmul.mubr.msk.bf16.gmra.mxu0 %vm30_vm0, %v5607_v43  ;;  %9559 = vmatmul.mubr.msk.bf16.gmra.mxu1 %vm30_vm0, %v5607_v43 }
 0x46b   :  { %5838 = vmatprep.mubr.bf16.mxu0 %v16128_v38  ;;  %5911 = vmatprep.mubr.bf16.mxu1 %v16128_v38 }
 0x46c   :  { %5945 = vmatpush1.bf16.msra.mxu0 %v13159_v0  ;;  %6018 = vmatpush1.bf16.msra.mxu1 %v13161_v59  ;;  %v16141_v0 = vld [vmem:[#allocation36_spill] sm:$0xff]  ;;  %v16142_v59 = vld [vmem:[#allocation42_spill] sm:$0xff] }
 0x46d   :  { %5946 = vmatprep.subr.bf16.mxu0 %v13165_v27  ;;  %6019 = vmatprep.subr.bf16.mxu1 %v13167_v10  ;;  %v5609_v35 = vpop.trf.xlu0 }
 0x470   :  { %5947 = vmatpush1.bf16.msra.mxu0 %v13189_v25  ;;  %6020 = vmatpush1.bf16.msra.mxu1 %v13191_v40  ;;  %v13595_v25 = vpop.trf.xlu1 }
 0x471   :  { %6274 = vmatprep.subr.bf16.mxu0 %v13195_v29  ;;  %6347 = vmatprep.subr.bf16.mxu1 %v13197_v46 }
 0x472   :  { %9556 = vmatmul.mubr.msk.bf16.gmra.mxu0 %vm30_vm0, %v5608_v28  ;;  %9560 = vmatmul.mubr.msk.bf16.gmra.mxu1 %vm30_vm0, %v5608_v28 }
 0x473   :  { %5848 = vmatprep.mubr.bf16.mxu0 %v16128_v38  ;;  %5921 = vmatprep.mubr.bf16.mxu1 %v16128_v38 }
 0x47a   :  { %9557 = vmatmul.mubr.msk.bf16.gmra.mxu0 %vm30_vm0, %v5609_v35  ;;  %9561 = vmatmul.mubr.msk.bf16.gmra.mxu1 %vm30_vm0, %v5609_v35 }
 0x47b   :  { %5964 = vmatprep.mubr.bf16.mxu0 %v16128_v38  ;;  %6037 = vmatprep.mubr.bf16.mxu1 %v16128_v38 }
 0x482   :  { %9562 = vmatmul.mubr.msk.bf16.vlgmr.msra.gmra.mxu0 %vm30_vm0, %v5606_v45  ;;  %9566 = vmatmul.mubr.msk.bf16.vlgmr.msra.gmra.mxu1 %vm30_vm0, %v5606_v45 }
 0x483   :  { %6275 = vmatpush1.bf16.msra.mxu0 %v13237_v54  ;;  %6348 = vmatpush1.bf16.msra.mxu1 %v13239_v12 }
 0x484   :  { %5974 = vmatprep.mubr.bf16.mxu0 %v16128_v38  ;;  %6047 = vmatprep.mubr.bf16.mxu1 %v16128_v38 }
 0x485   :  { %6276 = vmatprep.subr.bf16.mxu0 %v13241_v5  ;;  %6349 = vmatprep.subr.bf16.mxu1 %v13243_v49  ;;  %v6088_v5 = vpop.trf.xlu1 }
 0x487   :  { %6277 = vmatpush1.bf16.msra.mxu0 %v13267_v16  ;;  %6350 = vmatpush1.bf16.msra.mxu1 %v13269_v22 }
 0x488   :  { %6278 = vmatprep.subr.bf16.mxu0 %v13273_v6  ;;  %6351 = vmatprep.subr.bf16.mxu1 %v13275_v33 }
 0x48a   :  { %9563 = vmatmul.mubr.msk.bf16.gmra.mxu0 %vm30_vm0, %v5607_v43  ;;  %9567 = vmatmul.mubr.msk.bf16.gmra.mxu1 %vm30_vm0, %v5607_v43 }
 0x48b   :  { %5984 = vmatprep.mubr.bf16.mxu0 %v16128_v38  ;;  %6057 = vmatprep.mubr.bf16.mxu1 %v16128_v38 }
 0x48c   :  { %6279 = vmatpush1.bf16.msra.mxu0 %v16132_v62  ;;  %6352 = vmatpush1.bf16.msra.mxu1 %v16133_v8 }
 0x48d   :  { %6280 = vmatprep.subr.bf16.mxu0 %v16134_v15  ;;  %6353 = vmatprep.subr.bf16.mxu1 %v16135_v37 }
 0x490   :  { %6281 = vmatpush1.bf16.msra.mxu0 %v16136_v42  ;;  %6354 = vmatpush1.bf16.msra.mxu1 %v16137_v47 }
 0x491   :  { %6420 = vmatprep.subr.bf16.mxu0 %v16138_v20  ;;  %6493 = vmatprep.subr.bf16.mxu1 %v16139_v34 }
 0x492   :  { %9564 = vmatmul.mubr.msk.bf16.gmra.mxu0 %vm30_vm0, %v5608_v28  ;;  %9568 = vmatmul.mubr.msk.bf16.gmra.mxu1 %vm30_vm0, %v5608_v28 }
 0x493   :  { %5994 = vmatprep.mubr.bf16.mxu0 %v16128_v38  ;;  %6067 = vmatprep.mubr.bf16.mxu1 %v16128_v38 }
 0x49a   :  { %v13551_v3 = vpop.f32.mrf.mxu0  ;;  %v13553_v60 = vpop.f32.mrf.mxu1  ;;  %9565 = vmatmul.mubr.msk.bf16.gmra.mxu0 %vm30_vm0, %v5609_v35  ;;  %9569 = vmatmul.mubr.msk.bf16.gmra.mxu1 %vm30_vm0, %v5609_v35 }
 0x49b   :  { %6298 = vmatprep.mubr.bf16.mxu0 %v16128_v38  ;;  %6371 = vmatprep.mubr.bf16.mxu1 %v16128_v38 }
 0x49c   :  { %v13559_v61 = vpop.f32.mrf.mxu0  ;;  %v13561_v58 = vpop.f32.mrf.mxu1 }
 0x49e   :  { %v13563_v2 = vpop.f32.mrf.mxu0  ;;  %v13565_v23 = vpop.f32.mrf.mxu1 }
 0x4a0   :  { %v13569_v31 = vpop.f32.mrf.mxu0  ;;  %v13571_v18 = vpop.f32.mrf.mxu1 }
 0x4a2   :  { %v13573_v52 = vpop.f32.mrf.mxu0  ;;  %v13575_v51 = vpop.f32.mrf.mxu1  ;;  %9602 = vmatmul.mubr.msk.bf16.vlgmr.msra.gmra.mxu0 %vm30_vm0, %v13567_v13  ;;  %9606 = vmatmul.mubr.msk.bf16.vlgmr.msra.gmra.mxu1 %vm30_vm0, %v13567_v13 }
 0x4a3   :  { %6308 = vmatprep.mubr.bf16.mxu0 %v16128_v38  ;;  %6381 = vmatprep.mubr.bf16.mxu1 %v16128_v38 }
 0x4a4   :  { %v13583_v14 = vpop.f32.mrf.mxu0  ;;  %v13585_v56 = vpop.f32.mrf.mxu1  ;;  %6421 = vmatpush1.bf16.msra.mxu0 %v13359_v1  ;;  %6494 = vmatpush1.bf16.msra.mxu1 %v16140_v26 }
 0x4a5   :  { %6422 = vmatprep.subr.bf16.mxu0 %v16141_v0  ;;  %6495 = vmatprep.subr.bf16.mxu1 %v16142_v59 }
 0x4a6   :  { %v13591_v27 = vpop.f32.mrf.mxu0  ;;  %v13593_v10 = vpop.f32.mrf.mxu1 }
 0x4a8   :  { %v13597_v40 = vpop.f32.mrf.mxu0  ;;  %v13599_v29 = vpop.f32.mrf.mxu1  ;;  %6423 = vmatpush1.bf16.msra.mxu0 %v13387_v9  ;;  %6496 = vmatpush1.bf16.msra.mxu1 %v13389_v39 }
 0x4a9   :  { %16143 = vst [vmem:[#allocation40_spill] sm:$0xff] %v13599_v29  ;;  %6424 = vmatprep.subr.bf16.mxu0 %v13393_v32  ;;  %6497 = vmatprep.subr.bf16.mxu1 %v13395_v41  ;;  %v6089_v32 = vpop.trf.xlu1 }
 0x4aa   :  { %v13605_v46 = vpop.f32.mrf.mxu0  ;;  %v13607_v21 = vpop.f32.mrf.mxu1  ;;  %9603 = vmatmul.mubr.msk.bf16.gmra.mxu0 %vm30_vm0, %v13595_v25  ;;  %9607 = vmatmul.mubr.msk.bf16.gmra.mxu1 %vm30_vm0, %v13595_v25 }
 0x4ab   :  { %6318 = vmatprep.mubr.bf16.mxu0 %v16128_v38  ;;  %6391 = vmatprep.mubr.bf16.mxu1 %v16128_v38 }
 0x4ac   :  { %v13615_v4 = vpop.f32.mrf.mxu0  ;;  %v13617_v50 = vpop.f32.mrf.mxu1  ;;  %6425 = vmatpush1.bf16.msra.mxu0 %v13411_v57  ;;  %6498 = vmatpush1.bf16.msra.mxu1 %v13413_v24 }
 0x4ad   :  { %6426 = vmatprep.subr.bf16.mxu0 %v13417_v36  ;;  %6499 = vmatprep.subr.bf16.mxu1 %v13419_v17 }
 0x4ae   :  { %v13623_v54 = vpop.f32.mrf.mxu0  ;;  %v13625_v12 = vpop.f32.mrf.mxu1 }
 0x4b0   :  { %v13627_v49 = vpop.f32.mrf.mxu0  ;;  %v13629_v55 = vpop.f32.mrf.mxu1  ;;  %6427 = vmatpush1.bf16.msra.mxu0 %v13429_v19  ;;  %6500 = vmatpush1.bf16.msra.mxu1 %v13431_v53 }
 0x4b1   :  { %16144 = vst [vmem:[#allocation34_spill] sm:$0xff] %v13627_v49  ;;  %16145 = vst [vmem:[#allocation39_spill] sm:$0xff] %v13629_v55 }
 0x4b2   :  { %v13633_v16 = vpop.f32.mrf.mxu0  ;;  %v13635_v22 = vpop.f32.mrf.mxu1  ;;  %9604 = vmatmul.mubr.msk.bf16.gmra.mxu0 %vm30_vm0, %v6088_v5  ;;  %9608 = vmatmul.mubr.msk.bf16.gmra.mxu1 %vm30_vm0, %v6088_v5 }
 0x4b3   :  { %6328 = vmatprep.mubr.bf16.mxu0 %v16128_v38  ;;  %6401 = vmatprep.mubr.bf16.mxu1 %v16128_v38 }
 0x4b4   :  { %v13641_v6 = vpop.f32.mrf.mxu0  ;;  %v13643_v33 = vpop.f32.mrf.mxu1 }
 0x4b6   :  { %v13645_v63 = vpop.f32.mrf.mxu0  ;;  %v13647_v41 = vpop.f32.mrf.mxu1 }
 0x4b8   :  { %v13649_v39 = vpop.f32.mrf.mxu0  ;;  %v13651_v36 = vpop.f32.mrf.mxu1 }
 0x4b9   :  { %16146 = vst [vmem:[#allocation43_spill] sm:$0xff] %v13649_v39  ;;  %16147 = vst [vmem:[#allocation41_spill] sm:$0xff] %v13651_v36 }
 0x4ba   :  { %v13653_v17 = vpop.f32.mrf.mxu0  ;;  %v13655_v11 = vpop.f32.mrf.mxu1  ;;  %9605 = vmatmul.mubr.msk.bf16.gmra.mxu0 %vm30_vm0, %v6089_v32  ;;  %9609 = vmatmul.mubr.msk.bf16.gmra.mxu1 %vm30_vm0, %v6089_v32 }
 0x4bb   :  { %6444 = vmatprep.mubr.bf16.mxu0 %v16128_v38  ;;  %6517 = vmatprep.mubr.bf16.mxu1 %v16128_v38 }
 0x4bc   :  { %v13661_v1 = vpop.f32.mrf.mxu0  ;;  %v13663_v7 = vpop.f32.mrf.mxu1 }
 0x4be   :  { %v13665_v44 = vpop.f32.mrf.mxu0  ;;  %v13667_v9 = vpop.f32.mrf.mxu1 }
 0x4c0   :  { %v13669_v48 = vpop.f32.mrf.mxu0  ;;  %v13671_v30 = vpop.f32.mrf.mxu1 }
 0x4c1   :  { %16148 = vst [vmem:[#allocation61_spill] sm:$0xff] %v13669_v48  ;;  %16149 = vst [vmem:[#allocation64_spill] sm:$0xff] %v13671_v30 }
 0x4c2   :  { %v13673_v57 = vpop.f32.mrf.mxu0  ;;  %v13675_v24 = vpop.f32.mrf.mxu1  ;;  %9610 = vmatmul.mubr.msk.bf16.vlgmr.msra.gmra.mxu0 %vm30_vm0, %v13567_v13  ;;  %9614 = vmatmul.mubr.msk.bf16.vlgmr.msra.gmra.mxu1 %vm30_vm0, %v13567_v13 }
 0x4c3   :  { %6454 = vmatprep.mubr.bf16.mxu0 %v16128_v38  ;;  %6527 = vmatprep.mubr.bf16.mxu1 %v16128_v38 }
 0x4c4   :  { %v13683_v19 = vpop.f32.mrf.mxu0  ;;  %v13685_v53 = vpop.f32.mrf.mxu1 }
 0x4c6   :  { %v13687_v45 = vpop.f32.mrf.mxu0  ;;  %v13689_v43 = vpop.f32.mrf.mxu1 }
 0x4c8   :  { %v13691_v28 = vpop.f32.mrf.mxu0  ;;  %v13693_v35 = vpop.f32.mrf.mxu1 }
 0x4c9   :  { %16150 = vst [vmem:[#allocation45_spill] sm:$0xff] %v13691_v28  ;;  %16151 = vst [vmem:[#allocation46_spill] sm:$0xff] %v13693_v35 }
 0x4ca   :  { %v13695_v62 = vpop.f32.mrf.mxu0  ;;  %v13697_v8 = vpop.f32.mrf.mxu1  ;;  %9611 = vmatmul.mubr.msk.bf16.gmra.mxu0 %vm30_vm0, %v13595_v25  ;;  %9615 = vmatmul.mubr.msk.bf16.gmra.mxu1 %vm30_vm0, %v13595_v25 }
 0x4cb   :  { %6464 = vmatprep.mubr.bf16.mxu0 %v16128_v38  ;;  %6537 = vmatprep.mubr.bf16.mxu1 %v16128_v38 }
 0x4cc   :  { %v13705_v15 = vpop.f32.mrf.mxu0  ;;  %v13707_v37 = vpop.f32.mrf.mxu1 }
 0x4ce   :  { %v13709_v42 = vpop.f32.mrf.mxu0  ;;  %v13711_v47 = vpop.f32.mrf.mxu1 }
 0x4d0   :  { %v13713_v20 = vpop.f32.mrf.mxu0  ;;  %v13715_v34 = vpop.f32.mrf.mxu1 }
 0x4d1   :  { %16152 = vst [vmem:[#allocation44_spill] sm:$0xff] %v13713_v20  ;;  %16153 = vst [vmem:[#allocation70_spill] sm:$0xff] %v13715_v34 }
 0x4d2   :  { %v13717_v13 = vpop.f32.mrf.mxu0  ;;  %v13719_v26 = vpop.f32.mrf.mxu1  ;;  %9612 = vmatmul.mubr.msk.bf16.gmra.mxu0 %vm30_vm0, %v6088_v5  ;;  %9616 = vmatmul.mubr.msk.bf16.gmra.mxu1 %vm30_vm0, %v6088_v5 }
 0x4d3   :  { %6474 = vmatprep.mubr.bf16.mxu0 %v16128_v38  ;;  %6547 = vmatprep.mubr.bf16.mxu1 %v16128_v38 }
 0x4d4   :  { %v13725_v0 = vpop.f32.mrf.mxu0  ;;  %v13727_v59 = vpop.f32.mrf.mxu1 }
 0x4d6   :  { %v13729_v25 = vpop.f32.mrf.mxu0  ;;  %v13731_v20 = vpop.f32.mrf.mxu1 }
 0x4d8   :  { %v13733_v34 = vpop.f32.mrf.mxu0  ;;  %v13735_v35 = vpop.f32.mrf.mxu1 }
 0x4d9   :  { %16154 = vst [vmem:[#allocation47_spill] sm:$0xff] %v13733_v34  ;;  %16155 = vst [vmem:[#allocation48_spill] sm:$0xff] %v13735_v35 }
 0x4da   :  { %v5196_v28 = vpop.f32.mrf.mxu0  ;;  %v5269_v30 = vpop.f32.mrf.mxu1  ;;  %9613 = vmatmul.mubr.msk.bf16.gmra.mxu0 %vm30_vm0, %v6089_v32  ;;  %9617 = vmatmul.mubr.msk.bf16.gmra.mxu1 %vm30_vm0, %v6089_v32 }
 0x4db   :  { %v13740_v38 = vadd.f32 %v5196_v28, %v13551_v3  ;;  %v13743_v5 = vadd.f32 %v5269_v30, %v13553_v60 }
 0x4dc   :  { %v5198_v48 = vpop.f32.mrf.mxu0  ;;  %v5271_v36 = vpop.f32.mrf.mxu1 }
 0x4dd   :  { %16156 = vst [vmem:[#allocation49_spill] sm:$0xff] %v13740_v38  ;;  %16157 = vst [vmem:[#allocation57_spill] sm:$0xff] %v13743_v5  ;;  %v13746_v39 = vadd.f32 %v5198_v48, %v13559_v61  ;;  %v13749_v34 = vadd.f32 %v5271_v36, %v13561_v58  ;;  %v6918_v3 = vmul.f32 %v13740_v38, %v13740_v38 }
 0x4de   :  { %v5200_v35 = vpop.f32.mrf.mxu0  ;;  %v5273_v55 = vpop.f32.mrf.mxu1  ;;  %v6920_v60 = vmul.f32 %v13743_v5, %v13743_v5 }
 0x4df   :  { %16158 = vst [vmem:[#allocation50_spill] sm:$0xff] %v13746_v39  ;;  %16159 = vst [vmem:[#allocation58_spill] sm:$0xff] %v13749_v34  ;;  %v13752_v49 = vadd.f32 %v5200_v35, %v13563_v2  ;;  %v13755_v32 = vadd.f32 %v5273_v55, %v13565_v23  ;;  %v6919_v55 = vmul.f32 %v13746_v39, %v13746_v39 }
 0x4e0   :  { %v5202_v30 = vpop.f32.mrf.mxu0  ;;  %v5275_v61 = vpop.f32.mrf.mxu1  ;;  %v6921_v48 = vmul.f32 %v13749_v34, %v13749_v34 }
 0x4e1   :  { %16160 = vst [vmem:[#allocation55_spill] sm:$0xff] %v13752_v49  ;;  %16161 = vst [vmem:[#allocation52_spill] sm:$0xff] %v13755_v32  ;;  %v13763_v58 = vadd.f32 %v13752_v49, %v13740_v38  ;;  %v6926_v36 = vmul.f32 %v13752_v49, %v13752_v49  ;;  %v13769_v2 = vadd.f32 %v13755_v32, %v13743_v5 }
 0x4e2   :  { %v6928_v23 = vmul.f32 %v13755_v32, %v13755_v32  ;;  %v13778_v28 = vadd.f32 %v5202_v30, %v13569_v31  ;;  %v13781_v35 = vadd.f32 %v5275_v61, %v13571_v18  ;;  %v5206_v49 = vpop.f32.mrf.mxu0  ;;  %v5279_v38 = vpop.f32.mrf.mxu1 }
 0x4e3   :  { %16162 = vst [vmem:[#allocation60_spill] sm:$0xff] %v13763_v58  ;;  %16163 = vst [vmem:[#allocation56_spill] sm:$0xff] %v13769_v2  ;;  %v13783_v29 = vadd.f32 %v6926_v36, %v6918_v3  ;;  %v13788_v32 = vadd.f32 %v5206_v49, %v13573_v52  ;;  %v13791_v2 = vadd.f32 %v5279_v38, %v13575_v51 }
 0x4e4   :  { %16164 = vst [vmem:[#allocation53_spill] sm:$0xff] %v13778_v28  ;;  %16165 = vst [vmem:[#allocation68_spill] sm:$0xff] %v13781_v35  ;;  %v13785_v5 = vadd.f32 %v6928_v23, %v6920_v60  ;;  %v13795_v58 = vadd.f32 %v13778_v28, %v13746_v39  ;;  %v6927_v31 = vmul.f32 %v13778_v28, %v13778_v28  ;;  %v5208_v60 = vpop.f32.mrf.mxu0  ;;  %v5281_v52 = vpop.f32.mrf.mxu1 }
 0x4e5   :  { %16166 = vst [vmem:[#allocation65_spill] sm:$0xff] %v13788_v32  ;;  %16167 = vst [vmem:[#allocation63_spill] sm:$0xff] %v13791_v2  ;;  %v13801_v18 = vadd.f32 %v13781_v35, %v13749_v34  ;;  %v6929_v3 = vmul.f32 %v13781_v35, %v13781_v35  ;;  %v13810_v38 = vadd.f32 %v5208_v60, %v13583_v14 }
 0x4e6   :  { %v13805_v49 = vadd.f32 %v6927_v31, %v6919_v55  ;;  %v13813_v30 = vadd.f32 %v5281_v52, %v13585_v56  ;;  %v5210_v61 = vpop.f32.mrf.mxu0  ;;  %v5283_v36 = vpop.f32.mrf.mxu1 }
 0x4e7   :  { %v13807_v51 = vadd.f32 %v6929_v3, %v6921_v48  ;;  %16168 = vst [vmem:[#allocation67_spill] sm:$0xff] %v13810_v38  ;;  %v13816_v23 = vadd.f32 %v5210_v61, %v13591_v27  ;;  %v13819_v34 = vadd.f32 %v5283_v36, %v13593_v10 }
 0x4e8   :  { %16169 = vst [vmem:[#allocation69_spill] sm:$0xff] %v13813_v30  ;;  %v13821_v35 = vpop.f32.mrf.mxu0  ;;  %v13823_v55 = vpop.f32.mrf.mxu1 }
 0x4e9   :  { %16170 = vst [vmem:[#allocation66_spill] sm:$0xff] %v13816_v23  ;;  %16171 = vst [vmem:[#allocation54_spill] sm:$0xff] %v13819_v34 }
 0x4ea   :  { %v5216_v48 = vpop.f32.mrf.mxu0  ;;  %v5289_v31 = vpop.f32.mrf.mxu1 }
 0x4eb   :  { %v13826_v14 = vadd.f32 %v5216_v48, %v13605_v46  ;;  %v13829_v56 = vadd.f32 %v5289_v31, %v13607_v21 }
 0x4ec   :  { %v5218_v3 = vpop.f32.mrf.mxu0  ;;  %v5291_v60 = vpop.f32.mrf.mxu1 }
 0x4ed   :  { %16172 = vst [vmem:[#allocation51_spill] sm:$0xff] %v13826_v14  ;;  %16173 = vst [vmem:[#allocation7_spill] sm:$0xff] %v13829_v56  ;;  %v13832_v27 = vadd.f32 %v5218_v3, %v13615_v4  ;;  %v13835_v10 = vadd.f32 %v5291_v60, %v13617_v50 }
 0x4ee   :  { %v5220_v52 = vpop.f32.mrf.mxu0  ;;  %v5293_v61 = vpop.f32.mrf.mxu1 }
 0x4ef   :  { %16174 = vst [vmem:[#allocation6_spill] sm:$0xff] %v13832_v27  ;;  %16175 = vst [vmem:[#allocation16_spill] sm:$0xff] %v13835_v10  ;;  %v13838_v36 = vadd.f32 %v5220_v52, %v13623_v54  ;;  %v13841_v28 = vadd.f32 %v5293_v61, %v13625_v12 }
 0x4f0   :  { %v13843_v46 = vpop.f32.mrf.mxu0  ;;  %v13845_v21 = vpop.f32.mrf.mxu1 }
 0x4f1   :  { %16176 = vst [vmem:[#allocation59_spill] sm:$0xff] %v13838_v36  ;;  %16177 = vst [vmem:[#allocation13_spill] sm:$0xff] %v13841_v28 }
 0x4f2   :  { %v5226_v48 = vpop.f32.mrf.mxu0  ;;  %v5299_v31 = vpop.f32.mrf.mxu1 }
 0x4f3   :  { %v13848_v4 = vadd.f32 %v5226_v48, %v13633_v16  ;;  %v13851_v50 = vadd.f32 %v5299_v31, %v13635_v22 }
 0x4f4   :  { %v5228_v3 = vpop.f32.mrf.mxu0  ;;  %v5301_v60 = vpop.f32.mrf.mxu1 }
 0x4f5   :  { %16178 = vst [vmem:[#allocation62_spill] sm:$0xff] %v13848_v4  ;;  %16179 = vst [vmem:[#allocation8_spill] sm:$0xff] %v13851_v50  ;;  %v13854_v54 = vadd.f32 %v5228_v3, %v13641_v6  ;;  %v13857_v12 = vadd.f32 %v5301_v60, %v13643_v33 }
 0x4f6   :  { %v5230_v52 = vpop.f32.mrf.mxu0  ;;  %v5303_v61 = vpop.f32.mrf.mxu1 }
 0x4f7   :  { %16180 = vst [vmem:[#allocation11_spill] sm:$0xff] %v13854_v54  ;;  %16181 = vst [vmem:[#allocation9_spill] sm:$0xff] %v13857_v12  ;;  %v13860_v39 = vadd.f32 %v5230_v52, %v13645_v63  ;;  %v13863_v28 = vadd.f32 %v5303_v61, %v13647_v41 }
 0x4f8   :  { %v13865_v16 = vpop.f32.mrf.mxu0  ;;  %v13867_v22 = vpop.f32.mrf.mxu1 }
 0x4f9   :  { %16182 = vst [vmem:[#allocation25_spill] sm:$0xff] %v13860_v39  ;;  %16183 = vst [vmem:[#allocation21_spill] sm:$0xff] %v13863_v28 }
 0x4fa   :  { %v5342_v48 = vpop.f32.mrf.mxu0  ;;  %v5415_v31 = vpop.f32.mrf.mxu1 }
 0x4fb   :  { %v13870_v6 = vadd.f32 %v5342_v48, %v13653_v17  ;;  %v13873_v33 = vadd.f32 %v5415_v31, %v13655_v11 }
 0x4fc   :  { %v5344_v3 = vpop.f32.mrf.mxu0  ;;  %v5417_v60 = vpop.f32.mrf.mxu1 }
 0x4fd   :  { %16184 = vst [vmem:[#allocation12_spill] sm:$0xff] %v13870_v6  ;;  %16185 = vst [vmem:[#allocation14_spill] sm:$0xff] %v13873_v33  ;;  %v13876_v63 = vadd.f32 %v5344_v3, %v13661_v1  ;;  %v13879_v41 = vadd.f32 %v5417_v60, %v13663_v7  ;;  %v6922_v17 = vmul.f32 %v13870_v6, %v13870_v6 }
 0x4fe   :  { %v5346_v52 = vpop.f32.mrf.mxu0  ;;  %v5419_v61 = vpop.f32.mrf.mxu1  ;;  %v6924_v11 = vmul.f32 %v13873_v33, %v13873_v33 }
 0x4ff   :  { %16186 = vst [vmem:[#allocation17_spill] sm:$0xff] %v13876_v63  ;;  %16187 = vst [vmem:[#allocation15_spill] sm:$0xff] %v13879_v41  ;;  %v13882_v28 = vadd.f32 %v5346_v52, %v13665_v44  ;;  %v13885_v39 = vadd.f32 %v5419_v61, %v13667_v9 }
 0x500   :  { %v13891_v48 = vpop.f32.mrf.mxu0  ;;  %v13893_v1 = vpop.f32.mrf.mxu1 }
 0x501   :  { %16188 = vst [vmem:[#allocation23_spill] sm:$0xff] %v13882_v28  ;;  %16189 = vst [vmem:[#allocation5_spill] sm:$0xff] %v13885_v39  ;;  %v13897_v7 = vadd.f32 %v13882_v28, %v13870_v6  ;;  %v6930_v44 = vmul.f32 %v13882_v28, %v13882_v28  ;;  %v13903_v9 = vadd.f32 %v13885_v39, %v13873_v33 }
 0x502   :  { %v6932_v31 = vmul.f32 %v13885_v39, %v13885_v39  ;;  %v5352_v3 = vpop.f32.mrf.mxu0  ;;  %v5425_v60 = vpop.f32.mrf.mxu1 }
 0x503   :  { %16190 = vst [vmem:[#allocation22_spill] sm:$0xff] %v13897_v7  ;;  %16191 = vst [vmem:[#allocation4_spill] sm:$0xff] %v13903_v9  ;;  %v13907_v52 = vadd.f32 %v6930_v44, %v6922_v17  ;;  %v13912_v41 = vadd.f32 %v5352_v3, %v13673_v57  ;;  %v13915_v6 = vadd.f32 %v5425_v60, %v13675_v24 }
 0x504   :  { %v13909_v61 = vadd.f32 %v6932_v31, %v6924_v11  ;;  %v5354_v28 = vpop.f32.mrf.mxu0  ;;  %v5427_v7 = vpop.f32.mrf.mxu1 }
 0x505   :  { %16192 = vst [vmem:[#allocation20_spill] sm:$0xff] %v13912_v41  ;;  %16193 = vst [vmem:[#allocation10_spill] sm:$0xff] %v13915_v6  ;;  %v13918_v33 = vadd.f32 %v5354_v28, %v13683_v19  ;;  %v13921_v9 = vadd.f32 %v5427_v7, %v13685_v53 }
 0x506   :  { %v5356_v39 = vpop.f32.mrf.mxu0  ;;  %v5429_v63 = vpop.f32.mrf.mxu1 }
 0x507   :  { %16194 = vst [vmem:[#allocation18_spill] sm:$0xff] %v13918_v33  ;;  %16195 = vst [vmem:[#allocation27_spill] sm:$0xff] %v13921_v9  ;;  %v13924_v17 = vadd.f32 %v5356_v39, %v13687_v45  ;;  %v13927_v11 = vadd.f32 %v5429_v63, %v13689_v43 }
 0x508   :  { %v13929_v57 = vpop.f32.mrf.mxu0  ;;  %v13931_v24 = vpop.f32.mrf.mxu1 }
 0x509   :  { %16196 = vst [vmem:[#allocation26_spill] sm:$0xff] %v13924_v17  ;;  %16197 = vst [vmem:[#allocation30_spill] sm:$0xff] %v13927_v11 }
 0x50a   :  { %v5362_v44 = vpop.f32.mrf.mxu0  ;;  %v5435_v31 = vpop.f32.mrf.mxu1 }
 0x50b   :  { %v13934_v19 = vadd.f32 %v5362_v44, %v13695_v62  ;;  %v13937_v53 = vadd.f32 %v5435_v31, %v13697_v8 }
 0x50c   :  { %v5364_v28 = vpop.f32.mrf.mxu0  ;;  %v5437_v7 = vpop.f32.mrf.mxu1 }
 0x50d   :  { %16198 = vst [vmem:[#allocation19_spill] sm:$0xff] %v13934_v19  ;;  %16199 = vst [vmem:[#allocation28_spill] sm:$0xff] %v13937_v53  ;;  %v13940_v39 = vadd.f32 %v5364_v28, %v13705_v15  ;;  %v13943_v45 = vadd.f32 %v5437_v7, %v13707_v37 }
 0x50e   :  { %v5366_v43 = vpop.f32.mrf.mxu0  ;;  %v5439_v63 = vpop.f32.mrf.mxu1 }
 0x50f   :  { %16200 = vst [vmem:[#allocation24_spill] sm:$0xff] %v13940_v39  ;;  %16201 = vst [vmem:[#allocation32_spill] sm:$0xff] %v13943_v45  ;;  %v13946_v3 = vadd.f32 %v5366_v43, %v13709_v42  ;;  %v13949_v60 = vadd.f32 %v5439_v63, %v13711_v47 }
 0x510   :  { %v13951_v62 = vpop.f32.mrf.mxu0  ;;  %v13953_v8 = vpop.f32.mrf.mxu1 }
 0x511   :  { %16202 = vst [vmem:[#allocation29_spill] sm:$0xff] %v13946_v3  ;;  %16203 = vst [vmem:[#allocation35_spill] sm:$0xff] %v13949_v60 }
 0x512   :  { %v5372_v44 = vpop.f32.mrf.mxu0  ;;  %v5445_v31 = vpop.f32.mrf.mxu1 }
 0x513   :  { %v13956_v15 = vadd.f32 %v5372_v44, %v13717_v13  ;;  %v13959_v37 = vadd.f32 %v5445_v31, %v13719_v26 }
 0x514   :  { %v5374_v28 = vpop.f32.mrf.mxu0  ;;  %v5447_v7 = vpop.f32.mrf.mxu1 }
 0x515   :  { %16204 = vst [vmem:[#allocation31_spill] sm:$0xff] %v13956_v15  ;;  %16205 = vst [vmem:[#allocation37_spill] sm:$0xff] %v13959_v37  ;;  %v13962_v42 = vadd.f32 %v5374_v28, %v13725_v0  ;;  %v13965_v47 = vadd.f32 %v5447_v7, %v13727_v59 }
 0x516   :  { %v5376_v43 = vpop.f32.mrf.mxu0  ;;  %v5449_v63 = vpop.f32.mrf.mxu1 }
 0x517   :  { %16206 = vst [vmem:[#allocation33_spill] sm:$0xff] %v13962_v42  ;;  %16207 = vst [vmem:[#allocation38_spill] sm:$0xff] %v13965_v47  ;;  %v13968_v60 = vadd.f32 %v5376_v43, %v13729_v25  ;;  %v13971_v3 = vadd.f32 %v5449_v63, %v13731_v20 }
 0x518   :  { %v13973_v13 = vpop.f32.mrf.mxu0  ;;  %v13975_v26 = vpop.f32.mrf.mxu1 }
 0x519   :  { %16208 = vst [vmem:[#allocation36_spill] sm:$0xff] %v13968_v60  ;;  %16209 = vst [vmem:[#allocation42_spill] sm:$0xff] %v13971_v3 }
 0x51a   :  { %16210 = vst [vmem:[#allocation71_spill] sm:$0xff] %v13973_v13  ;;  %16211 = vst [vmem:[#allocation72_spill] sm:$0xff] %v13975_v26  ;;  %v16240_v13 = vld [vmem:[#allocation40_spill] sm:$0xff] }
 0x522   :  { %v13977_v44 = vpop.f32.mrf.mxu0  ;;  %v13979_v31 = vpop.f32.mrf.mxu1 }
 0x523   :  { %16212 = vst [vmem:[#allocation73_spill] sm:$0xff] %v13977_v44  ;;  %16213 = vst [vmem:[#allocation74_spill] sm:$0xff] %v13979_v31 }
 0x524   :  { %v13981_v0 = vpop.f32.mrf.mxu0  ;;  %v13983_v59 = vpop.f32.mrf.mxu1 }
 0x525   :  { %16214 = vst [vmem:[#allocation75_spill] sm:$0xff] %v13981_v0  ;;  %16215 = vst [vmem:[#allocation76_spill] sm:$0xff] %v13983_v59  ;;  %v10742_v59 = vld [vmem:[%s15668_s6 + $0x78] sm:$0xff]   ;;  %v16239_v0 = vld [vmem:[#allocation60_spill] sm:$0xff] }
 0x526   :  { %v13985_v28 = vpop.f32.mrf.mxu0  ;;  %v13987_v7 = vpop.f32.mrf.mxu1  ;;  %9927 = vmatprep.subr.bf16.mxu0 %v10742_v59  ;;  %v10747_v59 = vld [vmem:[%s15668_s6 + $0xf0] sm:$0xff]   ;;  %v6751_v31 = vadd.f32 %v16239_v0, %v13788_v32 }
 0x527   :  { %16216 = vst [vmem:[#allocation77_spill] sm:$0xff] %v13985_v28  ;;  %16217 = vst [vmem:[#allocation78_spill] sm:$0xff] %v13987_v7  ;;  %v10743_v7 = vld [vmem:[%s15668_s6 + $0xf8] sm:$0xff]  }
 0x528   :  { %v13989_v25 = vpop.f32.mrf.mxu0  ;;  %v13991_v20 = vpop.f32.mrf.mxu1  ;;  %9991 = vmatprep.subr.bf16.mxu1 %v10743_v7 }
 0x529   :  { %16218 = vst [vmem:[#allocation79_spill] sm:$0xff] %v13989_v25  ;;  %16219 = vst [vmem:[#allocation80_spill] sm:$0xff] %v13991_v20 }
 0x52a   :  { %v13993_v43 = vpop.f32.mrf.mxu0  ;;  %v13995_v63 = vpop.f32.mrf.mxu1 }
 0x52b   :  { %16220 = vst [vmem:[#allocation81_spill] sm:$0xff] %v13993_v43  ;;  %16221 = vst [vmem:[#allocation82_spill] sm:$0xff] %v13995_v63  ;;  %v10744_v63 = vld [vmem:[%s15668_s6 + $0x38] sm:$0xff]  }
 0x52c   :  { %v13997_v26 = vpop.f32.mrf.mxu0  ;;  %v13999_v44 = vpop.f32.mrf.mxu1  ;;  %9928 = vmatpush3.bf16.msra.mxu0 %v10744_v63  ;;  %v10749_v63 = vld [vmem:[%s15668_s6 + $0xb0] sm:$0xff]  }
 0x52d   :  { %16222 = vst [vmem:[#allocation83_spill] sm:$0xff] %v13997_v26  ;;  %16223 = vst [vmem:[#allocation84_spill] sm:$0xff] %v13999_v44  ;;  %v10745_v44 = vld [vmem:[%s15668_s6 + $0xb8] sm:$0xff]  }
 0x52e   :  { %v14007_v28 = vpop.f32.mrf.mxu0  ;;  %v14009_v25 = vpop.f32.mrf.mxu1  ;;  %9992 = vmatpush3.bf16.msra.mxu1 %v10745_v44 }
 0x52f   :  { %16224 = vst [vmem:[#allocation85_spill] sm:$0xff] %v14007_v28  ;;  %16225 = vst [vmem:[#allocation86_spill] sm:$0xff] %v14009_v25  ;;  %v10746_v28 = vld [vmem:[%s15668_s6 + $0x70] sm:$0xff]   ;;  %9993 = vmatprep.subr.bf16.mxu1 %v10747_v59 }
 0x530   :  { %v14017_v26 = vpop.f32.mrf.mxu0  ;;  %v14019_v43 = vpop.f32.mrf.mxu1  ;;  %9929 = vmatprep.subr.bf16.mxu0 %v10746_v28  ;;  %v10751_v28 = vld [vmem:[%s15668_s6 + $0xe8] sm:$0xff]  }
 0x531   :  { %16226 = vst [vmem:[#allocation87_spill] sm:$0xff] %v14017_v26  ;;  %16227 = vst [vmem:[#allocation88_spill] sm:$0xff] %v14019_v43  ;;  %v10748_v26 = vld [vmem:[%s15668_s6 + $0x30] sm:$0xff]  }
 0x532   :  { %v14027_v25 = vpop.f32.mrf.mxu0  ;;  %v14029_v7 = vpop.f32.mrf.mxu1  ;;  %9930 = vmatpush3.bf16.msra.mxu0 %v10748_v26  ;;  %9994 = vmatpush3.bf16.msra.mxu1 %v10749_v63  ;;  %v10753_v26 = vld [vmem:[%s15668_s6 + $0xa8] sm:$0xff]  }
 0x533   :  { %16228 = vst [vmem:[#allocation89_spill] sm:$0xff] %v14027_v25  ;;  %16229 = vst [vmem:[#allocation90_spill] sm:$0xff] %v14029_v7  ;;  %v10750_v25 = vld [vmem:[%s15668_s6 + $0x68] sm:$0xff]   ;;  %9995 = vmatprep.subr.bf16.mxu1 %v10751_v28  ;;  %v10755_v28 = vld [vmem:[%s15668_s6 + $0xe0] sm:$0xff]  }
 0x534   :  { %v14037_v43 = vpop.f32.mrf.mxu0  ;;  %v14039_v44 = vpop.f32.mrf.mxu1  ;;  %9931 = vmatprep.subr.bf16.mxu0 %v10750_v25  ;;  %v6934_v25 = vmul.f32 %v13788_v32, %v13788_v32  ;;  %v6772_v32 = vadd.f32 %v13795_v58, %v13810_v38 }
 0x535   :  { %16230 = vst [vmem:[#allocation91_spill] sm:$0xff] %v14037_v43  ;;  %16231 = vst [vmem:[#allocation92_spill] sm:$0xff] %v14039_v44  ;;  %v10752_v43 = vld [vmem:[%s15668_s6 + $0x28] sm:$0xff]  }
 0x536   :  { %v14047_v7 = vpop.f32.mrf.mxu0  ;;  %v14049_v59 = vpop.f32.mrf.mxu1  ;;  %9932 = vmatpush3.bf16.msra.mxu0 %v10752_v43  ;;  %9996 = vmatpush3.bf16.msra.mxu1 %v10753_v26  ;;  %v6935_v43 = vmul.f32 %v13810_v38, %v13810_v38  ;;  %v14081_v26 = vadd.f32 %v13821_v35, %v13597_v40  ;;  %v7047_v60 = vadd.f32 %v13783_v29, %v6934_v25  ;;  %v16244_v40 = vld [vmem:[#allocation56_spill] sm:$0xff] }
 0x537   :  { %16232 = vst [vmem:[#allocation93_spill] sm:$0xff] %v14047_v7  ;;  %16233 = vst [vmem:[#allocation94_spill] sm:$0xff] %v14049_v59  ;;  %v10754_v7 = vld [vmem:[%s15668_s6 + $0x60] sm:$0xff]   ;;  %v6936_v59 = vmul.f32 %v13791_v2, %v13791_v2  ;;  %9997 = vmatprep.subr.bf16.mxu1 %v10755_v28  ;;  %v6793_v35 = vadd.f32 %v16244_v40, %v13791_v2  ;;  %v6944_v28 = vmul.f32 %v13819_v34, %v13819_v34 }
 0x538   :  { %v14057_v44 = vpop.f32.mrf.mxu0  ;;  %v14059_v63 = vpop.f32.mrf.mxu1  ;;  %9933 = vmatprep.subr.bf16.mxu0 %v10754_v7  ;;  %16238 = vst [vmem:[#allocation99_spill] sm:$0xff] %v14081_v26  ;;  %v14089_v7 = vadd.f32 %v13823_v55, %v16240_v13  ;;  %v6814_v55 = vadd.f32 %v13801_v18, %v13813_v30  ;;  %v6752_v13 = vadd.f32 %v6751_v31, %v13816_v23 }
 0x539   :  { %16234 = vst [vmem:[#allocation95_spill] sm:$0xff] %v14057_v44  ;;  %16235 = vst [vmem:[#allocation96_spill] sm:$0xff] %v14059_v63  ;;  %v6937_v63 = vmul.f32 %v13813_v30, %v13813_v30  ;;  %v7089_v0 = vadd.f32 %v13785_v5, %v6936_v59  ;;  %v7068_v29 = vadd.f32 %v13805_v49, %v6935_v43  ;;  %v16248_v30 = vld [vmem:[#allocation39_spill] sm:$0xff] }
 0x53a   :  { %v14071_v20 = vpop.f32.mrf.mxu0  ;;  %v14073_v44 = vpop.f32.mrf.mxu1  ;;  %16241 = vst [vmem:[#allocation60_spill] sm:$0xff] %v14089_v7  ;;  %v6794_v40 = vadd.f32 %v6793_v35, %v13819_v34  ;;  %v6943_v5 = vmul.f32 %v14081_v26, %v14081_v26  ;;  %v6945_v58 = vmul.f32 %v14089_v7, %v14089_v7  ;;  %v6950_v18 = vmul.f32 %v13826_v14, %v13826_v14  ;;  %v16246_v34 = vld [vmem:[#allocation34_spill] sm:$0xff] }
 0x53b   :  { %16236 = vst [vmem:[#allocation97_spill] sm:$0xff] %v14071_v20  ;;  %16237 = vst [vmem:[#allocation98_spill] sm:$0xff] %v14073_v44  ;;  %v6942_v20 = vmul.f32 %v13816_v23, %v13816_v23  ;;  %v7110_v25 = vadd.f32 %v13807_v51, %v6937_v63  ;;  %v6952_v31 = vmul.f32 %v13829_v56, %v13829_v56 }
 0x53c   :  { %v14091_v44 = vpop.f32.mrf.mxu0  ;;  %v14093_v3 = vpop.f32.mrf.mxu1  ;;  %v7090_v51 = vadd.f32 %v7089_v0, %v6944_v28  ;;  %v6773_v63 = vadd.f32 %v6772_v32, %v14081_v26  ;;  %v6815_v43 = vadd.f32 %v6814_v55, %v14089_v7  ;;  %v6953_v35 = vmul.f32 %v13835_v10, %v13835_v10 }
 0x53d   :  { %16242 = vst [vmem:[#allocation40_spill] sm:$0xff] %v14091_v44  ;;  %16243 = vst [vmem:[#allocation100_spill] sm:$0xff] %v14093_v3  ;;  %v7048_v59 = vadd.f32 %v7047_v60, %v6942_v20  ;;  %v6951_v60 = vmul.f32 %v13832_v27, %v13832_v27  ;;  %v6753_v20 = vadd.f32 %v6752_v13, %v13826_v14  ;;  %v16252_v14 = vld [vmem:[#allocation13_spill] sm:$0xff] }
 0x53e   :  { %v14106_v44 = vpop.f32.mrf.mxu0  ;;  %v14108_v3 = vpop.f32.mrf.mxu1  ;;  %v14134_v23 = vadd.f32 %v13843_v46, %v16246_v34  ;;  %v14138_v38 = vadd.f32 %v13845_v21, %v16248_v30  ;;  %v7069_v0 = vadd.f32 %v7068_v29, %v6943_v5  ;;  %v6795_v55 = vadd.f32 %v6794_v40, %v13829_v56 }
 0x53f   :  { %v6958_v13 = vmul.f32 %v13838_v36, %v13838_v36  ;;  %v6960_v7 = vmul.f32 %v16252_v14, %v16252_v14  ;;  %v7111_v26 = vadd.f32 %v7110_v25, %v6945_v58  ;;  %v7049_v34 = vadd.f32 %v7048_v59, %v6950_v18  ;;  %v16253_v59 = vld [vmem:[#allocation43_spill] sm:$0xff] }
 0x540   :  { %v14121_v2 = vpop.f32.mrf.mxu0  ;;  %v14123_v49 = vpop.f32.mrf.mxu1  ;;  %16247 = vst [vmem:[#allocation34_spill] sm:$0xff] %v14134_v23  ;;  %16249 = vst [vmem:[#allocation39_spill] sm:$0xff] %v14138_v38  ;;  %v7091_v46 = vadd.f32 %v7090_v51, %v6952_v31  ;;  %v6816_v29 = vadd.f32 %v6815_v43, %v13835_v10  ;;  %v6754_v40 = vadd.f32 %v6753_v20, %v13838_v36 }
 0x541   :  { %16245 = vst [vmem:[#allocation56_spill] sm:$0xff] %v14123_v49  ;;  %v6774_v49 = vadd.f32 %v6773_v63, %v13832_v27  ;;  %v6796_v5 = vadd.f32 %v6795_v55, %v16252_v14  ;;  %v7112_v56 = vadd.f32 %v7111_v26, %v6953_v35  ;;  %v6961_v25 = vmul.f32 %v14138_v38, %v14138_v38  ;;  %v16255_v26 = vld [vmem:[#allocation41_spill] sm:$0xff] }
 0x542   :  { %v14140_v28 = vpop.f32.mrf.mxu0  ;;  %v14142_v32 = vpop.f32.mrf.mxu1  ;;  %v14163_v58 = vadd.f32 %v13865_v16, %v16253_v59  ;;  %v7050_v51 = vadd.f32 %v7049_v34, %v6958_v13  ;;  %v7092_v63 = vadd.f32 %v7091_v46, %v6960_v7  ;;  %v6966_v43 = vmul.f32 %v13848_v4, %v13848_v4 }
 0x543   :  { %16250 = vst [vmem:[#allocation101_spill] sm:$0xff] %v14140_v28  ;;  %16251 = vst [vmem:[#allocation102_spill] sm:$0xff] %v14142_v32  ;;  %v7070_v28 = vadd.f32 %v7069_v0, %v6951_v60  ;;  %v6959_v32 = vmul.f32 %v14134_v23, %v14134_v23  ;;  %v14173_v60 = vadd.f32 %v13867_v22, %v16255_v26  ;;  %v16258_v26 = vld [vmem:[#allocation21_spill] sm:$0xff] }
 0x544   :  { %v14150_v30 = vpop.f32.mrf.mxu0  ;;  %v14152_v21 = vpop.f32.mrf.mxu1  ;;  %16254 = vst [vmem:[#allocation43_spill] sm:$0xff] %v14163_v58  ;;  %v6775_v20 = vadd.f32 %v6774_v49, %v14134_v23  ;;  %v6817_v35 = vadd.f32 %v6816_v29, %v14138_v38  ;;  %v6968_v16 = vmul.f32 %v13851_v50, %v13851_v50  ;;  %v6967_v0 = vmul.f32 %v13854_v54, %v13854_v54  ;;  %v16257_v49 = vld [vmem:[#allocation25_spill] sm:$0xff] }
 0x545   :  { %16256 = vst [vmem:[#allocation41_spill] sm:$0xff] %v14173_v60  ;;  %v6755_v13 = vadd.f32 %v6754_v40, %v13848_v4  ;;  %v6797_v34 = vadd.f32 %v6796_v5, %v13851_v50  ;;  %v6969_v22 = vmul.f32 %v13857_v12, %v13857_v12  ;;  %v6974_v46 = vmul.f32 %v16257_v49, %v16257_v49  ;;  %v16261_v50 = vld [vmem:[#allocation61_spill] sm:$0xff] }
 0x546   :  { %v14165_v18 = vpop.f32.mrf.mxu0  ;;  %v14167_v31 = vpop.f32.mrf.mxu1  ;;  %v7071_v29 = vadd.f32 %v7070_v28, %v6959_v32  ;;  %v7113_v59 = vadd.f32 %v7112_v56, %v6961_v25  ;;  %v6976_v14 = vmul.f32 %v16258_v26, %v16258_v26  ;;  %v6975_v36 = vmul.f32 %v14163_v58, %v14163_v58  ;;  %v16263_v28 = vld [vmem:[#allocation64_spill] sm:$0xff] }
 0x547   :  { %v7051_v40 = vadd.f32 %v7050_v51, %v6966_v43  ;;  %v6977_v5 = vmul.f32 %v14173_v60, %v14173_v60  ;;  %v14203_v4 = vadd.f32 %v13891_v48, %v16261_v50  ;;  %v14207_v56 = vadd.f32 %v13893_v1, %v16263_v28 }
 0x548   :  { %v14181_v55 = vpop.f32.mrf.mxu0  ;;  %v14183_v7 = vpop.f32.mrf.mxu1  ;;  %v7093_v32 = vadd.f32 %v7092_v63, %v6968_v16  ;;  %v6776_v25 = vadd.f32 %v6775_v20, %v13854_v54  ;;  %v7072_v23 = vadd.f32 %v7071_v29, %v6967_v0  ;;  %v6818_v27 = vadd.f32 %v6817_v35, %v13857_v12 }
 0x549   :  { %16262 = vst [vmem:[#allocation61_spill] sm:$0xff] %v14203_v4  ;;  %16264 = vst [vmem:[#allocation64_spill] sm:$0xff] %v14207_v56  ;;  %v7114_v43 = vadd.f32 %v7113_v59, %v6969_v22  ;;  %v14218_v50 = vadd.f32 %v7051_v40, %v6974_v46  ;;  %v14221_v48 = vadd.f32 %v6797_v34, %v16258_v26 }
 0x54a   :  { %v14195_v38 = vpop.f32.mrf.mxu0  ;;  %v14197_v10 = vpop.f32.mrf.mxu1  ;;  %v14223_v1 = vadd.f32 %v7093_v32, %v6976_v14  ;;  %v14226_v63 = vadd.f32 %v6776_v25, %v14163_v58  ;;  %v14228_v20 = vadd.f32 %v7072_v23, %v6975_v36  ;;  %v14231_v35 = vadd.f32 %v6818_v27, %v14173_v60  ;;  %v16266_v23 = vld [vmem:[#allocation17_spill] sm:$0xff]  ;;  %v16267_v27 = vld [vmem:[#allocation15_spill] sm:$0xff] }
 0x54b   :  { %16259 = vst [vmem:[#allocation103_spill] sm:$0xff] %v14195_v38  ;;  %16260 = vst [vmem:[#allocation104_spill] sm:$0xff] %v14197_v10  ;;  %v14216_v10 = vadd.f32 %v6755_v13, %v16257_v49  ;;  %v14237_v13 = vadd.f32 %v7114_v43, %v6977_v5  ;;  %v6931_v34 = vmul.f32 %v14203_v4, %v14203_v4  ;;  %v16270_v43 = vld [vmem:[#allocation45_spill] sm:$0xff]  ;;  %v16273_v49 = vld [vmem:[#allocation4_spill] sm:$0xff] }
 0x54c   :  { %v14211_v38 = vpop.f32.mrf.mxu0  ;;  %v14213_v51 = vpop.f32.mrf.mxu1  ;;  %v6933_v14 = vmul.f32 %v14207_v56, %v14207_v56  ;;  %v6938_v22 = vmul.f32 %v13912_v41, %v13912_v41  ;;  %v6923_v36 = vmul.f32 %v16266_v23, %v16266_v23  ;;  %v6925_v46 = vmul.f32 %v16267_v27, %v16267_v27 }
 0x54d   :  { %v6855_v29 = vadd.f32 %v14203_v4, %v16266_v23  ;;  %v6940_v59 = vmul.f32 %v13915_v6, %v13915_v6  ;;  %v6897_v28 = vadd.f32 %v14207_v56, %v16267_v27  ;;  %v6939_v32 = vmul.f32 %v13918_v33, %v13918_v33  ;;  %v16272_v4 = vld [vmem:[#allocation22_spill] sm:$0xff] }
 0x54e   :  { %v14233_v16 = vpop.f32.mrf.mxu0  ;;  %v14235_v0 = vpop.f32.mrf.mxu1  ;;  %v6941_v25 = vmul.f32 %v13921_v9, %v13921_v9  ;;  %v14265_v26 = vadd.f32 %v13929_v57, %v16270_v43  ;;  %v6835_v23 = vadd.f32 %v16272_v4, %v13912_v41  ;;  %v6877_v60 = vadd.f32 %v16273_v49, %v13915_v6  ;;  %v16274_v56 = vld [vmem:[#allocation46_spill] sm:$0xff] }
 0x54f   :  { %16265 = vst [vmem:[#allocation105_spill] sm:$0xff] %v14235_v0  ;;  %v6946_v12 = vmul.f32 %v13924_v17, %v13924_v17  ;;  %v14275_v27 = vadd.f32 %v13931_v24, %v16274_v56  ;;  %v7193_v57 = vadd.f32 %v6933_v14, %v6925_v46  ;;  %v7131_v43 = vadd.f32 %v13907_v52, %v6938_v22 }
 0x550   :  { %v14253_v40 = vpop.f32.mrf.mxu0  ;;  %v14255_v5 = vpop.f32.mrf.mxu1  ;;  %16271 = vst [vmem:[#allocation45_spill] sm:$0xff] %v14265_v26  ;;  %v6948_v4 = vmul.f32 %v13927_v11, %v13927_v11  ;;  %v7173_v49 = vadd.f32 %v13909_v61, %v6940_v59  ;;  %v6856_v6 = vadd.f32 %v6855_v29, %v13918_v33  ;;  %v6898_v41 = vadd.f32 %v6897_v28, %v13921_v9 }
 0x551   :  { %16268 = vst [vmem:[#allocation106_spill] sm:$0xff] %v14253_v40  ;;  %16269 = vst [vmem:[#allocation107_spill] sm:$0xff] %v14255_v5  ;;  %v7151_v5 = vadd.f32 %v6931_v34, %v6923_v36  ;;  %v6836_v24 = vadd.f32 %v6835_v23, %v13924_v17  ;;  %v7194_v34 = vadd.f32 %v7193_v57, %v6941_v25 }
 0x552   :  { %16275 = vst [vmem:[#allocation22_spill] sm:$0xff] %v14275_v27  ;;  %v14277_v58 = vpop.f32.mrf.mxu0  ;;  %v14279_v54 = vpop.f32.mrf.mxu1  ;;  %v6878_v14 = vadd.f32 %v6877_v60, %v13927_v11  ;;  %v6947_v52 = vmul.f32 %v14265_v26, %v14265_v26  ;;  %v7132_v22 = vadd.f32 %v7131_v43, %v6946_v12  ;;  %v6949_v61 = vmul.f32 %v14275_v27, %v14275_v27  ;;  %v16284_v12 = vld [vmem:[#allocation70_spill] sm:$0xff]  ;;  %v16288_v11 = vld [vmem:[#allocation29_spill] sm:$0xff] }
 0x553   :  { %16276 = vst [vmem:[#allocation4_spill] sm:$0xff] %v14277_v58  ;;  %16277 = vst [vmem:[#allocation46_spill] sm:$0xff] %v14279_v54  ;;  %v7152_v54 = vadd.f32 %v7151_v5, %v6939_v32  ;;  %v6954_v36 = vmul.f32 %v13934_v19, %v13934_v19  ;;  %v6956_v23 = vmul.f32 %v13937_v53, %v13937_v53  ;;  %v16282_v5 = vld [vmem:[#allocation44_spill] sm:$0xff] }
 0x554   :  { %v14288_v56 = vpop.f32.mrf.mxu0  ;;  %v14290_v58 = vpop.f32.mrf.mxu1  ;;  %v7174_v59 = vadd.f32 %v7173_v49, %v6948_v4  ;;  %v6857_v60 = vadd.f32 %v6856_v6, %v14265_v26  ;;  %v14308_v28 = vadd.f32 %v13951_v62, %v16282_v5  ;;  %v14312_v32 = vadd.f32 %v13953_v8, %v16284_v12  ;;  %v16289_v12 = vld [vmem:[#allocation35_spill] sm:$0xff] }
 0x555   :  { %16278 = vst [vmem:[#allocation108_spill] sm:$0xff] %v14288_v56  ;;  %16279 = vst [vmem:[#allocation109_spill] sm:$0xff] %v14290_v58  ;;  %v6899_v25 = vadd.f32 %v6898_v41, %v14275_v27  ;;  %v6837_v57 = vadd.f32 %v6836_v24, %v13934_v19  ;;  %v6955_v43 = vmul.f32 %v13940_v39, %v13940_v39 }
 0x556   :  { %v14301_v46 = vpop.f32.mrf.mxu0  ;;  %v14303_v29 = vpop.f32.mrf.mxu1  ;;  %16283 = vst [vmem:[#allocation44_spill] sm:$0xff] %v14308_v28  ;;  %16285 = vst [vmem:[#allocation70_spill] sm:$0xff] %v14312_v32  ;;  %v6957_v4 = vmul.f32 %v13943_v45, %v13943_v45  ;;  %v7153_v62 = vadd.f32 %v7152_v54, %v6947_v52  ;;  %v6879_v5 = vadd.f32 %v6878_v14, %v13937_v53 }
 0x557   :  { %16280 = vst [vmem:[#allocation110_spill] sm:$0xff] %v14301_v46  ;;  %16281 = vst [vmem:[#allocation111_spill] sm:$0xff] %v14303_v29  ;;  %v6962_v8 = vmul.f32 %v16288_v11, %v16288_v11  ;;  %v6964_v41 = vmul.f32 %v16289_v12, %v16289_v12  ;;  %v7195_v24 = vadd.f32 %v7194_v34, %v6949_v61 }
 0x558   :  { %v14320_v49 = vpop.f32.mrf.mxu0  ;;  %v14322_v6 = vpop.f32.mrf.mxu1  ;;  %v7133_v19 = vadd.f32 %v7132_v22, %v6954_v36  ;;  %v7175_v17 = vadd.f32 %v7174_v59, %v6956_v23  ;;  %v6858_v27 = vadd.f32 %v6857_v60, %v13940_v39  ;;  %v6900_v33 = vadd.f32 %v6899_v25, %v13943_v45  ;;  %v16302_v39 = vld [vmem:[#allocation72_spill] sm:$0xff] }
 0x559   :  { %16286 = vst [vmem:[#allocation112_spill] sm:$0xff] %v14320_v49  ;;  %16287 = vst [vmem:[#allocation113_spill] sm:$0xff] %v14322_v6  ;;  %v6838_v54 = vadd.f32 %v6837_v57, %v16288_v11  ;;  %v6963_v14 = vmul.f32 %v14308_v28, %v14308_v28  ;;  %v6965_v52 = vmul.f32 %v14312_v32, %v14312_v32 }
 0x55a   :  { %v14330_v9 = vpop.f32.mrf.mxu0  ;;  %v14332_v26 = vpop.f32.mrf.mxu1  ;;  %v7154_v53 = vadd.f32 %v7153_v62, %v6955_v43  ;;  %v7196_v34 = vadd.f32 %v7195_v24, %v6957_v4  ;;  %v6880_v22 = vadd.f32 %v6879_v5, %v16289_v12  ;;  %v6970_v61 = vmul.f32 %v13956_v15, %v13956_v15  ;;  %v16297_v12 = vld [vmem:[#allocation42_spill] sm:$0xff] }
 0x55b   :  { %16290 = vst [vmem:[#allocation114_spill] sm:$0xff] %v14330_v9  ;;  %16291 = vst [vmem:[#allocation115_spill] sm:$0xff] %v14332_v26  ;;  %v7134_v59 = vadd.f32 %v7133_v19, %v6962_v8  ;;  %v7176_v60 = vadd.f32 %v7175_v17, %v6964_v41  ;;  %v6859_v25 = vadd.f32 %v6858_v27, %v14308_v28  ;;  %v16296_v8 = vld [vmem:[#allocation36_spill] sm:$0xff] }
 0x55c   :  { %v14343_v36 = vpop.f32.mrf.mxu0  ;;  %v14345_v23 = vpop.f32.mrf.mxu1  ;;  %v6972_v57 = vmul.f32 %v13959_v37, %v13959_v37  ;;  %v6901_v11 = vadd.f32 %v6900_v33, %v14312_v32  ;;  %v6839_v43 = vadd.f32 %v6838_v54, %v13956_v15  ;;  %v6971_v4 = vmul.f32 %v13962_v42, %v13962_v42  ;;  %v16298_v15 = vld [vmem:[#allocation47_spill] sm:$0xff]  ;;  %v16301_v28 = vld [vmem:[#allocation48_spill] sm:$0xff] }
 0x55d   :  { %16292 = vst [vmem:[#allocation116_spill] sm:$0xff] %v14343_v36  ;;  %16293 = vst [vmem:[#allocation117_spill] sm:$0xff] %v14345_v23  ;;  %v6973_v62 = vmul.f32 %v13965_v47, %v13965_v47  ;;  %v7155_v17 = vadd.f32 %v7154_v53, %v6963_v14  ;;  %v7197_v19 = vadd.f32 %v7196_v34, %v6965_v52  ;;  %v16299_v32 = vld [vmem:[#allocation71_spill] sm:$0xff]  ;;  %v10756_v14 = vld [vmem:[%s15668_s6 + $0x20] sm:$0xff]  }
 0x55e   :  { %v14356_v5 = vpop.f32.mrf.mxu0  ;;  %v14358_v24 = vpop.f32.mrf.mxu1  ;;  %v6881_v27 = vadd.f32 %v6880_v22, %v13959_v37  ;;  %v6978_v41 = vmul.f32 %v16296_v8, %v16296_v8  ;;  %v7135_v33 = vadd.f32 %v7134_v59, %v6970_v61  ;;  %v6980_v54 = vmul.f32 %v16297_v12, %v16297_v12  ;;  %v10757_v52 = vld [vmem:[%s15668_s6 + $0xa0] sm:$0xff]   ;;  %v10759_v22 = vld [vmem:[%s15668_s6 + $0xd8] sm:$0xff]   ;;  %9934 = vmatpush3.bf16.msra.mxu0 %v10756_v14 }
 0x55f   :  { %16294 = vst [vmem:[#allocation118_spill] sm:$0xff] %v14356_v5  ;;  %16295 = vst [vmem:[#allocation119_spill] sm:$0xff] %v14358_v24  ;;  %v14367_v45 = vadd.f32 %v16299_v32, %v16298_v15  ;;  %v14371_v5 = vadd.f32 %v16302_v39, %v16301_v28  ;;  %v7177_v34 = vadd.f32 %v7176_v60, %v6972_v57  ;;  %v10758_v28 = vld [vmem:[%s15668_s6 + $0x58] sm:$0xff]   ;;  %9998 = vmatpush3.bf16.msra.mxu1 %v10757_v52 }
 0x560   :  { %v14373_v24 = vpop.f32.mrf.mxu0  ;;  %v14375_v53 = vpop.f32.mrf.mxu1  ;;  %v6860_v15 = vadd.f32 %v6859_v25, %v13962_v42  ;;  %v6902_v32 = vadd.f32 %v6901_v11, %v13965_v47  ;;  %v14386_v39 = vadd.f32 %v6839_v43, %v16296_v8  ;;  %v14394_v61 = vadd.f32 %v7155_v17, %v6971_v4  ;;  %v10760_v57 = vld [vmem:[%s15668_s6 + $0x18] sm:$0xff]   ;;  %v16306_v4 = vld [vmem:[#allocation73_spill] sm:$0xff]  ;;  %v16308_v17 = vld [vmem:[#allocation74_spill] sm:$0xff]  ;;  %9935 = vmatprep.subr.bf16.mxu0 %v10758_v28 }
 0x561   :  { %16300 = vst [vmem:[#allocation47_spill] sm:$0xff] %v14367_v45  ;;  %16303 = vst [vmem:[#allocation71_spill] sm:$0xff] %v14371_v5  ;;  %v14396_v59 = vadd.f32 %v7197_v19, %v6973_v62  ;;  %v14399_v60 = vadd.f32 %v6881_v27, %v16297_v12  ;;  %v10761_v43 = vld [vmem:[%s15668_s6 + $0x98] sm:$0xff]   ;;  %v14407_v37 = vadd.f32 %v7135_v33, %v6978_v41  ;;  %9999 = vmatprep.subr.bf16.mxu1 %v10759_v22  ;;  %v10762_v27 = vld [vmem:[%s15668_s6 + $0x50] sm:$0xff]  }
 0x562   :  { %16304 = vst [vmem:[#allocation48_spill] sm:$0xff] %v14373_v24  ;;  %16305 = vst [vmem:[#allocation72_spill] sm:$0xff] %v14375_v53  ;;  %v6300_v25 = vpop.f32.mrf.mxu0  ;;  %v6373_v11 = vpop.f32.mrf.mxu1  ;;  %v14418_v14 = vadd.f32 %v7177_v34, %v6980_v54  ;;  %v14421_v52 = vadd.f32 %v6860_v15, %v14367_v45  ;;  %v14425_v41 = vmul.f32 %v14367_v45, %v14367_v45  ;;  %v10763_v28 = vld [vmem:[%s15668_s6 + $0xd0] sm:$0xff]   ;;  %v16312_v12 = vld [vmem:[#allocation76_spill] sm:$0xff]  ;;  %9936 = vmatpush3.bf16.msra.mxu0 %v10760_v57 }
 0x563   :  { %v14410_v62 = vadd.f32 %v6300_v25, %v16306_v4  ;;  %v14413_v19 = vadd.f32 %v6373_v11, %v16308_v17  ;;  %v14428_v33 = vadd.f32 %v6902_v32, %v14371_v5  ;;  %v14435_v54 = vmul.f32 %v14371_v5, %v14371_v5  ;;  %v16310_v4 = vld [vmem:[#allocation75_spill] sm:$0xff]  ;;  %10000 = vmatpush3.bf16.msra.mxu1 %v10761_v43  ;;  %v16322_v24 = vld [vmem:[#allocation81_spill] sm:$0xff] }
 0x564   :  { %v6302_v25 = vpop.f32.mrf.mxu0  ;;  %v6375_v11 = vpop.f32.mrf.mxu1  ;;  %9937 = vmatprep.subr.bf16.mxu0 %v10762_v27  ;;  %10001 = vmatprep.subr.bf16.mxu1 %v10763_v28 }
 0x565   :  { %16307 = vst [vmem:[#allocation73_spill] sm:$0xff] %v14410_v62  ;;  %16309 = vst [vmem:[#allocation74_spill] sm:$0xff] %v14413_v19  ;;  %v6757_v34 = vadd.f32 %v14216_v10, %v14410_v62  ;;  %v6982_v15 = vmul.f32 %v14410_v62, %v14410_v62  ;;  %v6984_v32 = vmul.f32 %v14413_v19, %v14413_v19  ;;  %v10764_v10 = vld [vmem:[%s15668_s6 + $0x10] sm:$0xff]   ;;  %v16314_v62 = vld [vmem:[#allocation77_spill] sm:$0xff] }
 0x566   :  { %v6799_v22 = vadd.f32 %v14221_v48, %v14413_v19  ;;  %v14446_v17 = vadd.f32 %v6302_v25, %v16310_v4  ;;  %v14449_v8 = vadd.f32 %v6375_v11, %v16312_v12  ;;  %v6304_v5 = vpop.f32.mrf.mxu0  ;;  %v6377_v47 = vpop.f32.mrf.mxu1  ;;  %v16316_v25 = vld [vmem:[#allocation78_spill] sm:$0xff]  ;;  %9938 = vmatpush3.bf16.msra.mxu0 %v10764_v10 }
 0x567   :  { %v7053_v45 = vadd.f32 %v14218_v50, %v6982_v15  ;;  %v7095_v42 = vadd.f32 %v14223_v1, %v6984_v32  ;;  %v14457_v48 = vadd.f32 %v6304_v5, %v16314_v62  ;;  %v14460_v4 = vadd.f32 %v6377_v47, %v16316_v25  ;;  %v10765_v12 = vld [vmem:[%s15668_s6 + $0x90] sm:$0xff]   ;;  %v10766_v62 = vld [vmem:[%s15668_s6 + $0x48] sm:$0xff]   ;;  %v16318_v25 = vld [vmem:[#allocation79_spill] sm:$0xff] }
 0x568   :  { %16311 = vst [vmem:[#allocation75_spill] sm:$0xff] %v14446_v17  ;;  %16313 = vst [vmem:[#allocation76_spill] sm:$0xff] %v14449_v8  ;;  %v6778_v57 = vadd.f32 %v14226_v63, %v14446_v17  ;;  %v6983_v43 = vmul.f32 %v14446_v17, %v14446_v17  ;;  %v6820_v50 = vadd.f32 %v14231_v35, %v14449_v8  ;;  %v6306_v5 = vpop.f32.mrf.mxu0  ;;  %v6379_v47 = vpop.f32.mrf.mxu1  ;;  %v10767_v15 = vld [vmem:[%s15668_s6 + $0xc8] sm:$0xff]   ;;  %10002 = vmatpush3.bf16.msra.mxu1 %v10765_v12 }
 0x569   :  { %16315 = vst [vmem:[#allocation77_spill] sm:$0xff] %v14457_v48  ;;  %16317 = vst [vmem:[#allocation78_spill] sm:$0xff] %v14460_v4  ;;  %v6985_v1 = vmul.f32 %v14449_v8, %v14449_v8  ;;  %v6758_v27 = vadd.f32 %v6757_v34, %v14457_v48  ;;  %v6990_v63 = vmul.f32 %v14457_v48, %v14457_v48  ;;  %v16320_v34 = vld [vmem:[#allocation80_spill] sm:$0xff]  ;;  %9939 = vmatprep.subr.bf16.mxu0 %v10766_v62 }
 0x56a   :  { %v6800_v11 = vadd.f32 %v6799_v22, %v14460_v4  ;;  %v6992_v35 = vmul.f32 %v14460_v4, %v14460_v4  ;;  %v7074_v28 = vadd.f32 %v14228_v20, %v6983_v43  ;;  %v14488_v19 = vadd.f32 %v6306_v5, %v16318_v25  ;;  %v6310_v48 = vpop.f32.mrf.mxu0  ;;  %v6383_v17 = vpop.f32.mrf.mxu1  ;;  %v10768_v22 = vld [vmem:[%s15668_s6 + $0x8] sm:$0xff]   ;;  %v16324_v20 = vld [vmem:[#allocation82_spill] sm:$0xff]  ;;  %10003 = vmatprep.subr.bf16.mxu1 %v10767_v15 }
 0x56b   :  { %v7116_v32 = vadd.f32 %v14237_v13, %v6985_v1  ;;  %v14491_v8 = vadd.f32 %v6379_v47, %v16320_v34  ;;  %v7054_v4 = vadd.f32 %v7053_v45, %v6990_v63  ;;  %v14497_v23 = vadd.f32 %v6310_v48, %v16322_v24  ;;  %v10769_v43 = vld [vmem:[%s15668_s6 + $0x88] sm:$0xff]   ;;  %v10771_v47 = vld [vmem:[%s15668_s6 + $0xc0] sm:$0xff]   ;;  %9940 = vmatpush3.bf16.msra.mxu0 %v10768_v22 }
 0x56c   :  { %16319 = vst [vmem:[#allocation79_spill] sm:$0xff] %v14488_v19  ;;  %v7096_v53 = vadd.f32 %v7095_v42, %v6992_v35  ;;  %v14500_v13 = vadd.f32 %v6383_v17, %v16324_v20  ;;  %v6779_v1 = vadd.f32 %v6778_v57, %v14488_v19  ;;  %v6991_v10 = vmul.f32 %v14488_v19, %v14488_v19  ;;  %v6312_v42 = vpop.f32.mrf.mxu0  ;;  %v6385_v24 = vpop.f32.mrf.mxu1  ;;  %v10770_v17 = vld [vmem:[%s15668_s6 + $0x40] sm:$0xff]   ;;  %v16326_v35 = vld [vmem:[#allocation83_spill] sm:$0xff] }
 0x56d   :  { %16321 = vst [vmem:[#allocation80_spill] sm:$0xff] %v14491_v8  ;;  %16323 = vst [vmem:[#allocation81_spill] sm:$0xff] %v14497_v23  ;;  %v6821_v5 = vadd.f32 %v6820_v50, %v14491_v8  ;;  %v6993_v45 = vmul.f32 %v14491_v8, %v14491_v8  ;;  %v6759_v48 = vadd.f32 %v6758_v27, %v14497_v23  ;;  %v16328_v34 = vld [vmem:[#allocation84_spill] sm:$0xff]  ;;  %v16330_v8 = vld [vmem:[#allocation85_spill] sm:$0xff]  ;;  %10004 = vmatpush3.bf16.msra.mxu1 %v10769_v43 }
 0x56e   :  { %16325 = vst [vmem:[#allocation82_spill] sm:$0xff] %v14500_v13  ;;  %v6998_v12 = vmul.f32 %v14497_v23, %v14497_v23  ;;  %v6801_v57 = vadd.f32 %v6800_v11, %v14500_v13  ;;  %v7000_v50 = vmul.f32 %v14500_v13, %v14500_v13  ;;  %v7075_v62 = vadd.f32 %v7074_v28, %v6991_v10  ;;  %v6314_v20 = vpop.f32.mrf.mxu0  ;;  %v6387_v23 = vpop.f32.mrf.mxu1  ;;  %v10772_v11 = vld [vmem:[%s15668_s6] sm:$0xff]   ;;  %v16332_v28 = vld [vmem:[#allocation86_spill] sm:$0xff] }
 0x56f   :  { %v7117_v63 = vadd.f32 %v7116_v32, %v6993_v45  ;;  %v14524_v25 = vadd.f32 %v6312_v42, %v16326_v35  ;;  %v14527_v27 = vadd.f32 %v6385_v24, %v16328_v34  ;;  %v14533_v19 = vadd.f32 %v6314_v20, %v16330_v8  ;;  %v10773_v10 = vld [vmem:[%s15668_s6 + $0x80] sm:$0xff]   ;;  %9941 = vmatprep.subr.bf16.mxu0 %v10770_v17  ;;  %v16334_v35 = vld [vmem:[#allocation87_spill] sm:$0xff] }
 0x570   :  { %v7055_v15 = vadd.f32 %v7054_v4, %v6998_v12  ;;  %v7097_v13 = vadd.f32 %v7096_v53, %v7000_v50  ;;  %v14536_v32 = vadd.f32 %v6387_v23, %v16332_v28  ;;  %v6316_v8 = vpop.f32.mrf.mxu0  ;;  %v6389_v4 = vpop.f32.mrf.mxu1  ;;  %v10774_v23 = vld [vmem:[%s15668_s6 + $0x178] sm:$0xff]   ;;  %10005 = vmatprep.subr.bf16.mxu1 %v10771_v47  ;;  %v16336_v20 = vld [vmem:[#allocation88_spill] sm:$0xff]  ;;  %9942 = vmatpush3.bf16.msra.mxu0 %v10772_v11  ;;  %v16340_v47 = vld [vmem:[#allocation90_spill] sm:$0xff] }
 0x571   :  { %16327 = vst [vmem:[#allocation83_spill] sm:$0xff] %v14524_v25  ;;  %16329 = vst [vmem:[#allocation84_spill] sm:$0xff] %v14527_v27  ;;  %v6780_v45 = vadd.f32 %v6779_v1, %v14524_v25  ;;  %v6999_v22 = vmul.f32 %v14524_v25, %v14524_v25  ;;  %v6822_v42 = vadd.f32 %v6821_v5, %v14527_v27  ;;  %v10776_v12 = vld [vmem:[%s15668_s6 + $0x1f8] sm:$0xff]   ;;  %v16338_v25 = vld [vmem:[#allocation89_spill] sm:$0xff]  ;;  %10006 = vmatpush3.bf16.msra.mxu1 %v10773_v10 }
 0x572   :  { %16331 = vst [vmem:[#allocation85_spill] sm:$0xff] %v14533_v19  ;;  %16333 = vst [vmem:[#allocation86_spill] sm:$0xff] %v14536_v32  ;;  %v7001_v53 = vmul.f32 %v14527_v27, %v14527_v27  ;;  %v6760_v43 = vadd.f32 %v6759_v48, %v14533_v19  ;;  %v7006_v1 = vmul.f32 %v14533_v19, %v14533_v19  ;;  %v6320_v28 = vpop.f32.mrf.mxu0  ;;  %v6393_v19 = vpop.f32.mrf.mxu1  ;;  %10055 = vmatprep.subr.bf16.mxu0 %v10774_v23 }
 0x573   :  { %v6802_v24 = vadd.f32 %v6801_v57, %v14536_v32  ;;  %v7008_v5 = vmul.f32 %v14536_v32, %v14536_v32  ;;  %v7076_v17 = vadd.f32 %v7075_v62, %v6999_v22  ;;  %v14560_v34 = vadd.f32 %v6316_v8, %v16334_v35  ;;  %10119 = vmatprep.subr.bf16.mxu1 %v10776_v12 }
 0x574   :  { %v7118_v50 = vadd.f32 %v7117_v63, %v7001_v53  ;;  %v14563_v48 = vadd.f32 %v6389_v4, %v16336_v20  ;;  %v7056_v57 = vadd.f32 %v7055_v15, %v7006_v1  ;;  %v14566_v32 = vadd.f32 %v6320_v28, %v16338_v25  ;;  %v6322_v11 = vpop.f32.mrf.mxu0  ;;  %v6395_v15 = vpop.f32.mrf.mxu1  ;;  %v16344_v1 = vld [vmem:[#allocation92_spill] sm:$0xff]  ;;  %v16346_v28 = vld [vmem:[#allocation93_spill] sm:$0xff] }
 0x575   :  { %16335 = vst [vmem:[#allocation87_spill] sm:$0xff] %v14560_v34  ;;  %v7098_v27 = vadd.f32 %v7097_v13, %v7008_v5  ;;  %v14569_v36 = vadd.f32 %v6393_v19, %v16340_v47  ;;  %v6781_v62 = vadd.f32 %v6780_v45, %v14560_v34  ;;  %v7007_v63 = vmul.f32 %v14560_v34, %v14560_v34 }
 0x576   :  { %16337 = vst [vmem:[#allocation88_spill] sm:$0xff] %v14563_v48  ;;  %16339 = vst [vmem:[#allocation89_spill] sm:$0xff] %v14566_v32  ;;  %v6823_v22 = vadd.f32 %v6822_v42, %v14563_v48  ;;  %v7009_v53 = vmul.f32 %v14563_v48, %v14563_v48  ;;  %v6761_v13 = vadd.f32 %v6760_v43, %v14566_v32  ;;  %v16342_v42 = vld [vmem:[#allocation91_spill] sm:$0xff]  ;;  %v6324_v23 = vpop.f32.mrf.mxu0  ;;  %v6397_v35 = vpop.f32.mrf.mxu1 }
 0x577   :  { %16341 = vst [vmem:[#allocation90_spill] sm:$0xff] %v14569_v36  ;;  %v7014_v19 = vmul.f32 %v14566_v32, %v14566_v32  ;;  %v6803_v25 = vadd.f32 %v6802_v24, %v14569_v36  ;;  %v7016_v10 = vmul.f32 %v14569_v36, %v14569_v36  ;;  %v7077_v45 = vadd.f32 %v7076_v17, %v7007_v63  ;;  %v16348_v24 = vld [vmem:[#allocation94_spill] sm:$0xff]  ;;  %v16354_v36 = vld [vmem:[#allocation97_spill] sm:$0xff] }
 0x578   :  { %v7119_v8 = vadd.f32 %v7118_v50, %v7009_v53  ;;  %v14584_v4 = vadd.f32 %v6322_v11, %v16342_v42  ;;  %v14587_v5 = vadd.f32 %v6395_v15, %v16344_v1  ;;  %v14590_v47 = vadd.f32 %v6324_v23, %v16346_v28  ;;  %v6326_v53 = vpop.f32.mrf.mxu0  ;;  %v6399_v11 = vpop.f32.mrf.mxu1  ;;  %v16350_v42 = vld [vmem:[#allocation95_spill] sm:$0xff] }
 0x579   :  { %v7057_v43 = vadd.f32 %v7056_v57, %v7014_v19  ;;  %v7099_v20 = vadd.f32 %v7098_v27, %v7016_v10  ;;  %v14593_v32 = vadd.f32 %v6397_v35, %v16348_v24  ;;  %v14608_v1 = vadd.f32 %v6326_v53, %v16350_v42 }
 0x57a   :  { %16343 = vst [vmem:[#allocation91_spill] sm:$0xff] %v14584_v4  ;;  %16345 = vst [vmem:[#allocation92_spill] sm:$0xff] %v14587_v5  ;;  %v6782_v12 = vadd.f32 %v6781_v62, %v14584_v4  ;;  %v7015_v17 = vmul.f32 %v14584_v4, %v14584_v4  ;;  %v6824_v50 = vadd.f32 %v6823_v22, %v14587_v5  ;;  %v16352_v22 = vld [vmem:[#allocation96_spill] sm:$0xff]  ;;  %v6330_v35 = vpop.f32.mrf.mxu0  ;;  %v6403_v28 = vpop.f32.mrf.mxu1 }
 0x57b   :  { %16347 = vst [vmem:[#allocation93_spill] sm:$0xff] %v14590_v47  ;;  %16349 = vst [vmem:[#allocation94_spill] sm:$0xff] %v14593_v32  ;;  %v7017_v63 = vmul.f32 %v14587_v5, %v14587_v5  ;;  %v6762_v27 = vadd.f32 %v6761_v13, %v14590_v47  ;;  %v7022_v57 = vmul.f32 %v14590_v47, %v14590_v47  ;;  %v16356_v47 = vld [vmem:[#allocation98_spill] sm:$0xff] }
 0x57c   :  { %v6804_v15 = vadd.f32 %v6803_v25, %v14593_v32  ;;  %v7024_v62 = vmul.f32 %v14593_v32, %v14593_v32  ;;  %v7078_v19 = vadd.f32 %v7077_v45, %v7015_v17  ;;  %16351 = vst [vmem:[#allocation95_spill] sm:$0xff] %v14608_v1  ;;  %v14611_v23 = vadd.f32 %v6399_v11, %v16352_v22  ;;  %v6405_v53 = vpop.f32.mrf.mxu1 }
 0x57d   :  { %v7120_v10 = vadd.f32 %v7119_v8, %v7017_v63  ;;  %v7058_v24 = vadd.f32 %v7057_v43, %v7022_v57  ;;  %v14614_v5 = vadd.f32 %v6330_v35, %v16354_v36  ;;  %v14617_v25 = vadd.f32 %v6403_v28, %v16356_v47  ;;  %v6332_v63 = vpop.f32.mrf.mxu0  ;;  %v16358_v57 = vld [vmem:[#allocation40_spill] sm:$0xff] }
 0x57e   :  { %16353 = vst [vmem:[#allocation96_spill] sm:$0xff] %v14611_v23  ;;  %v7100_v13 = vadd.f32 %v7099_v20, %v7024_v62  ;;  %v6783_v32 = vadd.f32 %v6782_v12, %v14608_v1  ;;  %v7023_v45 = vmul.f32 %v14608_v1, %v14608_v1  ;;  %v6825_v8 = vadd.f32 %v6824_v50, %v14611_v23  ;;  %v16360_v50 = vld [vmem:[#allocation100_spill] sm:$0xff]  ;;  %v6407_v35 = vpop.f32.mrf.mxu1 }
 0x57f   :  { %16355 = vst [vmem:[#allocation97_spill] sm:$0xff] %v14614_v5  ;;  %16357 = vst [vmem:[#allocation98_spill] sm:$0xff] %v14617_v25  ;;  %v7025_v17 = vmul.f32 %v14611_v23, %v14611_v23  ;;  %v6763_v43 = vadd.f32 %v6762_v27, %v14614_v5  ;;  %v7030_v36 = vmul.f32 %v14614_v5, %v14614_v5  ;;  %v6334_v22 = vpop.f32.mrf.mxu0 }
 0x580   :  { %v6805_v20 = vadd.f32 %v6804_v15, %v14617_v25  ;;  %v7032_v47 = vmul.f32 %v14617_v25, %v14617_v25  ;;  %v7079_v12 = vadd.f32 %v7078_v19, %v7023_v45  ;;  %v14632_v62 = vadd.f32 %v6332_v63, %v16358_v57  ;;  %v6409_v63 = vpop.f32.mrf.mxu1 }
 0x581   :  { %v7121_v11 = vadd.f32 %v7120_v10, %v7025_v17  ;;  %v14635_v42 = vadd.f32 %v6405_v53, %v16360_v50  ;;  %v7059_v28 = vadd.f32 %v7058_v24, %v7030_v36  ;;  %v14638_v23 = vadd.f32 %v6334_v22, %v14106_v44  ;;  %v6336_v17 = vpop.f32.mrf.mxu0 }
 0x582   :  { %16359 = vst [vmem:[#allocation40_spill] sm:$0xff] %v14632_v62  ;;  %v7101_v27 = vadd.f32 %v7100_v13, %v7032_v47  ;;  %v14641_v15 = vadd.f32 %v6407_v35, %v14108_v3  ;;  %v6784_v25 = vadd.f32 %v6783_v32, %v14632_v62  ;;  %v7031_v19 = vmul.f32 %v14632_v62, %v14632_v62  ;;  %v14663_v50 = vpop.f32.mrf.mxu1 }
 0x583   :  { %16361 = vst [vmem:[#allocation100_spill] sm:$0xff] %v14635_v42  ;;  %v6826_v10 = vadd.f32 %v6825_v8, %v14635_v42  ;;  %v7033_v45 = vmul.f32 %v14635_v42, %v14635_v42  ;;  %v6764_v24 = vadd.f32 %v6763_v43, %v14638_v23  ;;  %v7038_v44 = vmul.f32 %v14638_v23, %v14638_v23  ;;  %v16362_v8 = vld [vmem:[#allocation56_spill] sm:$0xff]  ;;  %v14661_v57 = vpop.f32.mrf.mxu0 }
 0x584   :  { %v6806_v3 = vadd.f32 %v6805_v20, %v14641_v15  ;;  %v7040_v32 = vmul.f32 %v14641_v15, %v14641_v15  ;;  %v7080_v13 = vadd.f32 %v7079_v12, %v7031_v19  ;;  %v14656_v36 = vadd.f32 %v6336_v17, %v14121_v2 }
 0x585   :  { %v7122_v53 = vadd.f32 %v7121_v11, %v7033_v45  ;;  %v14659_v47 = vadd.f32 %v6409_v63, %v16362_v8  ;;  %v6765_v43 = vrot.slane %v6764_v24, 4  ;;  %v7060_v22 = vadd.f32 %v7059_v28, %v7038_v44  ;;  %v14671_v19 = vpop.f32.mrf.mxu0  ;;  %v14673_v45 = vpop.f32.mrf.mxu1 }
 0x586   :  { %v6807_v35 = vrot.slane %v6806_v3, 4  ;;  %v7102_v5 = vadd.f32 %v7101_v27, %v7040_v32  ;;  %v6785_v20 = vadd.f32 %v6784_v25, %v14656_v36  ;;  %v7039_v12 = vmul.f32 %v14656_v36, %v14656_v36 }
 0x587   :  { %v6827_v11 = vadd.f32 %v6826_v10, %v14659_v47  ;;  %v7041_v2 = vmul.f32 %v14659_v47, %v14659_v47  ;;  %v6766_v17 = vadd.f32 %v6765_v43, %v6764_v24  ;;  %v7061_v63 = vrot.slane %v7060_v22, 4  ;;  %v14675_v42 = vpop.f32.mrf.mxu0  ;;  %v14677_v62 = vpop.f32.mrf.mxu1 }
 0x588   :  { %v6808_v8 = vadd.f32 %v6807_v35, %v6806_v3  ;;  %v7103_v28 = vrot.slane %v7102_v5, 4  ;;  %v6786_v44 = vrot.slane %v6785_v20, 4  ;;  %v7081_v27 = vadd.f32 %v7080_v13, %v7039_v12 }
 0x589   :  { %v6828_v32 = vrot.slane %v6827_v11, 4  ;;  %v7123_v25 = vadd.f32 %v7122_v53, %v7041_v2  ;;  %v6767_v10 = vrot.slane %v6766_v17, 2  ;;  %v7062_v1 = vadd.f32 %v7061_v63, %v7060_v22  ;;  %v14679_v24 = vpop.f32.mrf.mxu0  ;;  %v14681_v3 = vpop.f32.mrf.mxu1 }
 0x58a   :  { %v6809_v4 = vrot.slane %v6808_v8, 2  ;;  %v7104_v48 = vadd.f32 %v7103_v28, %v7102_v5  ;;  %v6787_v34 = vadd.f32 %v6786_v44, %v6785_v20  ;;  %v7082_v26 = vrot.slane %v7081_v27, 4 }
 0x58b   :  { %v6829_v9 = vadd.f32 %v6828_v32, %v6827_v11  ;;  %v7124_v6 = vrot.slane %v7123_v25, 4  ;;  %v6768_v43 = vadd.f32 %v6767_v10, %v6766_v17  ;;  %v7063_v13 = vrot.slane %v7062_v1, 2  ;;  %v14683_v46 = vpop.f32.mrf.mxu0  ;;  %v14685_v22 = vpop.f32.mrf.mxu1 }
 0x58c   :  { %v6810_v35 = vadd.f32 %v6809_v4, %v6808_v8  ;;  %v7105_v53 = vrot.slane %v7104_v48, 2  ;;  %v6788_v12 = vrot.slane %v6787_v34, 2  ;;  %v7083_v2 = vadd.f32 %v7082_v26, %v7081_v27 }
 0x58d   :  { %v6830_v49 = vrot.slane %v6829_v9, 2  ;;  %v7125_v29 = vadd.f32 %v7124_v6, %v7123_v25  ;;  %v6769_v5 = vrot.slane %v6768_v43, 1  ;;  %v7064_v20 = vadd.f32 %v7063_v13, %v7062_v1  ;;  %v14687_v17 = vpop.f32.mrf.mxu0  ;;  %v14689_v27 = vpop.f32.mrf.mxu1 }
 0x58e   :  { %v6811_v11 = vrot.slane %v6810_v35, 1  ;;  %v7106_v63 = vadd.f32 %v7105_v53, %v7104_v48  ;;  %v6789_v28 = vadd.f32 %v6788_v12, %v6787_v34  ;;  %v7084_v44 = vrot.slane %v7083_v2, 2 }
 0x58f   :  { %v6831_v32 = vadd.f32 %v6830_v49, %v6829_v9  ;;  %v7126_v58 = vrot.slane %v7125_v29, 2  ;;  %v6770_v4 = vadd.f32 %v6769_v5, %v6768_v43  ;;  %v7065_v8 = vrot.slane %v7064_v20, 1  ;;  %v14695_v9 = vpop.f32.mrf.mxu0 }
 0x590   :  { %v6812_v10 = vadd.f32 %v6811_v11, %v6810_v35  ;;  %v7107_v26 = vrot.slane %v7106_v63, 1  ;;  %v6790_v6 = vrot.slane %v6789_v28, 1  ;;  %v7085_v25 = vadd.f32 %v7084_v44, %v7083_v2 }
 0x591   :  { %v6832_v56 = vrot.slane %v6831_v32, 1  ;;  %v7127_v40 = vadd.f32 %v7126_v58, %v7125_v29  ;;  %v7066_v0 = vadd.f32 %v7065_v8, %v7064_v20  ;;  %v14691_v1 = vmul.f32 0.0078125, %v6770_v4  ;;  %v14701_v29 = vpop.f32.mrf.mxu1 }
 0x592   :  { %v7108_v48 = vadd.f32 %v7107_v26, %v7106_v63  ;;  %v14693_v34 = vmul.f32 0.0078125, %v6812_v10  ;;  %v6791_v49 = vadd.f32 %v6790_v6, %v6789_v28  ;;  %v7086_v13 = vrot.slane %v7085_v25, 1 }
 0x593   :  { %v6833_v43 = vadd.f32 %v6832_v56, %v6831_v32  ;;  %v7128_v53 = vrot.slane %v7127_v40, 1  ;;  %v7157_v35 = vadd.f32 %v14394_v61, %v14425_v41  ;;  %v7222_v12 = vmul.f32 0.0078125, %v7066_v0  ;;  %v16363_v0 = vld [vmem:[#allocation101_spill] sm:$0xff]  ;;  %v14715_v41 = vpop.f32.mrf.mxu0 }
 0x594   :  { %v7230_v2 = vmul.f32 %v14691_v1, %v14691_v1  ;;  %v7224_v58 = vmul.f32 0.0078125, %v7108_v48  ;;  %v7199_v5 = vadd.f32 %v14396_v59, %v14435_v54  ;;  %v7232_v20 = vmul.f32 %v14693_v34, %v14693_v34 }
 0x595   :  { %v7087_v11 = vadd.f32 %v7086_v13, %v7085_v25  ;;  %v14707_v63 = vmul.f32 0.0078125, %v6791_v49  ;;  %v7129_v28 = vadd.f32 %v7128_v53, %v7127_v40  ;;  %v14709_v44 = vmul.f32 0.0078125, %v6833_v43  ;;  %v16364_v53 = vld [vmem:[#allocation102_spill] sm:$0xff] }
 0x596   :  { %v7238_v56 = vsub.f32 %v7222_v12, %v7230_v2  ;;  %v14713_v61 = vadd.f32 %v14661_v57, %v16363_v0  ;;  %v7374_v32 = vsub.f32 %v14638_v23, %v14691_v1  ;;  %v7240_v59 = vsub.f32 %v7224_v58, %v7232_v20  ;;  %v14725_v57 = vpop.f32.mrf.mxu1  ;;  %v14739_v58 = vpop.f32.mrf.mxu0 }
 0x597   :  { %v7223_v54 = vmul.f32 0.0078125, %v7087_v11  ;;  %v7231_v4 = vmul.f32 %v14707_v63, %v14707_v63  ;;  %v7376_v40 = vsub.f32 %v14641_v15, %v14693_v34  ;;  %v7225_v10 = vmul.f32 0.0078125, %v7129_v28 }
 0x598   :  { %v7246_v8 = vmax.f32 %v7238_v56, 0.0  ;;  %v7233_v26 = vmul.f32 %v14709_v44, %v14709_v44  ;;  %v7248_v6 = vmax.f32 %v7240_v59, 0.0  ;;  %v7375_v48 = vsub.f32 %v14656_v36, %v14707_v63 }
 0x599   :  { %v7239_v25 = vsub.f32 %v7223_v54, %v7231_v4  ;;  %v6986_v49 = vmul.f32 %v14713_v61, %v14713_v61  ;;  %v14733_v12 = vadd.f32 %v14663_v50, %v16364_v53  ;;  %v14737_v2 = vadd.f32 %v14671_v19, %v14150_v30  ;;  %v14751_v19 = vpop.f32.mrf.mxu1 }
 0x59a   :  { %v7382_v13 = vadd.f32 1e-05, %v7246_v8  ;;  %v7241_v43 = vsub.f32 %v7225_v10, %v7233_v26  ;;  %v7384_v20 = vadd.f32 1e-05, %v7248_v6  ;;  %v14745_v28 = vadd.f32 %v14673_v45, %v14152_v21  ;;  %v14762_v10 = vpop.f32.mrf.mxu0 }
 0x59b   :  { %v7247_v11 = vmax.f32 %v7239_v25, 0.0  ;;  %v6841_v50 = vadd.f32 %v14386_v39, %v14713_v61  ;;  %v6988_v30 = vmul.f32 %v14733_v12, %v14733_v12  ;;  %v7137_v54 = vadd.f32 %v14407_v37, %v6986_v49 }
 0x59c   :  { %10808 = vrsqrt.f32 %v7382_v13  ;;  %v7249_v0 = vmax.f32 %v7241_v43, 0.0  ;;  %v6987_v4 = vmul.f32 %v14737_v2, %v14737_v2  ;;  %v6883_v21 = vadd.f32 %v14399_v60, %v14733_v12  ;;  %v16366_v43 = vld [vmem:[#allocation104_spill] sm:$0xff] }
 0x59d   :  { %10810 = vrsqrt.f32 %v7384_v20  ;;  %v7383_v59 = vadd.f32 1e-05, %v7247_v11  ;;  %v6862_v45 = vadd.f32 %v14421_v52, %v14737_v2  ;;  %v6989_v39 = vmul.f32 %v14745_v28, %v14745_v28 }
 0x59e   :  { %v7385_v8 = vadd.f32 1e-05, %v7249_v0  ;;  %v7179_v26 = vadd.f32 %v14418_v14, %v6988_v30  ;;  %v14767_v37 = vadd.f32 %v14675_v42, %v14165_v18  ;;  %v14771_v6 = vadd.f32 %v14677_v62, %v14167_v31  ;;  %v14783_v14 = vpop.f32.mrf.mxu1 }
 0x59f   :  { %10812 = vrsqrt.f32 %v7383_v59  ;;  %v7158_v60 = vadd.f32 %v7157_v35, %v6987_v4  ;;  %v6904_v52 = vadd.f32 %v14428_v33, %v14745_v28  ;;  %v14777_v25 = vadd.f32 %v14679_v24, %v14181_v55  ;;  %v14795_v24 = vpop.f32.mrf.mxu0 }
 0x5a0   :  { %v14781_v49 = vadd.f32 %v14681_v3, %v14183_v7  ;;  %10814 = vrsqrt.f32 %v7385_v8  ;;  %v7200_v18 = vadd.f32 %v7199_v5, %v6989_v39  ;;  %v6994_v31 = vmul.f32 %v14767_v37, %v14767_v37  ;;  %v16365_v5 = vld [vmem:[#allocation103_spill] sm:$0xff]  ;;  %v6543_v30 = vpop.f32.mrf.mxu1  ;;  %v16368_v39 = vld [vmem:[#allocation105_spill] sm:$0xff] }
 0x5a1   :  { %v6996_v62 = vmul.f32 %v14771_v6, %v14771_v6  ;;  %v6842_v33 = vadd.f32 %v6841_v50, %v14767_v37  ;;  %v6884_v42 = vadd.f32 %v6883_v21, %v14771_v6  ;;  %v6995_v55 = vmul.f32 %v14777_v25, %v14777_v25 }
 0x5a2   :  { %v6997_v7 = vmul.f32 %v14781_v49, %v14781_v49  ;;  %v6863_v3 = vadd.f32 %v6862_v45, %v14777_v25  ;;  %v6905_v35 = vadd.f32 %v6904_v52, %v14781_v49  ;;  %v14801_v13 = vadd.f32 %v14683_v46, %v16365_v5 }
 0x5a3   :  { %v14805_v53 = vadd.f32 %v14685_v22, %v16366_v43  ;;  %v7138_v20 = vadd.f32 %v7137_v54, %v6994_v31  ;;  %v7180_v11 = vadd.f32 %v7179_v26, %v6996_v62  ;;  %v14809_v0 = vadd.f32 %v14687_v17, %v14211_v38  ;;  %v6472_v17 = vpop.f32.mrf.mxu0  ;;  %v16371_v62 = vld [vmem:[#allocation107_spill] sm:$0xff] }
 0x5a4   :  { %v14813_v50 = vadd.f32 %v14689_v27, %v14213_v51  ;;  %v7159_v59 = vadd.f32 %v7158_v60, %v6995_v55  ;;  %v7201_v4 = vadd.f32 %v7200_v18, %v6997_v7  ;;  %v7002_v46 = vmul.f32 %v14801_v13, %v14801_v13  ;;  %v16370_v18 = vld [vmem:[#allocation106_spill] sm:$0xff] }
 0x5a5   :  { %16367 = vst [vmem:[#allocation56_spill] sm:$0xff] %v14805_v53  ;;  %v7004_v22 = vmul.f32 %v14805_v53, %v14805_v53  ;;  %v6843_v54 = vadd.f32 %v6842_v33, %v14801_v13  ;;  %v6885_v8 = vadd.f32 %v6884_v42, %v14805_v53  ;;  %v7003_v38 = vmul.f32 %v14809_v0, %v14809_v0  ;;  %v6545_v42 = vpop.f32.mrf.mxu1  ;;  %v6476_v43 = vpop.f32.mrf.mxu0 }
 0x5a6   :  { %v7005_v51 = vmul.f32 %v14813_v50, %v14813_v50  ;;  %v6864_v27 = vadd.f32 %v6863_v3, %v14809_v0  ;;  %v6906_v21 = vadd.f32 %v6905_v35, %v14813_v50  ;;  %v14829_v45 = vadd.f32 %v14695_v9, %v14233_v16 }
 0x5a7   :  { %v14833_v26 = vadd.f32 %v14701_v29, %v16368_v39  ;;  %v7139_v60 = vadd.f32 %v7138_v20, %v7002_v46  ;;  %v7181_v52 = vadd.f32 %v7180_v11, %v7004_v22  ;;  %v14837_v31 = vadd.f32 %v14715_v41, %v16370_v18  ;;  %v16372_v22 = vld [vmem:[#allocation4_spill] sm:$0xff] }
 0x5a8   :  { %v14841_v33 = vadd.f32 %v14725_v57, %v16371_v62  ;;  %v7160_v7 = vadd.f32 %v7159_v59, %v7003_v38  ;;  %v7202_v16 = vadd.f32 %v7201_v4, %v7005_v51  ;;  %v7010_v9 = vmul.f32 %v14829_v45, %v14829_v45  ;;  %v6478_v62 = vpop.f32.mrf.mxu0 }
 0x5a9   :  { %16369 = vst [vmem:[#allocation101_spill] sm:$0xff] %v14833_v26  ;;  %v14843_v55 = vpop.eup %10808  ;;  %v7012_v29 = vmul.f32 %v14833_v26, %v14833_v26  ;;  %v6844_v57 = vadd.f32 %v6843_v54, %v14829_v45  ;;  %v6886_v35 = vadd.f32 %v6885_v8, %v14833_v26  ;;  %v7011_v5 = vmul.f32 %v14837_v31, %v14837_v31  ;;  %v16374_v8 = vld [vmem:[#allocation46_spill] sm:$0xff] }
 0x5aa   :  { %v14849_v3 = vpop.eup %10810  ;;  %v14855_v41 = vmul.f32 %v14843_v55, %v7374_v32  ;;  %v6865_v11 = vadd.f32 %v6864_v27, %v14837_v31  ;;  %v6907_v23 = vadd.f32 %v6906_v21, %v14841_v33  ;;  %v7013_v32 = vmul.f32 %v14841_v33, %v14841_v33  ;;  %v16376_v21 = vld [vmem:[#allocation108_spill] sm:$0xff] }
 0x5ab   :  { %v14865_v20 = vmul.f32 %v14849_v3, %v7376_v40  ;;  %v7140_v4 = vadd.f32 %v7139_v60, %v7010_v9  ;;  %v7182_v46 = vadd.f32 %v7181_v52, %v7012_v29  ;;  %v14875_v54 = vadd.f32 %v14739_v58, %v16372_v22  ;;  %v6549_v40 = vpop.f32.mrf.mxu1  ;;  %v16380_v29 = vld [vmem:[#allocation110_spill] sm:$0xff] }
 0x5ac   :  { %v14871_v59 = vpop.eup %10812  ;;  %v14879_v15 = vadd.f32 %v14751_v19, %v16374_v8  ;;  %v14882_v38 = vmul.f32 0.2, %v14855_v41  ;;  %v7161_v27 = vadd.f32 %v7160_v7, %v7011_v5  ;;  %v14892_v39 = vadd.f32 %v14762_v10, %v16376_v21  ;;  %v16378_v7 = vld [vmem:[#allocation109_spill] sm:$0xff]  ;;  %v16382_v5 = vld [vmem:[#allocation111_spill] sm:$0xff] }
 0x5ad   :  { %16373 = vst [vmem:[#allocation102_spill] sm:$0xff] %v14875_v54  ;;  %v14888_v51 = vmul.f32 %v14871_v59, %v7375_v48  ;;  %v14894_v58 = vpop.eup %10814  ;;  %v7203_v60 = vadd.f32 %v7202_v16, %v7013_v32  ;;  %v6845_v19 = vadd.f32 %v6844_v57, %v14875_v54  ;;  %v7018_v52 = vmul.f32 %v14875_v54, %v14875_v54  ;;  %v16384_v32 = vld [vmem:[#allocation112_spill] sm:$0xff]  ;;  %v6551_v8 = vpop.f32.mrf.mxu1 }
 0x5ae   :  { %16375 = vst [vmem:[#allocation103_spill] sm:$0xff] %v14879_v15  ;;  %16377 = vst [vmem:[#allocation104_spill] sm:$0xff] %v14892_v39  ;;  %v6887_v18 = vadd.f32 %v6886_v35, %v14879_v15  ;;  %v7020_v36 = vmul.f32 %v14879_v15, %v14879_v15  ;;  %v6866_v48 = vadd.f32 %v6865_v11, %v14892_v39 }
 0x5af   :  { %v7019_v10 = vmul.f32 %v14892_v39, %v14892_v39  ;;  %v14907_v9 = vadd.f32 %v14783_v14, %v16378_v7  ;;  %v7141_v16 = vadd.f32 %v7140_v4, %v7018_v52  ;;  %v14911_v57 = vadd.f32 %v14795_v24, %v16380_v29  ;;  %v16388_v29 = vld [vmem:[#allocation114_spill] sm:$0xff]  ;;  %v6553_v15 = vpop.f32.mrf.mxu1 }
 0x5b0   :  { %v14914_v35 = vadd.f32 %v6543_v30, %v16382_v5  ;;  %v14917_v22 = vadd.f32 %v6472_v17, %v16384_v32  ;;  %v7183_v11 = vadd.f32 %v7182_v46, %v7020_v36  ;;  %v6480_v17 = vpop.f32.mrf.mxu0  ;;  %v14935_v5 = vadd.f32 %v6476_v43, %v16388_v29  ;;  %v16390_v32 = vld [vmem:[#allocation115_spill] sm:$0xff] }
 0x5b1   :  { %16379 = vst [vmem:[#allocation105_spill] sm:$0xff] %v14907_v9  ;;  %16381 = vst [vmem:[#allocation106_spill] sm:$0xff] %v14911_v57  ;;  %v7162_v21 = vadd.f32 %v7161_v27, %v7019_v10  ;;  %v6908_v56 = vadd.f32 %v6907_v23, %v14907_v9  ;;  %v7021_v14 = vmul.f32 %v14907_v9, %v14907_v9  ;;  %v16386_v27 = vld [vmem:[#allocation113_spill] sm:$0xff] }
 0x5b2   :  { %16383 = vst [vmem:[#allocation107_spill] sm:$0xff] %v14914_v35  ;;  %16385 = vst [vmem:[#allocation4_spill] sm:$0xff] %v14917_v22  ;;  %v6846_v4 = vadd.f32 %v6845_v19, %v14911_v57  ;;  %v7026_v24 = vmul.f32 %v14911_v57, %v14911_v57  ;;  %v6888_v52 = vadd.f32 %v6887_v18, %v14914_v35 }
 0x5b3   :  { %v7028_v30 = vmul.f32 %v14914_v35, %v14914_v35  ;;  %v7204_v7 = vadd.f32 %v7203_v60, %v7021_v14  ;;  %v6867_v46 = vadd.f32 %v6866_v48, %v14917_v22  ;;  %v7027_v23 = vmul.f32 %v14917_v22, %v14917_v22  ;;  %16389 = vst [vmem:[#allocation108_spill] sm:$0xff] %v14935_v5  ;;  %v16392_v14 = vld [vmem:[#allocation116_spill] sm:$0xff] }
 0x5b4   :  { %v14932_v36 = vadd.f32 %v6545_v42, %v16386_v27  ;;  %v7142_v10 = vadd.f32 %v7141_v16, %v7026_v24  ;;  %v14938_v18 = vadd.f32 %v6549_v40, %v16390_v32  ;;  %v14944_v57 = vadd.f32 %v6478_v62, %v16392_v14  ;;  %v16396_v27 = vld [vmem:[#allocation118_spill] sm:$0xff]  ;;  %v16397_v32 = vld [vmem:[#allocation119_spill] sm:$0xff]  ;;  %v6555_v14 = vpop.f32.mrf.mxu1 }
 0x5b5   :  { %v7184_v19 = vadd.f32 %v7183_v11, %v7028_v30  ;;  %v7163_v35 = vadd.f32 %v7162_v21, %v7027_v23  ;;  %v6847_v42 = vadd.f32 %v6846_v4, %v14935_v5  ;;  %v7034_v16 = vmul.f32 %v14935_v5, %v14935_v5  ;;  %v6482_v11 = vpop.f32.mrf.mxu0  ;;  %v16394_v30 = vld [vmem:[#allocation117_spill] sm:$0xff] }
 0x5b6   :  { %16387 = vst [vmem:[#allocation46_spill] sm:$0xff] %v14932_v36  ;;  %16391 = vst [vmem:[#allocation109_spill] sm:$0xff] %v14938_v18  ;;  %v6909_v60 = vadd.f32 %v6908_v56, %v14932_v36  ;;  %v7029_v48 = vmul.f32 %v14932_v36, %v14932_v36  ;;  %v6889_v43 = vadd.f32 %v6888_v52, %v14938_v18 }
 0x5b7   :  { %16393 = vst [vmem:[#allocation110_spill] sm:$0xff] %v14944_v57  ;;  %v7036_v40 = vmul.f32 %v14938_v18, %v14938_v18  ;;  %v6868_v56 = vadd.f32 %v6867_v46, %v14944_v57  ;;  %v7035_v24 = vmul.f32 %v14944_v57, %v14944_v57  ;;  %v14956_v62 = vadd.f32 %v6551_v8, %v16394_v30 }
 0x5b8   :  { %v7205_v21 = vadd.f32 %v7204_v7, %v7029_v48  ;;  %v7143_v23 = vadd.f32 %v7142_v10, %v7034_v16  ;;  %v14959_v29 = vadd.f32 %v6480_v17, %v16396_v27  ;;  %v14962_v52 = vadd.f32 %v6553_v15, %v16397_v32  ;;  %v16398_v48 = vld [vmem:[#allocation48_spill] sm:$0xff] }
 0x5b9   :  { %16395 = vst [vmem:[#allocation111_spill] sm:$0xff] %v14956_v62  ;;  %v7185_v4 = vadd.f32 %v7184_v19, %v7036_v40  ;;  %v7164_v18 = vadd.f32 %v7163_v35, %v7035_v24  ;;  %v6910_v7 = vadd.f32 %v6909_v60, %v14956_v62  ;;  %v7037_v46 = vmul.f32 %v14956_v62, %v14956_v62  ;;  %v16399_v16 = vld [vmem:[#allocation72_spill] sm:$0xff] }
 0x5ba   :  { %v14968_v5 = vadd.f32 %v6482_v11, %v16398_v48  ;;  %v6848_v8 = vadd.f32 %v6847_v42, %v14959_v29  ;;  %v7042_v10 = vmul.f32 %v14959_v29, %v14959_v29  ;;  %v6890_v17 = vadd.f32 %v6889_v43, %v14962_v52 }
 0x5bb   :  { %v7044_v15 = vmul.f32 %v14962_v52, %v14962_v52  ;;  %v7206_v19 = vadd.f32 %v7205_v21, %v7037_v46  ;;  %v14980_v40 = vadd.f32 %v6555_v14, %v16399_v16 }
 0x5bc   :  { %v6869_v35 = vadd.f32 %v6868_v56, %v14968_v5  ;;  %v7043_v60 = vmul.f32 %v14968_v5, %v14968_v5  ;;  %v6849_v11 = vrot.slane %v6848_v8, 4  ;;  %v7144_v24 = vadd.f32 %v7143_v23, %v7042_v10 }
 0x5bd   :  { %v6891_v42 = vrot.slane %v6890_v17, 4  ;;  %v7186_v30 = vadd.f32 %v7185_v4, %v7044_v15  ;;  %v6911_v43 = vadd.f32 %v6910_v7, %v14980_v40  ;;  %v7045_v48 = vmul.f32 %v14980_v40, %v14980_v40 }
 0x5be   :  { %v6870_v27 = vrot.slane %v6869_v35, 4  ;;  %v7165_v32 = vadd.f32 %v7164_v18, %v7043_v60  ;;  %v6850_v21 = vadd.f32 %v6849_v11, %v6848_v8  ;;  %v7145_v46 = vrot.slane %v7144_v24, 4 }
 0x5bf   :  { %v6892_v56 = vadd.f32 %v6891_v42, %v6890_v17  ;;  %v7187_v62 = vrot.slane %v7186_v30, 4  ;;  %v6912_v36 = vrot.slane %v6911_v43, 4  ;;  %v7207_v14 = vadd.f32 %v7206_v19, %v7045_v48 }
 0x5c0   :  { %v6871_v57 = vadd.f32 %v6870_v27, %v6869_v35  ;;  %v7166_v54 = vrot.slane %v7165_v32, 4  ;;  %v6851_v16 = vrot.slane %v6850_v21, 2  ;;  %v7146_v9 = vadd.f32 %v7145_v46, %v7144_v24 }
 0x5c1   :  { %v6893_v23 = vrot.slane %v6892_v56, 2  ;;  %v7188_v10 = vadd.f32 %v7187_v62, %v7186_v30  ;;  %v6913_v18 = vadd.f32 %v6912_v36, %v6911_v43  ;;  %v7208_v60 = vrot.slane %v7207_v14, 4 }
 0x5c2   :  { %v6872_v4 = vrot.slane %v6871_v57, 2  ;;  %v7167_v15 = vadd.f32 %v7166_v54, %v7165_v32  ;;  %v6852_v7 = vadd.f32 %v6851_v16, %v6850_v21  ;;  %v7147_v22 = vrot.slane %v7146_v9, 2 }
 0x5c3   :  { %v6894_v39 = vadd.f32 %v6893_v23, %v6892_v56  ;;  %v7189_v26 = vrot.slane %v7188_v10, 2  ;;  %v6914_v17 = vrot.slane %v6913_v18, 2  ;;  %v7209_v42 = vadd.f32 %v7208_v60, %v7207_v14 }
 0x5c4   :  { %v6873_v8 = vadd.f32 %v6872_v4, %v6871_v57  ;;  %v7168_v11 = vrot.slane %v7167_v15, 2  ;;  %v6853_v35 = vrot.slane %v6852_v7, 1  ;;  %v7148_v27 = vadd.f32 %v7147_v22, %v7146_v9 }
 0x5c5   :  { %v6895_v53 = vrot.slane %v6894_v39, 1  ;;  %v7190_v19 = vadd.f32 %v7189_v26, %v7188_v10  ;;  %v6915_v46 = vadd.f32 %v6914_v17, %v6913_v18  ;;  %v7210_v62 = vrot.slane %v7209_v42, 2 }
 0x5c6   :  { %v6874_v48 = vrot.slane %v6873_v8, 1  ;;  %v7169_v24 = vadd.f32 %v7168_v11, %v7167_v15  ;;  %v6854_v30 = vadd.f32 %v6853_v35, %v6852_v7  ;;  %v7149_v54 = vrot.slane %v7148_v27, 1 }
 0x5c7   :  { %v6896_v36 = vadd.f32 %v6895_v53, %v6894_v39  ;;  %v7191_v32 = vrot.slane %v7190_v19, 1  ;;  %v6916_v56 = vrot.slane %v6915_v46, 1  ;;  %v7211_v16 = vadd.f32 %v7210_v62, %v7209_v42  ;;  %v16402_v62 = vld [vmem:[#allocation53_spill] sm:$0xff] }
 0x5c8   :  { %v6875_v43 = vadd.f32 %v6874_v48, %v6873_v8  ;;  %v7170_v21 = vrot.slane %v7169_v24, 1  ;;  %v7150_v57 = vadd.f32 %v7149_v54, %v7148_v27  ;;  %v14985_v23 = vmul.f32 0.0078125, %v6854_v30 }
 0x5c9   :  { %v7192_v14 = vadd.f32 %v7191_v32, %v7190_v19  ;;  %v14987_v4 = vmul.f32 0.0078125, %v6896_v36  ;;  %v6917_v22 = vadd.f32 %v6916_v56, %v6915_v46  ;;  %v7212_v10 = vrot.slane %v7211_v16, 1 }
 0x5ca   :  { %v7171_v9 = vadd.f32 %v7170_v21, %v7169_v24  ;;  %v14989_v26 = vmul.f32 0.0078125, %v6875_v43  ;;  %v16400_v15 = vsub.f32 %v14659_v47, %v14709_v44  ;;  %v7226_v39 = vmul.f32 0.0078125, %v7150_v57  ;;  %v16401_v24 = vld [vmem:[#allocation50_spill] sm:$0xff] }
 0x5cb   :  { %v7234_v18 = vmul.f32 %v14985_v23, %v14985_v23  ;;  %v7228_v60 = vmul.f32 0.0078125, %v7192_v14  ;;  %v7378_v7 = vsub.f32 %v14959_v29, %v14985_v23  ;;  %v7236_v8 = vmul.f32 %v14987_v4, %v14987_v4  ;;  %v16416_v29 = vld [vmem:[#allocation63_spill] sm:$0xff] }
 0x5cc   :  { %v14995_v53 = vmul.f32 %v14894_v58, %v16400_v15  ;;  %v7227_v11 = vmul.f32 0.0078125, %v7171_v9  ;;  %v7235_v17 = vmul.f32 %v14989_v26, %v14989_v26  ;;  %v7380_v47 = vsub.f32 %v14962_v52, %v14987_v4  ;;  %v16404_v15 = vld [vmem:[#allocation68_spill] sm:$0xff] }
 0x5cd   :  { %v7242_v42 = vsub.f32 %v7226_v39, %v7234_v18  ;;  %v7213_v35 = vadd.f32 %v7212_v10, %v7211_v16  ;;  %v15007_v27 = vmul.f32 0.0078125, %v6917_v22  ;;  %v7244_v19 = vsub.f32 %v7228_v60, %v7236_v8  ;;  %v16403_v22 = vld [vmem:[#allocation58_spill] sm:$0xff] }
 0x5ce   :  { %v7243_v48 = vsub.f32 %v7227_v11, %v7235_v17  ;;  %v7255_v46 = vsub.f32 %v16401_v24, %v14707_v63  ;;  %v7263_v30 = vsub.f32 %v16402_v62, %v14707_v63  ;;  %v7379_v36 = vsub.f32 %v14968_v5, %v14989_v26  ;;  %v10783_v5 = vld [vmem:[%s15668_s6 + $0x128] sm:$0xff]  }
 0x5cf   :  { %v7250_v54 = vmax.f32 %v7242_v42, 0.0  ;;  %v7229_v32 = vmul.f32 0.0078125, %v7213_v35  ;;  %v7237_v43 = vmul.f32 %v15007_v27, %v15007_v27  ;;  %v7252_v21 = vmax.f32 %v7244_v19, 0.0  ;;  %v16405_v19 = vld [vmem:[#allocation49_spill] sm:$0xff] }
 0x5d0   :  { %v7251_v56 = vmax.f32 %v7243_v48, 0.0  ;;  %v7399_v16 = vmul.f32 %v14871_v59, %v7255_v46  ;;  %v7407_v57 = vmul.f32 %v14871_v59, %v7263_v30  ;;  %v7257_v10 = vsub.f32 %v16403_v22, %v14709_v44 }
 0x5d1   :  { %v7386_v14 = vadd.f32 1e-05, %v7250_v54  ;;  %v7245_v9 = vsub.f32 %v7229_v32, %v7237_v43  ;;  %v7265_v39 = vsub.f32 %v16404_v15, %v14709_v44  ;;  %v7388_v18 = vadd.f32 1e-05, %v7252_v21  ;;  %v16406_v43 = vld [vmem:[#allocation55_spill] sm:$0xff] }
 0x5d2   :  { %v7387_v60 = vadd.f32 1e-05, %v7251_v56  ;;  %vm7527_vm0 = vcmp.ge.f32.partialorder %v7399_v16, 0.0  ;;  %vm7535_vm8 = vcmp.ge.f32.partialorder %v7407_v57, 0.0  ;;  %v7655_v11 = vmul.f32 0.2, %v7399_v16 }
 0x5d3   :  { %10816 = vrsqrt.f32 %v7386_v14  ;;  %v7253_v8 = vmax.f32 %v7245_v9, 0.0  ;;  %v7663_v17 = vmul.f32 0.2, %v7407_v57  ;;  %v7401_v42 = vmul.f32 %v14894_v58, %v7257_v10  ;;  %v16407_v9 = vld [vmem:[#allocation57_spill] sm:$0xff]  ;;  %v16408_v10 = vld [vmem:[#allocation52_spill] sm:$0xff] }
 0x5d4   :  { %10818 = vrsqrt.f32 %v7388_v18  ;;  %v7409_v35 = vmul.f32 %v14894_v58, %v7265_v39  ;;  %v7254_v48 = vsub.f32 %v16405_v19, %v14691_v1  ;;  %v7783_v46 = vsel %vm7527_vm0, %v7399_v16, %v7655_v11 }
 0x5d5   :  { %10820 = vrsqrt.f32 %v7387_v60  ;;  %v7389_v24 = vadd.f32 1e-05, %v7253_v8  ;;  %v7791_v62 = vsel %vm7535_vm8, %v7407_v57, %v7663_v17  ;;  %vm7529_vm9 = vcmp.ge.f32.partialorder %v7401_v42, 0.0  ;;  %v16409_v57 = vld [vmem:[#allocation67_spill] sm:$0xff] }
 0x5d6   :  { %v7911_v30 = vpack.c.bf16 %v7791_v62, %v7783_v46  ;;  %vm7537_vm10 = vcmp.ge.f32.partialorder %v7409_v35, 0.0  ;;  %v7657_v54 = vmul.f32 0.2, %v7401_v42  ;;  %v7665_v32 = vmul.f32 0.2, %v7409_v35 }
 0x5d7   :  { %10822 = vrsqrt.f32 %v7389_v24  ;;  %v7262_v21 = vsub.f32 %v16406_v43, %v14691_v1  ;;  %v7398_v56 = vmul.f32 %v14843_v55, %v7254_v48  ;;  %v7256_v22 = vsub.f32 %v16407_v9, %v14693_v34  ;;  %v10775_v43 = vld [vmem:[%s15668_s6 + $0x138] sm:$0xff]  }
 0x5d8   :  { %8525 = vmatprep.mubr.bf16.mxu0 %v7911_v30  ;;  %v7785_v14 = vsel %vm7529_vm9, %v7401_v42, %v7657_v54  ;;  %v7264_v16 = vsub.f32 %v16408_v10, %v14693_v34  ;;  %v7271_v15 = vsub.f32 %v16409_v57, %v14707_v63  ;;  %v7793_v39 = vsel %vm7537_vm10, %v7409_v35, %v7665_v32  ;;  %v16410_v42 = vld [vmem:[#allocation99_spill] sm:$0xff] }
 0x5d9   :  { %v7406_v18 = vmul.f32 %v14843_v55, %v7262_v21  ;;  %vm7526_vm11 = vcmp.ge.f32.partialorder %v7398_v56, 0.0  ;;  %v7654_v60 = vmul.f32 0.2, %v7398_v56  ;;  %v7913_v8 = vpack.c.bf16 %v7793_v39, %v7785_v14  ;;  %v10777_v10 = vld [vmem:[%s15668_s6 + $0x1b8] sm:$0xff]  }
 0x5da   :  { %v7400_v11 = vmul.f32 %v14849_v3, %v7256_v22  ;;  %v7408_v17 = vmul.f32 %v14849_v3, %v7264_v16  ;;  %v7279_v19 = vsub.f32 %v16410_v42, %v14707_v63  ;;  %v7415_v46 = vmul.f32 %v14871_v59, %v7271_v15  ;;  %v10778_v16 = vld [vmem:[%s15668_s6 + $0x170] sm:$0xff]  }
 0x5db   :  { %vm7534_vm12 = vcmp.ge.f32.partialorder %v7406_v18, 0.0  ;;  %v7662_v48 = vmul.f32 0.2, %v7406_v18  ;;  %v7782_v24 = vsel %vm7526_vm11, %v7398_v56, %v7654_v60  ;;  %8622 = vmatprep.mubr.bf16.mxu1 %v7913_v8  ;;  %v16411_v56 = vld [vmem:[#allocation69_spill] sm:$0xff]  ;;  %v7381_v8 = vsub.f32 %v14980_v40, %v15007_v27 }
 0x5dc   :  { %vm7528_vm13 = vcmp.ge.f32.partialorder %v7400_v11, 0.0  ;;  %vm7536_vm14 = vcmp.ge.f32.partialorder %v7408_v17, 0.0  ;;  %v7656_v35 = vmul.f32 0.2, %v7400_v11  ;;  %v7664_v62 = vmul.f32 0.2, %v7408_v17 }
 0x5dd   :  { %v7790_v30 = vsel %vm7534_vm12, %v7406_v18, %v7662_v48  ;;  %v7423_v54 = vmul.f32 %v14871_v59, %v7279_v19  ;;  %vm7543_vm15 = vcmp.ge.f32.partialorder %v7415_v46, 0.0  ;;  %v7671_v32 = vmul.f32 0.2, %v7415_v46  ;;  %v10780_v18 = vld [vmem:[%s15668_s6 + $0x1f0] sm:$0xff]   ;;  %v16413_v19 = vld [vmem:[#allocation65_spill] sm:$0xff] }
 0x5de   :  { %v7910_v21 = vpack.c.bf16 %v7790_v30, %v7782_v24  ;;  %v7784_v14 = vsel %vm7528_vm13, %v7400_v11, %v7656_v35  ;;  %v7792_v9 = vsel %vm7536_vm14, %v7408_v17, %v7664_v62  ;;  %v7273_v22 = vsub.f32 %v16411_v56, %v14709_v44  ;;  %v16412_v11 = vld [vmem:[#allocation60_spill] sm:$0xff]  ;;  %v16415_v62 = vld [vmem:[#allocation66_spill] sm:$0xff] }
 0x5df   :  { %v7912_v57 = vpack.c.bf16 %v7792_v9, %v7784_v14  ;;  %vm7551_vm1 = vcmp.ge.f32.partialorder %v7423_v54, 0.0  ;;  %v7679_v15 = vmul.f32 0.2, %v7423_v54  ;;  %v7799_v39 = vsel %vm7543_vm15, %v7415_v46, %v7671_v32  ;;  %v10779_v32 = vld [vmem:[%s15668_s6 + $0x130] sm:$0xff]  }
 0x5e0   :  { %v15057_v60 = vpop.eup %10816  ;;  %8526 = vmatmul.mubr.bf16.vlgmr.msra.gmra.mxu0 %v7910_v21  ;;  %v7281_v17 = vsub.f32 %v16412_v11, %v14709_v44  ;;  %v7417_v42 = vmul.f32 %v14894_v58, %v7273_v22  ;;  %v7270_v48 = vsub.f32 %v16413_v19, %v14691_v1  ;;  %v15069_v46 = vmul.f32 0.2, %v14865_v20 }
 0x5e1   :  { %v15066_v24 = vpop.eup %10818  ;;  %v15075_v35 = vmul.f32 %v15057_v60, %v7378_v7  ;;  %8623 = vmatmul.mubr.bf16.vlgmr.msra.gmra.mxu1 %v7912_v57  ;;  %v7807_v40 = vsel %vm7551_vm1, %v7423_v54, %v7679_v15  ;;  %10056 = vmatpush3.bf16.msra.mxu0 %v10775_v43  ;;  %v7278_v30 = vsub.f32 %v16415_v62, %v14691_v1  ;;  %v10781_v54 = vld [vmem:[%s15668_s6 + $0x1b0] sm:$0xff]   ;;  %v10782_v43 = vld [vmem:[%s15668_s6 + $0x168] sm:$0xff]  }
 0x5e2   :  { %v15082_v21 = vpop.eup %10820  ;;  %v7919_v14 = vpack.c.bf16 %v7807_v40, %v7799_v39  ;;  %v7425_v9 = vmul.f32 %v14894_v58, %v7281_v17  ;;  %vm7545_vm2 = vcmp.ge.f32.partialorder %v7417_v42, 0.0  ;;  %10120 = vmatpush3.bf16.msra.mxu1 %v10777_v10  ;;  %v7272_v7 = vsub.f32 %v16416_v29, %v14693_v34  ;;  %10057 = vmatprep.subr.bf16.mxu0 %v10778_v16  ;;  %v10784_v57 = vld [vmem:[%s15668_s6 + $0x1e8] sm:$0xff]   ;;  %v10788_v29 = vld [vmem:[%s15668_s6 + $0x1e0] sm:$0xff]  }
 0x5e3   :  { %16414 = vst [vmem:[#allocation112_spill] sm:$0xff] %v15075_v35  ;;  %v15094_v56 = vmul.f32 0.2, %v15075_v35  ;;  %v15100_v22 = vmul.f32 %v15066_v24, %v7380_v47  ;;  %v7673_v10 = vmul.f32 0.2, %v7417_v42  ;;  %v7414_v16 = vmul.f32 %v14843_v55, %v7270_v48  ;;  %10121 = vmatprep.subr.bf16.mxu1 %v10780_v18  ;;  %v16418_v48 = vld [vmem:[#allocation54_spill] sm:$0xff] }
 0x5e4   :  { %v15106_v15 = vpop.eup %10822  ;;  %v15112_v39 = vmul.f32 %v15082_v21, %v7379_v36  ;;  %8533 = vmatprep.mubr.bf16.mxu0 %v7919_v14  ;;  %vm7553_vm3 = vcmp.ge.f32.partialorder %v7425_v9, 0.0  ;;  %v7681_v52 = vmul.f32 0.2, %v7425_v9  ;;  %v7422_v47 = vmul.f32 %v14843_v55, %v7278_v30  ;;  %v16419_v14 = vld [vmem:[#allocation6_spill] sm:$0xff] }
 0x5e5   :  { %16417 = vst [vmem:[#allocation113_spill] sm:$0xff] %v15094_v56  ;;  %v15116_v11 = vmul.f32 %v15106_v15, %v7381_v8  ;;  %v7801_v18 = vsel %vm7545_vm2, %v7417_v42, %v7673_v10  ;;  %vm7542_vm4 = vcmp.ge.f32.partialorder %v7414_v16, 0.0  ;;  %v7670_v17 = vmul.f32 0.2, %v7414_v16  ;;  %10058 = vmatpush3.bf16.msra.mxu0 %v10779_v32  ;;  %v10785_v8 = vld [vmem:[%s15668_s6 + $0x1a8] sm:$0xff]   ;;  %v10786_v42 = vld [vmem:[%s15668_s6 + $0x160] sm:$0xff]  }
 0x5e6   :  { %v7809_v19 = vsel %vm7553_vm3, %v7425_v9, %v7681_v52  ;;  %vm7550_vm5 = vcmp.ge.f32.partialorder %v7422_v47, 0.0  ;;  %v7678_v36 = vmul.f32 0.2, %v7422_v47  ;;  %v7280_v40 = vsub.f32 %v16418_v48, %v14693_v34  ;;  %10122 = vmatpush3.bf16.msra.mxu1 %v10781_v54  ;;  %10059 = vmatprep.subr.bf16.mxu0 %v10782_v43  ;;  %v16420_v10 = vld [vmem:[#allocation34_spill] sm:$0xff]  ;;  %v16421_v48 = vld [vmem:[#allocation16_spill] sm:$0xff] }
 0x5e7   :  { %v7921_v62 = vpack.c.bf16 %v7809_v19, %v7801_v18  ;;  %v7798_v30 = vsel %vm7542_vm4, %v7414_v16, %v7670_v17  ;;  %v7416_v32 = vmul.f32 %v14849_v3, %v7272_v7  ;;  %v7287_v9 = vsub.f32 %v16419_v14, %v14707_v63  ;;  %10123 = vmatprep.subr.bf16.mxu1 %v10784_v57  ;;  %v10787_v57 = vld [vmem:[%s15668_s6 + $0x120] sm:$0xff]  }
 0x5e8   :  { %v7806_v54 = vsel %vm7550_vm5, %v7422_v47, %v7678_v36  ;;  %v7424_v43 = vmul.f32 %v14849_v3, %v7280_v40  ;;  %v7295_v52 = vsub.f32 %v16420_v10, %v14707_v63  ;;  %v7289_v18 = vsub.f32 %v16421_v48, %v14709_v44  ;;  %v16422_v36 = vld [vmem:[#allocation39_spill] sm:$0xff] }
 0x5e9   :  { %8630 = vmatprep.mubr.bf16.mxu1 %v7921_v62  ;;  %v7918_v16 = vpack.c.bf16 %v7806_v54, %v7798_v30  ;;  %vm7544_vm6 = vcmp.ge.f32.partialorder %v7416_v32, 0.0  ;;  %v7672_v7 = vmul.f32 0.2, %v7416_v32  ;;  %v7431_v17 = vmul.f32 %v14871_v59, %v7287_v9  ;;  %10060 = vmatpush3.bf16.msra.mxu0 %v10783_v5  ;;  %v10789_v62 = vld [vmem:[%s15668_s6 + $0x1a0] sm:$0xff]   ;;  %v10790_v5 = vld [vmem:[%s15668_s6 + $0x158] sm:$0xff]  }
 0x5ea   :  { %vm7552_vm7 = vcmp.ge.f32.partialorder %v7424_v43, 0.0  ;;  %v7680_v47 = vmul.f32 0.2, %v7424_v43  ;;  %v7439_v19 = vmul.f32 %v14871_v59, %v7295_v52  ;;  %v7297_v40 = vsub.f32 %v16422_v36, %v14709_v44  ;;  %10124 = vmatpush3.bf16.msra.mxu1 %v10785_v8  ;;  %10061 = vmatprep.subr.bf16.mxu0 %v10786_v42  ;;  %v10792_v42 = vld [vmem:[%s15668_s6 + $0x1d8] sm:$0xff]  }
 0x5eb   :  { %8534 = vmatmul.mubr.bf16.gmra.mxu0 %v7918_v16  ;;  %v7800_v30 = vsel %vm7544_vm6, %v7416_v32, %v7672_v7  ;;  %vm7559_vm0 = vcmp.ge.f32.partialorder %v7431_v17, 0.0  ;;  %v7687_v14 = vmul.f32 0.2, %v7431_v17  ;;  %v7433_v9 = vmul.f32 %v14894_v58, %v7289_v18  ;;  %10125 = vmatprep.subr.bf16.mxu1 %v10788_v29  ;;  %v16423_v18 = vld [vmem:[#allocation51_spill] sm:$0xff] }
 0x5ec   :  { %v7808_v54 = vsel %vm7552_vm7, %v7424_v43, %v7680_v47  ;;  %vm7567_vm8 = vcmp.ge.f32.partialorder %v7439_v19, 0.0  ;;  %v7695_v10 = vmul.f32 0.2, %v7439_v19  ;;  %v7441_v8 = vmul.f32 %v14894_v58, %v7297_v40  ;;  %v10791_v43 = vld [vmem:[%s15668_s6 + $0x118] sm:$0xff]  }
 0x5ed   :  { %v7920_v52 = vpack.c.bf16 %v7808_v54, %v7800_v30  ;;  %v7815_v48 = vsel %vm7559_vm0, %v7431_v17, %v7687_v14  ;;  %vm7561_vm9 = vcmp.ge.f32.partialorder %v7433_v9, 0.0  ;;  %v7689_v36 = vmul.f32 0.2, %v7433_v9  ;;  %10062 = vmatpush3.bf16.msra.mxu0 %v10787_v57  ;;  %v10793_v7 = vld [vmem:[%s15668_s6 + $0x198] sm:$0xff]   ;;  %v16426_v54 = vld [vmem:[#allocation13_spill] sm:$0xff] }
 0x5ee   :  { %v7823_v32 = vsel %vm7567_vm8, %v7439_v19, %v7695_v10  ;;  %vm7569_vm10 = vcmp.ge.f32.partialorder %v7441_v8, 0.0  ;;  %v7697_v16 = vmul.f32 0.2, %v7441_v8  ;;  %v7286_v29 = vsub.f32 %v16423_v18, %v14691_v1  ;;  %10126 = vmatpush3.bf16.msra.mxu1 %v10789_v62  ;;  %10063 = vmatprep.subr.bf16.mxu0 %v10790_v5  ;;  %v16424_v57 = vld [vmem:[#allocation59_spill] sm:$0xff]  ;;  %v10794_v62 = vld [vmem:[%s15668_s6 + $0x150] sm:$0xff]  }
 0x5ef   :  { %8631 = vmatmul.mubr.bf16.gmra.mxu1 %v7920_v52  ;;  %v7927_v17 = vpack.c.bf16 %v7823_v32, %v7815_v48  ;;  %v7817_v47 = vsel %vm7561_vm9, %v7433_v9, %v7689_v36  ;;  %v7294_v19 = vsub.f32 %v16424_v57, %v14691_v1  ;;  %v16425_v40 = vld [vmem:[#allocation7_spill] sm:$0xff]  ;;  %v7296_v10 = vsub.f32 %v16426_v54, %v14693_v34  ;;  %v10796_v9 = vld [vmem:[%s15668_s6 + $0x1d0] sm:$0xff]  }
 0x5f0   :  { %v7288_v30 = vsub.f32 %v16425_v40, %v14693_v34  ;;  %v7825_v5 = vsel %vm7569_vm10, %v7441_v8, %v7697_v16  ;;  %v7430_v14 = vmul.f32 %v14843_v55, %v7286_v29  ;;  %v16427_v52 = vld [vmem:[#allocation11_spill] sm:$0xff]  ;;  %10127 = vmatprep.subr.bf16.mxu1 %v10792_v42  ;;  %v10795_v42 = vld [vmem:[%s15668_s6 + $0x110] sm:$0xff]  }
 0x5f1   :  { %v7303_v48 = vsub.f32 %v16427_v52, %v14707_v63  ;;  %8541 = vmatprep.mubr.bf16.mxu0 %v7927_v17  ;;  %v7929_v36 = vpack.c.bf16 %v7825_v5, %v7817_v47  ;;  %v7438_v32 = vmul.f32 %v14843_v55, %v7294_v19  ;;  %v16428_v8 = vld [vmem:[#allocation43_spill] sm:$0xff]  ;;  %v7440_v57 = vmul.f32 %v14849_v3, %v7296_v10  ;;  %v10797_v17 = vld [vmem:[%s15668_s6 + $0x190] sm:$0xff]   ;;  %v10798_v47 = vld [vmem:[%s15668_s6 + $0x148] sm:$0xff]  }
 0x5f2   :  { %v7432_v18 = vmul.f32 %v14849_v3, %v7288_v30  ;;  %v7311_v16 = vsub.f32 %v16428_v8, %v14707_v63  ;;  %vm7558_vm11 = vcmp.ge.f32.partialorder %v7430_v14, 0.0  ;;  %v7686_v29 = vmul.f32 0.2, %v7430_v14  ;;  %10064 = vmatpush3.bf16.msra.mxu0 %v10791_v43  ;;  %10128 = vmatpush3.bf16.msra.mxu1 %v10793_v7 }
 0x5f3   :  { %v7447_v40 = vmul.f32 %v14871_v59, %v7303_v48  ;;  %8638 = vmatprep.mubr.bf16.mxu1 %v7929_v36  ;;  %vm7566_vm12 = vcmp.ge.f32.partialorder %v7438_v32, 0.0  ;;  %v7694_v19 = vmul.f32 0.2, %v7438_v32  ;;  %10065 = vmatprep.subr.bf16.mxu0 %v10794_v62  ;;  %vm7568_vm14 = vcmp.ge.f32.partialorder %v7440_v57, 0.0  ;;  %v10799_v62 = vld [vmem:[%s15668_s6 + $0x108] sm:$0xff]  }
 0x5f4   :  { %vm7560_vm13 = vcmp.ge.f32.partialorder %v7432_v18, 0.0  ;;  %v7688_v30 = vmul.f32 0.2, %v7432_v18  ;;  %v7814_v43 = vsel %vm7558_vm11, %v7430_v14, %v7686_v29  ;;  %v7696_v7 = vmul.f32 0.2, %v7440_v57  ;;  %10129 = vmatprep.subr.bf16.mxu1 %v10796_v9  ;;  %v16429_v29 = vld [vmem:[#allocation9_spill] sm:$0xff] }
 0x5f5   :  { %v7455_v5 = vmul.f32 %v14871_v59, %v7311_v16  ;;  %v7822_v54 = vsel %vm7566_vm12, %v7438_v32, %v7694_v19  ;;  %vm7575_vm15 = vcmp.ge.f32.partialorder %v7447_v40, 0.0  ;;  %v7703_v52 = vmul.f32 0.2, %v7447_v40  ;;  %v16430_v9 = vld [vmem:[#allocation41_spill] sm:$0xff] }
 0x5f6   :  { %v7816_v10 = vsel %vm7560_vm13, %v7432_v18, %v7688_v30  ;;  %v7926_v48 = vpack.c.bf16 %v7822_v54, %v7814_v43  ;;  %v7824_v8 = vsel %vm7568_vm14, %v7440_v57, %v7696_v7  ;;  %10066 = vmatpush3.bf16.msra.mxu0 %v10795_v42  ;;  %10130 = vmatpush3.bf16.msra.mxu1 %v10797_v17  ;;  %v10800_v18 = vld [vmem:[%s15668_s6 + $0x1c8] sm:$0xff]   ;;  %v16431_v42 = vld [vmem:[#allocation62_spill] sm:$0xff] }
 0x5f7   :  { %vm7583_vm1 = vcmp.ge.f32.partialorder %v7455_v5, 0.0  ;;  %v7711_v56 = vmul.f32 0.2, %v7455_v5  ;;  %v7928_v14 = vpack.c.bf16 %v7824_v8, %v7816_v10  ;;  %v7831_v36 = vsel %vm7575_vm15, %v7447_v40, %v7703_v52  ;;  %10067 = vmatprep.subr.bf16.mxu0 %v10798_v47  ;;  %v16432_v19 = vld [vmem:[#allocation25_spill] sm:$0xff]  ;;  %v16433_v40 = vld [vmem:[#allocation8_spill] sm:$0xff]  ;;  %10131 = vmatprep.subr.bf16.mxu1 %v10800_v18 }
 0x5f8   :  { %v7305_v16 = vsub.f32 %v16429_v29, %v14709_v44  ;;  %v7313_v32 = vsub.f32 %v16430_v9, %v14709_v44  ;;  %8542 = vmatmul.mubr.bf16.gmra.mxu0 %v7926_v48  ;;  %v7302_v17 = vsub.f32 %v16431_v42, %v14691_v1  ;;  %v7310_v30 = vsub.f32 %v16432_v19, %v14691_v1  ;;  %v10801_v7 = vld [vmem:[%s15668_s6 + $0x188] sm:$0xff]   ;;  %v10802_v47 = vld [vmem:[%s15668_s6 + $0x140] sm:$0xff]  }
 0x5f9   :  { %v7839_v57 = vsel %vm7583_vm1, %v7455_v5, %v7711_v56  ;;  %v7304_v43 = vsub.f32 %v16433_v40, %v14693_v34  ;;  %8639 = vmatmul.mubr.bf16.gmra.mxu1 %v7928_v14  ;;  %v16434_v10 = vld [vmem:[#allocation21_spill] sm:$0xff]  ;;  %v10804_v48 = vld [vmem:[%s15668_s6 + $0x1c0] sm:$0xff]   ;;  %v16435_v14 = vld [vmem:[#allocation75_spill] sm:$0xff] }
 0x5fa   :  { %v7935_v54 = vpack.c.bf16 %v7839_v57, %v7831_v36  ;;  %v7449_v56 = vmul.f32 %v14894_v58, %v7305_v16  ;;  %v7457_v5 = vmul.f32 %v14894_v58, %v7313_v32  ;;  %v7312_v52 = vsub.f32 %v16434_v10, %v14693_v34  ;;  %10068 = vmatpush3.bf16.msra.mxu0 %v10799_v62  ;;  %v10803_v16 = vld [vmem:[%s15668_s6 + $0x100] sm:$0xff]  }
 0x5fb   :  { %v7446_v8 = vmul.f32 %v14843_v55, %v7302_v17  ;;  %v7454_v29 = vmul.f32 %v14843_v55, %v7310_v30  ;;  %v7448_v9 = vmul.f32 %v14849_v3, %v7304_v43  ;;  %v7319_v36 = vsub.f32 %v16435_v14, %v14707_v63  ;;  %10132 = vmatpush3.bf16.msra.mxu1 %v10801_v7  ;;  %v10805_v18 = vld [vmem:[%s15668_s6 + $0x180] sm:$0xff]   ;;  %v16436_v7 = vld [vmem:[#allocation79_spill] sm:$0xff] }
 0x5fc   :  { %8549 = vmatprep.mubr.bf16.mxu0 %v7935_v54  ;;  %vm7577_vm2 = vcmp.ge.f32.partialorder %v7449_v56, 0.0  ;;  %vm7585_vm3 = vcmp.ge.f32.partialorder %v7457_v5, 0.0  ;;  %v7705_v32 = vmul.f32 0.2, %v7449_v56  ;;  %v7713_v57 = vmul.f32 0.2, %v7457_v5  ;;  %10069 = vmatprep.subr.bf16.mxu0 %v10802_v47 }
 0x5fd   :  { %vm7574_vm4 = vcmp.ge.f32.partialorder %v7446_v8, 0.0  ;;  %vm7582_vm5 = vcmp.ge.f32.partialorder %v7454_v29, 0.0  ;;  %v7702_v42 = vmul.f32 0.2, %v7446_v8  ;;  %v7710_v17 = vmul.f32 0.2, %v7454_v29  ;;  %10133 = vmatprep.subr.bf16.mxu1 %v10804_v48 }
 0x5fe   :  { %v7833_v19 = vsel %vm7577_vm2, %v7449_v56, %v7705_v32  ;;  %v7841_v30 = vsel %vm7585_vm3, %v7457_v5, %v7713_v57  ;;  %v7456_v62 = vmul.f32 %v14849_v3, %v7312_v52  ;;  %vm7576_vm6 = vcmp.ge.f32.partialorder %v7448_v9, 0.0  ;;  %10070 = vmatpush3.bf16.msra.mxu0 %v10803_v16  ;;  %v16437_v52 = vld [vmem:[#allocation76_spill] sm:$0xff]  ;;  %v16439_v57 = vld [vmem:[#allocation73_spill] sm:$0xff] }
 0x5ff   :  { %v7937_v40 = vpack.c.bf16 %v7841_v30, %v7833_v19  ;;  %v7830_v43 = vsel %vm7574_vm4, %v7446_v8, %v7702_v42  ;;  %v7838_v54 = vsel %vm7582_vm5, %v7454_v29, %v7710_v17  ;;  %v7704_v10 = vmul.f32 0.2, %v7448_v9  ;;  %v16438_v8 = vld [vmem:[#allocation80_spill] sm:$0xff]  ;;  %v16440_v17 = vld [vmem:[#allocation77_spill] sm:$0xff]  ;;  %10134 = vmatpush3.bf16.msra.mxu1 %v10805_v18 }
 0x600   :  { %v7934_v14 = vpack.c.bf16 %v7838_v54, %v7830_v43  ;;  %vm7584_vm7 = vcmp.ge.f32.partialorder %v7456_v62, 0.0  ;;  %v7712_v35 = vmul.f32 0.2, %v7456_v62  ;;  %v7327_v47 = vsub.f32 %v16436_v7, %v14707_v63 }
 0x601   :  { %8646 = vmatprep.mubr.bf16.mxu1 %v7937_v40  ;;  %v7832_v56 = vsel %vm7576_vm6, %v7448_v9, %v7704_v10  ;;  %v7463_v5 = vmul.f32 %v14871_v59, %v7319_v36  ;;  %v7321_v48 = vsub.f32 %v16437_v52, %v14709_v44  ;;  %v7329_v29 = vsub.f32 %v16438_v8, %v14709_v44  ;;  %v16441_v8 = vld [vmem:[#allocation74_spill] sm:$0xff] }
 0x602   :  { %8550 = vmatmul.mubr.bf16.gmra.mxu0 %v7934_v14  ;;  %v7840_v16 = vsel %vm7584_vm7, %v7456_v62, %v7712_v35  ;;  %v7471_v32 = vmul.f32 %v14871_v59, %v7327_v47  ;;  %v7318_v42 = vsub.f32 %v16439_v57, %v14691_v1  ;;  %v7326_v19 = vsub.f32 %v16440_v17, %v14691_v1 }
 0x603   :  { %v7936_v30 = vpack.c.bf16 %v7840_v16, %v7832_v56  ;;  %vm7591_vm0 = vcmp.ge.f32.partialorder %v7463_v5, 0.0  ;;  %v7719_v9 = vmul.f32 0.2, %v7463_v5  ;;  %v7465_v36 = vmul.f32 %v14894_v58, %v7321_v48  ;;  %v16442_v16 = vld [vmem:[#allocation78_spill] sm:$0xff] }
 0x604   :  { %vm7599_vm8 = vcmp.ge.f32.partialorder %v7471_v32, 0.0  ;;  %v7727_v40 = vmul.f32 0.2, %v7471_v32  ;;  %v7473_v43 = vmul.f32 %v14894_v58, %v7329_v29  ;;  %v7462_v35 = vmul.f32 %v14843_v55, %v7318_v42 }
 0x605   :  { %8647 = vmatmul.mubr.bf16.gmra.mxu1 %v7936_v30  ;;  %v7847_v62 = vsel %vm7591_vm0, %v7463_v5, %v7719_v9  ;;  %vm7593_vm9 = vcmp.ge.f32.partialorder %v7465_v36, 0.0  ;;  %v7721_v54 = vmul.f32 0.2, %v7465_v36  ;;  %v7470_v10 = vmul.f32 %v14843_v55, %v7326_v19  ;;  %v16444_v19 = vld [vmem:[#allocation87_spill] sm:$0xff] }
 0x606   :  { %v7855_v14 = vsel %vm7599_vm8, %v7471_v32, %v7727_v40  ;;  %vm7601_vm10 = vcmp.ge.f32.partialorder %v7473_v43, 0.0  ;;  %v7729_v7 = vmul.f32 0.2, %v7473_v43  ;;  %vm7590_vm11 = vcmp.ge.f32.partialorder %v7462_v35, 0.0  ;;  %v16443_v32 = vld [vmem:[#allocation83_spill] sm:$0xff] }
 0x607   :  { %v7943_v47 = vpack.c.bf16 %v7855_v14, %v7847_v62  ;;  %v7849_v56 = vsel %vm7593_vm9, %v7465_v36, %v7721_v54  ;;  %vm7598_vm12 = vcmp.ge.f32.partialorder %v7470_v10, 0.0  ;;  %v7718_v18 = vmul.f32 0.2, %v7462_v35 }
 0x608   :  { %v7857_v52 = vsel %vm7601_vm10, %v7473_v43, %v7729_v7  ;;  %v7726_v48 = vmul.f32 0.2, %v7470_v10  ;;  %v7320_v29 = vsub.f32 %v16441_v8, %v14693_v34  ;;  %v7328_v5 = vsub.f32 %v16442_v16, %v14693_v34  ;;  %v16445_v43 = vld [vmem:[#allocation84_spill] sm:$0xff] }
 0x609   :  { %8557 = vmatprep.mubr.bf16.mxu0 %v7943_v47  ;;  %v7945_v57 = vpack.c.bf16 %v7857_v52, %v7849_v56  ;;  %v7846_v42 = vsel %vm7590_vm11, %v7462_v35, %v7718_v18  ;;  %v7335_v17 = vsub.f32 %v16443_v32, %v14707_v63  ;;  %v7343_v30 = vsub.f32 %v16444_v19, %v14707_v63  ;;  %v16446_v7 = vld [vmem:[#allocation88_spill] sm:$0xff]  ;;  %v16447_v32 = vld [vmem:[#allocation81_spill] sm:$0xff] }
 0x60a   :  { %v7854_v9 = vsel %vm7598_vm12, %v7470_v10, %v7726_v48  ;;  %v7464_v36 = vmul.f32 %v14849_v3, %v7320_v29  ;;  %v7472_v40 = vmul.f32 %v14849_v3, %v7328_v5  ;;  %v7337_v62 = vsub.f32 %v16445_v43, %v14709_v44  ;;  %v16448_v43 = vld [vmem:[#allocation85_spill] sm:$0xff] }
 0x60b   :  { %8654 = vmatprep.mubr.bf16.mxu1 %v7945_v57  ;;  %v7942_v54 = vpack.c.bf16 %v7854_v9, %v7846_v42  ;;  %v7479_v14 = vmul.f32 %v14871_v59, %v7335_v17  ;;  %v7487_v35 = vmul.f32 %v14871_v59, %v7343_v30  ;;  %v7345_v47 = vsub.f32 %v16446_v7, %v14709_v44 }
 0x60c   :  { %vm7592_vm13 = vcmp.ge.f32.partialorder %v7464_v36, 0.0  ;;  %vm7600_vm14 = vcmp.ge.f32.partialorder %v7472_v40, 0.0  ;;  %v7720_v56 = vmul.f32 0.2, %v7464_v36  ;;  %v7728_v10 = vmul.f32 0.2, %v7472_v40 }
 0x60d   :  { %8558 = vmatmul.mubr.bf16.gmra.mxu0 %v7942_v54  ;;  %vm7607_vm15 = vcmp.ge.f32.partialorder %v7479_v14, 0.0  ;;  %vm7615_vm1 = vcmp.ge.f32.partialorder %v7487_v35, 0.0  ;;  %v7735_v18 = vmul.f32 0.2, %v7479_v14  ;;  %v7743_v52 = vmul.f32 0.2, %v7487_v35 }
 0x60e   :  { %v7848_v48 = vsel %vm7592_vm13, %v7464_v36, %v7720_v56  ;;  %v7856_v8 = vsel %vm7600_vm14, %v7472_v40, %v7728_v10  ;;  %v7481_v29 = vmul.f32 %v14894_v58, %v7337_v62  ;;  %v7489_v16 = vmul.f32 %v14894_v58, %v7345_v47  ;;  %v16449_v62 = vld [vmem:[#allocation82_spill] sm:$0xff]  ;;  %v16451_v47 = vld [vmem:[#allocation91_spill] sm:$0xff] }
 0x60f   :  { %v7944_v5 = vpack.c.bf16 %v7856_v8, %v7848_v48  ;;  %v7863_v57 = vsel %vm7607_vm15, %v7479_v14, %v7735_v18  ;;  %v7871_v42 = vsel %vm7615_vm1, %v7487_v35, %v7743_v52  ;;  %v7334_v17 = vsub.f32 %v16447_v32, %v14691_v1  ;;  %v16450_v35 = vld [vmem:[#allocation86_spill] sm:$0xff]  ;;  %v16452_v10 = vld [vmem:[#allocation95_spill] sm:$0xff] }
 0x610   :  { %v7951_v19 = vpack.c.bf16 %v7871_v42, %v7863_v57  ;;  %vm7609_vm2 = vcmp.ge.f32.partialorder %v7481_v29, 0.0  ;;  %vm7617_vm3 = vcmp.ge.f32.partialorder %v7489_v16, 0.0  ;;  %v7737_v30 = vmul.f32 0.2, %v7481_v29 }
 0x611   :  { %8655 = vmatmul.mubr.bf16.gmra.mxu1 %v7944_v5  ;;  %v7745_v9 = vmul.f32 0.2, %v7489_v16  ;;  %v7342_v36 = vsub.f32 %v16448_v43, %v14691_v1  ;;  %v7478_v40 = vmul.f32 %v14843_v55, %v7334_v17  ;;  %v7336_v54 = vsub.f32 %v16449_v62, %v14693_v34 }
 0x612   :  { %8565 = vmatprep.mubr.bf16.mxu0 %v7951_v19  ;;  %v7865_v14 = vsel %vm7609_vm2, %v7481_v29, %v7737_v30  ;;  %v7344_v7 = vsub.f32 %v16450_v35, %v14693_v34  ;;  %v7351_v56 = vsub.f32 %v16451_v47, %v14707_v63  ;;  %v7359_v18 = vsub.f32 %v16452_v10, %v14707_v63  ;;  %v16453_v47 = vld [vmem:[#allocation92_spill] sm:$0xff] }
 0x613   :  { %v7873_v52 = vsel %vm7617_vm3, %v7489_v16, %v7745_v9  ;;  %v7486_v48 = vmul.f32 %v14843_v55, %v7342_v36  ;;  %vm7606_vm4 = vcmp.ge.f32.partialorder %v7478_v40, 0.0  ;;  %v7734_v8 = vmul.f32 0.2, %v7478_v40 }
 0x614   :  { %v7953_v5 = vpack.c.bf16 %v7873_v52, %v7865_v14  ;;  %v7480_v57 = vmul.f32 %v14849_v3, %v7336_v54  ;;  %v7488_v42 = vmul.f32 %v14849_v3, %v7344_v7  ;;  %v7495_v29 = vmul.f32 %v14871_v59, %v7351_v56  ;;  %v16454_v56 = vld [vmem:[#allocation96_spill] sm:$0xff]  ;;  %v16455_v52 = vld [vmem:[#allocation89_spill] sm:$0xff] }
 0x615   :  { %vm7614_vm5 = vcmp.ge.f32.partialorder %v7486_v48, 0.0  ;;  %v7742_v32 = vmul.f32 0.2, %v7486_v48  ;;  %v7862_v17 = vsel %vm7606_vm4, %v7478_v40, %v7734_v8  ;;  %v7503_v19 = vmul.f32 %v14871_v59, %v7359_v18  ;;  %v16456_v8 = vld [vmem:[#allocation93_spill] sm:$0xff] }
 0x616   :  { %8662 = vmatprep.mubr.bf16.mxu1 %v7953_v5  ;;  %vm7608_vm6 = vcmp.ge.f32.partialorder %v7480_v57, 0.0  ;;  %vm7616_vm7 = vcmp.ge.f32.partialorder %v7488_v42, 0.0  ;;  %v7736_v16 = vmul.f32 0.2, %v7480_v57  ;;  %v7744_v30 = vmul.f32 0.2, %v7488_v42 }
 0x617   :  { %v7870_v9 = vsel %vm7614_vm5, %v7486_v48, %v7742_v32  ;;  %vm7623_vm0 = vcmp.ge.f32.partialorder %v7495_v29, 0.0  ;;  %vm7631_vm8 = vcmp.ge.f32.partialorder %v7503_v19, 0.0  ;;  %v7751_v43 = vmul.f32 0.2, %v7495_v29 }
 0x618   :  { %v7950_v36 = vpack.c.bf16 %v7870_v9, %v7862_v17  ;;  %v7864_v62 = vsel %vm7608_vm6, %v7480_v57, %v7736_v16  ;;  %v7872_v54 = vsel %vm7616_vm7, %v7488_v42, %v7744_v30  ;;  %v7759_v14 = vmul.f32 0.2, %v7503_v19  ;;  %v16457_v57 = vld [vmem:[#allocation90_spill] sm:$0xff] }
 0x619   :  { %v7952_v35 = vpack.c.bf16 %v7872_v54, %v7864_v62  ;;  %v7879_v7 = vsel %vm7623_vm0, %v7495_v29, %v7751_v43  ;;  %v7353_v40 = vsub.f32 %v16453_v47, %v14709_v44  ;;  %v7361_v10 = vsub.f32 %v16454_v56, %v14709_v44  ;;  %v16458_v16 = vld [vmem:[#allocation94_spill] sm:$0xff] }
 0x61a   :  { %vm7647_vm9 = vcmp.ge.f32.partialorder %v14888_v51, 0.0  ;;  %8566 = vmatmul.mubr.bf16.gmra.mxu0 %v7950_v36  ;;  %v7887_v18 = vsel %vm7631_vm8, %v7503_v19, %v7759_v14  ;;  %v7350_v48 = vsub.f32 %v16455_v52, %v14691_v1  ;;  %v7358_v5 = vsub.f32 %v16456_v8, %v14691_v1  ;;  %v16459_v36 = vld [vmem:[#allocation40_spill] sm:$0xff] }
 0x61b   :  { %v7352_v42 = vsub.f32 %v16457_v57, %v14693_v34  ;;  %8663 = vmatmul.mubr.bf16.gmra.mxu1 %v7952_v35  ;;  %v7959_v29 = vpack.c.bf16 %v7887_v18, %v7879_v7  ;;  %v7497_v32 = vmul.f32 %v14894_v58, %v7353_v40  ;;  %v7505_v17 = vmul.f32 %v14894_v58, %v7361_v10 }
 0x61c   :  { %v7360_v30 = vsub.f32 %v16458_v16, %v14693_v34  ;;  %v7494_v19 = vmul.f32 %v14843_v55, %v7350_v48  ;;  %v7502_v9 = vmul.f32 %v14843_v55, %v7358_v5  ;;  %v7367_v62 = vsub.f32 %v16459_v36, %v14707_v63 }
 0x61d   :  { %v7496_v43 = vmul.f32 %v14849_v3, %v7352_v42  ;;  %8573 = vmatprep.mubr.bf16.mxu0 %v7959_v29  ;;  %vm7625_vm10 = vcmp.ge.f32.partialorder %v7497_v32, 0.0  ;;  %vm7633_vm11 = vcmp.ge.f32.partialorder %v7505_v17, 0.0  ;;  %v7753_v54 = vmul.f32 0.2, %v7497_v32  ;;  %v16460_v29 = vld [vmem:[#allocation100_spill] sm:$0xff] }
 0x61e   :  { %v7761_v14 = vmul.f32 0.2, %v7505_v17  ;;  %vm7622_vm12 = vcmp.ge.f32.partialorder %v7494_v19, 0.0  ;;  %vm7630_vm13 = vcmp.ge.f32.partialorder %v7502_v9, 0.0  ;;  %v7750_v35 = vmul.f32 0.2, %v7494_v19 }
 0x61f   :  { %v7758_v7 = vmul.f32 0.2, %v7502_v9  ;;  %v7881_v47 = vsel %vm7625_vm10, %v7497_v32, %v7753_v54  ;;  %v7504_v56 = vmul.f32 %v14849_v3, %v7360_v30  ;;  %vm7624_vm14 = vcmp.ge.f32.partialorder %v7496_v43, 0.0  ;;  %v16462_v54 = vld [vmem:[#allocation98_spill] sm:$0xff] }
 0x620   :  { %v7889_v40 = vsel %vm7633_vm11, %v7505_v17, %v7761_v14  ;;  %v7878_v18 = vsel %vm7622_vm12, %v7494_v19, %v7750_v35  ;;  %v7752_v48 = vmul.f32 0.2, %v7496_v43  ;;  %v7511_v5 = vmul.f32 %v14871_v59, %v7367_v62 }
 0x621   :  { %v7961_v10 = vpack.c.bf16 %v7889_v40, %v7881_v47  ;;  %v7886_v52 = vsel %vm7630_vm13, %v7502_v9, %v7758_v7  ;;  %vm7632_vm15 = vcmp.ge.f32.partialorder %v7504_v56, 0.0  ;;  %v7760_v63 = vmul.f32 0.2, %v7504_v56 }
 0x622   :  { %v7958_v8 = vpack.c.bf16 %v7886_v52, %v7878_v18  ;;  %v7880_v57 = vsel %vm7624_vm14, %v7496_v43, %v7752_v48  ;;  %v7775_v42 = vmul.f32 0.2, %v14888_v51  ;;  %v7369_v32 = vsub.f32 %v16460_v29, %v14709_v44  ;;  %v16461_v43 = vld [vmem:[#allocation97_spill] sm:$0xff]  ;;  %v16465_v52 = vld [vmem:[#allocation15_spill] sm:$0xff] }
 0x623   :  { %8670 = vmatprep.mubr.bf16.mxu1 %v7961_v10  ;;  %vm7649_vm1 = vcmp.ge.f32.partialorder %v14995_v53, 0.0  ;;  %v7888_v17 = vsel %vm7632_vm15, %v7504_v56, %v7760_v63  ;;  %vm7639_vm2 = vcmp.ge.f32.partialorder %v7511_v5, 0.0  ;;  %v7767_v16 = vmul.f32 0.2, %v7511_v5  ;;  %v16464_v18 = vld [vmem:[#allocation61_spill] sm:$0xff] }
 0x624   :  { %8574 = vmatmul.mubr.bf16.gmra.mxu0 %v7958_v8  ;;  %v7777_v30 = vmul.f32 0.2, %v14995_v53  ;;  %v7960_v19 = vpack.c.bf16 %v7888_v17, %v7880_v57  ;;  %v7903_v59 = vsel %vm7647_vm9, %v14888_v51, %v7775_v42  ;;  %v7513_v9 = vmul.f32 %v14894_v58, %v7369_v32  ;;  %v16466_v8 = vld [vmem:[#allocation64_spill] sm:$0xff] }
 0x625   :  { %v7366_v36 = vsub.f32 %v16461_v43, %v14691_v1  ;;  %v7895_v62 = vsel %vm7639_vm2, %v7511_v5, %v7767_v16  ;;  %vm7646_vm3 = vcmp.ge.f32.partialorder %v14855_v41, 0.0  ;;  %v7368_v14 = vsub.f32 %v16462_v54, %v14693_v34  ;;  %v16463_v1 = vld [vmem:[#allocation17_spill] sm:$0xff] }
 0x626   :  { %v7905_v44 = vsel %vm7649_vm1, %v14995_v53, %v7777_v30  ;;  %8671 = vmatmul.mubr.bf16.gmra.mxu1 %v7960_v19  ;;  %v7967_v35 = vpack.c.bf16 %v7903_v59, %v7895_v62  ;;  %vm7641_vm4 = vcmp.ge.f32.partialorder %v7513_v9, 0.0  ;;  %v7769_v7 = vmul.f32 0.2, %v7513_v9  ;;  %v16468_v19 = vld [vmem:[#allocation23_spill] sm:$0xff] }
 0x627   :  { %v7510_v47 = vmul.f32 %v14843_v55, %v7366_v36  ;;  %v7902_v51 = vsel %vm7646_vm3, %v14855_v41, %v14882_v38  ;;  %v7512_v58 = vmul.f32 %v14849_v3, %v7368_v14  ;;  %vm7648_vm5 = vcmp.ge.f32.partialorder %v14865_v20, 0.0 }
 0x628   :  { %v7259_v53 = vsub.f32 %v16463_v1, %v14989_v26  ;;  %8581 = vmatprep.mubr.bf16.mxu0 %v7967_v35  ;;  %v7897_v40 = vsel %vm7641_vm4, %v7513_v9, %v7769_v7  ;;  %v7904_v56 = vsel %vm7648_vm5, %v14865_v20, %v15069_v46  ;;  %v7267_v41 = vsub.f32 %v16464_v18, %v14989_v26  ;;  %v16467_v46 = vld [vmem:[#allocation12_spill] sm:$0xff] }
 0x629   :  { %vm7638_vm6 = vcmp.ge.f32.partialorder %v7510_v47, 0.0  ;;  %v7766_v34 = vmul.f32 0.2, %v7510_v47  ;;  %v7969_v10 = vpack.c.bf16 %v7905_v44, %v7897_v40  ;;  %vm7640_vm7 = vcmp.ge.f32.partialorder %v7512_v58, 0.0 }
 0x62a   :  { %v7768_v55 = vmul.f32 0.2, %v7512_v58  ;;  %v7403_v3 = vmul.f32 %v15082_v21, %v7259_v53  ;;  %v7261_v48 = vsub.f32 %v16465_v52, %v15007_v27  ;;  %v7269_v63 = vsub.f32 %v16466_v8, %v15007_v27  ;;  %v16473_v52 = vld [vmem:[#allocation27_spill] sm:$0xff] }
 0x62b   :  { %v7894_v38 = vsel %vm7638_vm6, %v7510_v47, %v7766_v34  ;;  %8678 = vmatprep.mubr.bf16.mxu1 %v7969_v10  ;;  %v7411_v20 = vmul.f32 %v15082_v21, %v7267_v41  ;;  %v7258_v42 = vsub.f32 %v16467_v46, %v14985_v23  ;;  %v7266_v59 = vsub.f32 %v16468_v19, %v14985_v23  ;;  %v16470_v34 = vld [vmem:[#allocation5_spill] sm:$0xff]  ;;  %v16471_v10 = vld [vmem:[#allocation18_spill] sm:$0xff] }
 0x62c   :  { %v7966_v5 = vpack.c.bf16 %v7902_v51, %v7894_v38  ;;  %v7896_v57 = vsel %vm7640_vm7, %v7512_v58, %v7768_v55  ;;  %vm7531_vm0 = vcmp.ge.f32.partialorder %v7403_v3, 0.0  ;;  %v7659_v32 = vmul.f32 0.2, %v7403_v3  ;;  %v16469_v58 = vld [vmem:[#allocation14_spill] sm:$0xff]  ;;  %v16472_v38 = vld [vmem:[#allocation45_spill] sm:$0xff] }
 0x62d   :  { %v7968_v29 = vpack.c.bf16 %v7904_v56, %v7896_v57  ;;  %v7405_v17 = vmul.f32 %v15106_v15, %v7261_v48  ;;  %vm7539_vm8 = vcmp.ge.f32.partialorder %v7411_v20, 0.0  ;;  %v7667_v16 = vmul.f32 0.2, %v7411_v20  ;;  %v16474_v57 = vld [vmem:[#allocation22_spill] sm:$0xff] }
 0x62e   :  { %8582 = vmatmul.mubr.bf16.gmra.mxu0 %v7966_v5  ;;  %v7413_v30 = vmul.f32 %v15106_v15, %v7269_v63  ;;  %v7787_v9 = vsel %vm7531_vm0, %v7403_v3, %v7659_v32  ;;  %v7402_v36 = vmul.f32 %v15057_v60, %v7258_v42  ;;  %v7410_v54 = vmul.f32 %v15057_v60, %v7266_v59 }
 0x62f   :  { %8679 = vmatmul.mubr.bf16.gmra.mxu1 %v7968_v29  ;;  %vm7533_vm9 = vcmp.ge.f32.partialorder %v7405_v17, 0.0  ;;  %v7661_v43 = vmul.f32 0.2, %v7405_v17  ;;  %v7795_v62 = vsel %vm7539_vm8, %v7411_v20, %v7667_v16  ;;  %v7260_v1 = vsub.f32 %v16469_v58, %v14987_v4 }
 0x630   :  { %vm7541_vm10 = vcmp.ge.f32.partialorder %v7413_v30, 0.0  ;;  %v7669_v44 = vmul.f32 0.2, %v7413_v30  ;;  %v7915_v14 = vpack.c.bf16 %v7795_v62, %v7787_v9  ;;  %vm7530_vm11 = vcmp.ge.f32.partialorder %v7402_v36, 0.0 }
 0x631   :  { %v7789_v35 = vsel %vm7533_vm9, %v7405_v17, %v7661_v43  ;;  %v7658_v7 = vmul.f32 0.2, %v7402_v36  ;;  %vm7538_vm12 = vcmp.ge.f32.partialorder %v7410_v54, 0.0  ;;  %v7666_v51 = vmul.f32 0.2, %v7410_v54 }
 0x632   :  { %v7797_v47 = vsel %vm7541_vm10, %v7413_v30, %v7669_v44  ;;  %8719 = vmatprep.mubr.bf16.mxu0 %v7915_v14  ;;  %v7268_v56 = vsub.f32 %v16470_v34, %v14987_v4  ;;  %v7275_v55 = vsub.f32 %v16471_v10, %v14989_v26  ;;  %v7404_v41 = vmul.f32 %v15066_v24, %v7260_v1  ;;  %v16477_v1 = vld [vmem:[#allocation10_spill] sm:$0xff] }
 0x633   :  { %v7917_v53 = vpack.c.bf16 %v7797_v47, %v7789_v35  ;;  %v7786_v40 = vsel %vm7530_vm11, %v7402_v36, %v7658_v7  ;;  %v7794_v18 = vsel %vm7538_vm12, %v7410_v54, %v7666_v51  ;;  %v7283_v3 = vsub.f32 %v16472_v38, %v14989_v26  ;;  %v16475_v35 = vld [vmem:[#allocation20_spill] sm:$0xff]  ;;  %v16476_v47 = vld [vmem:[#allocation26_spill] sm:$0xff] }
 0x634   :  { %v7277_v48 = vsub.f32 %v16473_v52, %v15007_v27  ;;  %v7914_v8 = vpack.c.bf16 %v7794_v18, %v7786_v40  ;;  %v7412_v63 = vmul.f32 %v15066_v24, %v7268_v56  ;;  %v7419_v5 = vmul.f32 %v15082_v21, %v7275_v55  ;;  %v16478_v40 = vld [vmem:[#allocation30_spill] sm:$0xff]  ;;  %v16479_v56 = vld [vmem:[#allocation24_spill] sm:$0xff] }
 0x635   :  { %8816 = vmatprep.mubr.bf16.mxu1 %v7917_v53  ;;  %v7285_v20 = vsub.f32 %v16474_v57, %v15007_v27  ;;  %vm7532_vm13 = vcmp.ge.f32.partialorder %v7404_v41, 0.0  ;;  %v7660_v46 = vmul.f32 0.2, %v7404_v41  ;;  %v7427_v42 = vmul.f32 %v15082_v21, %v7283_v3  ;;  %v16480_v38 = vld [vmem:[#allocation44_spill] sm:$0xff] }
 0x636   :  { %v7421_v29 = vmul.f32 %v15106_v15, %v7277_v48  ;;  %8720 = vmatmul.mubr.bf16.vlgmr.msra.gmra.mxu0 %v7914_v8  ;;  %vm7540_vm14 = vcmp.ge.f32.partialorder %v7412_v63, 0.0  ;;  %v7668_v32 = vmul.f32 0.2, %v7412_v63  ;;  %vm7547_vm15 = vcmp.ge.f32.partialorder %v7419_v5, 0.0 }
 0x637   :  { %v7675_v17 = vmul.f32 0.2, %v7419_v5  ;;  %v7788_v16 = vsel %vm7532_vm13, %v7404_v41, %v7660_v46  ;;  %vm7555_vm1 = vcmp.ge.f32.partialorder %v7427_v42, 0.0  ;;  %v7683_v30 = vmul.f32 0.2, %v7427_v42 }
 0x638   :  { %v7429_v19 = vmul.f32 %v15106_v15, %v7285_v20  ;;  %v7796_v59 = vsel %vm7540_vm14, %v7412_v63, %v7668_v32  ;;  %vm7549_vm2 = vcmp.ge.f32.partialorder %v7421_v29, 0.0  ;;  %v7677_v43 = vmul.f32 0.2, %v7421_v29  ;;  %v16481_v63 = vld [vmem:[#allocation32_spill] sm:$0xff] }
 0x639   :  { %v7803_v9 = vsel %vm7547_vm15, %v7419_v5, %v7675_v17  ;;  %v7916_v36 = vpack.c.bf16 %v7796_v59, %v7788_v16  ;;  %v7811_v62 = vsel %vm7555_vm1, %v7427_v42, %v7683_v30  ;;  %v7274_v7 = vsub.f32 %v16475_v35, %v14985_v23 }
 0x63a   :  { %vm7557_vm3 = vcmp.ge.f32.partialorder %v7429_v19, 0.0  ;;  %v7685_v44 = vmul.f32 0.2, %v7429_v19  ;;  %v7923_v54 = vpack.c.bf16 %v7811_v62, %v7803_v9  ;;  %v7805_v14 = vsel %vm7549_vm2, %v7421_v29, %v7677_v43 }
 0x63b   :  { %v7282_v51 = vsub.f32 %v16476_v47, %v14985_v23  ;;  %8817 = vmatmul.mubr.bf16.vlgmr.msra.gmra.mxu1 %v7916_v36  ;;  %v7276_v53 = vsub.f32 %v16477_v1, %v14987_v4  ;;  %v7284_v34 = vsub.f32 %v16478_v40, %v14987_v4  ;;  %v7291_v10 = vsub.f32 %v16479_v56, %v14989_v26  ;;  %v16482_v36 = vld [vmem:[#allocation70_spill] sm:$0xff]  ;;  %v16485_v1 = vld [vmem:[#allocation28_spill] sm:$0xff]  ;;  %v16486_v40 = vld [vmem:[#allocation35_spill] sm:$0xff] }
 0x63c   :  { %v7813_v58 = vsel %vm7557_vm3, %v7429_v19, %v7685_v44  ;;  %8727 = vmatprep.mubr.bf16.mxu0 %v7923_v54  ;;  %v7418_v18 = vmul.f32 %v15057_v60, %v7274_v7  ;;  %v7299_v3 = vsub.f32 %v16480_v38, %v14989_v26  ;;  %v7293_v5 = vsub.f32 %v16481_v63, %v15007_v27  ;;  %v16484_v7 = vld [vmem:[#allocation29_spill] sm:$0xff] }
 0x63d   :  { %v7925_v55 = vpack.c.bf16 %v7813_v58, %v7805_v14  ;;  %v7426_v41 = vmul.f32 %v15057_v60, %v7282_v51  ;;  %v7420_v52 = vmul.f32 %v15066_v24, %v7276_v53  ;;  %v7428_v48 = vmul.f32 %v15066_v24, %v7284_v34  ;;  %v16483_v14 = vld [vmem:[#allocation19_spill] sm:$0xff] }
 0x63e   :  { %v7435_v8 = vmul.f32 %v15082_v21, %v7291_v10  ;;  %vm7546_vm4 = vcmp.ge.f32.partialorder %v7418_v18, 0.0  ;;  %v7674_v57 = vmul.f32 0.2, %v7418_v18  ;;  %v7443_v17 = vmul.f32 %v15082_v21, %v7299_v3 }
 0x63f   :  { %8824 = vmatprep.mubr.bf16.mxu1 %v7925_v55  ;;  %vm7554_vm5 = vcmp.ge.f32.partialorder %v7426_v41, 0.0  ;;  %v7682_v20 = vmul.f32 0.2, %v7426_v41  ;;  %vm7548_vm6 = vcmp.ge.f32.partialorder %v7420_v52, 0.0  ;;  %vm7556_vm7 = vcmp.ge.f32.partialorder %v7428_v48, 0.0 }
 0x640   :  { %v7676_v46 = vmul.f32 0.2, %v7420_v52  ;;  %v7684_v42 = vmul.f32 0.2, %v7428_v48  ;;  %v7802_v29 = vsel %vm7546_vm4, %v7418_v18, %v7674_v57  ;;  %vm7563_vm0 = vcmp.ge.f32.partialorder %v7435_v8, 0.0 }
 0x641   :  { %v7810_v32 = vsel %vm7554_vm5, %v7426_v41, %v7682_v20  ;;  %v7691_v59 = vmul.f32 0.2, %v7435_v8  ;;  %vm7571_vm8 = vcmp.ge.f32.partialorder %v7443_v17, 0.0  ;;  %v7699_v43 = vmul.f32 0.2, %v7443_v17 }
 0x642   :  { %v7922_v16 = vpack.c.bf16 %v7810_v32, %v7802_v29  ;;  %v7804_v30 = vsel %vm7548_vm6, %v7420_v52, %v7676_v46  ;;  %v7812_v19 = vsel %vm7556_vm7, %v7428_v48, %v7684_v42  ;;  %v7301_v62 = vsub.f32 %v16482_v36, %v15007_v27  ;;  %v16487_v29 = vld [vmem:[#allocation33_spill] sm:$0xff] }
 0x643   :  { %v7924_v9 = vpack.c.bf16 %v7812_v19, %v7804_v30  ;;  %v7819_v44 = vsel %vm7563_vm0, %v7435_v8, %v7691_v59  ;;  %v7437_v54 = vmul.f32 %v15106_v15, %v7293_v5  ;;  %v7290_v35 = vsub.f32 %v16483_v14, %v14985_v23  ;;  %v16489_v59 = vld [vmem:[#allocation38_spill] sm:$0xff]  ;;  %v16491_v14 = vld [vmem:[#allocation31_spill] sm:$0xff] }
 0x644   :  { %8728 = vmatmul.mubr.bf16.gmra.mxu0 %v7922_v16  ;;  %v7298_v47 = vsub.f32 %v16484_v7, %v14985_v23  ;;  %v7827_v51 = vsel %vm7571_vm8, %v7443_v17, %v7699_v43  ;;  %v7445_v58 = vmul.f32 %v15106_v15, %v7301_v62  ;;  %v7292_v53 = vsub.f32 %v16485_v1, %v14987_v4  ;;  %v16488_v17 = vld [vmem:[#allocation47_spill] sm:$0xff] }
 0x645   :  { %8825 = vmatmul.mubr.bf16.gmra.mxu1 %v7924_v9  ;;  %v7300_v34 = vsub.f32 %v16486_v40, %v14987_v4  ;;  %v7931_v56 = vpack.c.bf16 %v7827_v51, %v7819_v44  ;;  %vm7565_vm9 = vcmp.ge.f32.partialorder %v7437_v54, 0.0  ;;  %v7693_v10 = vmul.f32 0.2, %v7437_v54  ;;  %v16490_v43 = vld [vmem:[#allocation71_spill] sm:$0xff] }
 0x646   :  { %v7434_v55 = vmul.f32 %v15057_v60, %v7290_v35  ;;  %vm7573_vm10 = vcmp.ge.f32.partialorder %v7445_v58, 0.0  ;;  %v7701_v18 = vmul.f32 0.2, %v7445_v58  ;;  %v7442_v41 = vmul.f32 %v15057_v60, %v7298_v47 }
 0x647   :  { %v7436_v38 = vmul.f32 %v15066_v24, %v7292_v53  ;;  %8735 = vmatprep.mubr.bf16.mxu0 %v7931_v56  ;;  %v7821_v3 = vsel %vm7565_vm9, %v7437_v54, %v7693_v10  ;;  %v7444_v48 = vmul.f32 %v15066_v24, %v7300_v34  ;;  %v7307_v32 = vsub.f32 %v16487_v29, %v14989_v26 }
 0x648   :  { %vm7562_vm11 = vcmp.ge.f32.partialorder %v7434_v55, 0.0  ;;  %v7690_v52 = vmul.f32 0.2, %v7434_v55  ;;  %v7829_v8 = vsel %vm7573_vm10, %v7445_v58, %v7701_v18  ;;  %vm7570_vm12 = vcmp.ge.f32.partialorder %v7442_v41, 0.0  ;;  %v16492_v58 = vld [vmem:[#allocation36_spill] sm:$0xff] }
 0x649   :  { %v7698_v63 = vmul.f32 0.2, %v7442_v41  ;;  %vm7564_vm13 = vcmp.ge.f32.partialorder %v7436_v38, 0.0  ;;  %v7933_v5 = vpack.c.bf16 %v7829_v8, %v7821_v3  ;;  %vm7572_vm14 = vcmp.ge.f32.partialorder %v7444_v48, 0.0 }
 0x64a   :  { %v7818_v57 = vsel %vm7562_vm11, %v7434_v55, %v7690_v52  ;;  %v7692_v20 = vmul.f32 0.2, %v7436_v38  ;;  %v7700_v42 = vmul.f32 0.2, %v7444_v48  ;;  %v7315_v16 = vsub.f32 %v16488_v17, %v14989_v26 }
 0x64b   :  { %v7826_v46 = vsel %vm7570_vm12, %v7442_v41, %v7698_v63  ;;  %8832 = vmatprep.mubr.bf16.mxu1 %v7933_v5  ;;  %v7309_v9 = vsub.f32 %v16489_v59, %v15007_v27  ;;  %v7317_v36 = vsub.f32 %v16490_v43, %v15007_v27  ;;  %v7451_v44 = vmul.f32 %v15082_v21, %v7307_v32 }
 0x64c   :  { %v7930_v30 = vpack.c.bf16 %v7826_v46, %v7818_v57  ;;  %v7820_v19 = vsel %vm7564_vm13, %v7436_v38, %v7692_v20  ;;  %v7828_v62 = vsel %vm7572_vm14, %v7444_v48, %v7700_v42  ;;  %v7459_v54 = vmul.f32 %v15082_v21, %v7315_v16  ;;  %v16493_v48 = vld [vmem:[#allocation37_spill] sm:$0xff]  ;;  %v16494_v20 = vld [vmem:[#allocation42_spill] sm:$0xff] }
 0x64d   :  { %v7306_v35 = vsub.f32 %v16491_v14, %v14985_v23  ;;  %v7932_v7 = vpack.c.bf16 %v7828_v62, %v7820_v19  ;;  %v7453_v47 = vmul.f32 %v15106_v15, %v7309_v9  ;;  %v7461_v51 = vmul.f32 %v15106_v15, %v7317_v36 }
 0x64e   :  { %8736 = vmatmul.mubr.bf16.gmra.mxu0 %v7930_v30  ;;  %v7314_v1 = vsub.f32 %v16492_v58, %v14985_v23  ;;  %vm7579_vm15 = vcmp.ge.f32.partialorder %v7451_v44, 0.0  ;;  %vm7587_vm1 = vcmp.ge.f32.partialorder %v7459_v54, 0.0  ;;  %v7707_v53 = vmul.f32 0.2, %v7451_v44 }
 0x64f   :  { %v7715_v40 = vmul.f32 0.2, %v7459_v54  ;;  %8833 = vmatmul.mubr.bf16.gmra.mxu1 %v7932_v7  ;;  %vm7581_vm2 = vcmp.ge.f32.partialorder %v7453_v47, 0.0  ;;  %vm7589_vm3 = vcmp.ge.f32.partialorder %v7461_v51, 0.0  ;;  %v7709_v34 = vmul.f32 0.2, %v7453_v47 }
 0x650   :  { %v7717_v56 = vmul.f32 0.2, %v7461_v51  ;;  %v7835_v10 = vsel %vm7579_vm15, %v7451_v44, %v7707_v53  ;;  %v7450_v18 = vmul.f32 %v15057_v60, %v7306_v35  ;;  %v7458_v41 = vmul.f32 %v15057_v60, %v7314_v1 }
 0x651   :  { %v7843_v55 = vsel %vm7587_vm1, %v7459_v54, %v7715_v40  ;;  %v7837_v3 = vsel %vm7581_vm2, %v7453_v47, %v7709_v34  ;;  %v7308_v8 = vsub.f32 %v16493_v48, %v14987_v4  ;;  %v7316_v46 = vsub.f32 %v16494_v20, %v14987_v4 }
 0x652   :  { %v7939_v38 = vpack.c.bf16 %v7843_v55, %v7835_v10  ;;  %v7845_v52 = vsel %vm7589_vm3, %v7461_v51, %v7717_v56  ;;  %vm7578_vm4 = vcmp.ge.f32.partialorder %v7450_v18, 0.0  ;;  %vm7586_vm5 = vcmp.ge.f32.partialorder %v7458_v41, 0.0 }
 0x653   :  { %v7941_v63 = vpack.c.bf16 %v7845_v52, %v7837_v3  ;;  %v7706_v5 = vmul.f32 0.2, %v7450_v18  ;;  %v7714_v57 = vmul.f32 0.2, %v7458_v41  ;;  %v7452_v42 = vmul.f32 %v15066_v24, %v7308_v8 }
 0x654   :  { %8743 = vmatprep.mubr.bf16.mxu0 %v7939_v38  ;;  %v7323_v29 = vsub.f32 %v14737_v2, %v14989_v26  ;;  %v7331_v17 = vsub.f32 %v14777_v25, %v14989_v26  ;;  %v7325_v16 = vsub.f32 %v14745_v28, %v15007_v27  ;;  %v7333_v30 = vsub.f32 %v14781_v49, %v15007_v27 }
 0x655   :  { %8840 = vmatprep.mubr.bf16.mxu1 %v7941_v63  ;;  %v7834_v32 = vsel %vm7578_vm4, %v7450_v18, %v7706_v5  ;;  %v7842_v19 = vsel %vm7586_vm5, %v7458_v41, %v7714_v57  ;;  %v7460_v59 = vmul.f32 %v15066_v24, %v7316_v46  ;;  %vm7580_vm6 = vcmp.ge.f32.partialorder %v7452_v42, 0.0 }
 0x656   :  { %v7708_v9 = vmul.f32 0.2, %v7452_v42  ;;  %v7938_v43 = vpack.c.bf16 %v7842_v19, %v7834_v32  ;;  %v7467_v36 = vmul.f32 %v15082_v21, %v7323_v29  ;;  %v7475_v2 = vmul.f32 %v15082_v21, %v7331_v17 }
 0x657   :  { %v7469_v62 = vmul.f32 %v15106_v15, %v7325_v16  ;;  %vm7588_vm7 = vcmp.ge.f32.partialorder %v7460_v59, 0.0  ;;  %v7716_v25 = vmul.f32 0.2, %v7460_v59  ;;  %v7477_v28 = vmul.f32 %v15106_v15, %v7333_v30 }
 0x658   :  { %v7836_v44 = vsel %vm7580_vm6, %v7452_v42, %v7708_v9  ;;  %8744 = vmatmul.mubr.bf16.gmra.mxu0 %v7938_v43  ;;  %vm7595_vm0 = vcmp.ge.f32.partialorder %v7467_v36, 0.0  ;;  %vm7603_vm8 = vcmp.ge.f32.partialorder %v7475_v2, 0.0  ;;  %v7723_v49 = vmul.f32 0.2, %v7467_v36 }
 0x659   :  { %v7731_v54 = vmul.f32 0.2, %v7475_v2  ;;  %v7844_v14 = vsel %vm7588_vm7, %v7460_v59, %v7716_v25  ;;  %vm7597_vm9 = vcmp.ge.f32.partialorder %v7469_v62, 0.0  ;;  %vm7605_vm10 = vcmp.ge.f32.partialorder %v7477_v28, 0.0 }
 0x65a   :  { %v7725_v35 = vmul.f32 0.2, %v7469_v62  ;;  %v7940_v7 = vpack.c.bf16 %v7844_v14, %v7836_v44  ;;  %v7851_v47 = vsel %vm7595_vm0, %v7467_v36, %v7723_v49  ;;  %v7733_v58 = vmul.f32 0.2, %v7477_v28  ;;  %v16495_v36 = vld [vmem:[#allocation56_spill] sm:$0xff] }
 0x65b   :  { %v7859_v51 = vsel %vm7603_vm8, %v7475_v2, %v7731_v54  ;;  %v7322_v40 = vsub.f32 %v14713_v61, %v14985_v23  ;;  %v7330_v34 = vsub.f32 %v14767_v37, %v14985_v23  ;;  %v7324_v10 = vsub.f32 %v14733_v12, %v14987_v4 }
 0x65c   :  { %v7947_v1 = vpack.c.bf16 %v7859_v51, %v7851_v47  ;;  %v7853_v53 = vsel %vm7597_vm9, %v7469_v62, %v7725_v35  ;;  %8841 = vmatmul.mubr.bf16.gmra.mxu1 %v7940_v7  ;;  %v7861_v56 = vsel %vm7605_vm10, %v7477_v28, %v7733_v58  ;;  %v7332_v55 = vsub.f32 %v14771_v6, %v14987_v4  ;;  %v16496_v62 = vld [vmem:[#allocation101_spill] sm:$0xff] }
 0x65d   :  { %v7339_v18 = vsub.f32 %v14809_v0, %v14989_v26  ;;  %v7949_v41 = vpack.c.bf16 %v7861_v56, %v7853_v53  ;;  %v7466_v38 = vmul.f32 %v15057_v60, %v7322_v40  ;;  %v7474_v61 = vmul.f32 %v15057_v60, %v7330_v34  ;;  %v16497_v34 = vld [vmem:[#allocation104_spill] sm:$0xff] }
 0x65e   :  { %8751 = vmatprep.mubr.bf16.mxu0 %v7947_v1  ;;  %v7347_v37 = vsub.f32 %v14837_v31, %v14989_v26  ;;  %v7468_v3 = vmul.f32 %v15066_v24, %v7324_v10  ;;  %v7476_v52 = vmul.f32 %v15066_v24, %v7332_v55  ;;  %v7341_v6 = vsub.f32 %v14813_v50, %v15007_v27  ;;  %v16498_v10 = vld [vmem:[#allocation4_spill] sm:$0xff] }
 0x65f   :  { %v7483_v12 = vmul.f32 %v15082_v21, %v7339_v18  ;;  %8848 = vmatprep.mubr.bf16.mxu1 %v7949_v41  ;;  %vm7594_vm11 = vcmp.ge.f32.partialorder %v7466_v38, 0.0  ;;  %vm7602_vm12 = vcmp.ge.f32.partialorder %v7474_v61, 0.0  ;;  %v7722_v0 = vmul.f32 0.2, %v7466_v38 }
 0x660   :  { %v7730_v48 = vmul.f32 0.2, %v7474_v61  ;;  %vm7596_vm13 = vcmp.ge.f32.partialorder %v7468_v3, 0.0  ;;  %vm7604_vm14 = vcmp.ge.f32.partialorder %v7476_v52, 0.0  ;;  %v7724_v8 = vmul.f32 0.2, %v7468_v3 }
 0x661   :  { %v7732_v63 = vmul.f32 0.2, %v7476_v52  ;;  %v7850_v5 = vsel %vm7594_vm11, %v7466_v38, %v7722_v0  ;;  %v7491_v57 = vmul.f32 %v15082_v21, %v7347_v37  ;;  %vm7611_vm15 = vcmp.ge.f32.partialorder %v7483_v12, 0.0  ;;  %v16499_v38 = vld [vmem:[#allocation105_spill] sm:$0xff]  ;;  %v16500_v37 = vld [vmem:[#allocation46_spill] sm:$0xff] }
 0x662   :  { %v7858_v31 = vsel %vm7602_vm12, %v7474_v61, %v7730_v48  ;;  %v7852_v46 = vsel %vm7596_vm13, %v7468_v3, %v7724_v8  ;;  %v7739_v29 = vmul.f32 0.2, %v7483_v12  ;;  %v7349_v17 = vsub.f32 %v14841_v33, %v15007_v27  ;;  %v16501_v0 = vld [vmem:[#allocation102_spill] sm:$0xff] }
 0x663   :  { %v7946_v20 = vpack.c.bf16 %v7858_v31, %v7850_v5  ;;  %v7860_v42 = vsel %vm7604_vm14, %v7476_v52, %v7732_v63  ;;  %vm7619_vm1 = vcmp.ge.f32.partialorder %v7491_v57, 0.0  ;;  %v7747_v50 = vmul.f32 0.2, %v7491_v57  ;;  %v16502_v31 = vld [vmem:[#allocation106_spill] sm:$0xff] }
 0x664   :  { %v7948_v32 = vpack.c.bf16 %v7860_v42, %v7852_v46  ;;  %v7867_v16 = vsel %vm7611_vm15, %v7483_v12, %v7739_v29  ;;  %v7485_v30 = vmul.f32 %v15106_v15, %v7341_v6  ;;  %v7338_v19 = vsub.f32 %v14801_v13, %v14985_v23 }
 0x665   :  { %8752 = vmatmul.mubr.bf16.gmra.mxu0 %v7946_v20  ;;  %v7346_v59 = vsub.f32 %v14829_v45, %v14985_v23  ;;  %v7875_v9 = vsel %vm7619_vm1, %v7491_v57, %v7747_v50  ;;  %v7493_v43 = vmul.f32 %v15106_v15, %v7349_v17  ;;  %v7340_v2 = vsub.f32 %v16495_v36, %v14987_v4 }
 0x666   :  { %8849 = vmatmul.mubr.bf16.gmra.mxu1 %v7948_v32  ;;  %v7348_v33 = vsub.f32 %v16496_v62, %v14987_v4  ;;  %v7955_v25 = vpack.c.bf16 %v7875_v9, %v7867_v16  ;;  %vm7613_vm2 = vcmp.ge.f32.partialorder %v7485_v30, 0.0  ;;  %v7741_v44 = vmul.f32 0.2, %v7485_v30  ;;  %v16503_v9 = vld [vmem:[#allocation103_spill] sm:$0xff] }
 0x667   :  { %v7482_v28 = vmul.f32 %v15057_v60, %v7338_v19  ;;  %vm7621_vm3 = vcmp.ge.f32.partialorder %v7493_v43, 0.0  ;;  %v7749_v13 = vmul.f32 0.2, %v7493_v43  ;;  %v7490_v49 = vmul.f32 %v15057_v60, %v7346_v59 }
 0x668   :  { %v7484_v45 = vmul.f32 %v15066_v24, %v7340_v2  ;;  %8759 = vmatprep.mubr.bf16.mxu0 %v7955_v25  ;;  %v7869_v54 = vsel %vm7613_vm2, %v7485_v30, %v7741_v44  ;;  %v7492_v35 = vmul.f32 %v15066_v24, %v7348_v33  ;;  %v7355_v56 = vsub.f32 %v16497_v34, %v14989_v26  ;;  %v16504_v33 = vld [vmem:[#allocation107_spill] sm:$0xff] }
 0x669   :  { %vm7610_vm4 = vcmp.ge.f32.partialorder %v7482_v28, 0.0  ;;  %v7738_v14 = vmul.f32 0.2, %v7482_v28  ;;  %v7877_v7 = vsel %vm7621_vm3, %v7493_v43, %v7749_v13  ;;  %vm7618_vm5 = vcmp.ge.f32.partialorder %v7490_v49, 0.0 }
 0x66a   :  { %v7746_v47 = vmul.f32 0.2, %v7490_v49  ;;  %vm7612_vm6 = vcmp.ge.f32.partialorder %v7484_v45, 0.0  ;;  %v7957_v51 = vpack.c.bf16 %v7877_v7, %v7869_v54  ;;  %vm7620_vm7 = vcmp.ge.f32.partialorder %v7492_v35, 0.0  ;;  %v16506_v54 = vld [vmem:[#allocation111_spill] sm:$0xff] }
 0x66b   :  { %v7866_v58 = vsel %vm7610_vm4, %v7482_v28, %v7738_v14  ;;  %v7740_v1 = vmul.f32 0.2, %v7484_v45  ;;  %v7748_v40 = vmul.f32 0.2, %v7492_v35  ;;  %v7363_v55 = vsub.f32 %v16498_v10, %v14989_v26  ;;  %v16505_v28 = vld [vmem:[#allocation110_spill] sm:$0xff] }
 0x66c   :  { %v7874_v53 = vsel %vm7618_vm5, %v7490_v49, %v7746_v47  ;;  %8856 = vmatprep.mubr.bf16.mxu1 %v7957_v51  ;;  %v7357_v61 = vsub.f32 %v16499_v38, %v15007_v27  ;;  %v7365_v3 = vsub.f32 %v16500_v37, %v15007_v27  ;;  %v7499_v12 = vmul.f32 %v15082_v21, %v7355_v56  ;;  %v16508_v38 = vld [vmem:[#allocation112_spill] sm:$0xff] }
 0x66d   :  { %v7954_v18 = vpack.c.bf16 %v7874_v53, %v7866_v58  ;;  %v7868_v41 = vsel %vm7612_vm6, %v7484_v45, %v7740_v1  ;;  %v7876_v52 = vsel %vm7620_vm7, %v7492_v35, %v7748_v40  ;;  %v7507_v6 = vmul.f32 %v15082_v21, %v7363_v55 }
 0x66e   :  { %v7354_v48 = vsub.f32 %v16501_v0, %v14985_v23  ;;  %v7956_v8 = vpack.c.bf16 %v7876_v52, %v7868_v41  ;;  %v7501_v63 = vmul.f32 %v15106_v15, %v7357_v61  ;;  %v7509_v5 = vmul.f32 %v15106_v15, %v7365_v3  ;;  %v16509_v52 = vld [vmem:[#allocation109_spill] sm:$0xff] }
 0x66f   :  { %8760 = vmatmul.mubr.bf16.gmra.mxu0 %v7954_v18  ;;  %v7362_v57 = vsub.f32 %v16502_v31, %v14985_v23  ;;  %vm7627_vm0 = vcmp.ge.f32.partialorder %v7499_v12, 0.0  ;;  %vm7635_vm8 = vcmp.ge.f32.partialorder %v7507_v6, 0.0  ;;  %v7755_v20 = vmul.f32 0.2, %v7499_v12  ;;  %v16510_v0 = vld [vmem:[#allocation113_spill] sm:$0xff] }
 0x670   :  { %v7763_v46 = vmul.f32 0.2, %v7507_v6  ;;  %8857 = vmatmul.mubr.bf16.gmra.mxu1 %v7956_v8  ;;  %vm7629_vm9 = vcmp.ge.f32.partialorder %v7501_v63, 0.0  ;;  %vm7637_vm10 = vcmp.ge.f32.partialorder %v7509_v5, 0.0  ;;  %v7757_v42 = vmul.f32 0.2, %v7501_v63 }
 0x671   :  { %v7765_v29 = vmul.f32 0.2, %v7509_v5  ;;  %v7883_v32 = vsel %vm7627_vm0, %v7499_v12, %v7755_v20  ;;  %v7498_v17 = vmul.f32 %v15057_v60, %v7354_v48  ;;  %v7506_v16 = vmul.f32 %v15057_v60, %v7362_v57 }
 0x672   :  { %v7891_v50 = vsel %vm7635_vm8, %v7507_v6, %v7763_v46  ;;  %v7885_v19 = vsel %vm7629_vm9, %v7501_v63, %v7757_v42  ;;  %v7356_v43 = vsub.f32 %v16503_v9, %v14987_v4  ;;  %v7364_v25 = vsub.f32 %v16504_v33, %v14987_v4 }
 0x673   :  { %v7963_v30 = vpack.c.bf16 %v7891_v50, %v7883_v32  ;;  %v7893_v59 = vsel %vm7637_vm10, %v7509_v5, %v7765_v29  ;;  %vm7626_vm11 = vcmp.ge.f32.partialorder %v7498_v17, 0.0  ;;  %vm7634_vm12 = vcmp.ge.f32.partialorder %v7506_v16, 0.0 }
 0x674   :  { %v7965_v36 = vpack.c.bf16 %v7893_v59, %v7885_v19  ;;  %v7754_v2 = vmul.f32 0.2, %v7498_v17  ;;  %v7762_v62 = vmul.f32 0.2, %v7506_v16  ;;  %v7500_v44 = vmul.f32 %v15066_v24, %v7356_v43 }
 0x675   :  { %8767 = vmatprep.mubr.bf16.mxu0 %v7963_v30  ;;  %v7371_v13 = vsub.f32 %v16505_v28, %v14989_v26  ;;  %vm7651_vm13 = vcmp.ge.f32.partialorder %v15112_v39, 0.0  ;;  %v7779_v45 = vmul.f32 0.2, %v15112_v39  ;;  %v7373_v14 = vsub.f32 %v16506_v54, %v15007_v27  ;;  %v15546_v30 = vld [vmem:[%s15669_s7] ss:$0 sm:$0xff] }
 0x676   :  { %8864 = vmatprep.mubr.bf16.mxu1 %v7965_v36  ;;  %v7882_v49 = vsel %vm7626_vm11, %v7498_v17, %v7754_v2  ;;  %v7890_v35 = vsel %vm7634_vm12, %v7506_v16, %v7762_v62  ;;  %v7508_v7 = vmul.f32 %v15066_v24, %v7364_v25  ;;  %vm7628_vm14 = vcmp.ge.f32.partialorder %v7500_v44, 0.0 }
 0x677   :  { %v7756_v47 = vmul.f32 0.2, %v7500_v44  ;;  %v7962_v51 = vpack.c.bf16 %v7890_v35, %v7882_v49  ;;  %v7515_v58 = vmul.f32 %v15082_v21, %v7371_v13  ;;  %v7907_v1 = vsel %vm7651_vm13, %v15112_v39, %v7779_v45  ;;  %v16507_v21 = vld [vmem:[#allocation108_spill] sm:$0xff] }
 0x678   :  { %v7517_v26 = vmul.f32 %v15106_v15, %v7373_v14  ;;  %vm7636_vm15 = vcmp.ge.f32.partialorder %v7508_v7, 0.0  ;;  %v7764_v53 = vmul.f32 0.2, %v7508_v7  ;;  %vm7653_vm1 = vcmp.ge.f32.partialorder %v15116_v11, 0.0 }
 0x679   :  { %v7884_v40 = vsel %vm7628_vm14, %v7500_v44, %v7756_v47  ;;  %8768 = vmatmul.mubr.bf16.gmra.mxu0 %v7962_v51  ;;  %vm7643_vm2 = vcmp.ge.f32.partialorder %v7515_v58, 0.0  ;;  %v7771_v27 = vmul.f32 0.2, %v7515_v58  ;;  %v7780_v56 = vmul.f32 0.2, %v15100_v22 }
 0x67a   :  { %vm7645_vm3 = vcmp.ge.f32.partialorder %v7517_v26, 0.0  ;;  %v7773_v34 = vmul.f32 0.2, %v7517_v26  ;;  %v7892_v10 = vsel %vm7636_vm15, %v7508_v7, %v7764_v53  ;;  %v7781_v55 = vmul.f32 0.2, %v15116_v11 }
 0x67b   :  { %v7370_v39 = vsub.f32 %v16507_v21, %v14985_v23  ;;  %v7964_v18 = vpack.c.bf16 %v7892_v10, %v7884_v40  ;;  %v7899_v15 = vsel %vm7643_vm2, %v7515_v58, %v7771_v27  ;;  %vm7650_vm4 = vcmp.ge.f32.partialorder %v16508_v38, 0.0 }
 0x67c   :  { %v7901_v41 = vsel %vm7645_vm3, %v7517_v26, %v7773_v34  ;;  %v7971_v61 = vpack.c.bf16 %v7907_v1, %v7899_v15  ;;  %v7909_v37 = vsel %vm7653_vm1, %v15116_v11, %v7781_v55  ;;  %v7372_v12 = vsub.f32 %v16509_v52, %v14987_v4 }
 0x67d   :  { %v7514_v3 = vmul.f32 %v15057_v60, %v7370_v39  ;;  %8865 = vmatmul.mubr.bf16.gmra.mxu1 %v7964_v18  ;;  %v7973_v6 = vpack.c.bf16 %v7909_v37, %v7901_v41  ;;  %vm7652_vm5 = vcmp.ge.f32.partialorder %v15100_v22, 0.0  ;;  %v7906_v48 = vsel %vm7650_vm4, %v16508_v38, %v16510_v0 }
 0x67e   :  { %8775 = vmatprep.mubr.bf16.mxu0 %v7971_v61  ;;  %v7516_v8 = vmul.f32 %v15066_v24, %v7372_v12  ;;  %v7908_v60 = vsel %vm7652_vm5, %v15100_v22, %v7780_v56 }
 0x67f   :  { %vm7642_vm6 = vcmp.ge.f32.partialorder %v7514_v3, 0.0  ;;  %v7770_v23 = vmul.f32 0.2, %v7514_v3  ;;  %8872 = vmatprep.mubr.bf16.mxu1 %v7973_v6 }
 0x680   :  { %vm7644_vm7 = vcmp.ge.f32.partialorder %v7516_v8, 0.0  ;;  %v7772_v11 = vmul.f32 0.2, %v7516_v8 }
 0x681   :  { %v7898_v63 = vsel %vm7642_vm6, %v7514_v3, %v7770_v23 }
 0x682   :  { %v7970_v5 = vpack.c.bf16 %v7906_v48, %v7898_v63  ;;  %v7900_v4 = vsel %vm7644_vm7, %v7516_v8, %v7772_v11 }
 0x683   :  { %v7972_v31 = vpack.c.bf16 %v7908_v60, %v7900_v4 }
 0x684   :  { %8776 = vmatmul.mubr.bf16.gmra.mxu0 %v7970_v5 }
 0x685   :  { %8873 = vmatmul.mubr.bf16.gmra.mxu1 %v7972_v31 }
 0x6a0   :  { %v15527_v57 = vpop.f32.mrf.mxu0 }
 0x6a1   :  { %v15529_v20 = vpop.f32.mrf.mxu1 }
 0x6a2   :  { %v15531_v46 = vpop.f32.mrf.mxu0 }
 0x6a3   :  { %v15533_v42 = vpop.f32.mrf.mxu1 }
 0x6a4   :  { %v15535_v24 = vpop.f32.mrf.mxu0 }
 0x6a5   :  { %v15537_v29 = vpop.f32.mrf.mxu1 }
 0x6a6   :  { %v15539_v32 = vpop.f32.mrf.mxu0 }
 0x6a7   :  { %v15541_v22 = vpop.f32.mrf.mxu1 }
 0x6ab   :  { %v9949_v50 = vpop.f32.mrf.mxu0 }
 0x6ad   :  { %v9950_v17 = vpop.f32.mrf.mxu0 }
 0x6ae   :  { %v9951_v16 = vadd.f32 %v9950_v17, %v9949_v50 }
 0x6af   :  { %v10013_v19 = vpop.f32.mrf.mxu1  ;;  %v9952_v59 = vpop.f32.mrf.mxu0 }
 0x6b0   :  { %v8536_v9 = vadd.f32 %v9951_v16, %v15546_v30 }
 0x6b1   :  { %v10014_v43 = vpop.f32.mrf.mxu1  ;;  %v9953_v36 = vpop.f32.mrf.mxu0 }
 0x6b2   :  { %v10015_v2 = vadd.f32 %v10014_v43, %v10013_v19  ;;  %v9954_v62 = vadd.f32 %v9953_v36, %v9952_v59 }
 0x6b3   :  { %v10016_v33 = vpop.f32.mrf.mxu1 }
 0x6b4   :  { %v15549_v25 = vadd.f32 %v10015_v2, %v8536_v9  ;;  %v8539_v44 = vadd.f32 %v9954_v62, %v15546_v30 }
 0x6b5   :  { %v10017_v28 = vpop.f32.mrf.mxu1 }
 0x6b6   :  { %v10018_v13 = vadd.f32 %v10017_v28, %v10016_v33 }
 0x6b8   :  { %v15552_v49 = vadd.f32 %v10018_v13, %v8539_v44  ;;  %v9955_v45 = vpop.f32.mrf.mxu0 }
 0x6b9   :  { %v10019_v54 = vpop.f32.mrf.mxu1 }
 0x6ba   :  { %v9956_v14 = vpop.f32.mrf.mxu0 }
 0x6bb   :  { %v9957_v35 = vadd.f32 %v9956_v14, %v9955_v45  ;;  %v10020_v7 = vpop.f32.mrf.mxu1 }
 0x6bc   :  { %v10021_v47 = vadd.f32 %v10020_v7, %v10019_v54  ;;  %v9958_v51 = vpop.f32.mrf.mxu0 }
 0x6bd   :  { %v8544_v58 = vadd.f32 %v9957_v35, %v15546_v30  ;;  %v10022_v1 = vpop.f32.mrf.mxu1 }
 0x6be   :  { %v9959_v26 = vpop.f32.mrf.mxu0 }
 0x6bf   :  { %v15555_v53 = vadd.f32 %v10021_v47, %v8544_v58  ;;  %v9960_v40 = vadd.f32 %v9959_v26, %v9958_v51  ;;  %v10023_v27 = vpop.f32.mrf.mxu1 }
 0x6c0   :  { %v10024_v34 = vadd.f32 %v10023_v27, %v10022_v1 }
 0x6c1   :  { %v8547_v56 = vadd.f32 %v9960_v40, %v15546_v30 }
 0x6c2   :  { %v9961_v10 = vpop.f32.mrf.mxu0 }
 0x6c3   :  { %v15558_v55 = vadd.f32 %v10024_v34, %v8547_v56 }
 0x6c4   :  { %v9962_v21 = vpop.f32.mrf.mxu0 }
 0x6c5   :  { %v10025_v39 = vpop.f32.mrf.mxu1  ;;  %v9963_v18 = vadd.f32 %v9962_v21, %v9961_v10 }
 0x6c6   :  { %v9964_v15 = vpop.f32.mrf.mxu0 }
 0x6c7   :  { %v8552_v41 = vadd.f32 %v9963_v18, %v15546_v30  ;;  %v10026_v38 = vpop.f32.mrf.mxu1 }
 0x6c8   :  { %v10027_v61 = vadd.f32 %v10026_v38, %v10025_v39  ;;  %v9965_v37 = vpop.f32.mrf.mxu0 }
 0x6c9   :  { %v10028_v3 = vpop.f32.mrf.mxu1  ;;  %v9966_v52 = vadd.f32 %v9965_v37, %v9964_v15 }
 0x6ca   :  { %v15561_v12 = vadd.f32 %v10027_v61, %v8552_v41 }
 0x6cb   :  { %v8555_v6 = vadd.f32 %v9966_v52, %v15546_v30  ;;  %v10029_v23 = vpop.f32.mrf.mxu1 }
 0x6cc   :  { %v10030_v0 = vadd.f32 %v10029_v23, %v10028_v3 }
 0x6cd   :  { %v9967_v48 = vpop.f32.mrf.mxu0 }
 0x6ce   :  { %v15564_v8 = vadd.f32 %v10030_v0, %v8555_v6 }
 0x6cf   :  { %v9968_v63 = vpop.f32.mrf.mxu0 }
 0x6d0   :  { %v9969_v11 = vadd.f32 %v9968_v63, %v9967_v48 }
 0x6d1   :  { %v10031_v60 = vpop.f32.mrf.mxu1  ;;  %v9970_v5 = vpop.f32.mrf.mxu0 }
 0x6d2   :  { %v8560_v4 = vadd.f32 %v9969_v11, %v15546_v30 }
 0x6d3   :  { %v10032_v31 = vpop.f32.mrf.mxu1  ;;  %v9971_v50 = vpop.f32.mrf.mxu0 }
 0x6d4   :  { %v10033_v17 = vadd.f32 %v10032_v31, %v10031_v60  ;;  %v9972_v16 = vadd.f32 %v9971_v50, %v9970_v5  ;;  %v9945_v31 = vadd.f32 %v15531_v46, %v15527_v57  ;;  %v10009_v57 = vadd.f32 %v15533_v42, %v15529_v20 }
 0x6d5   :  { %v10034_v19 = vpop.f32.mrf.mxu1 }
 0x6d6   :  { %v15567_v59 = vadd.f32 %v10033_v17, %v8560_v4  ;;  %v8563_v9 = vadd.f32 %v9972_v16, %v15546_v30 }
 0x6d7   :  { %v10035_v43 = vpop.f32.mrf.mxu1 }
 0x6d8   :  { %v10036_v36 = vadd.f32 %v10035_v43, %v10034_v19 }
 0x6da   :  { %v15570_v2 = vadd.f32 %v10036_v36, %v8563_v9  ;;  %v9973_v62 = vpop.f32.mrf.mxu0 }
 0x6db   :  { %v10037_v33 = vpop.f32.mrf.mxu1 }
 0x6dc   :  { %v9974_v44 = vpop.f32.mrf.mxu0 }
 0x6dd   :  { %v9975_v28 = vadd.f32 %v9974_v44, %v9973_v62  ;;  %v10038_v13 = vpop.f32.mrf.mxu1  ;;  %v8528_v62 = vadd.f32 %v9945_v31, %v15546_v30 }
 0x6de   :  { %v10039_v45 = vadd.f32 %v10038_v13, %v10037_v33  ;;  %v9976_v54 = vpop.f32.mrf.mxu0  ;;  %v9948_v33 = vadd.f32 %v15539_v32, %v15535_v24 }
 0x6df   :  { %v8568_v14 = vadd.f32 %v9975_v28, %v15546_v30  ;;  %v10040_v35 = vpop.f32.mrf.mxu1 }
 0x6e0   :  { %v9977_v7 = vpop.f32.mrf.mxu0 }
 0x6e1   :  { %v15573_v47 = vadd.f32 %v10039_v45, %v8568_v14  ;;  %v9978_v51 = vadd.f32 %v9977_v7, %v9976_v54  ;;  %v10041_v58 = vpop.f32.mrf.mxu1  ;;  %v8625_v54 = vadd.f32 %v10009_v57, %v8528_v62  ;;  %v8531_v14 = vadd.f32 %v9948_v33, %v15546_v30 }
 0x6e2   :  { %v10042_v1 = vadd.f32 %v10041_v58, %v10040_v35 }
 0x6e3   :  { %v8571_v26 = vadd.f32 %v9978_v51, %v15546_v30  ;;  %v10012_v51 = vadd.f32 %v15541_v22, %v15537_v29 }
 0x6e4   :  { %v9979_v40 = vpop.f32.mrf.mxu0 }
 0x6e5   :  { %v15576_v27 = vadd.f32 %v10042_v1, %v8571_v26  ;;  %v8628_v26 = vadd.f32 %v10012_v51, %v8531_v14 }
 0x6e6   :  { %v9980_v34 = vpop.f32.mrf.mxu0  ;;  %v10043_v56 = vpop.f32.mrf.mxu1 }
 0x6e7   :  { %v9981_v10 = vadd.f32 %v9980_v34, %v9979_v40 }
 0x6e8   :  { %v9982_v21 = vpop.f32.mrf.mxu0  ;;  %v10044_v18 = vpop.f32.mrf.mxu1 }
 0x6e9   :  { %v8576_v39 = vadd.f32 %v9981_v10, %v15546_v30  ;;  %v10045_v15 = vadd.f32 %v10044_v18, %v10043_v56 }
 0x6ea   :  { %v9983_v41 = vpop.f32.mrf.mxu0  ;;  %v10046_v38 = vpop.f32.mrf.mxu1 }
 0x6eb   :  { %v9984_v61 = vadd.f32 %v9983_v41, %v9982_v21  ;;  %v15579_v37 = vadd.f32 %v10045_v15, %v8576_v39 }
 0x6ec   :  { %v10047_v52 = vpop.f32.mrf.mxu1 }
 0x6ed   :  { %v8579_v3 = vadd.f32 %v9984_v61, %v15546_v30  ;;  %v10048_v6 = vadd.f32 %v10047_v52, %v10046_v38 }
 0x6ee   :  { %v9985_v23 = vpop.f32.mrf.mxu0 }
 0x6ef   :  { %v10049_v0 = vpop.f32.mrf.mxu1  ;;  %v15582_v48 = vadd.f32 %v10048_v6, %v8579_v3 }
 0x6f0   :  { %v9986_v63 = vpop.f32.mrf.mxu0 }
 0x6f1   :  { %v9987_v11 = vadd.f32 %v9986_v63, %v9985_v23  ;;  %v10050_v60 = vpop.f32.mrf.mxu1 }
 0x6f2   :  { %v10051_v5 = vadd.f32 %v10050_v60, %v10049_v0  ;;  %v9988_v4 = vpop.f32.mrf.mxu0 }
 0x6f3   :  { %v8584_v50 = vadd.f32 %v9987_v11, %v15546_v30  ;;  %v10052_v17 = vpop.f32.mrf.mxu1 }
 0x6f4   :  { %v9989_v16 = vpop.f32.mrf.mxu0 }
 0x6f5   :  { %v15587_v19 = vadd.f32 %v10051_v5, %v8584_v50  ;;  %v9990_v9 = vadd.f32 %v9989_v16, %v9988_v4  ;;  %v10053_v43 = vpop.f32.mrf.mxu1 }
 0x6f6   :  { %v10054_v36 = vadd.f32 %v10053_v43, %v10052_v17  ;;  %v10071_v28 = vpop.f32.mrf.mxu0 }
 0x6f7   :  { %v8587_v44 = vadd.f32 %v9990_v9, %v15546_v30 }
 0x6f8   :  { %v10072_v13 = vpop.f32.mrf.mxu0 }
 0x6f9   :  { %v15595_v46 = vadd.f32 %v10054_v36, %v8587_v44  ;;  %v10073_v45 = vadd.f32 %v10072_v13, %v10071_v28 }
 0x6fa   :  { %v10074_v35 = vpop.f32.mrf.mxu0 }
 0x6fb   :  { %v10135_v7 = vpop.f32.mrf.mxu1  ;;  %v8722_v58 = vadd.f32 %v10073_v45, %v8625_v54 }
 0x6fc   :  { %v10075_v24 = vpop.f32.mrf.mxu0 }
 0x6fd   :  { %v10136_v32 = vpop.f32.mrf.mxu1  ;;  %v10076_v1 = vadd.f32 %v10075_v24, %v10074_v35 }
 0x6fe   :  { %v10137_v40 = vadd.f32 %v10136_v32, %v10135_v7 }
 0x6ff   :  { %v10138_v34 = vpop.f32.mrf.mxu1  ;;  %v8725_v42 = vadd.f32 %v10076_v1, %v8628_v26 }
 0x700   :  { %v8819_v20 = vadd.f32 %v10137_v40, %v8722_v58 }
 0x701   :  { %v10139_v56 = vpop.f32.mrf.mxu1 }
 0x702   :  { %v9683_v10 = vmul.f32 -1.442695, %v8819_v20  ;;  %v10140_v21 = vadd.f32 %v10139_v56, %v10138_v34 }
 0x704   :  { %v10077_v39 = vpop.f32.mrf.mxu0  ;;  %10824 = vpow2.f32 %v9683_v10  ;;  %v8822_v30 = vadd.f32 %v10140_v21, %v8725_v42 }
 0x705   :  { %v10141_v18 = vpop.f32.mrf.mxu1 }
 0x706   :  { %v10078_v15 = vpop.f32.mrf.mxu0  ;;  %v9684_v41 = vmul.f32 -1.442695, %v8822_v30 }
 0x707   :  { %v10079_v38 = vadd.f32 %v10078_v15, %v10077_v39  ;;  %v10142_v29 = vpop.f32.mrf.mxu1 }
 0x708   :  { %v10080_v22 = vpop.f32.mrf.mxu0  ;;  %10826 = vpow2.f32 %v9684_v41  ;;  %v10143_v3 = vadd.f32 %v10142_v29, %v10141_v18 }
 0x709   :  { %v8730_v61 = vadd.f32 %v10079_v38, %v15549_v25  ;;  %v10144_v52 = vpop.f32.mrf.mxu1 }
 0x70a   :  { %v10081_v6 = vpop.f32.mrf.mxu0 }
 0x70b   :  { %v8827_v23 = vadd.f32 %v10143_v3, %v8730_v61  ;;  %v10082_v0 = vadd.f32 %v10081_v6, %v10080_v22  ;;  %v10145_v63 = vpop.f32.mrf.mxu1 }
 0x70c   :  { %v10146_v5 = vadd.f32 %v10145_v63, %v10144_v52 }
 0x70d   :  { %v9685_v11 = vmul.f32 -1.442695, %v8827_v23  ;;  %v8733_v60 = vadd.f32 %v10082_v0, %v15552_v49 }
 0x70e   :  { %v10083_v4 = vpop.f32.mrf.mxu0 }
 0x70f   :  { %10828 = vpow2.f32 %v9685_v11  ;;  %v8830_v31 = vadd.f32 %v10146_v5, %v8733_v60  ;;  %v10147_v50 = vpop.f32.mrf.mxu1 }
 0x710   :  { %v10084_v17 = vpop.f32.mrf.mxu0 }
 0x711   :  { %v9686_v16 = vmul.f32 -1.442695, %v8830_v31  ;;  %v10085_v9 = vadd.f32 %v10084_v17, %v10083_v4  ;;  %v10825_v43 = vpop.eup %10824  ;;  %v10148_v36 = vpop.f32.mrf.mxu1 }
 0x712   :  { %v10086_v25 = vpop.f32.mrf.mxu0  ;;  %v8929_v62 = vadd.f32 1.0, %v10825_v43  ;;  %v10149_v44 = vadd.f32 %v10148_v36, %v10147_v50 }
 0x713   :  { %10830 = vpow2.f32 %v9686_v16  ;;  %v8738_v33 = vadd.f32 %v10085_v9, %v15555_v53  ;;  %v10150_v28 = vpop.f32.mrf.mxu1 }
 0x714   :  { %v10087_v57 = vpop.f32.mrf.mxu0  ;;  %10832 = vrcp.f32 %v8929_v62 }
 0x715   :  { %v8835_v49 = vadd.f32 %v10149_v44, %v8738_v33  ;;  %v10088_v13 = vadd.f32 %v10087_v57, %v10086_v25  ;;  %v10827_v45 = vpop.eup %10826  ;;  %v10151_v54 = vpop.f32.mrf.mxu1 }
 0x716   :  { %v8930_v14 = vadd.f32 1.0, %v10827_v45  ;;  %v10152_v51 = vadd.f32 %v10151_v54, %v10150_v28 }
 0x717   :  { %v9687_v35 = vmul.f32 -1.442695, %v8835_v49  ;;  %v8741_v7 = vadd.f32 %v10088_v13, %v15558_v55 }
 0x718   :  { %10834 = vrcp.f32 %v8930_v14  ;;  %v10089_v24 = vpop.f32.mrf.mxu0 }
 0x719   :  { %v8838_v58 = vadd.f32 %v10152_v51, %v8741_v7  ;;  %10836 = vpow2.f32 %v9687_v35 }
 0x71a   :  { %v10090_v1 = vpop.f32.mrf.mxu0 }
 0x71b   :  { %v9688_v32 = vmul.f32 -1.442695, %v8838_v58  ;;  %v10091_v26 = vadd.f32 %v10090_v1, %v10089_v24 }
 0x71c   :  { %v10829_v53 = vpop.eup %10828  ;;  %v10153_v34 = vpop.f32.mrf.mxu1 }
 0x71d   :  { %v8931_v40 = vadd.f32 1.0, %v10829_v53  ;;  %10838 = vpow2.f32 %v9688_v32  ;;  %v10092_v20 = vpop.f32.mrf.mxu0  ;;  %v8746_v42 = vadd.f32 %v10091_v26, %v15561_v12 }
 0x71e   :  { %v10154_v56 = vpop.f32.mrf.mxu1 }
 0x71f   :  { %10840 = vrcp.f32 %v8931_v40  ;;  %v10093_v10 = vpop.f32.mrf.mxu0  ;;  %v10155_v55 = vadd.f32 %v10154_v56, %v10153_v34 }
 0x720   :  { %v10831_v21 = vpop.eup %10830  ;;  %v10094_v39 = vadd.f32 %v10093_v10, %v10092_v20  ;;  %v10156_v18 = vpop.f32.mrf.mxu1 }
 0x721   :  { %v8932_v30 = vadd.f32 1.0, %v10831_v21  ;;  %v10833_v15 = vpop.eup %10832  ;;  %v8843_v41 = vadd.f32 %v10155_v55, %v8746_v42 }
 0x722   :  { %v8749_v38 = vadd.f32 %v10094_v39, %v15564_v8  ;;  %8977 = vst [vmem:[%s15670_s8] sm:$0xff] %v10833_v15  ;;  %v10157_v29 = vpop.f32.mrf.mxu1 }
 0x723   :  { %10842 = vrcp.f32 %v8932_v30  ;;  %v9689_v22 = vmul.f32 -1.442695, %v8843_v41  ;;  %v10158_v12 = vadd.f32 %v10157_v29, %v10156_v18 }
 0x725   :  { %v10095_v61 = vpop.f32.mrf.mxu0  ;;  %v10835_v3 = vpop.eup %10834  ;;  %10844 = vpow2.f32 %v9689_v22  ;;  %v8846_v52 = vadd.f32 %v10158_v12, %v8749_v38 }
 0x726   :  { %v10159_v6 = vpop.f32.mrf.mxu1  ;;  %v10837_v23 = vpop.eup %10836  ;;  %8978 = vst [vmem:[%s15670_s8 + $0x8] sm:$0xff] %v10835_v3 }
 0x727   :  { %v10096_v0 = vpop.f32.mrf.mxu0  ;;  %v8933_v8 = vadd.f32 1.0, %v10837_v23  ;;  %v9690_v63 = vmul.f32 -1.442695, %v8846_v52 }
 0x728   :  { %v10097_v11 = vadd.f32 %v10096_v0, %v10095_v61  ;;  %v10160_v60 = vpop.f32.mrf.mxu1 }
 0x729   :  { %v10098_v5 = vpop.f32.mrf.mxu0  ;;  %10846 = vrcp.f32 %v8933_v8  ;;  %v10161_v50 = vadd.f32 %v10160_v60, %v10159_v6 }
 0x72a   :  { %v10839_v4 = vpop.eup %10838  ;;  %v8754_v31 = vadd.f32 %v10097_v11, %v15567_v59  ;;  %v10162_v17 = vpop.f32.mrf.mxu1  ;;  %10848 = vpow2.f32 %v9690_v63 }
 0x72b   :  { %v8934_v16 = vadd.f32 1.0, %v10839_v4  ;;  %v10099_v9 = vpop.f32.mrf.mxu0 }
 0x72c   :  { %v10841_v43 = vpop.eup %10840  ;;  %v8851_v36 = vadd.f32 %v10161_v50, %v8754_v31  ;;  %v10100_v25 = vadd.f32 %v10099_v9, %v10098_v5  ;;  %v10163_v62 = vpop.f32.mrf.mxu1 }
 0x72d   :  { %8979 = vst [vmem:[%s15670_s8 + $0x10] sm:$0xff] %v10841_v43  ;;  %10850 = vrcp.f32 %v8934_v16  ;;  %v10164_v28 = vadd.f32 %v10163_v62, %v10162_v17 }
 0x72e   :  { %v9691_v33 = vmul.f32 -1.442695, %v8851_v36  ;;  %v8757_v44 = vadd.f32 %v10100_v25, %v15570_v2 }
 0x72f   :  { %v10101_v57 = vpop.f32.mrf.mxu0 }
 0x730   :  { %v10843_v59 = vpop.eup %10842  ;;  %10852 = vpow2.f32 %v9691_v33  ;;  %v8854_v49 = vadd.f32 %v10164_v28, %v8757_v44  ;;  %v10165_v13 = vpop.f32.mrf.mxu1 }
 0x731   :  { %8980 = vst [vmem:[%s15670_s8 + $0x18] sm:$0xff] %v10843_v59  ;;  %v10102_v45 = vpop.f32.mrf.mxu0 }
 0x732   :  { %v9692_v54 = vmul.f32 -1.442695, %v8854_v49  ;;  %v10103_v14 = vadd.f32 %v10102_v45, %v10101_v57  ;;  %v10845_v35 = vpop.eup %10844  ;;  %v10166_v7 = vpop.f32.mrf.mxu1 }
 0x733   :  { %v10104_v51 = vpop.f32.mrf.mxu0  ;;  %v8935_v58 = vadd.f32 1.0, %v10845_v35  ;;  %v10167_v24 = vadd.f32 %v10166_v7, %v10165_v13 }
 0x734   :  { %10854 = vpow2.f32 %v9692_v54  ;;  %v8762_v2 = vadd.f32 %v10103_v14, %v15573_v47  ;;  %v10168_v32 = vpop.f32.mrf.mxu1 }
 0x735   :  { %v10105_v1 = vpop.f32.mrf.mxu0  ;;  %10856 = vrcp.f32 %v8935_v58 }
 0x736   :  { %v8859_v53 = vadd.f32 %v10167_v24, %v8762_v2  ;;  %v10106_v26 = vadd.f32 %v10105_v1, %v10104_v51  ;;  %v10847_v40 = vpop.eup %10846  ;;  %v10169_v34 = vpop.f32.mrf.mxu1 }
 0x737   :  { %v10849_v20 = vpop.eup %10848  ;;  %8981 = vst [vmem:[%s15670_s8 + $0x20] sm:$0xff] %v10847_v40  ;;  %v10170_v10 = vadd.f32 %v10169_v34, %v10168_v32 }
 0x738   :  { %v9693_v42 = vmul.f32 -1.442695, %v8859_v53  ;;  %v8765_v56 = vadd.f32 %v10106_v26, %v15576_v27  ;;  %v8936_v21 = vadd.f32 1.0, %v10849_v20 }
 0x739   :  { %v10107_v39 = vpop.f32.mrf.mxu0 }
 0x73a   :  { %v10851_v55 = vpop.eup %10850  ;;  %10858 = vpow2.f32 %v9693_v42  ;;  %v8862_v47 = vadd.f32 %v10170_v10, %v8765_v56 }
 0x73b   :  { %8982 = vst [vmem:[%s15670_s8 + $0x28] sm:$0xff] %v10851_v55  ;;  %10860 = vrcp.f32 %v8936_v21  ;;  %v10108_v18 = vpop.f32.mrf.mxu0 }
 0x73c   :  { %v9694_v30 = vmul.f32 -1.442695, %v8862_v47  ;;  %v10109_v41 = vadd.f32 %v10108_v18, %v10107_v39 }
 0x73d   :  { %v10853_v15 = vpop.eup %10852  ;;  %v10171_v29 = vpop.f32.mrf.mxu1 }
 0x73e   :  { %v8937_v38 = vadd.f32 1.0, %v10853_v15  ;;  %10862 = vpow2.f32 %v9694_v30  ;;  %v10110_v22 = vpop.f32.mrf.mxu0  ;;  %v8770_v27 = vadd.f32 %v10109_v41, %v15579_v37 }
 0x73f   :  { %v10172_v12 = vpop.f32.mrf.mxu1 }
 0x740   :  { %10864 = vrcp.f32 %v8937_v38  ;;  %v10111_v61 = vpop.f32.mrf.mxu0  ;;  %v10173_v52 = vadd.f32 %v10172_v12, %v10171_v29 }
 0x741   :  { %v10855_v3 = vpop.eup %10854  ;;  %v10112_v6 = vadd.f32 %v10111_v61, %v10110_v22  ;;  %v10174_v0 = vpop.f32.mrf.mxu1 }
 0x742   :  { %v8938_v23 = vadd.f32 1.0, %v10855_v3  ;;  %v10857_v8 = vpop.eup %10856  ;;  %v8867_v63 = vadd.f32 %v10173_v52, %v8770_v27 }
 0x743   :  { %v8773_v11 = vadd.f32 %v10112_v6, %v15582_v48  ;;  %8983 = vst [vmem:[%s15670_s8 + $0x30] sm:$0xff] %v10857_v8  ;;  %v10175_v60 = vpop.f32.mrf.mxu1 }
 0x744   :  { %10866 = vrcp.f32 %v8938_v23  ;;  %v10113_v5 = vpop.f32.mrf.mxu0  ;;  %v9695_v37 = vmul.f32 -1.442695, %v8867_v63  ;;  %v10176_v4 = vadd.f32 %v10175_v60, %v10174_v0 }
 0x745   :  { %v10177_v31 = vpop.f32.mrf.mxu1 }
 0x746   :  { %v10114_v50 = vpop.f32.mrf.mxu0  ;;  %10868 = vpow2.f32 %v9695_v37  ;;  %v8870_v16 = vadd.f32 %v10176_v4, %v8773_v11 }
 0x747   :  { %v10859_v17 = vpop.eup %10858  ;;  %v10115_v9 = vadd.f32 %v10114_v50, %v10113_v5  ;;  %v10178_v25 = vpop.f32.mrf.mxu1 }
 0x748   :  { %v10861_v43 = vpop.eup %10860  ;;  %v8939_v36 = vadd.f32 1.0, %v10859_v17  ;;  %v10116_v62 = vpop.f32.mrf.mxu0  ;;  %v9696_v48 = vmul.f32 -1.442695, %v8870_v16  ;;  %v10179_v44 = vadd.f32 %v10178_v25, %v10177_v31 }
 0x749   :  { %8984 = vst [vmem:[%s15670_s8 + $0x38] sm:$0xff] %v10861_v43  ;;  %v8778_v33 = vadd.f32 %v10115_v9, %v15587_v19  ;;  %v10180_v28 = vpop.f32.mrf.mxu1 }
 0x74a   :  { %10870 = vrcp.f32 %v8939_v36  ;;  %v10117_v57 = vpop.f32.mrf.mxu0 }
 0x74b   :  { %v10863_v59 = vpop.eup %10862  ;;  %10872 = vpow2.f32 %v9696_v48  ;;  %v8875_v49 = vadd.f32 %v10179_v44, %v8778_v33  ;;  %v10118_v13 = vadd.f32 %v10117_v57, %v10116_v62  ;;  %v10181_v54 = vpop.f32.mrf.mxu1 }
 0x74c   :  { %v8940_v45 = vadd.f32 1.0, %v10863_v59  ;;  %v10182_v51 = vadd.f32 %v10181_v54, %v10180_v28 }
 0x74d   :  { %v10865_v14 = vpop.eup %10864  ;;  %v9697_v35 = vmul.f32 -1.442695, %v8875_v49  ;;  %v8781_v7 = vadd.f32 %v10118_v13, %v15595_v46 }
 0x74e   :  { %8985 = vst [vmem:[%s15670_s8 + $0x40] sm:$0xff] %v10865_v14  ;;  %10874 = vrcp.f32 %v8940_v45 }
 0x74f   :  { %10876 = vpow2.f32 %v9697_v35  ;;  %v8878_v19 = vadd.f32 %v10182_v51, %v8781_v7 }
 0x751   :  { %v10867_v58 = vpop.eup %10866  ;;  %v9698_v2 = vmul.f32 -1.442695, %v8878_v19 }
 0x752   :  { %8986 = vst [vmem:[%s15670_s8 + $0x48] sm:$0xff] %v10867_v58 }
 0x753   :  { %10878 = vpow2.f32 %v9698_v2  ;;  %v10869_v24 = vpop.eup %10868 }
 0x754   :  { %v8941_v32 = vadd.f32 1.0, %v10869_v24 }
 0x756   :  { %10880 = vrcp.f32 %v8941_v32 }
 0x757   :  { %v10871_v1 = vpop.eup %10870 }
 0x758   :  { %v10873_v46 = vpop.eup %10872  ;;  %8987 = vst [vmem:[%s15670_s8 + $0x50] sm:$0xff] %v10871_v1 }
 0x759   :  { %v8942_v53 = vadd.f32 1.0, %v10873_v46 }
 0x75b   :  { %v10875_v26 = vpop.eup %10874  ;;  %10882 = vrcp.f32 %v8942_v53 }
 0x75c   :  { %v10877_v40 = vpop.eup %10876  ;;  %8988 = vst [vmem:[%s15670_s8 + $0x58] sm:$0xff] %v10875_v26 }
 0x75d   :  { %v8943_v34 = vadd.f32 1.0, %v10877_v40 }
 0x75f   :  { %10884 = vrcp.f32 %v8943_v34 }
 0x760   :  { %v10879_v20 = vpop.eup %10878 }
 0x761   :  { %v8944_v42 = vadd.f32 1.0, %v10879_v20 }
 0x763   :  { %10886 = vrcp.f32 %v8944_v42  ;;  %v10881_v56 = vpop.eup %10880 }
 0x764   :  { %8989 = vst [vmem:[%s15670_s8 + $0x60] sm:$0xff] %v10881_v56 }
 0x768   :  { %v10883_v10 = vpop.eup %10882 }
 0x769   :  { %8990 = vst [vmem:[%s15670_s8 + $0x68] sm:$0xff] %v10883_v10 }
 0x76c   :  { %v10885_v21 = vpop.eup %10884 }
 0x76d   :  { %8991 = vst [vmem:[%s15670_s8 + $0x70] sm:$0xff] %v10885_v21 }
 0x770   :  { %v10887_v55 = vpop.eup %10886 }
 0x771   :  { %8992 = vst [vmem:[%s15670_s8 + $0x78] sm:$0xff] %v10887_v55 }

</bundles_post_ra>
